<compile_context>
chip_gen: v5e
topology: v5e:2x2
jax: 0.10.0
libtpu: 0.0.40
codegen_flags: <defaults>
</compile_context>

<pallas_src>
import functools

import jax
import jax.numpy as jnp
from jax.experimental import pallas as pl
from jax.experimental.pallas import tpu as pltpu

LANE = 128


def _round_up(x, m):
    return (x + m - 1) // m * m


# ------------------------- in-kernel conv helper ----------------------------

def _conv3x3(src, w3_ref, b_ref, *, rows_out, row_off):
    """3x3 'same' conv over a column-halo'd source buffer.

    src:    (R, Wp, C) value.  Column c holds original column c-1 (col 0 and
            cols > W are the zero halo).  Output row a reads source rows
            row_off+a .. row_off+a+2.
    w3_ref: (3, 3*C, Cout) ref: [w[ky,0]; w[ky,1]; w[ky,2]] stacked along K.
    b_ref:  (1, Cout) f32 ref.
    Returns f32 (rows_out, Wp, Cout); columns outside [1, W] are junk that the
    caller masks or discards.
    """
    R, Wp, C = src.shape
    Cout = w3_ref.shape[-1]
    # kx = 0 / kx = 2 taps as column-shifted copies, built once per conv.
    left = jnp.concatenate([src[:, :1], src[:, :Wp - 1]], axis=1)    # c -> c-1
    right = jnp.concatenate([src[:, 1:], src[:, Wp - 1:]], axis=1)   # c -> c+1
    s3 = jnp.concatenate([left, src, right], axis=-1)                # (R, Wp, 3C)

    acc = jnp.zeros((rows_out * Wp, Cout), jnp.float32)
    for ky in range(3):
        rows = s3[row_off + ky: row_off + ky + rows_out]             # (rows_out, Wp, 3C)
        acc = acc + jnp.dot(rows.reshape(rows_out * Wp, 3 * C), w3_ref[ky],
                            preferred_element_type=jnp.float32)
    acc = acc + b_ref[...]                                           # (1, Cout) bcast
    return acc.reshape(rows_out, Wp, Cout)


def _valid_mask(rows, wp, c, y0, height, width):
    """True where (row, col) maps to a real pixel: y0+row in [0,H), col in [1,W]."""
    ry = jax.lax.broadcasted_iota(jnp.int32, (rows, wp, c), 0) + y0
    cx = jax.lax.broadcasted_iota(jnp.int32, (rows, wp, c), 1)
    return (ry >= 0) & (ry < height) & (cx >= 1) & (cx <= width)


# --------------------------------- kernel -----------------------------------

def _resnet_block_kernel(x_ref, w_in_ref, b_in_ref, w_b1_ref, b_b1_ref,
                         w_b2_ref, b_b2_ref, w_sk_ref, b_sk_ref,
                         o_ref, x1_scr, h_scr, *, H, W, tile_h):
    """One (image n, row-tile t) step of the fused ResnetBlock."""
    Wp = o_ref.shape[2]
    Cpo = o_ref.shape[3]
    t = pl.program_id(1)
    r0 = pl.multiple_of(t * tile_h, tile_h)          # first output row of tile

    # Halo'd input rows: original rows r0-3 .. r0+tile_h+2 (input over-padded by 3).
    xin = x_ref[0, pl.ds(r0, tile_h + 6)]            # (tile_h+6, Wp, Cpi)

    # ---- x1 = in_conv(x): x1 rows r0-2 .. r0+tile_h+1 -> VMEM scratch ----
    x1 = _conv3x3(xin, w_in_ref, b_in_ref, rows_out=tile_h + 4, row_off=0)
    x1 = jnp.where(_valid_mask(tile_h + 4, Wp, Cpo, r0 - 2, H, W), x1, 0.0)
    x1_scr[...] = x1.astype(x1_scr.dtype)

    # ---- h = relu(block1(x1)): h rows r0-1 .. r0+tile_h -> VMEM scratch ----
    h = _conv3x3(x1_scr[...], w_b1_ref, b_b1_ref, rows_out=tile_h + 2, row_off=0)
    h = jnp.maximum(h, 0.0)
    h = jnp.where(_valid_mask(tile_h + 2, Wp, Cpo, r0 - 1, H, W), h, 0.0)
    h_scr[...] = h.astype(h_scr.dtype)

    # ---- out = block2(h) + skep(x1): rows r0 .. r0+tile_h-1 ----
    out = _conv3x3(h_scr[...], w_b2_ref, b_b2_ref, rows_out=tile_h, row_off=0)
    out = out + _conv3x3(x1_scr[...], w_sk_ref, b_sk_ref, rows_out=tile_h, row_off=1)
    o_ref[0] = out.astype(o_ref.dtype)               # lane-dense (tile_h, Wp, 128) f32


# ------------------------------ JAX wrapper ----------------------------------

def _prep_weight(w, cin_pad, cout_pad, dtype):
    """HWIO (3,3,Cin,Cout) -> (3, 3*cin_pad, cout_pad): kx folded into K."""
    kh, kw, ci, co = w.shape
    wp = jnp.pad(w, ((0, 0), (0, 0), (0, cin_pad - ci), (0, cout_pad - co)))
    return wp.reshape(kh, kw * cin_pad, cout_pad).astype(dtype)


def _prep_bias(b, cout_pad):
    return jnp.pad(b, (0, cout_pad - b.shape[0])).reshape(1, cout_pad).astype(jnp.float32)


def resnet_block_forward(x_nchw, params, *, tile_h=8, compute_dtype=jnp.bfloat16):
    """ResnetBlock.forward (down=up=False, sk=False, no temb/norm)."""
    N, Cin, H, W = x_nchw.shape
    Cout = params["w_in"].shape[-1]
    Cpi = _round_up(Cin, LANE)
    Cpo = _round_up(Cout, LANE)
    Wp = _round_up(W + 2, 8)                     # 1-px halo, sublane aligned
    tH = tile_h if H % tile_h == 0 else H
    T = H // tH

    # NCHW -> NHWC; pad ONCE: 3-row halo (fused receptive field), 1-col halo +
    # alignment, channels -> multiple of 128; cast to bf16 for the MXU.
    x = jnp.transpose(x_nchw, (0, 2, 3, 1))
    xp = jnp.pad(x, ((0, 0), (3, 3), (1, Wp - W - 1), (0, Cpi - Cin)))
    xp = xp.astype(compute_dtype)

    w_in = _prep_weight(params["w_in"], Cpi, Cpo, compute_dtype)
    w_b1 = _prep_weight(params["w_b1"], Cpo, Cpo, compute_dtype)
    w_b2 = _prep_weight(params["w_b2"], Cpo, Cpo, compute_dtype)
    w_sk = _prep_weight(params["w_sk"], Cpo, Cpo, compute_dtype)
    b_in = _prep_bias(params["b_in"], Cpo)
    b_b1 = _prep_bias(params["b_b1"], Cpo)
    b_b2 = _prep_bias(params["b_b2"], Cpo)
    b_sk = _prep_bias(params["b_sk"], Cpo)

    def full(shape):
        return pl.BlockSpec(shape, lambda n, t: (0,) * len(shape))

    kernel = functools.partial(_resnet_block_kernel, H=H, W=W, tile_h=tH)

    out = pl.pallas_call(
        kernel,
        out_shape=jax.ShapeDtypeStruct((N, H, Wp, Cpo), jnp.float32),
        grid_spec=pltpu.PrefetchScalarGridSpec(
            num_scalar_prefetch=0,
            grid=(N, T),
            in_specs=[
                # whole padded image per n; block index constant over t so it
                # is DMA'd once per image, not once per row-tile.
                pl.BlockSpec((1, H + 6, Wp, Cpi), lambda n, t: (n, 0, 0, 0)),
                full((3, 3 * Cpi, Cpo)), full((1, Cpo)),   # in_conv
                full((3, 3 * Cpo, Cpo)), full((1, Cpo)),   # block1
                full((3, 3 * Cpo, Cpo)), full((1, Cpo)),   # block2
                full((3, 3 * Cpo, Cpo)), full((1, Cpo)),   # skep
            ],
            out_specs=pl.BlockSpec((1, tH, Wp, Cpo), lambda n, t: (n, t, 0, 0)),
            scratch_shapes=[
                pltpu.VMEM((tH + 4, Wp, Cpo), compute_dtype),   # x1 (+row halo)
                pltpu.VMEM((tH + 2, Wp, Cpo), compute_dtype),   # h  (+row halo)
            ],
        ),
        compiler_params=pltpu.CompilerParams(
            dimension_semantics=("parallel", "parallel"),
            vmem_limit_bytes=32 * 1024 * 1024,
        ),
    )(xp, w_in, b_in, w_b1, b_b1, w_b2, b_b2, w_sk, b_sk)

    # Drop the W halo / alignment columns and the channel padding; back to NCHW.
    out = out[:, :, 1:W + 1, :Cout]
    return jnp.transpose(out, (0, 3, 1, 2)).astype(x_nchw.dtype)


# ----------------------------- reference (JAX) ------------------------------

def _ref_conv(x_nhwc, w, b, dtype):
    y = jax.lax.conv_general_dilated(
        x_nhwc.astype(dtype), w.astype(dtype),
        window_strides=(1, 1), padding="SAME",
        dimension_numbers=("NHWC", "HWIO", "NHWC"),
        preferred_element_type=jnp.float32)
    return y + b.reshape(1, 1, 1, -1).astype(jnp.float32)


def resnet_block_reference(x_nchw, params, *, compute_dtype=jnp.bfloat16):
    """Mirrors the kernel's dtype strategy: bf16 matmuls, f32 accum/eltwise."""
    x = jnp.transpose(x_nchw, (0, 2, 3, 1))
    x1 = _ref_conv(x, params["w_in"], params["b_in"], compute_dtype)
    x1c = x1.astype(compute_dtype)
    h = jnp.maximum(_ref_conv(x1c, params["w_b1"], params["b_b1"], compute_dtype), 0.0)
    hc = h.astype(compute_dtype)
    out = (_ref_conv(hc, params["w_b2"], params["b_b2"], compute_dtype)
           + _ref_conv(x1c, params["w_sk"], params["b_sk"], compute_dtype))
    return jnp.transpose(out, (0, 3, 1, 2))


# ---------------------------------- main ------------------------------------

if __name__ == "__main__":
    key = jax.random.PRNGKey(0)
    N, C_in, C_out, H, W = 2, 4, 4, 16, 16   # in_c == out_c so skep(x1) is valid

    keys = jax.random.split(key, 9)
    params = {
        # weights stored as (kH, kW, Cin, Cout) (HWIO), f32
        "w_in": jax.random.normal(keys[0], (3, 3, C_in, C_out), jnp.float32) * 0.1,
        "b_in": jax.random.normal(keys[1], (C_out,), jnp.float32) * 0.1,
        "w_b1": jax.random.normal(keys[2], (3, 3, C_out, C_out), jnp.float32) * 0.1,
        "b_b1": jax.random.normal(keys[3], (C_out,), jnp.float32) * 0.1,
        "w_b2": jax.random.normal(keys[4], (3, 3, C_out, C_out), jnp.float32) * 0.1,
        "b_b2": jax.random.normal(keys[5], (C_out,), jnp.float32) * 0.1,
        "w_sk": jax.random.normal(keys[6], (3, 3, C_out, C_out), jnp.float32) * 0.1,
        "b_sk": jax.random.normal(keys[7], (C_out,), jnp.float32) * 0.1,
    }

    x = jax.random.normal(keys[8], (N, C_in, H, W), jnp.float32)   # NCHW input

    out = jax.block_until_ready(jax.jit(resnet_block_forward)(x, params))
    ref = jax.block_until_ready(jax.jit(resnet_block_reference)(x, params))

    assert out.shape == (N, C_out, H, W)
    err = float(jnp.max(jnp.abs(out - ref)))
    assert err < 1e-2, f"mismatch vs reference: max abs err = {err}"

    print("KERNEL_OK")
</pallas_src>

<mosaic_0001>
module attributes {stable_mosaic.version = 11 : i64} {
  func.func @_resnet_block_kernel(%arg0: i32, %arg1: i32, %arg2: memref<1x22x24x128xbf16, #tpu.memory_space<vmem>>, %arg3: memref<3x384x128xbf16, #tpu.memory_space<vmem>>, %arg4: memref<1x128xf32, #tpu.memory_space<vmem>>, %arg5: memref<3x384x128xbf16, #tpu.memory_space<vmem>>, %arg6: memref<1x128xf32, #tpu.memory_space<vmem>>, %arg7: memref<3x384x128xbf16, #tpu.memory_space<vmem>>, %arg8: memref<1x128xf32, #tpu.memory_space<vmem>>, %arg9: memref<3x384x128xbf16, #tpu.memory_space<vmem>>, %arg10: memref<1x128xf32, #tpu.memory_space<vmem>>, %arg11: memref<1x8x24x128xf32, #tpu.memory_space<vmem>>, %arg12: memref<12x24x128xbf16, #tpu.memory_space<vmem>>, %arg13: memref<10x24x128xbf16, #tpu.memory_space<vmem>>) attributes {dimension_semantics = [#tpu.dimension_semantics<parallel>, #tpu.dimension_semantics<parallel>], iteration_bounds = array<i64: 2, 2>, scalar_prefetch = 0 : i64, scratch_operands = 2 : i64, tpu.core_type = #tpu.core_type<tc>, window_params = [{transform_indices = @transform_0, window_bounds = array<i64: 1, 22, 24, 128>}, {pipeline_mode = #tpu.pipeline_mode<synchronous>, transform_indices = @transform_1, window_bounds = array<i64: 3, 384, 128>}, {pipeline_mode = #tpu.pipeline_mode<synchronous>, transform_indices = @transform_2, window_bounds = array<i64: 1, 128>}, {pipeline_mode = #tpu.pipeline_mode<synchronous>, transform_indices = @transform_3, window_bounds = array<i64: 3, 384, 128>}, {pipeline_mode = #tpu.pipeline_mode<synchronous>, transform_indices = @transform_4, window_bounds = array<i64: 1, 128>}, {pipeline_mode = #tpu.pipeline_mode<synchronous>, transform_indices = @transform_5, window_bounds = array<i64: 3, 384, 128>}, {pipeline_mode = #tpu.pipeline_mode<synchronous>, transform_indices = @transform_6, window_bounds = array<i64: 1, 128>}, {pipeline_mode = #tpu.pipeline_mode<synchronous>, transform_indices = @transform_7, window_bounds = array<i64: 3, 384, 128>}, {pipeline_mode = #tpu.pipeline_mode<synchronous>, transform_indices = @transform_8, window_bounds = array<i64: 1, 128>}, {transform_indices = @transform_9, window_bounds = array<i64: 1, 8, 24, 128>}]} {
    %c8_i32 = arith.constant 8 : i32
    %0 = arith.muli %arg1, %c8_i32 : i32
    %1 = tpu.assume_multiple %0, 8 : i32
    %c0 = arith.constant 0 : index
    %2 = arith.index_cast %1 : i32 to index
    %c0_0 = arith.constant 0 : index
    %c0_1 = arith.constant 0 : index
    %3 = vector.load %arg2[%c0, %2, %c0_0, %c0_1] : memref<1x22x24x128xbf16, #tpu.memory_space<vmem>>, vector<1x14x24x128xbf16>
    %4 = vector.shape_cast %3 : vector<1x14x24x128xbf16> to vector<14x24x128xbf16>
    %5 = vector.extract_strided_slice %4 {offsets = [0, 0, 0], sizes = [14, 1, 128], strides = [1, 1, 1]} : vector<14x24x128xbf16> to vector<14x1x128xbf16>
    %6 = vector.extract_strided_slice %4 {offsets = [0, 0, 0], sizes = [14, 23, 128], strides = [1, 1, 1]} : vector<14x24x128xbf16> to vector<14x23x128xbf16>
    %7 = tpu.concatenate %5, %6 in 1 : vector<14x1x128xbf16>, vector<14x23x128xbf16> -> vector<14x24x128xbf16>
    %8 = vector.extract_strided_slice %4 {offsets = [0, 1, 0], sizes = [14, 23, 128], strides = [1, 1, 1]} : vector<14x24x128xbf16> to vector<14x23x128xbf16>
    %9 = vector.extract_strided_slice %4 {offsets = [0, 23, 0], sizes = [14, 1, 128], strides = [1, 1, 1]} : vector<14x24x128xbf16> to vector<14x1x128xbf16>
    %10 = tpu.concatenate %8, %9 in 1 : vector<14x23x128xbf16>, vector<14x1x128xbf16> -> vector<14x24x128xbf16>
    %11 = tpu.concatenate %7, %4, %10 in 2 : vector<14x24x128xbf16>, vector<14x24x128xbf16>, vector<14x24x128xbf16> -> vector<14x24x384xbf16>
    %cst = arith.constant 0.000000e+00 : f32
    %12 = vector.broadcast %cst : f32 to vector<288x128xf32>
    %13 = vector.extract_strided_slice %11 {offsets = [0, 0, 0], sizes = [12, 24, 384], strides = [1, 1, 1]} : vector<14x24x384xbf16> to vector<12x24x384xbf16>
    %14 = vector.shape_cast %13 : vector<12x24x384xbf16> to vector<288x384xbf16>
    %c0_2 = arith.constant 0 : index
    %c0_3 = arith.constant 0 : index
    %c0_4 = arith.constant 0 : index
    %15 = vector.load %arg3[%c0_2, %c0_3, %c0_4] : memref<3x384x128xbf16, #tpu.memory_space<vmem>>, vector<1x384x128xbf16>
    %16 = vector.shape_cast %15 : vector<1x384x128xbf16> to vector<384x128xbf16>
    %cst_5 = arith.constant dense<0.000000e+00> : vector<288x128xf32>
    %17 = tpu.matmul %14, %16, %cst_5 {dimension_numbers = #tpu.dot_dimension_numbers<[1], [0], [0], [1], [0, 0, 1, 1], [], []>} : vector<288x384xbf16>, vector<384x128xbf16>, vector<288x128xf32> -> vector<288x128xf32>
    %18 = arith.addf %12, %17 : vector<288x128xf32>
    %19 = vector.extract_strided_slice %11 {offsets = [1, 0, 0], sizes = [12, 24, 384], strides = [1, 1, 1]} : vector<14x24x384xbf16> to vector<12x24x384xbf16>
    %20 = vector.shape_cast %19 : vector<12x24x384xbf16> to vector<288x384xbf16>
    %c1 = arith.constant 1 : index
    %c0_6 = arith.constant 0 : index
    %c0_7 = arith.constant 0 : index
    %21 = vector.load %arg3[%c1, %c0_6, %c0_7] : memref<3x384x128xbf16, #tpu.memory_space<vmem>>, vector<1x384x128xbf16>
    %22 = vector.shape_cast %21 : vector<1x384x128xbf16> to vector<384x128xbf16>
    %cst_8 = arith.constant dense<0.000000e+00> : vector<288x128xf32>
    %23 = tpu.matmul %20, %22, %cst_8 {dimension_numbers = #tpu.dot_dimension_numbers<[1], [0], [0], [1], [0, 0, 1, 1], [], []>} : vector<288x384xbf16>, vector<384x128xbf16>, vector<288x128xf32> -> vector<288x128xf32>
    %24 = arith.addf %18, %23 : vector<288x128xf32>
    %25 = vector.extract_strided_slice %11 {offsets = [2, 0, 0], sizes = [12, 24, 384], strides = [1, 1, 1]} : vector<14x24x384xbf16> to vector<12x24x384xbf16>
    %26 = vector.shape_cast %25 : vector<12x24x384xbf16> to vector<288x384xbf16>
    %c2 = arith.constant 2 : index
    %c0_9 = arith.constant 0 : index
    %c0_10 = arith.constant 0 : index
    %27 = vector.load %arg3[%c2, %c0_9, %c0_10] : memref<3x384x128xbf16, #tpu.memory_space<vmem>>, vector<1x384x128xbf16>
    %28 = vector.shape_cast %27 : vector<1x384x128xbf16> to vector<384x128xbf16>
    %cst_11 = arith.constant dense<0.000000e+00> : vector<288x128xf32>
    %29 = tpu.matmul %26, %28, %cst_11 {dimension_numbers = #tpu.dot_dimension_numbers<[1], [0], [0], [1], [0, 0, 1, 1], [], []>} : vector<288x384xbf16>, vector<384x128xbf16>, vector<288x128xf32> -> vector<288x128xf32>
    %30 = arith.addf %24, %29 : vector<288x128xf32>
    %c0_12 = arith.constant 0 : index
    %c0_13 = arith.constant 0 : index
    %31 = vector.load %arg4[%c0_12, %c0_13] : memref<1x128xf32, #tpu.memory_space<vmem>>, vector<1x128xf32>
    %32 = vector.broadcast %31 : vector<1x128xf32> to vector<288x128xf32>
    %33 = arith.addf %30, %32 : vector<288x128xf32>
    %34 = vector.shape_cast %33 : vector<288x128xf32> to vector<12x24x128xf32>
    %c2_i32 = arith.constant 2 : i32
    %35 = arith.subi %1, %c2_i32 : i32
    %36 = tpu.iota {dimensions = array<i32: 0>} : vector<12x24x128xi32>
    %37 = vector.broadcast %35 : i32 to vector<12x24x128xi32>
    %38 = arith.addi %36, %37 : vector<12x24x128xi32>
    %39 = tpu.iota {dimensions = array<i32: 1>} : vector<12x24x128xi32>
    %c0_i32 = arith.constant 0 : i32
    %40 = vector.broadcast %c0_i32 : i32 to vector<12x24x128xi32>
    %41 = arith.cmpi sge, %38, %40 : vector<12x24x128xi32>
    %c16_i32 = arith.constant 16 : i32
    %42 = vector.broadcast %c16_i32 : i32 to vector<12x24x128xi32>
    %43 = arith.cmpi slt, %38, %42 : vector<12x24x128xi32>
    %44 = arith.andi %41, %43 : vector<12x24x128xi1>
    %c1_i32 = arith.constant 1 : i32
    %45 = vector.broadcast %c1_i32 : i32 to vector<12x24x128xi32>
    %46 = arith.cmpi sge, %39, %45 : vector<12x24x128xi32>
    %47 = arith.andi %44, %46 : vector<12x24x128xi1>
    %c16_i32_14 = arith.constant 16 : i32
    %48 = vector.broadcast %c16_i32_14 : i32 to vector<12x24x128xi32>
    %49 = arith.cmpi sle, %39, %48 : vector<12x24x128xi32>
    %50 = arith.andi %47, %49 : vector<12x24x128xi1>
    %cst_15 = arith.constant 0.000000e+00 : f32
    %51 = vector.broadcast %cst_15 : f32 to vector<12x24x128xf32>
    %52 = arith.select %50, %34, %51 : vector<12x24x128xi1>, vector<12x24x128xf32>
    %53 = arith.truncf %52 : vector<12x24x128xf32> to vector<12x24x128xbf16>
    %c0_16 = arith.constant 0 : index
    %c0_17 = arith.constant 0 : index
    %c0_18 = arith.constant 0 : index
    %54 = vector.load %arg12[%c0_16, %c0_17, %c0_18] : memref<12x24x128xbf16, #tpu.memory_space<vmem>>, vector<12x24x128xbf16>
    tpu.vector_store %arg12[%c0_16, %c0_17, %c0_18], %53 {strides = array<i32>} : memref<12x24x128xbf16, #tpu.memory_space<vmem>>, vector<12x24x128xbf16>,
    %c0_19 = arith.constant 0 : index
    %c0_20 = arith.constant 0 : index
    %c0_21 = arith.constant 0 : index
    %55 = vector.load %arg12[%c0_19, %c0_20, %c0_21] : memref<12x24x128xbf16, #tpu.memory_space<vmem>>, vector<12x24x128xbf16>
    %56 = vector.extract_strided_slice %55 {offsets = [0, 0, 0], sizes = [12, 1, 128], strides = [1, 1, 1]} : vector<12x24x128xbf16> to vector<12x1x128xbf16>
    %57 = vector.extract_strided_slice %55 {offsets = [0, 0, 0], sizes = [12, 23, 128], strides = [1, 1, 1]} : vector<12x24x128xbf16> to vector<12x23x128xbf16>
    %58 = tpu.concatenate %56, %57 in 1 : vector<12x1x128xbf16>, vector<12x23x128xbf16> -> vector<12x24x128xbf16>
    %59 = vector.extract_strided_slice %55 {offsets = [0, 1, 0], sizes = [12, 23, 128], strides = [1, 1, 1]} : vector<12x24x128xbf16> to vector<12x23x128xbf16>
    %60 = vector.extract_strided_slice %55 {offsets = [0, 23, 0], sizes = [12, 1, 128], strides = [1, 1, 1]} : vector<12x24x128xbf16> to vector<12x1x128xbf16>
    %61 = tpu.concatenate %59, %60 in 1 : vector<12x23x128xbf16>, vector<12x1x128xbf16> -> vector<12x24x128xbf16>
    %62 = tpu.concatenate %58, %55, %61 in 2 : vector<12x24x128xbf16>, vector<12x24x128xbf16>, vector<12x24x128xbf16> -> vector<12x24x384xbf16>
    %cst_22 = arith.constant 0.000000e+00 : f32
    %63 = vector.broadcast %cst_22 : f32 to vector<240x128xf32>
    %64 = vector.extract_strided_slice %62 {offsets = [0, 0, 0], sizes = [10, 24, 384], strides = [1, 1, 1]} : vector<12x24x384xbf16> to vector<10x24x384xbf16>
    %65 = vector.shape_cast %64 : vector<10x24x384xbf16> to vector<240x384xbf16>
    %c0_23 = arith.constant 0 : index
    %c0_24 = arith.constant 0 : index
    %c0_25 = arith.constant 0 : index
    %66 = vector.load %arg5[%c0_23, %c0_24, %c0_25] : memref<3x384x128xbf16, #tpu.memory_space<vmem>>, vector<1x384x128xbf16>
    %67 = vector.shape_cast %66 : vector<1x384x128xbf16> to vector<384x128xbf16>
    %cst_26 = arith.constant dense<0.000000e+00> : vector<240x128xf32>
    %68 = tpu.matmul %65, %67, %cst_26 {dimension_numbers = #tpu.dot_dimension_numbers<[1], [0], [0], [1], [0, 0, 1, 1], [], []>} : vector<240x384xbf16>, vector<384x128xbf16>, vector<240x128xf32> -> vector<240x128xf32>
    %69 = arith.addf %63, %68 : vector<240x128xf32>
    %70 = vector.extract_strided_slice %62 {offsets = [1, 0, 0], sizes = [10, 24, 384], strides = [1, 1, 1]} : vector<12x24x384xbf16> to vector<10x24x384xbf16>
    %71 = vector.shape_cast %70 : vector<10x24x384xbf16> to vector<240x384xbf16>
    %c1_27 = arith.constant 1 : index
    %c0_28 = arith.constant 0 : index
    %c0_29 = arith.constant 0 : index
    %72 = vector.load %arg5[%c1_27, %c0_28, %c0_29] : memref<3x384x128xbf16, #tpu.memory_space<vmem>>, vector<1x384x128xbf16>
    %73 = vector.shape_cast %72 : vector<1x384x128xbf16> to vector<384x128xbf16>
    %cst_30 = arith.constant dense<0.000000e+00> : vector<240x128xf32>
    %74 = tpu.matmul %71, %73, %cst_30 {dimension_numbers = #tpu.dot_dimension_numbers<[1], [0], [0], [1], [0, 0, 1, 1], [], []>} : vector<240x384xbf16>, vector<384x128xbf16>, vector<240x128xf32> -> vector<240x128xf32>
    %75 = arith.addf %69, %74 : vector<240x128xf32>
    %76 = vector.extract_strided_slice %62 {offsets = [2, 0, 0], sizes = [10, 24, 384], strides = [1, 1, 1]} : vector<12x24x384xbf16> to vector<10x24x384xbf16>
    %77 = vector.shape_cast %76 : vector<10x24x384xbf16> to vector<240x384xbf16>
    %c2_31 = arith.constant 2 : index
    %c0_32 = arith.constant 0 : index
    %c0_33 = arith.constant 0 : index
    %78 = vector.load %arg5[%c2_31, %c0_32, %c0_33] : memref<3x384x128xbf16, #tpu.memory_space<vmem>>, vector<1x384x128xbf16>
    %79 = vector.shape_cast %78 : vector<1x384x128xbf16> to vector<384x128xbf16>
    %cst_34 = arith.constant dense<0.000000e+00> : vector<240x128xf32>
    %80 = tpu.matmul %77, %79, %cst_34 {dimension_numbers = #tpu.dot_dimension_numbers<[1], [0], [0], [1], [0, 0, 1, 1], [], []>} : vector<240x384xbf16>, vector<384x128xbf16>, vector<240x128xf32> -> vector<240x128xf32>
    %81 = arith.addf %75, %80 : vector<240x128xf32>
    %c0_35 = arith.constant 0 : index
    %c0_36 = arith.constant 0 : index
    %82 = vector.load %arg6[%c0_35, %c0_36] : memref<1x128xf32, #tpu.memory_space<vmem>>, vector<1x128xf32>
    %83 = vector.broadcast %82 : vector<1x128xf32> to vector<240x128xf32>
    %84 = arith.addf %81, %83 : vector<240x128xf32>
    %85 = vector.shape_cast %84 : vector<240x128xf32> to vector<10x24x128xf32>
    %cst_37 = arith.constant 0.000000e+00 : f32
    %86 = vector.broadcast %cst_37 : f32 to vector<10x24x128xf32>
    %87 = arith.maximumf %85, %86 : vector<10x24x128xf32>
    %c1_i32_38 = arith.constant 1 : i32
    %88 = arith.subi %1, %c1_i32_38 : i32
    %89 = tpu.iota {dimensions = array<i32: 0>} : vector<10x24x128xi32>
    %90 = vector.broadcast %88 : i32 to vector<10x24x128xi32>
    %91 = arith.addi %89, %90 : vector<10x24x128xi32>
    %92 = tpu.iota {dimensions = array<i32: 1>} : vector<10x24x128xi32>
    %c0_i32_39 = arith.constant 0 : i32
    %93 = vector.broadcast %c0_i32_39 : i32 to vector<10x24x128xi32>
    %94 = arith.cmpi sge, %91, %93 : vector<10x24x128xi32>
    %c16_i32_40 = arith.constant 16 : i32
    %95 = vector.broadcast %c16_i32_40 : i32 to vector<10x24x128xi32>
    %96 = arith.cmpi slt, %91, %95 : vector<10x24x128xi32>
    %97 = arith.andi %94, %96 : vector<10x24x128xi1>
    %c1_i32_41 = arith.constant 1 : i32
    %98 = vector.broadcast %c1_i32_41 : i32 to vector<10x24x128xi32>
    %99 = arith.cmpi sge, %92, %98 : vector<10x24x128xi32>
    %100 = arith.andi %97, %99 : vector<10x24x128xi1>
    %c16_i32_42 = arith.constant 16 : i32
    %101 = vector.broadcast %c16_i32_42 : i32 to vector<10x24x128xi32>
    %102 = arith.cmpi sle, %92, %101 : vector<10x24x128xi32>
    %103 = arith.andi %100, %102 : vector<10x24x128xi1>
    %cst_43 = arith.constant 0.000000e+00 : f32
    %104 = vector.broadcast %cst_43 : f32 to vector<10x24x128xf32>
    %105 = arith.select %103, %87, %104 : vector<10x24x128xi1>, vector<10x24x128xf32>
    %106 = arith.truncf %105 : vector<10x24x128xf32> to vector<10x24x128xbf16>
    %c0_44 = arith.constant 0 : index
    %c0_45 = arith.constant 0 : index
    %c0_46 = arith.constant 0 : index
    %107 = vector.load %arg13[%c0_44, %c0_45, %c0_46] : memref<10x24x128xbf16, #tpu.memory_space<vmem>>, vector<10x24x128xbf16>
    tpu.vector_store %arg13[%c0_44, %c0_45, %c0_46], %106 {strides = array<i32>} : memref<10x24x128xbf16, #tpu.memory_space<vmem>>, vector<10x24x128xbf16>,
    %c0_47 = arith.constant 0 : index
    %c0_48 = arith.constant 0 : index
    %c0_49 = arith.constant 0 : index
    %108 = vector.load %arg13[%c0_47, %c0_48, %c0_49] : memref<10x24x128xbf16, #tpu.memory_space<vmem>>, vector<10x24x128xbf16>
    %109 = vector.extract_strided_slice %108 {offsets = [0, 0, 0], sizes = [10, 1, 128], strides = [1, 1, 1]} : vector<10x24x128xbf16> to vector<10x1x128xbf16>
    %110 = vector.extract_strided_slice %108 {offsets = [0, 0, 0], sizes = [10, 23, 128], strides = [1, 1, 1]} : vector<10x24x128xbf16> to vector<10x23x128xbf16>
    %111 = tpu.concatenate %109, %110 in 1 : vector<10x1x128xbf16>, vector<10x23x128xbf16> -> vector<10x24x128xbf16>
    %112 = vector.extract_strided_slice %108 {offsets = [0, 1, 0], sizes = [10, 23, 128], strides = [1, 1, 1]} : vector<10x24x128xbf16> to vector<10x23x128xbf16>
    %113 = vector.extract_strided_slice %108 {offsets = [0, 23, 0], sizes = [10, 1, 128], strides = [1, 1, 1]} : vector<10x24x128xbf16> to vector<10x1x128xbf16>
    %114 = tpu.concatenate %112, %113 in 1 : vector<10x23x128xbf16>, vector<10x1x128xbf16> -> vector<10x24x128xbf16>
    %115 = tpu.concatenate %111, %108, %114 in 2 : vector<10x24x128xbf16>, vector<10x24x128xbf16>, vector<10x24x128xbf16> -> vector<10x24x384xbf16>
    %cst_50 = arith.constant 0.000000e+00 : f32
    %116 = vector.broadcast %cst_50 : f32 to vector<192x128xf32>
    %117 = vector.extract_strided_slice %115 {offsets = [0, 0, 0], sizes = [8, 24, 384], strides = [1, 1, 1]} : vector<10x24x384xbf16> to vector<8x24x384xbf16>
    %118 = vector.shape_cast %117 : vector<8x24x384xbf16> to vector<192x384xbf16>
    %c0_51 = arith.constant 0 : index
    %c0_52 = arith.constant 0 : index
    %c0_53 = arith.constant 0 : index
    %119 = vector.load %arg7[%c0_51, %c0_52, %c0_53] : memref<3x384x128xbf16, #tpu.memory_space<vmem>>, vector<1x384x128xbf16>
    %120 = vector.shape_cast %119 : vector<1x384x128xbf16> to vector<384x128xbf16>
    %cst_54 = arith.constant dense<0.000000e+00> : vector<192x128xf32>
    %121 = tpu.matmul %118, %120, %cst_54 {dimension_numbers = #tpu.dot_dimension_numbers<[1], [0], [0], [1], [0, 0, 1, 1], [], []>} : vector<192x384xbf16>, vector<384x128xbf16>, vector<192x128xf32> -> vector<192x128xf32>
    %122 = arith.addf %116, %121 : vector<192x128xf32>
    %123 = vector.extract_strided_slice %115 {offsets = [1, 0, 0], sizes = [8, 24, 384], strides = [1, 1, 1]} : vector<10x24x384xbf16> to vector<8x24x384xbf16>
    %124 = vector.shape_cast %123 : vector<8x24x384xbf16> to vector<192x384xbf16>
    %c1_55 = arith.constant 1 : index
    %c0_56 = arith.constant 0 : index
    %c0_57 = arith.constant 0 : index
    %125 = vector.load %arg7[%c1_55, %c0_56, %c0_57] : memref<3x384x128xbf16, #tpu.memory_space<vmem>>, vector<1x384x128xbf16>
    %126 = vector.shape_cast %125 : vector<1x384x128xbf16> to vector<384x128xbf16>
    %cst_58 = arith.constant dense<0.000000e+00> : vector<192x128xf32>
    %127 = tpu.matmul %124, %126, %cst_58 {dimension_numbers = #tpu.dot_dimension_numbers<[1], [0], [0], [1], [0, 0, 1, 1], [], []>} : vector<192x384xbf16>, vector<384x128xbf16>, vector<192x128xf32> -> vector<192x128xf32>
    %128 = arith.addf %122, %127 : vector<192x128xf32>
    %129 = vector.extract_strided_slice %115 {offsets = [2, 0, 0], sizes = [8, 24, 384], strides = [1, 1, 1]} : vector<10x24x384xbf16> to vector<8x24x384xbf16>
    %130 = vector.shape_cast %129 : vector<8x24x384xbf16> to vector<192x384xbf16>
    %c2_59 = arith.constant 2 : index
    %c0_60 = arith.constant 0 : index
    %c0_61 = arith.constant 0 : index
    %131 = vector.load %arg7[%c2_59, %c0_60, %c0_61] : memref<3x384x128xbf16, #tpu.memory_space<vmem>>, vector<1x384x128xbf16>
    %132 = vector.shape_cast %131 : vector<1x384x128xbf16> to vector<384x128xbf16>
    %cst_62 = arith.constant dense<0.000000e+00> : vector<192x128xf32>
    %133 = tpu.matmul %130, %132, %cst_62 {dimension_numbers = #tpu.dot_dimension_numbers<[1], [0], [0], [1], [0, 0, 1, 1], [], []>} : vector<192x384xbf16>, vector<384x128xbf16>, vector<192x128xf32> -> vector<192x128xf32>
    %134 = arith.addf %128, %133 : vector<192x128xf32>
    %c0_63 = arith.constant 0 : index
    %c0_64 = arith.constant 0 : index
    %135 = vector.load %arg8[%c0_63, %c0_64] : memref<1x128xf32, #tpu.memory_space<vmem>>, vector<1x128xf32>
    %136 = vector.broadcast %135 : vector<1x128xf32> to vector<192x128xf32>
    %137 = arith.addf %134, %136 : vector<192x128xf32>
    %138 = vector.shape_cast %137 : vector<192x128xf32> to vector<8x24x128xf32>
    %c0_65 = arith.constant 0 : index
    %c0_66 = arith.constant 0 : index
    %c0_67 = arith.constant 0 : index
    %139 = vector.load %arg12[%c0_65, %c0_66, %c0_67] : memref<12x24x128xbf16, #tpu.memory_space<vmem>>, vector<12x24x128xbf16>
    %140 = vector.extract_strided_slice %139 {offsets = [0, 0, 0], sizes = [12, 1, 128], strides = [1, 1, 1]} : vector<12x24x128xbf16> to vector<12x1x128xbf16>
    %141 = vector.extract_strided_slice %139 {offsets = [0, 0, 0], sizes = [12, 23, 128], strides = [1, 1, 1]} : vector<12x24x128xbf16> to vector<12x23x128xbf16>
    %142 = tpu.concatenate %140, %141 in 1 : vector<12x1x128xbf16>, vector<12x23x128xbf16> -> vector<12x24x128xbf16>
    %143 = vector.extract_strided_slice %139 {offsets = [0, 1, 0], sizes = [12, 23, 128], strides = [1, 1, 1]} : vector<12x24x128xbf16> to vector<12x23x128xbf16>
    %144 = vector.extract_strided_slice %139 {offsets = [0, 23, 0], sizes = [12, 1, 128], strides = [1, 1, 1]} : vector<12x24x128xbf16> to vector<12x1x128xbf16>
    %145 = tpu.concatenate %143, %144 in 1 : vector<12x23x128xbf16>, vector<12x1x128xbf16> -> vector<12x24x128xbf16>
    %146 = tpu.concatenate %142, %139, %145 in 2 : vector<12x24x128xbf16>, vector<12x24x128xbf16>, vector<12x24x128xbf16> -> vector<12x24x384xbf16>
    %cst_68 = arith.constant 0.000000e+00 : f32
    %147 = vector.broadcast %cst_68 : f32 to vector<192x128xf32>
    %148 = vector.extract_strided_slice %146 {offsets = [1, 0, 0], sizes = [8, 24, 384], strides = [1, 1, 1]} : vector<12x24x384xbf16> to vector<8x24x384xbf16>
    %149 = vector.shape_cast %148 : vector<8x24x384xbf16> to vector<192x384xbf16>
    %c0_69 = arith.constant 0 : index
    %c0_70 = arith.constant 0 : index
    %c0_71 = arith.constant 0 : index
    %150 = vector.load %arg9[%c0_69, %c0_70, %c0_71] : memref<3x384x128xbf16, #tpu.memory_space<vmem>>, vector<1x384x128xbf16>
    %151 = vector.shape_cast %150 : vector<1x384x128xbf16> to vector<384x128xbf16>
    %cst_72 = arith.constant dense<0.000000e+00> : vector<192x128xf32>
    %152 = tpu.matmul %149, %151, %cst_72 {dimension_numbers = #tpu.dot_dimension_numbers<[1], [0], [0], [1], [0, 0, 1, 1], [], []>} : vector<192x384xbf16>, vector<384x128xbf16>, vector<192x128xf32> -> vector<192x128xf32>
    %153 = arith.addf %147, %152 : vector<192x128xf32>
    %154 = vector.extract_strided_slice %146 {offsets = [2, 0, 0], sizes = [8, 24, 384], strides = [1, 1, 1]} : vector<12x24x384xbf16> to vector<8x24x384xbf16>
    %155 = vector.shape_cast %154 : vector<8x24x384xbf16> to vector<192x384xbf16>
    %c1_73 = arith.constant 1 : index
    %c0_74 = arith.constant 0 : index
    %c0_75 = arith.constant 0 : index
    %156 = vector.load %arg9[%c1_73, %c0_74, %c0_75] : memref<3x384x128xbf16, #tpu.memory_space<vmem>>, vector<1x384x128xbf16>
    %157 = vector.shape_cast %156 : vector<1x384x128xbf16> to vector<384x128xbf16>
    %cst_76 = arith.constant dense<0.000000e+00> : vector<192x128xf32>
    %158 = tpu.matmul %155, %157, %cst_76 {dimension_numbers = #tpu.dot_dimension_numbers<[1], [0], [0], [1], [0, 0, 1, 1], [], []>} : vector<192x384xbf16>, vector<384x128xbf16>, vector<192x128xf32> -> vector<192x128xf32>
    %159 = arith.addf %153, %158 : vector<192x128xf32>
    %160 = vector.extract_strided_slice %146 {offsets = [3, 0, 0], sizes = [8, 24, 384], strides = [1, 1, 1]} : vector<12x24x384xbf16> to vector<8x24x384xbf16>
    %161 = vector.shape_cast %160 : vector<8x24x384xbf16> to vector<192x384xbf16>
    %c2_77 = arith.constant 2 : index
    %c0_78 = arith.constant 0 : index
    %c0_79 = arith.constant 0 : index
    %162 = vector.load %arg9[%c2_77, %c0_78, %c0_79] : memref<3x384x128xbf16, #tpu.memory_space<vmem>>, vector<1x384x128xbf16>
    %163 = vector.shape_cast %162 : vector<1x384x128xbf16> to vector<384x128xbf16>
    %cst_80 = arith.constant dense<0.000000e+00> : vector<192x128xf32>
    %164 = tpu.matmul %161, %163, %cst_80 {dimension_numbers = #tpu.dot_dimension_numbers<[1], [0], [0], [1], [0, 0, 1, 1], [], []>} : vector<192x384xbf16>, vector<384x128xbf16>, vector<192x128xf32> -> vector<192x128xf32>
    %165 = arith.addf %159, %164 : vector<192x128xf32>
    %c0_81 = arith.constant 0 : index
    %c0_82 = arith.constant 0 : index
    %166 = vector.load %arg10[%c0_81, %c0_82] : memref<1x128xf32, #tpu.memory_space<vmem>>, vector<1x128xf32>
    %167 = vector.broadcast %166 : vector<1x128xf32> to vector<192x128xf32>
    %168 = arith.addf %165, %167 : vector<192x128xf32>
    %169 = vector.shape_cast %168 : vector<192x128xf32> to vector<8x24x128xf32>
    %170 = arith.addf %138, %169 : vector<8x24x128xf32>
    %c0_83 = arith.constant 0 : index
    %c0_84 = arith.constant 0 : index
    %c0_85 = arith.constant 0 : index
    %c0_86 = arith.constant 0 : index
    %171 = vector.load %arg11[%c0_83, %c0_84, %c0_85, %c0_86] : memref<1x8x24x128xf32, #tpu.memory_space<vmem>>, vector<1x8x24x128xf32>
    %172 = vector.shape_cast %171 : vector<1x8x24x128xf32> to vector<8x24x128xf32>
    %173 = vector.shape_cast %170 : vector<8x24x128xf32> to vector<1x8x24x128xf32>
    tpu.vector_store %arg11[%c0_83, %c0_84, %c0_85, %c0_86], %173 {strides = array<i32>} : memref<1x8x24x128xf32, #tpu.memory_space<vmem>>, vector<1x8x24x128xf32>,
    return
  }
  func.func @transform_0(%arg0: i32, %arg1: i32) -> (i32, i32, i32, i32) {
    %c0_i32 = arith.constant 0 : i32
    %c0_i32_0 = arith.constant 0 : i32
    %c0_i32_1 = arith.constant 0 : i32
    %c0_i32_2 = arith.constant 0 : i32
    return %arg0, %c0_i32, %c0_i32_0, %c0_i32_1 : i32, i32, i32, i32
  }
  func.func @transform_1(%arg0: i32, %arg1: i32) -> (i32, i32, i32) {
    %c0_i32 = arith.constant 0 : i32
    %c0_i32_0 = arith.constant 0 : i32
    %c0_i32_1 = arith.constant 0 : i32
    %c0_i32_2 = arith.constant 0 : i32
    return %c0_i32, %c0_i32_0, %c0_i32_1 : i32, i32, i32
  }
  func.func @transform_2(%arg0: i32, %arg1: i32) -> (i32, i32) {
    %c0_i32 = arith.constant 0 : i32
    %c0_i32_0 = arith.constant 0 : i32
    %c0_i32_1 = arith.constant 0 : i32
    return %c0_i32, %c0_i32_0 : i32, i32
  }
  func.func @transform_3(%arg0: i32, %arg1: i32) -> (i32, i32, i32) {
    %c0_i32 = arith.constant 0 : i32
    %c0_i32_0 = arith.constant 0 : i32
    %c0_i32_1 = arith.constant 0 : i32
    %c0_i32_2 = arith.constant 0 : i32
    return %c0_i32, %c0_i32_0, %c0_i32_1 : i32, i32, i32
  }
  func.func @transform_4(%arg0: i32, %arg1: i32) -> (i32, i32) {
    %c0_i32 = arith.constant 0 : i32
    %c0_i32_0 = arith.constant 0 : i32
    %c0_i32_1 = arith.constant 0 : i32
    return %c0_i32, %c0_i32_0 : i32, i32
  }
  func.func @transform_5(%arg0: i32, %arg1: i32) -> (i32, i32, i32) {
    %c0_i32 = arith.constant 0 : i32
    %c0_i32_0 = arith.constant 0 : i32
    %c0_i32_1 = arith.constant 0 : i32
    %c0_i32_2 = arith.constant 0 : i32
    return %c0_i32, %c0_i32_0, %c0_i32_1 : i32, i32, i32
  }
  func.func @transform_6(%arg0: i32, %arg1: i32) -> (i32, i32) {
    %c0_i32 = arith.constant 0 : i32
    %c0_i32_0 = arith.constant 0 : i32
    %c0_i32_1 = arith.constant 0 : i32
    return %c0_i32, %c0_i32_0 : i32, i32
  }
  func.func @transform_7(%arg0: i32, %arg1: i32) -> (i32, i32, i32) {
    %c0_i32 = arith.constant 0 : i32
    %c0_i32_0 = arith.constant 0 : i32
    %c0_i32_1 = arith.constant 0 : i32
    %c0_i32_2 = arith.constant 0 : i32
    return %c0_i32, %c0_i32_0, %c0_i32_1 : i32, i32, i32
  }
  func.func @transform_8(%arg0: i32, %arg1: i32) -> (i32, i32) {
    %c0_i32 = arith.constant 0 : i32
    %c0_i32_0 = arith.constant 0 : i32
    %c0_i32_1 = arith.constant 0 : i32
    return %c0_i32, %c0_i32_0 : i32, i32
  }
  func.func @transform_9(%arg0: i32, %arg1: i32) -> (i32, i32, i32, i32) {
    %c0_i32 = arith.constant 0 : i32
    %c0_i32_0 = arith.constant 0 : i32
    %c0_i32_1 = arith.constant 0 : i32
    return %arg0, %arg1, %c0_i32, %c0_i32_0 : i32, i32, i32, i32
  }
}

</mosaic_0001>

<bundles_post_ra>
// kernel: resnet_block_forward.1
= control target key start
LH: loop header
LB: loop body
LE: loop exit
PB: predicated region body
PF: predicated region fallthrough
CT: control target
= control target key end

     0   :  { %s11314_s30 = smov 0   ;;  %s11316_s10 = smov 0   ;;  %s17539_s0 = inlined_call_operand.vmem [shape: bf16[2,22,24,128], index: 0, kind: input, shape index: {}]   ;;  %s17540_s1 = inlined_call_operand.vmem [shape: bf16[3,384,128], index: 1, kind: input, shape index: {}]   ;;  %s17541_s2 = inlined_call_operand.vmem [shape: f32[1,128], index: 2, kind: input, shape index: {}]   ;;  %s17542_s3 = inlined_call_operand.vmem [shape: bf16[3,384,128], index: 3, kind: input, shape index: {}]   ;;  %s17543_s4 = inlined_call_operand.vmem [shape: f32[1,128], index: 4, kind: input, shape index: {}]   ;;  %s17544_s5 = inlined_call_operand.vmem [shape: bf16[3,384,128], index: 5, kind: input, shape index: {}]   ;;  %s17545_s6 = inlined_call_operand.vmem [shape: f32[1,128], index: 6, kind: input, shape index: {}]   ;;  %s17546_s7 = inlined_call_operand.vmem [shape: bf16[3,384,128], index: 7, kind: input, shape index: {}]   ;;  %s17547_s8 = inlined_call_operand.vmem [shape: f32[1,128], index: 8, kind: input, shape index: {}]   ;;  %s17548_s9 = inlined_call_operand.vmem [shape: f32[2,16,24,128], index: 9, kind: output, shape index: {}]  }
   0x1   :  { %s11318_s11 = smov 0   ;;  %s11320_s12 = smov 0  }
   0x2   :  { %s11322_s13 = smov 0  }
   0x3 LB: > { %s28_s14 = sadd.s32 1, %s11254_s11  ;;  %s31_s15 = sadd.s32 1, %s11258_s12  ;;  %s11262_s13 = sphi %s11322_s13, %s19_s13   ;;  %s11258_s12 = sphi %s11320_s12, %s19053_s12   ;;  %s11254_s11 = sphi %s11318_s11, %s19052_s11   ;;  %s11250_s10 = sphi %s11316_s10, %s19051_s10   ;;  %s11246_s30 = sphi %s11314_s30, %s19050_s30  }
   0x4   : > { %p29_p0 = scmp.ge.s32.totalorder %s28_s14, 2  ;;  %p9110_p1 = scmp.ge.s32.totalorder %s11262_s13, 1 }
   0x5   : > { %p301_p2 = scmp.lt.s32.totalorder %s11262_s13, 5 }
   0x6   : > { %s19055_s14 = smov (%p29_p0, %s28_s14), 0  ;;  %s19057_s15 = smov (!%p29_p0, %s31_s15), %s11258_s12 }
   0x7   : > { %p302_p3 = pnand %p9110_p1, %p301_p2  ;;  %p33_p4 = scmp.ge.s32.totalorder %s19057_s15, 2 }
   0x9   : > { %s19059_s15 = smov (%p33_p4, %s19057_s15), 0  ;;  %305 = sbr.rel (%p302_p3) target bundleno = 2597 (0xa25), region = 56 }
   0xe   : > { %v10706_v0 = vld [vmem:[%s17540_s1 + $0xf8] sm:$0xff]  ;;  %p342_p5 = scmp.lt.s32.totalorder %s11250_s10, 1  ;;  %v10705_v4 = vld [vmem:[%s17540_s1 + $0xf0] sm:$0xff]  ;;  %s10673_s18 = smul.u32 96, %s11246_s30  ;;  %v10704_v8 = vld [vmem:[%s17540_s1 + $0xe8] sm:$0xff]  ;;  %vm741_vm1 = vcmask 1040384  }
   0xf   : > { %v10714_v1 = vld [vmem:[%s17540_s1 + $0x138] sm:$0xff]  ;;  %1306 = vmatpush.bf16.msra.mxu0 %v10706_v0  ;;  %v10713_v5 = vld [vmem:[%s17540_s1 + $0x130] sm:$0xff]  ;;  %v10712_v9 = vld [vmem:[%s17540_s1 + $0x128] sm:$0xff]  ;;  %vm516_vm0 = vsmask.f32 256  ;;  %v17891_v0 = vmov 0 }
  0x10   : > { %v10722_v2 = vld [vmem:[%s17540_s1 + $0x178] sm:$0xff]  ;;  %1405 = vmatpush.bf16.msra.mxu1 %v10714_v1  ;;  %s19061_s10 = smov (!%p342_p5, %s11250_s10), 1  ;;  %v10721_v6 = vld [vmem:[%s17540_s1 + $0x170] sm:$0xff]  ;;  %v10720_v10 = vld [vmem:[%s17540_s1 + $0x168] sm:$0xff]  ;;  %vm757_vm3 = vsmask.f32 7424 }
  0x11   : > { %v10682_v3 = vld [vmem:[%s17540_s1 + $0x38] sm:$0xff]  ;;  %1504 = vmatpush.bf16.msra.mxu2 %v10722_v2  ;;  %v10681_v7 = vld [vmem:[%s17540_s1 + $0x30] sm:$0xff]  ;;  %s11162_s19 = smul.u32 264, %s19061_s10  ;;  %v10680_v11 = vld [vmem:[%s17540_s1 + $0x28] sm:$0xff]  ;;  %vm842_vm4 = vcmask 1043456   ;;  %s12765_s27 = sshll.u32 %s11246_s30, 3 }
  0x12   : > { %1849 = vmatpush.bf16.msra.mxu3 %v10682_v3  ;;  %v10703_v12 = vld [vmem:[%s17540_s1 + $0xe0] sm:$0xff]  ;;  %v10702_v19 = vld [vmem:[%s17540_s1 + $0xd8] sm:$0xff]  ;;  %v10701_v30 = vld [vmem:[%s17540_s1 + $0xd0] sm:$0xff]  ;;  %vm843_vm5 = vsmask.f32 3328  ;;  %s9505_s28 = sadd.s32 4294967294, %s12765_s27 }
  0x13   : > { %1307 = vmatpush.bf16.msra.mxu0 %v10705_v4  ;;  %s346_s26 = scalar_lea.vmem %s17539_s0, %s11162_s19  ;;  %v10711_v13 = vld [vmem:[%s17540_s1 + $0x120] sm:$0xff]  ;;  %v10710_v20 = vld [vmem:[%s17540_s1 + $0x118] sm:$0xff]  ;;  %v10709_v31 = vld [vmem:[%s17540_s1 + $0x110] sm:$0xff]  ;;  %s9894_s19 = sadd.s32 4294967295, %s12765_s27 }
  0x14   : > { %1406 = vmatpush.bf16.msra.mxu1 %v10713_v5  ;;  %s11389_s17 = scalar_lea.vmem %s346_s26, %s10673_s18  ;;  %v10719_v15 = vld [vmem:[%s17540_s1 + $0x160] sm:$0xff]  ;;  %v10718_v23 = vld [vmem:[%s17540_s1 + $0x158] sm:$0xff]  ;;  %v10717_v37 = vld [vmem:[%s17540_s1 + $0x150] sm:$0xff]  ;;  %p350_p6 = scmp.lt.s32.totalorder %s12765_s27, 15 }
  0x15   : > { %1505 = vmatpush.bf16.msra.mxu2 %v10721_v6  ;;  %v11398_v14 = vld [vmem:[%s11389_s17 + $0xc] sm:$0xf]  ;;  %v10679_v16 = vld [vmem:[%s17540_s1 + $0x20] sm:$0xff]  ;;  %v11407_v17 = vld [vmem:[%s11389_s17 + $0x10] sm:$0xf]  ;;  %s11164_s21 = smul.u32 48, %s19061_s10 }
  0x16   : > { %1850 = vmatpush.bf16.msra.mxu3 %v10681_v7  ;;  %v17554_v18 = vunpack.c.l.b16 %v11398_v14  ;;  %v17553_v21 = vunpack.c.l.b16 %v11407_v17  ;;  %v11418_v22 = vld [vmem:[%s11389_s17 + $0x14] sm:$0xf]  ;;  %v10678_v24 = vld [vmem:[%s17540_s1 + $0x18] sm:$0xff]  ;;  %v11427_v25 = vld [vmem:[%s11389_s17] sm:$0xff]  ;;  %s19063_s27 = smov (!%p350_p6, %s12765_s27), 15 }
  0x17   : > { %1308 = vmatpush.bf16.msra.mxu0 %v10704_v8  ;;  %v11436_v27 = vld [vmem:[%s11389_s17 + $0x18] sm:$0xf]  ;;  %v11439_v28 = vld [vmem:[%s11389_s17 + $0x1c] sm:$0xf]  ;;  %v11442_v29 = vunpack.c.l.b16 %v11418_v22  ;;  %v17557_v33 = vshrl.u32 %v11427_v25, 16  ;;  %v10677_v38 = vld [vmem:[%s17540_s1 + $0x10] sm:$0xff] }
  0x18   : > { %1407 = vmatpush.bf16.msra.mxu1 %v10712_v9  ;;  %v11433_v26 = vpack.c.b16 %v17553_v21, %v17554_v18  ;;  %v452_v34 = vunpack.c.l.b16 %v11436_v27  ;;  %v453_v35 = vunpack.c.l.b16 %v11439_v28  ;;  %v364_v36 = vld [vmem:[%s11389_s17 + $0x8] sm:$0xf]  ;;  %v11467_v41 = vld [vmem:[%s11389_s17 + $0x20] sm:$0xf]  ;;  %v17558_v42 = vshll.u32 %v11427_v25, 16  ;;  %vm11528_vm2 = vmand %vm741_vm1, %vm516_vm0 }
  0x19   : > { %1506 = vmatpush.bf16.msra.mxu2 %v10720_v10  ;;  %v11464_v40 = vpack.c.b16 %v11442_v29, %v11442_v29  ;;  %v11470_v43 = vunpack.c.l.b16 %v364_v36  ;;  %v10700_v44 = vld [vmem:[%s17540_s1 + $0xc8] sm:$0xff]  ;;  %v11482_v47 = vrot.slane %v17557_v33, 7  ;;  %v11491_v49 = vunpack.c.l.b16 %v11467_v41  ;;  %v10699_v56 = vld [vmem:[%s17540_s1 + $0xc0] sm:$0xff]  ;;  %v10690_v6 = vld [vmem:[%s17540_s1 + $0x78] sm:$0xff] }
  0x1a   : > { %1851 = vmatpush.bf16.msra.mxu3 %v10680_v11  ;;  %v533_v32 = vshrl.u32 %v11433_v26, 16  ;;  %v536_v39 = vshll.u32 %v11433_v26, 16  ;;  %v10708_v45 = vld [vmem:[%s17540_s1 + $0x108] sm:$0xff]  ;;  %v11488_v48 = vpack.c.b16 %v453_v35, %v452_v34  ;;  %v10707_v57 = vld [vmem:[%s17540_s1 + $0x100] sm:$0xff]  ;;  %v17892_v0 = vsel %vm11528_vm2, 4294967295, %v17891_v0  ;;  %vm11560_vm6 = vmand %vm842_vm4, %vm843_vm5 }
  0x1b   : > { %1309 = vmatpush.bf16.msra.mxu0 %v10703_v12  ;;  %v10716_v50 = vld [vmem:[%s17540_s1 + $0x148] sm:$0xff]  ;;  %v543_v52 = vshll.u32 %v11464_v40, 16  ;;  %v540_v54 = vshrl.u32 %v11464_v40, 16  ;;  %v11503_v55 = vpack.c.b16 %v11470_v43, %v11470_v43  ;;  %v10715_v58 = vld [vmem:[%s17540_s1 + $0x140] sm:$0xff]  ;;  %v523_v60 = vor.u32 %v17558_v42, %v11482_v47  ;;  %17893 = vst [vmem:[#allocation4_spill] sm:$0xff] %v17892_v0 }
  0x1c   : > { %1408 = vmatpush.bf16.msra.mxu1 %v10711_v13  ;;  %v11478_v46 = vrot.slane %v533_v32, 7  ;;  %v10676_v51 = vld [vmem:[%s17540_s1 + $0x8] sm:$0xff]  ;;  %v763_v53 = vrot.slane %v536_v39, 1  ;;  %v548_v61 = vshrl.u32 %v11488_v48, 16  ;;  %v11521_v62 = vpack.c.b16 %v11491_v49, %v11491_v49  ;;  %v10675_v63 = vld [vmem:[%s17540_s1] sm:$0xff] }
  0x1d   : > { %1507 = vmatpush.bf16.msra.mxu2 %v10719_v15  ;;  %v765_v2 = vrot.slane %v543_v52, 1  ;;  %v362_v3 = vld [vmem:[%s11389_s17] sm:$0xf]  ;;  %v551_v4 = vshll.u32 %v11488_v48, 16  ;;  %v17555_v5 = vshrl.u32 %v11503_v55, 16  ;;  %v542_v7 = vrot.slane %v540_v54, 7 }
  0x1e   : > { %1852 = vmatpush.bf16.msra.mxu3 %v10679_v16  ;;  %v538_v59 = vor.u32 %v536_v39, %v11478_v46  ;;  %v764_v1 = vor.u32 %v763_v53, %v533_v32  ;;  %v743_v9 = vsel %vm11528_vm2, %v362_v3, %v523_v60  ;;  %v550_v10 = vrot.slane %v548_v61, 7 }
  0x1f   : > { %1310 = vmatpush.bf16.msra.mxu0 %v10702_v19  ;;  %v558_v11 = vshll.u32 %v11521_v62, 16  ;;  %v768_v13 = vrot.slane %v551_v4, 1  ;;  %v527_v15 = vrot.slane %v17555_v5, 7  ;;  %v17556_v16 = vshll.u32 %v11503_v55, 16 }
  0x20   : > { %1409 = vmatpush.bf16.msra.mxu1 %v10710_v20  ;;  %v11541_v8 = vsel %vm11528_vm2, %v11398_v14, %v538_v59  ;;  %v11547_v12 = vsel %vm757_vm3, %v764_v1, %v765_v2  ;;  %v545_v19 = vor.u32 %v543_v52, %v542_v7  ;;  %v553_v20 = vor.u32 %v551_v4, %v550_v10 }
  0x21   : > { %1508 = vmatpush.bf16.msra.mxu2 %v10718_v23  ;;  %v10689_v23 = vld [vmem:[%s17540_s1 + $0x70] sm:$0xff]  ;;  %v530_v32 = vor.u32 %v17556_v16, %v527_v15  ;;  %v17894_v36 = vmov 0  ;;  %v889_v53 = vunpack.c.l.b16 %v11541_v8  ;;  %v891_v3 = vunpack.c.h.b16 %v11541_v8 }
  0x22   : > { %1853 = vmatpush.bf16.msra.mxu3 %v10678_v24  ;;  %v767_v24 = vor.u32 %v765_v2, %v540_v54  ;;  %v17895_v36 = vsel %vm11560_vm6, 4294967295, %v17894_v36  ;;  %v374_v15 = vld [vmem:[%s11389_s17 + $0x30] sm:$0xf] }
  0x23   : > { %1311 = vmatpush.bf16.msra.mxu0 %v10701_v30  ;;  %v769_v30 = vor.u32 %v768_v13, %v548_v61  ;;  %17896 = vst [vmem:[#allocation5_spill] sm:$0xff] %v17895_v36  ;;  %v531_v40 = vsel %vm516_vm0, %v11482_v47, %v530_v32 }
  0x24   : > { %1410 = vmatpush.bf16.msra.mxu1 %v10709_v31  ;;  %v770_v31 = vrot.slane %v558_v11, 1  ;;  %v846_v39 = vsel %vm11560_vm6, %v767_v24, %v11418_v22  ;;  %v887_v52 = vunpack.c.l.b16 %v531_v40  ;;  %v1063_v22 = vpack.c.b16 %v452_v34, %v11442_v29  ;;  %v11599_v34 = vld [vmem:[%s11389_s17 + $0x28] sm:$0xf] }
  0x25   : > { %1509 = vmatpush.bf16.msra.mxu2 %v10717_v37  ;;  %v11569_v37 = vsel %vm11528_vm2, %v11436_v27, %v553_v20  ;;  %v11596_v27 = vld [vmem:[%s11389_s17 + $0x24] sm:$0xf] }
  0x26   : > { %1854 = vmatpush.bf16.msra.mxu3 %v10677_v38  ;;  %17897 = vst [vmem:[#allocation6_spill] sm:$0xff] %v11569_v37  ;;  %v11572_v38 = vsel %vm757_vm3, %v769_v30, %v770_v31  ;;  %v17552_v4 = vunpack.c.l.b16 %v11596_v27 }
  0x27   : > { %1312 = vmatpush.bf16.msra.mxu0 %v10700_v44  ;;  %v898_v1 = vunpack.c.h.b16 %v11572_v38 }
  0x28   : > { %1411 = vmatpush.bf16.msra.mxu1 %v10708_v45  ;;  %v895_v45 = vunpack.c.l.b16 %v11569_v37 }
  0x29   : > { %1510 = vmatpush.bf16.msra.mxu2 %v10716_v50  ;;  %v11581_v50 = vunpack.c.l.b16 %v846_v39 }
  0x2a   : > { %1855 = vmatpush.bf16.msra.mxu3 %v10676_v51  ;;  %v896_v51 = vunpack.c.l.b16 %v11572_v38 }
  0x2b   : > { %1313 = vmatpush.bf16.msra.mxu0 %v10699_v56  ;;  %v1605_v56 = vpack.c.b16 %v889_v53, %v887_v52 }
  0x2c   : > { %1412 = vmatpush.bf16.msra.mxu1 %v10707_v57  ;;  %v1064_v47 = vpack.c.b16 %v896_v51, %v11581_v50 }
  0x2d   : > { %1511 = vmatpush.bf16.msra.mxu2 %v10715_v58 }
  0x2e   : > { %1856 = vmatpush.bf16.msra.mxu3 %v10675_v63  ;;  %1314 = vmatmul.bf16.vlgmr.msra.gmra.mxu0 %v11541_v8 }
  0x2f   : > { %1948 = vmatpush.bf16.msrb.mxu0 %v10690_v6  ;;  %1413 = vmatmul.bf16.vlgmr.msra.gmra.mxu1 %v11433_v26  ;;  %v546_v26 = vsel %vm516_vm0, %v11478_v46, %v545_v19  ;;  %v555_v46 = vshrl.u32 %v11521_v62, 16  ;;  %v897_v62 = vunpack.c.h.b16 %v11569_v37  ;;  %v373_v6 = vld [vmem:[%s11389_s17 + $0x2c] sm:$0xf]  ;;  %v11624_v19 = vld [vmem:[%s11389_s17 + $0x34] sm:$0xf] }
  0x30   : > { %1512 = vmatmul.bf16.vlgmr.msra.gmra.mxu2 %v11547_v12  ;;  %v893_v44 = vunpack.c.l.b16 %v546_v26  ;;  %v11620_v13 = vunpack.c.l.b16 %v373_v6  ;;  %v459_v20 = vunpack.c.l.b16 %v11624_v19 }
  0x31   : > { %1857 = vmatmul.bf16.vlgmr.msra.gmra.mxu3 %v743_v9  ;;  %v557_v57 = vrot.slane %v555_v46, 7  ;;  %v772_v59 = vor.u32 %v770_v31, %v555_v46  ;;  %v1066_v9 = vpack.c.b16 %v11491_v49, %v453_v35  ;;  %v458_v35 = vunpack.c.l.b16 %v374_v15  ;;  %v376_v31 = vld [vmem:[%s11389_s17 + $0x38] sm:$0xf] }
  0x32   : > { %v1062_v54 = vpack.c.b16 %v895_v45, %v893_v44  ;;  %v495_v30 = vpack.c.b16 %v11620_v13, %v11620_v13 }
  0x33   : > { %1949 = vmatpush.bf16.msrb.mxu0 %v10689_v23  ;;  %v560_v58 = vor.u32 %v558_v11, %v557_v57  ;;  %v847_v61 = vsel %vm11560_vm6, %v772_v59, %v11467_v41  ;;  %v17551_v41 = vunpack.c.l.b16 %v11599_v34  ;;  %v1608_v11 = vpack.c.b16 %v893_v44, %v891_v3  ;;  %v10688_v23 = vld [vmem:[%s17540_s1 + $0x68] sm:$0xff] }
  0x34   : > { %v11604_v2 = vunpack.c.l.b16 %v847_v61  ;;  %v11635_v26 = vpack.c.b16 %v459_v20, %v458_v35  ;;  %v573_v39 = vshll.u32 %v495_v30, 16  ;;  %v11637_v44 = vunpack.c.l.b16 %v376_v31 }
  0x35   : > { %v11590_v60 = vsel %vm516_vm0, %v550_v10, %v560_v58  ;;  %v494_v8 = vpack.c.b16 %v17551_v41, %v17552_v4  ;;  %v570_v46 = vshrl.u32 %v495_v30, 16 }
  0x36   : > { %v899_v63 = vunpack.c.l.b16 %v11590_v60  ;;  %v1067_v10 = vpack.c.b16 %v11604_v2, %v898_v1  ;;  %v578_v51 = vshrl.u32 %v11635_v26, 16  ;;  %v775_v53 = vrot.slane %v573_v39, 1 }
  0x37   : > { %v563_v28 = vshrl.u32 %v494_v8, 16  ;;  %v566_v24 = vshll.u32 %v494_v8, 16  ;;  %1950 = vmatpush.bf16.msrb.mxu0 %v10688_v23 }
  0x38   : > { %v1065_v7 = vpack.c.b16 %v899_v63, %v897_v62  ;;  %v580_v57 = vrot.slane %v578_v51, 7  ;;  %v777_v3 = vor.u32 %v775_v53, %v570_v46 }
  0x39   : > { %v565_v32 = vrot.slane %v563_v28, 7  ;;  %v773_v40 = vrot.slane %v566_v24, 1 }
  0x3b   : > { %v568_v45 = vor.u32 %v566_v24, %v565_v32  ;;  %v774_v52 = vor.u32 %v773_v40, %v563_v28 }
  0x3d   : > { %v11647_v58 = vsel %vm757_vm3, %v774_v52, %v775_v53  ;;  %v10687_v53 = vld [vmem:[%s17540_s1 + $0x60] sm:$0xff] }
  0x3e   : > { %1319 = vmatmul.bf16.gmra.mxu0 %v1062_v54  ;;  %v581_v54 = vshll.u32 %v11635_v26, 16 }
  0x3f   : > { %1418 = vmatmul.bf16.gmra.mxu1 %v1063_v22  ;;  %v497_v22 = vpack.c.b16 %v11637_v44, %v11637_v44  ;;  %1951 = vmatpush.bf16.msrb.mxu0 %v10687_v53 }
  0x40   : > { %1517 = vmatmul.bf16.gmra.mxu2 %v1064_v47  ;;  %v746_v47 = vsel %vm11528_vm2, %v11596_v27, %v568_v45  ;;  %v778_v61 = vrot.slane %v581_v54, 1  ;;  %v583_v1 = vor.u32 %v581_v54, %v580_v57 }
  0x41   : > { %1862 = vmatmul.bf16.gmra.mxu3 %v1605_v56  ;;  %v572_v56 = vrot.slane %v570_v46, 7  ;;  %v588_v59 = vshll.u32 %v497_v22, 16  ;;  %v901_v40 = vunpack.c.l.b16 %v746_v47  ;;  %v585_v45 = vshrl.u32 %v497_v22, 16  ;;  %v11684_v22 = vld [vmem:[%s11389_s17 + $0x40] sm:$0xf] }
  0x43   : > { %v575_v62 = vor.u32 %v573_v39, %v572_v56 }
  0x4e   : > { %1324 = vmatmul.bf16.gmra.mxu0 %v1065_v7  ;;  %v779_v7 = vor.u32 %v778_v61, %v578_v51  ;;  %v11669_v51 = vpack.c.b16 %v901_v40, %v899_v63  ;;  %v11681_v63 = vld [vmem:[%s11389_s17 + $0x3c] sm:$0xf]  ;;  %v11710_v40 = vld [vmem:[%s11389_s17 + $0x4c] sm:$0xf] }
  0x4f   : > { %1423 = vmatmul.bf16.gmra.mxu1 %v1066_v9  ;;  %v780_v9 = vrot.slane %v588_v59, 1 }
  0x50   : > { %1522 = vmatmul.bf16.gmra.mxu2 %v1067_v10  ;;  %v576_v10 = vsel %vm516_vm0, %v565_v32, %v575_v62  ;;  %17899 = vst [vmem:[#allocation8_spill] sm:$0xff] %v11669_v51 }
  0x51   : > { %1867 = vmatmul.bf16.gmra.mxu3 %v1608_v11  ;;  %v11654_v11 = vsel %vm11528_vm2, %v374_v15, %v583_v1  ;;  %v11657_v28 = vsel %vm757_vm3, %v779_v7, %v780_v9  ;;  %v905_v23 = vunpack.c.l.b16 %v576_v10  ;;  %v1071_v15 = vpack.c.b16 %v458_v35, %v11620_v13 }
  0x52   : > { %17898 = vst [vmem:[#allocation7_spill] sm:$0xff] %v11654_v11  ;;  %v907_v24 = vunpack.c.l.b16 %v11654_v11  ;;  %v908_v39 = vunpack.c.l.b16 %v11657_v28  ;;  %v782_v54 = vor.u32 %v780_v9, %v585_v45  ;;  %v909_v56 = vunpack.c.h.b16 %v11654_v11 }
  0x53   : > { %v910_v61 = vunpack.c.h.b16 %v11657_v28  ;;  %v903_v1 = vunpack.c.h.b16 %v746_v47  ;;  %v1074_v9 = vpack.c.b16 %v11637_v44, %v459_v20 }
  0x54   : > { %v1070_v32 = vpack.c.b16 %v907_v24, %v905_v23  ;;  %v849_v60 = vsel %vm11560_vm6, %v782_v54, %v376_v31  ;;  %v379_v31 = vld [vmem:[%s11389_s17 + $0x44] sm:$0xf] }
  0x55   : > { %v11689_v62 = vunpack.c.l.b16 %v849_v60  ;;  %v11706_v24 = vunpack.c.l.b16 %v379_v31 }
  0x57   : > { %v1075_v10 = vpack.c.b16 %v11689_v62, %v910_v61 }
  0x5e   : > { %1329 = vmatmul.bf16.gmra.mxu0 %v746_v47 }
  0x5f   : > { %1428 = vmatmul.bf16.gmra.mxu1 %v494_v8  ;;  %v848_v8 = vsel %vm11560_vm6, %v777_v3, %v373_v6  ;;  %v587_v6 = vrot.slane %v585_v45, 7  ;;  %v17549_v3 = vunpack.c.l.b16 %v11684_v22 }
  0x60   : > { %1527 = vmatmul.bf16.gmra.mxu2 %v11647_v58  ;;  %v11662_v30 = vunpack.c.l.b16 %v848_v8  ;;  %v11700_v8 = vpack.c.b16 %v905_v23, %v903_v1  ;;  %v465_v23 = vunpack.c.l.b16 %v11710_v40  ;;  %v11799_v40 = vld [vmem:[%s11389_s17 + $0x64] sm:$0xf] }
  0x61   : > { %1872 = vmatmul.bf16.gmra.mxu3 %v11569_v37  ;;  %v590_v52 = vor.u32 %v588_v59, %v587_v6 }
  0x62   : > { %v1072_v46 = vpack.c.b16 %v908_v39, %v11662_v30  ;;  %17900 = vst [vmem:[#allocation9_spill] sm:$0xff] %v11700_v8  ;;  %v380_v39 = vld [vmem:[%s11389_s17 + $0x48] sm:$0xf] }
  0x63   : > { %v11676_v35 = vsel %vm516_vm0, %v580_v57, %v590_v52  ;;  %v17550_v57 = vunpack.c.l.b16 %v11681_v63  ;;  %v464_v20 = vunpack.c.l.b16 %v380_v39 }
  0x64   : > { %v911_v59 = vunpack.c.l.b16 %v11676_v35 }
  0x65   : > { %v498_v47 = vpack.c.b16 %v17549_v3, %v17550_v57  ;;  %v11719_v6 = vpack.c.b16 %v465_v23, %v464_v20 }
  0x66   : > { %v1073_v7 = vpack.c.b16 %v911_v59, %v909_v56 }
  0x67   : > { %v593_v19 = vshrl.u32 %v498_v47, 16  ;;  %v596_v45 = vshll.u32 %v498_v47, 16  ;;  %17901 = vst [vmem:[#allocation10_spill] sm:$0xff] %v11719_v6  ;;  %v608_v61 = vshrl.u32 %v11719_v6, 16 }
  0x69   : > { %v783_v53 = vrot.slane %v596_v45, 1  ;;  %v610_v41 = vrot.slane %v608_v61, 7 }
  0x6b   : > { %v784_v1 = vor.u32 %v783_v53, %v593_v19 }
  0x6e   : > { %1334 = vmatmul.bf16.gmra.mxu0 %v1070_v32  ;;  %v499_v32 = vpack.c.b16 %v11706_v24, %v11706_v24 }
  0x6f   : > { %1433 = vmatmul.bf16.gmra.mxu1 %v1071_v15  ;;  %v382_v15 = vld [vmem:[%s11389_s17 + $0x50] sm:$0xf] }
  0x70   : > { %1532 = vmatmul.bf16.gmra.mxu2 %v1072_v46  ;;  %v595_v46 = vrot.slane %v593_v19, 7  ;;  %v603_v52 = vshll.u32 %v499_v32, 16  ;;  %v11721_v54 = vunpack.c.l.b16 %v382_v15  ;;  %v600_v56 = vshrl.u32 %v499_v32, 16 }
  0x71   : > { %1877 = vmatmul.bf16.gmra.mxu3 %v11669_v51 }
  0x72   : > { %17902 = vst [vmem:[#allocation11_spill] sm:$0xff] %v11721_v54  ;;  %v598_v60 = vor.u32 %v596_v45, %v595_v46  ;;  %v602_v57 = vrot.slane %v600_v56, 7 }
  0x74   : > { %v748_v3 = vsel %vm11528_vm2, %v11681_v63, %v598_v60  ;;  %v605_v19 = vor.u32 %v603_v52, %v602_v57 }
  0x76   : > { %v606_v60 = vsel %vm516_vm0, %v595_v46, %v605_v19 }
  0x77   : > { %v917_v33 = vunpack.c.l.b16 %v606_v60 }
  0x7e   : > { %1339 = vmatmul.bf16.gmra.mxu0 %v1073_v7  ;;  %v785_v7 = vrot.slane %v603_v52, 1 }
  0x7f   : > { %1438 = vmatmul.bf16.gmra.mxu1 %v1074_v9  ;;  %v611_v9 = vshll.u32 %v11719_v6, 16 }
  0x80   : > { %1537 = vmatmul.bf16.gmra.mxu2 %v1075_v10  ;;  %v501_v10 = vpack.c.b16 %v11721_v54, %v11721_v54  ;;  %v11731_v4 = vsel %vm757_vm3, %v784_v1, %v785_v7  ;;  %v787_v21 = vor.u32 %v785_v7, %v600_v56  ;;  %v913_v56 = vunpack.c.l.b16 %v748_v3 }
  0x81   : > { %1882 = vmatmul.bf16.gmra.mxu3 %v11700_v8  ;;  %v788_v32 = vrot.slane %v611_v9, 1  ;;  %v613_v53 = vor.u32 %v611_v9, %v610_v41 }
  0x82   : > { %v618_v45 = vshll.u32 %v501_v10, 16  ;;  %v11753_v7 = vpack.c.b16 %v913_v56, %v911_v59  ;;  %v11765_v59 = vld [vmem:[%s11389_s17 + $0x54] sm:$0xf] }
  0x83   : > { %v789_v18 = vor.u32 %v788_v32, %v608_v61  ;;  %v11738_v16 = vsel %vm11528_vm2, %v380_v39, %v613_v53  ;;  %v615_v61 = vshrl.u32 %v501_v10, 16  ;;  %v1079_v39 = vpack.c.b16 %v464_v20, %v11706_v24  ;;  %17906 = vst [vmem:[#allocation15_spill] sm:$0xff] %v11765_v59  ;;  %v11768_v10 = vld [vmem:[%s11389_s17 + $0x58] sm:$0xf] }
  0x84   : > { %v790_v5 = vrot.slane %v618_v45, 1  ;;  %17903 = vst [vmem:[#allocation12_spill] sm:$0xff] %v11738_v16  ;;  %v919_v42 = vunpack.c.l.b16 %v11738_v16  ;;  %v921_v32 = vunpack.c.h.b16 %v11738_v16  ;;  %v915_v53 = vunpack.c.h.b16 %v748_v3 }
  0x85   : > { %17905 = vst [vmem:[#allocation14_spill] sm:$0xff] %v11753_v7  ;;  %v17559_v60 = vunpack.c.l.b16 %v11768_v10 }
  0x86   : > { %v11741_v1 = vsel %vm757_vm3, %v789_v18, %v790_v5  ;;  %v1078_v46 = vpack.c.b16 %v919_v42, %v917_v33  ;;  %v10686_v42 = vld [vmem:[%s17540_s1 + $0x58] sm:$0xff]  ;;  %v792_v9 = vor.u32 %v790_v5, %v615_v61  ;;  %17907 = vst [vmem:[#allocation16_spill] sm:$0xff] %v11768_v10 }
  0x87   : > { %17904 = vst [vmem:[#allocation13_spill] sm:$0xff] %v11741_v1  ;;  %v920_v52 = vunpack.c.l.b16 %v11741_v1  ;;  %1952 = vmatpush.bf16.msrb.mxu0 %v10686_v42  ;;  %v922_v19 = vunpack.c.h.b16 %v11741_v1  ;;  %v17568_v42 = vunpack.c.l.b16 %v11799_v40 }
  0x88   : > { %v851_v35 = vsel %vm11560_vm6, %v792_v9, %v382_v15  ;;  %v11778_v15 = vld [vmem:[%s11389_s17 + $0x5c] sm:$0xf] }
  0x89   : > { %v11773_v5 = vunpack.c.l.b16 %v851_v35 }
  0x8b   : > { %17908 = vst [vmem:[#allocation17_spill] sm:$0xff] %v11773_v5 }
  0x8e   : > { %1344 = vmatmul.bf16.gmra.mxu0 %v748_v3 }
  0x8f   : > { %1443 = vmatmul.bf16.gmra.mxu1 %v498_v47  ;;  %v850_v47 = vsel %vm11560_vm6, %v787_v21, %v379_v31  ;;  %v617_v21 = vrot.slane %v615_v61, 7 }
  0x90   : > { %1542 = vmatmul.bf16.gmra.mxu2 %v11731_v4  ;;  %v11746_v57 = vunpack.c.l.b16 %v850_v47 }
  0x91   : > { %1887 = vmatmul.bf16.gmra.mxu3 %v11654_v11  ;;  %v620_v31 = vor.u32 %v618_v45, %v617_v21  ;;  %v11793_v21 = vunpack.c.l.b16 %v11778_v15 }
  0x92   : > { %v1080_v18 = vpack.c.b16 %v920_v52, %v11746_v57  ;;  %v1082_v52 = vpack.c.b16 %v11721_v54, %v465_v23 }
  0x93   : > { %v11760_v20 = vsel %vm516_vm0, %v610_v41, %v620_v31  ;;  %v17560_v41 = vunpack.c.l.b16 %v11765_v59  ;;  %17910 = vst [vmem:[#allocation19_spill] sm:$0xff] %v11793_v21  ;;  %v11796_v31 = vld [vmem:[%s11389_s17 + $0x60] sm:$0xf]  ;;  %v503_v35 = vpack.c.b16 %v11793_v21, %v11793_v21 }
  0x94   : > { %v17561_v45 = vunpack.c.l.b16 %v11760_v20  ;;  %v17569_v23 = vunpack.c.l.b16 %v11796_v31 }
  0x95   : > { %v502_v3 = vpack.c.b16 %v17559_v60, %v17560_v41  ;;  %v633_v41 = vshll.u32 %v503_v35, 16  ;;  %v630_v10 = vshrl.u32 %v503_v35, 16 }
  0x96   : > { %v1081_v47 = vpack.c.b16 %v17561_v45, %v921_v32  ;;  %v11807_v32 = vld [vmem:[%s11389_s17 + $0x68] sm:$0xf] }
  0x97   : > { %v626_v9 = vshll.u32 %v502_v3, 16  ;;  %v795_v8 = vrot.slane %v633_v41, 1 }
  0x99   : > { %v793_v45 = vrot.slane %v626_v9, 1 }
  0x9e   : > { %1349 = vmatmul.bf16.gmra.mxu0 %v1078_v46  ;;  %v1083_v46 = vpack.c.b16 %v11773_v5, %v922_v19 }
  0x9f   : > { %1448 = vmatmul.bf16.gmra.mxu1 %v1079_v39  ;;  %v11786_v39 = vpack.c.b16 %v917_v33, %v915_v53  ;;  %v623_v33 = vshrl.u32 %v502_v3, 16 }
  0xa0   : > { %1547 = vmatmul.bf16.gmra.mxu2 %v1080_v18 }
  0xa1   : > { %1892 = vmatmul.bf16.gmra.mxu3 %v11753_v7  ;;  %17909 = vst [vmem:[#allocation18_spill] sm:$0xff] %v11786_v39 }
  0xab   : > { %v1315_v56 = vpop.f32.mrf.mxu0 }
  0xac   : > { %v1414_v61 = vpop.f32.mrf.mxu1 }
  0xad   : > { %v1415_v18 = vadd.f32 %v1414_v61, %v1315_v56 }
  0xae   : > { %1354 = vmatmul.bf16.gmra.mxu0 %v1081_v47 }
  0xaf   : > { %1453 = vmatmul.bf16.gmra.mxu1 %v1082_v52  ;;  %v625_v52 = vrot.slane %v623_v33, 7 }
  0xb0   : > { %1552 = vmatmul.bf16.gmra.mxu2 %v1083_v46  ;;  %v11813_v46 = vpack.c.b16 %v17568_v42, %v17569_v23 }
  0xb1   : > { %1897 = vmatmul.bf16.gmra.mxu3 %v11786_v39  ;;  %v11816_v39 = vunpack.c.l.b16 %v11807_v32  ;;  %v628_v11 = vor.u32 %v626_v9, %v625_v52  ;;  %v632_v9 = vrot.slane %v630_v10, 7 }
  0xb2   : > { %17911 = vst [vmem:[#allocation20_spill] sm:$0xff] %v11813_v46  ;;  %v641_v5 = vshll.u32 %v11813_v46, 16 }
  0xb3   : > { %v1513_v19 = vpop.f32.mrf.mxu2  ;;  %v1317_v61 = vpop.f32.mrf.mxu0  ;;  %17912 = vst [vmem:[#allocation21_spill] sm:$0xff] %v11816_v39  ;;  %v505_v42 = vpack.c.b16 %v11816_v39, %v11816_v39 }
  0xb4   : > { %v1858_v53 = vpop.f32.mrf.mxu3  ;;  %v1514_v56 = vadd.f32 %v1513_v19, %v1415_v18  ;;  %v1416_v47 = vpop.f32.mrf.mxu1  ;;  %v638_v18 = vshrl.u32 %v11813_v46, 16  ;;  %v794_v19 = vor.u32 %v793_v45, %v623_v33  ;;  %v798_v46 = vrot.slane %v641_v5, 1 }
  0xb5   : > { %v1417_v60 = vadd.f32 %v1416_v47, %v1317_v61  ;;  %v648_v33 = vshll.u32 %v505_v42, 16 }
  0xb6   : > { %v11818_v7 = vadd.f32 %v1858_v53, %v1514_v56  ;;  %v11827_v53 = vsel %vm11528_vm2, %v11765_v59, %v628_v11  ;;  %v640_v35 = vrot.slane %v638_v18, 7  ;;  %v11830_v45 = vsel %vm757_vm3, %v794_v19, %v795_v8 }
  0xb7   : > { %17914 = vst [vmem:[#allocation23_spill] sm:$0xff] %v11830_v45  ;;  %v799_v59 = vor.u32 %v798_v46, %v638_v18  ;;  %v800_v6 = vrot.slane %v648_v33, 1 }
  0xb8   : > { %17913 = vst [vmem:[#allocation22_spill] sm:$0xff] %v11818_v7  ;;  %v643_v11 = vor.u32 %v641_v5, %v640_v35  ;;  %v10685_v5 = vld [vmem:[%s17540_s1 + $0x50] sm:$0xff] }
  0xb9   : > { %1953 = vmatpush.bf16.msrb.mxu0 %v10685_v5 }
  0xbb   : > { %v1515_v23 = vpop.f32.mrf.mxu2  ;;  %v1320_v54 = vpop.f32.mrf.mxu0 }
  0xbc   : > { %v1860_v61 = vpop.f32.mrf.mxu3  ;;  %v1516_v47 = vadd.f32 %v1515_v23, %v1417_v60  ;;  %v1419_v51 = vpop.f32.mrf.mxu1  ;;  %v635_v60 = vor.u32 %v633_v41, %v632_v9  ;;  %v797_v23 = vor.u32 %v795_v8, %v630_v10  ;;  %v11849_v10 = vsel %vm757_vm3, %v799_v59, %v800_v6 }
  0xbd   : > { %v1420_v56 = vadd.f32 %v1419_v51, %v1320_v54  ;;  %17917 = vst [vmem:[#allocation26_spill] sm:$0xff] %v11849_v10  ;;  %v932_v9 = vunpack.c.l.b16 %v11849_v10 }
  0xbe   : > { %v11832_v1 = vadd.f32 %v1860_v61, %v1516_v47  ;;  %1359 = vmatmul.bf16.gmra.mxu0 %v11827_v53  ;;  %v11838_v61 = vsel %vm516_vm0, %v625_v52, %v635_v60  ;;  %v852_v41 = vsel %vm11560_vm6, %v797_v23, %v11778_v15  ;;  %v17920_v15 = vunpack.c.l.b16 %v11796_v31 }
  0xbf   : > { %1458 = vmatmul.bf16.gmra.mxu1 %v502_v3  ;;  %v11843_v3 = vsel %vm11528_vm2, %v11796_v31, %v643_v11  ;;  %v929_v52 = vunpack.c.l.b16 %v11838_v61  ;;  %v11858_v47 = vunpack.c.l.b16 %v852_v41  ;;  %v17921_v61 = vunpack.c.l.b16 %v11760_v20 }
  0xc0   : > { %17915 = vst [vmem:[#allocation24_spill] sm:$0xff] %v11832_v1  ;;  %1557 = vmatmul.bf16.gmra.mxu2 %v11830_v45  ;;  %v931_v18 = vunpack.c.l.b16 %v11843_v3  ;;  %v1087_v11 = vpack.c.b16 %v17920_v15, %v11793_v21  ;;  %v11883_v15 = vld [vmem:[%s11389_s17 + $0x6c] sm:$0xf] }
  0xc1   : > { %1902 = vmatmul.bf16.gmra.mxu3 %v11738_v16  ;;  %17916 = vst [vmem:[#allocation25_spill] sm:$0xff] %v11843_v3 }
  0xc2   : > { %17919 = vst [vmem:[#allocation28_spill] sm:$0xff] %v11858_v47  ;;  %v1086_v60 = vpack.c.b16 %v931_v18, %v929_v52 }
  0xc3   : > { %v1518_v51 = vpop.f32.mrf.mxu2  ;;  %v1322_v37 = vpop.f32.mrf.mxu0  ;;  %17924 = vst [vmem:[#allocation31_spill] sm:$0xff] %v11883_v15 }
  0xc4   : > { %v1863_v54 = vpop.f32.mrf.mxu3  ;;  %v1519_v19 = vadd.f32 %v1518_v51, %v1420_v56  ;;  %v1421_v7 = vpop.f32.mrf.mxu1 }
  0xc5   : > { %v1422_v8 = vadd.f32 %v1421_v7, %v1322_v37  ;;  %v925_v37 = vunpack.c.l.b16 %v11827_v53  ;;  %v645_v7 = vshrl.u32 %v505_v42, 16  ;;  %v10730_v42 = vld [vmem:[%s17540_s1 + $0x1b8] sm:$0xff] }
  0xc6   : > { %v11854_v46 = vadd.f32 %v1863_v54, %v1519_v19  ;;  %v1088_v19 = vpack.c.b16 %v932_v9, %v11858_v47  ;;  %2364 = vmatpush.bf16.msrb.mxu2 %v10730_v42 }
  0xc7   : > { %v11868_v5 = vpack.c.b16 %v925_v37, %v17921_v61  ;;  %v647_v41 = vrot.slane %v645_v7, 7  ;;  %v11902_v61 = vld [vmem:[%s11389_s17 + $0x74] sm:$0xf] }
  0xc8   : > { %17918 = vst [vmem:[#allocation27_spill] sm:$0xff] %v11854_v46 }
  0xc9   : > { %17922 = vst [vmem:[#allocation29_spill] sm:$0xff] %v11868_v5  ;;  %v650_v31 = vor.u32 %v648_v33, %v647_v41 }
  0xcb   : > { %v1520_v59 = vpop.f32.mrf.mxu2  ;;  %v1325_v51 = vpop.f32.mrf.mxu0 }
  0xcc   : > { %v1865_v56 = vpop.f32.mrf.mxu3  ;;  %v1521_v23 = vadd.f32 %v1520_v59, %v1422_v8  ;;  %v1424_v54 = vpop.f32.mrf.mxu1  ;;  %v802_v8 = vor.u32 %v800_v6, %v645_v7  ;;  %v933_v7 = vunpack.c.h.b16 %v11843_v3 }
  0xcd   : > { %v1425_v16 = vadd.f32 %v1424_v54, %v1325_v51  ;;  %v17584_v54 = vunpack.c.l.b16 %v11883_v15 }
  0xce   : > { %v11870_v45 = vadd.f32 %v1865_v56, %v1521_v23  ;;  %1364 = vmatmul.bf16.gmra.mxu0 %v1086_v60  ;;  %v11877_v56 = vsel %vm516_vm0, %v640_v35, %v650_v31  ;;  %v853_v33 = vsel %vm11560_vm6, %v802_v8, %v11807_v32  ;;  %v934_v23 = vunpack.c.h.b16 %v11849_v10 }
  0xcf   : > { %1463 = vmatmul.bf16.gmra.mxu1 %v1087_v11  ;;  %v11886_v11 = vld [vmem:[%s11389_s17 + $0x70] sm:$0xf]  ;;  %v17585_v35 = vunpack.c.l.b16 %v11877_v56  ;;  %v11896_v51 = vunpack.c.l.b16 %v853_v33  ;;  %v927_v32 = vunpack.c.h.b16 %v11827_v53  ;;  %v17928_v8 = vunpack.c.l.b16 %v11799_v40  ;;  %v11920_v40 = vld [vmem:[%s11389_s17 + $0x78] sm:$0xf] }
  0xd0   : > { %17923 = vst [vmem:[#allocation30_spill] sm:$0xff] %v11870_v45  ;;  %1562 = vmatmul.bf16.gmra.mxu2 %v1088_v19  ;;  %v17583_v19 = vunpack.c.l.b16 %v11886_v11 }
  0xd1   : > { %1907 = vmatmul.bf16.gmra.mxu3 %v11868_v5  ;;  %17925 = vst [vmem:[#allocation32_spill] sm:$0xff] %v11886_v11  ;;  %v1089_v42 = vpack.c.b16 %v17585_v35, %v933_v7  ;;  %v11917_v7 = vunpack.c.l.b16 %v11902_v61 }
  0xd2   : > { %17927 = vst [vmem:[#allocation34_spill] sm:$0xff] %v11896_v51  ;;  %v506_v33 = vpack.c.b16 %v17583_v19, %v17584_v54 }
  0xd3   : > { %v1523_v20 = vpop.f32.mrf.mxu2  ;;  %v1327_v37 = vpop.f32.mrf.mxu0  ;;  %17930 = vst [vmem:[#allocation36_spill] sm:$0xff] %v11917_v7 }
  0xd4   : > { %v1868_v18 = vpop.f32.mrf.mxu3  ;;  %v1524_v9 = vadd.f32 %v1523_v20, %v1425_v16  ;;  %v1426_v59 = vpop.f32.mrf.mxu1  ;;  %v10698_v16 = vld [vmem:[%s17540_s1 + $0xb8] sm:$0xff]  ;;  %v1090_v20 = vpack.c.b16 %v11816_v39, %v17928_v8 }
  0xd5   : > { %v1427_v60 = vadd.f32 %v1426_v59, %v1327_v37  ;;  %2047 = vmatpush.bf16.msrb.mxu1 %v10698_v16  ;;  %v1091_v37 = vpack.c.b16 %v11896_v51, %v934_v23  ;;  %v11910_v59 = vpack.c.b16 %v929_v52, %v927_v32  ;;  %v11923_v8 = vld [vmem:[%s11389_s17 + $0x7c] sm:$0xf]  ;;  %v653_v52 = vshrl.u32 %v506_v33, 16 }
  0xd6   : > { %v11888_v6 = vadd.f32 %v1868_v18, %v1524_v9  ;;  %v17595_v23 = vunpack.c.l.b16 %v11920_v40  ;;  %v17594_v32 = vunpack.c.l.b16 %v11923_v8 }
  0xd7   : > { %17929 = vst [vmem:[#allocation35_spill] sm:$0xff] %v11910_v59 }
  0xd8   : > { %17926 = vst [vmem:[#allocation33_spill] sm:$0xff] %v11888_v6 }
  0xdb   : > { %v1525_v41 = vpop.f32.mrf.mxu2  ;;  %v1330_v53 = vpop.f32.mrf.mxu0 }
  0xdc   : > { %v1870_v31 = vpop.f32.mrf.mxu3  ;;  %v1526_v18 = vadd.f32 %v1525_v41, %v1427_v60  ;;  %v1429_v9 = vpop.f32.mrf.mxu1  ;;  %v656_v41 = vshll.u32 %v506_v33, 16 }
  0xdd   : > { %v1430_v16 = vadd.f32 %v1429_v9, %v1330_v53  ;;  %v507_v53 = vpack.c.b16 %v11917_v7, %v11917_v7  ;;  %v11933_v9 = vld [vmem:[%s11389_s17 + $0x80] sm:$0xf] }
  0xde   : > { %v11925_v60 = vadd.f32 %v1870_v31, %v1526_v18  ;;  %1369 = vmatmul.bf16.gmra.mxu0 %v1089_v42  ;;  %v803_v5 = vrot.slane %v656_v41, 1  ;;  %v11942_v11 = vunpack.c.l.b16 %v11933_v9 }
  0xdf   : > { %1468 = vmatmul.bf16.gmra.mxu1 %v1090_v20  ;;  %v655_v20 = vrot.slane %v653_v52, 7  ;;  %v660_v39 = vshrl.u32 %v507_v53, 16 }
  0xe0   : > { %17931 = vst [vmem:[#allocation37_spill] sm:$0xff] %v11925_v60  ;;  %1567 = vmatmul.bf16.gmra.mxu2 %v1091_v37  ;;  %v11939_v37 = vpack.c.b16 %v17594_v32, %v17595_v23  ;;  %v804_v47 = vor.u32 %v803_v5, %v653_v52 }
  0xe1   : > { %1912 = vmatmul.bf16.gmra.mxu3 %v11910_v59  ;;  %v663_v59 = vshll.u32 %v507_v53, 16  ;;  %17933 = vst [vmem:[#allocation39_spill] sm:$0xff] %v11942_v11  ;;  %v662_v53 = vrot.slane %v660_v39, 7 }
  0xe2   : > { %17932 = vst [vmem:[#allocation38_spill] sm:$0xff] %v11939_v37  ;;  %v668_v10 = vshrl.u32 %v11939_v37, 16 }
  0xe3   : > { %v1528_v19 = vpop.f32.mrf.mxu2  ;;  %v1332_v18 = vpop.f32.mrf.mxu0  ;;  %v805_v32 = vrot.slane %v663_v59, 1 }
  0xe4   : > { %v1873_v54 = vpop.f32.mrf.mxu3  ;;  %v1529_v31 = vadd.f32 %v1528_v19, %v1430_v16  ;;  %v1431_v42 = vpop.f32.mrf.mxu1  ;;  %v10684_v19 = vld [vmem:[%s17540_s1 + $0x48] sm:$0xff]  ;;  %v658_v16 = vor.u32 %v656_v41, %v655_v20  ;;  %v670_v60 = vrot.slane %v668_v10, 7 }
  0xe5   : > { %v1432_v35 = vadd.f32 %v1431_v42, %v1332_v18  ;;  %1954 = vmatpush.bf16.msrb.mxu0 %v10684_v19  ;;  %v671_v18 = vshll.u32 %v11939_v37, 16  ;;  %v509_v42 = vpack.c.b16 %v11942_v11, %v11942_v11  ;;  %v11959_v5 = vsel %vm757_vm3, %v804_v47, %v805_v32 }
  0xe6   : > { %v11944_v51 = vadd.f32 %v1873_v54, %v1529_v31  ;;  %v11956_v41 = vsel %vm11528_vm2, %v11883_v15, %v658_v16  ;;  %17935 = vst [vmem:[#allocation41_spill] sm:$0xff] %v11959_v5  ;;  %v807_v16 = vor.u32 %v805_v32, %v660_v39  ;;  %v10729_v32 = vld [vmem:[%s17540_s1 + $0x1b0] sm:$0xff] }
  0xe7   : > { %v678_v52 = vshll.u32 %v509_v42, 16  ;;  %v808_v37 = vrot.slane %v671_v18, 1  ;;  %2365 = vmatpush.bf16.msrb.mxu2 %v10729_v32 }
  0xe8   : > { %17934 = vst [vmem:[#allocation40_spill] sm:$0xff] %v11944_v51  ;;  %v854_v39 = vsel %vm11560_vm6, %v807_v16, %v11902_v61  ;;  %v675_v61 = vshrl.u32 %v509_v42, 16 }
  0xe9   : > { %v809_v15 = vor.u32 %v808_v37, %v668_v10  ;;  %v810_v45 = vrot.slane %v678_v52, 1 }
  0xeb   : > { %v1530_v23 = vpop.f32.mrf.mxu2  ;;  %v1335_v31 = vpop.f32.mrf.mxu0 }
  0xec   : > { %v1875_v21 = vpop.f32.mrf.mxu3  ;;  %v1531_v54 = vadd.f32 %v1530_v23, %v1432_v35  ;;  %v1434_v51 = vpop.f32.mrf.mxu1  ;;  %v665_v35 = vor.u32 %v663_v59, %v662_v53  ;;  %v673_v23 = vor.u32 %v671_v18, %v670_v60 }
  0xed   : > { %v1435_v19 = vadd.f32 %v1434_v51, %v1335_v31 }
  0xee   : > { %v11961_v6 = vadd.f32 %v1875_v21, %v1531_v54  ;;  %1374 = vmatmul.bf16.gmra.mxu0 %v11956_v41  ;;  %v666_v21 = vsel %vm516_vm0, %v655_v20, %v665_v35  ;;  %v11973_v54 = vsel %vm757_vm3, %v809_v15, %v810_v45  ;;  %v10697_v20 = vld [vmem:[%s17540_s1 + $0xb0] sm:$0xff]  ;;  %v11988_v15 = vunpack.c.l.b16 %v854_v39 }
  0xef   : > { %1473 = vmatmul.bf16.gmra.mxu1 %v506_v33  ;;  %v11970_v33 = vsel %vm11528_vm2, %v11920_v40, %v673_v23  ;;  %17937 = vst [vmem:[#allocation43_spill] sm:$0xff] %v11973_v54  ;;  %v941_v37 = vunpack.c.l.b16 %v666_v21  ;;  %v944_v18 = vunpack.c.l.b16 %v11973_v54  ;;  %v17939_v23 = vunpack.c.l.b16 %v11920_v40 }
  0xf0   : > { %1572 = vmatmul.bf16.gmra.mxu2 %v11959_v5  ;;  %17936 = vst [vmem:[#allocation42_spill] sm:$0xff] %v11970_v33  ;;  %2048 = vmatpush.bf16.msrb.mxu1 %v10697_v20  ;;  %v17940_v39 = vunpack.c.l.b16 %v11877_v56  ;;  %v677_v5 = vrot.slane %v675_v61, 7 }
  0xf1   : > { %1917 = vmatmul.bf16.gmra.mxu3 %v11843_v3  ;;  %17938 = vst [vmem:[#allocation44_spill] sm:$0xff] %v11988_v15  ;;  %v1095_v16 = vpack.c.b16 %v17939_v23, %v11917_v7  ;;  %v1096_v21 = vpack.c.b16 %v944_v18, %v11988_v15 }
  0xf2   : > { %v680_v40 = vor.u32 %v678_v52, %v677_v5  ;;  %v945_v52 = vunpack.c.h.b16 %v11970_v33 }
  0xf3   : > { %v1533_v51 = vpop.f32.mrf.mxu2  ;;  %v1337_v46 = vpop.f32.mrf.mxu0 }
  0xf4   : > { %v1878_v31 = vpop.f32.mrf.mxu3  ;;  %v1534_v47 = vadd.f32 %v1533_v51, %v1435_v19  ;;  %v1436_v1 = vpop.f32.mrf.mxu1 }
  0xf5   : > { %v1437_v59 = vadd.f32 %v1436_v1, %v1337_v46  ;;  %v943_v1 = vunpack.c.l.b16 %v11970_v33  ;;  %v937_v46 = vunpack.c.l.b16 %v11956_v41 }
  0xf6   : > { %v11978_v10 = vadd.f32 %v1878_v31, %v1534_v47 }
  0xf7   : > { %v1094_v35 = vpack.c.b16 %v943_v1, %v941_v37  ;;  %v11997_v3 = vpack.c.b16 %v937_v46, %v17940_v39 }
  0xf9   : > { %17941 = vst [vmem:[#allocation45_spill] sm:$0xff] %v11997_v3 }
  0xfb   : > { %v1535_v53 = vpop.f32.mrf.mxu2  ;;  %v1340_v31 = vpop.f32.mrf.mxu0 }
  0xfc   : > { %v1880_v19 = vpop.f32.mrf.mxu3  ;;  %v1536_v51 = vadd.f32 %v1535_v53, %v1437_v59  ;;  %v1439_v47 = vpop.f32.mrf.mxu1  ;;  %v812_v59 = vor.u32 %v810_v45, %v675_v61  ;;  %v12003_v53 = vsel %vm516_vm0, %v670_v60, %v680_v40  ;;  %v939_v45 = vunpack.c.h.b16 %v11956_v41 }
  0xfd   : > { %v1440_v42 = vadd.f32 %v1439_v47, %v1340_v31  ;;  %v17605_v61 = vunpack.c.l.b16 %v12003_v53  ;;  %v946_v60 = vunpack.c.h.b16 %v11973_v54  ;;  %v12025_v47 = vld [vmem:[%s11389_s17 + $0x8c] sm:$0xf] }
  0xfe   : > { %v11999_v32 = vadd.f32 %v1880_v19, %v1536_v51  ;;  %1379 = vmatmul.bf16.gmra.mxu0 %v1094_v35  ;;  %v855_v19 = vsel %vm11560_vm6, %v812_v59, %v11933_v9  ;;  %v12009_v35 = vld [vmem:[%s11389_s17 + $0x84] sm:$0xf] }
  0xff   : > { %1478 = vmatmul.bf16.gmra.mxu1 %v1095_v16  ;;  %17943 = vst [vmem:[#allocation47_spill] sm:$0xff] %v12009_v35  ;;  %v12012_v16 = vld [vmem:[%s11389_s17 + $0x88] sm:$0xf]  ;;  %v12020_v51 = vunpack.c.l.b16 %v855_v19  ;;  %v17604_v31 = vunpack.c.l.b16 %v12009_v35  ;;  %v1097_v41 = vpack.c.b16 %v17605_v61, %v945_v52  ;;  %v10683_v19 = vld [vmem:[%s17540_s1 + $0x40] sm:$0xff]  ;;  %v12043_v52 = vunpack.c.l.b16 %v12025_v47 }
 0x100   : > { %17942 = vst [vmem:[#allocation46_spill] sm:$0xff] %v11999_v32  ;;  %1577 = vmatmul.bf16.gmra.mxu2 %v1096_v21  ;;  %v17603_v9 = vunpack.c.l.b16 %v12012_v16  ;;  %1955 = vmatpush.bf16.msrb.mxu0 %v10683_v19 }
 0x101   : > { %1922 = vmatmul.bf16.gmra.mxu3 %v11997_v3  ;;  %17944 = vst [vmem:[#allocation48_spill] sm:$0xff] %v12012_v16 }
 0x102   : > { %17946 = vst [vmem:[#allocation50_spill] sm:$0xff] %v12020_v51 }
 0x103   : > { %v1538_v20 = vpop.f32.mrf.mxu2  ;;  %v1342_v56 = vpop.f32.mrf.mxu0 }
 0x104   : > { %v1883_v1 = vpop.f32.mrf.mxu3  ;;  %v1539_v18 = vadd.f32 %v1538_v20, %v1440_v42  ;;  %v1441_v46 = vpop.f32.mrf.mxu1  ;;  %v17947_v42 = vunpack.c.l.b16 %v11923_v8 }
 0x105   : > { %v1442_v23 = vadd.f32 %v1441_v46, %v1342_v56  ;;  %v12033_v56 = vpack.c.b16 %v941_v37, %v939_v45  ;;  %v510_v46 = vpack.c.b16 %v17603_v9, %v17604_v31  ;;  %v12059_v9 = vld [vmem:[%s11389_s17 + $0x98] sm:$0xf] }
 0x106   : > { %v12014_v5 = vadd.f32 %v1883_v1, %v1539_v18  ;;  %v1098_v40 = vpack.c.b16 %v11942_v11, %v17947_v42  ;;  %v1099_v18 = vpack.c.b16 %v12020_v51, %v946_v60  ;;  %v12070_v16 = vunpack.c.l.b16 %v12059_v9 }
 0x107   : > { %17948 = vst [vmem:[#allocation51_spill] sm:$0xff] %v12033_v56  ;;  %v683_v45 = vshrl.u32 %v510_v46, 16 }
 0x108   : > { %17945 = vst [vmem:[#allocation49_spill] sm:$0xff] %v12014_v5 }
 0x109   : > { %17952 = vst [vmem:[#allocation55_spill] sm:$0xff] %v12070_v16 }
 0x10b   : > { %v1540_v21 = vpop.f32.mrf.mxu2  ;;  %v1345_v20 = vpop.f32.mrf.mxu0 }
 0x10c   : > { %v1885_v39 = vpop.f32.mrf.mxu3  ;;  %v1541_v59 = vadd.f32 %v1540_v21, %v1442_v23  ;;  %v1444_v1 = vpop.f32.mrf.mxu1  ;;  %v12046_v23 = vld [vmem:[%s11389_s17 + $0x90] sm:$0xf]  ;;  %v12049_v21 = vld [vmem:[%s11389_s17 + $0x94] sm:$0xf] }
 0x10d   : > { %v1445_v8 = vadd.f32 %v1444_v1, %v1345_v20  ;;  %v17614_v60 = vunpack.c.l.b16 %v12046_v23  ;;  %v17613_v42 = vunpack.c.l.b16 %v12049_v21  ;;  %v686_v20 = vshll.u32 %v510_v46, 16 }
 0x10e   : > { %v12051_v37 = vadd.f32 %v1885_v39, %v1541_v59  ;;  %1384 = vmatmul.bf16.gmra.mxu0 %v1097_v41  ;;  %v511_v1 = vpack.c.b16 %v12043_v52, %v12043_v52 }
 0x10f   : > { %1483 = vmatmul.bf16.gmra.mxu1 %v1098_v40  ;;  %v685_v40 = vrot.slane %v683_v45, 7  ;;  %v813_v3 = vrot.slane %v686_v20, 1 }
 0x110   : > { %17949 = vst [vmem:[#allocation52_spill] sm:$0xff] %v12051_v37  ;;  %1582 = vmatmul.bf16.gmra.mxu2 %v1099_v18  ;;  %v12065_v18 = vpack.c.b16 %v17613_v42, %v17614_v60  ;;  %v690_v11 = vshrl.u32 %v511_v1, 16 }
 0x111   : > { %1927 = vmatmul.bf16.gmra.mxu3 %v12033_v56  ;;  %v693_v56 = vshll.u32 %v511_v1, 16  ;;  %v814_v42 = vor.u32 %v813_v3, %v683_v45 }
 0x112   : > { %17950 = vst [vmem:[#allocation53_spill] sm:$0xff] %v12065_v18  ;;  %v698_v54 = vshrl.u32 %v12065_v18, 16  ;;  %v692_v45 = vrot.slane %v690_v11, 7 }
 0x113   : > { %v1543_v31 = vpop.f32.mrf.mxu2  ;;  %v1347_v19 = vpop.f32.mrf.mxu0  ;;  %v815_v60 = vrot.slane %v693_v56, 1 }
 0x114   : > { %v1888_v39 = vpop.f32.mrf.mxu3  ;;  %v1544_v59 = vadd.f32 %v1543_v31, %v1445_v8  ;;  %v1446_v41 = vpop.f32.mrf.mxu1  ;;  %v10728_v31 = vld [vmem:[%s17540_s1 + $0x1a8] sm:$0xff]  ;;  %v688_v8 = vor.u32 %v686_v20, %v685_v40 }
 0x115   : > { %v12067_v61 = vadd.f32 %v1446_v41, %v1347_v19  ;;  %2366 = vmatpush.bf16.msrb.mxu2 %v10728_v31  ;;  %v701_v19 = vshll.u32 %v12065_v18, 16  ;;  %v12081_v41 = vpack.c.b16 %v12070_v16, %v12070_v16  ;;  %v12095_v31 = vrot.slane %v698_v54, 7 }
 0x116   : > { %v12072_v51 = vadd.f32 %v1888_v39, %v1544_v59  ;;  %v10696_v39 = vld [vmem:[%s17540_s1 + $0xa8] sm:$0xff]  ;;  %v12093_v3 = vsel %vm11528_vm2, %v12009_v35, %v688_v8  ;;  %v10694_v35 = vld [vmem:[%s17540_s1 + $0x98] sm:$0xff] }
 0x117   : > { %17951 = vst [vmem:[#allocation54_spill] sm:$0xff] %v12067_v61  ;;  %2049 = vmatpush.bf16.msrb.mxu1 %v10696_v39  ;;  %v708_v15 = vshll.u32 %v12081_v41, 16  ;;  %v10695_v39 = vld [vmem:[%s17540_s1 + $0xa0] sm:$0xff]  ;;  %v703_v8 = vor.u32 %v701_v19, %v12095_v31 }
 0x118   : > { %17953 = vst [vmem:[#allocation56_spill] sm:$0xff] %v12072_v51  ;;  %v12098_v51 = vsel %vm757_vm3, %v814_v42, %v815_v60 }
 0x11b   : > { %v12086_v59 = vpop.f32.mrf.mxu2  ;;  %v1350_v20 = vpop.f32.mrf.mxu0  ;;  %2050 = vmatpush.bf16.msrb.mxu1 %v10695_v39 }
 0x11c   : > { %17954 = vst [vmem:[#allocation57_spill] sm:$0xff] %v12086_v59  ;;  %v12088_v61 = vpop.f32.mrf.mxu3  ;;  %v1449_v1 = vpop.f32.mrf.mxu1  ;;  %v818_v59 = vrot.slane %v701_v19, 1  ;;  %v949_v19 = vunpack.c.l.b16 %v12093_v3 }
 0x11d   : > { %17955 = vst [vmem:[#allocation58_spill] sm:$0xff] %v12088_v61  ;;  %v1450_v18 = vadd.f32 %v1449_v1, %v1350_v20  ;;  %v695_v61 = vor.u32 %v693_v56, %v692_v45  ;;  %v817_v20 = vor.u32 %v815_v60, %v690_v11  ;;  %v820_v1 = vrot.slane %v708_v15, 1 }
 0x11e   : > { %1389 = vmatmul.bf16.gmra.mxu0 %v12093_v3  ;;  %v819_v42 = vor.u32 %v818_v59, %v698_v54  ;;  %v12115_v45 = vsel %vm11528_vm2, %v12046_v23, %v703_v8 }
 0x11f   : > { %1488 = vmatmul.bf16.gmra.mxu1 %v510_v46  ;;  %v696_v56 = vsel %vm516_vm0, %v685_v40, %v695_v61  ;;  %17956 = vst [vmem:[#allocation59_spill] sm:$0xff] %v12115_v45  ;;  %v856_v60 = vsel %vm11560_vm6, %v817_v20, %v12025_v47  ;;  %v10738_v40 = vld [vmem:[%s17540_s1 + $0x1f8] sm:$0xff]  ;;  %v17958_v20 = vunpack.c.l.b16 %v12046_v23 }
 0x120   : > { %1587 = vmatmul.bf16.gmra.mxu2 %v12098_v51  ;;  %v12120_v54 = vsel %vm757_vm3, %v819_v42, %v820_v1  ;;  %2051 = vmatpush.bf16.msrb.mxu1 %v10694_v35  ;;  %v12135_v59 = vunpack.c.l.b16 %v856_v60  ;;  %v705_v35 = vshrl.u32 %v12081_v41, 16  ;;  %v17959_v41 = vunpack.c.l.b16 %v12003_v53  ;;  %v10746_v23 = vld [vmem:[%s17540_s1 + $0x238] sm:$0xff] }
 0x121   : > { %1932 = vmatmul.bf16.gmra.mxu3 %v11970_v33  ;;  %17957 = vst [vmem:[#allocation60_spill] sm:$0xff] %v12120_v54  ;;  %v1006_v47 = vunpack.c.l.b16 %v12120_v54  ;;  %v1103_v42 = vpack.c.b16 %v17958_v20, %v12043_v52  ;;  %v10691_v33 = vld [vmem:[%s17540_s1 + $0x80] sm:$0xff]  ;;  %2562 = vmatpush.bf16.msra.mxu0 %v10746_v23 }
 0x122   : > { %2463 = vmatpush.bf16.msrb.mxu3 %v10738_v40  ;;  %v707_v40 = vrot.slane %v705_v35, 7  ;;  %v822_v53 = vor.u32 %v820_v1, %v705_v35  ;;  %v1008_v1 = vunpack.c.h.b16 %v12120_v54  ;;  %v11210_v54 = vld [vmem:[%s11389_s17 + $0x8] sm:$0xf] }
 0x123   : > { %v1548_v7 = vpop.f32.mrf.mxu2  ;;  %v1352_v32 = vpop.f32.mrf.mxu0  ;;  %v1104_v60 = vpack.c.b16 %v1006_v47, %v12135_v59 }
 0x124   : > { %v1893_v37 = vpop.f32.mrf.mxu3  ;;  %v1549_v5 = vadd.f32 %v1548_v7, %v1450_v18  ;;  %v1451_v46 = vpop.f32.mrf.mxu1  ;;  %v10693_v7 = vld [vmem:[%s17540_s1 + $0x90] sm:$0xff]  ;;  %v1005_v18 = vunpack.c.l.b16 %v12115_v45 }
 0x125   : > { %v12117_v11 = vadd.f32 %v1451_v46, %v1352_v32  ;;  %v953_v32 = vunpack.c.l.b16 %v696_v56  ;;  %2052 = vmatpush.bf16.msrb.mxu1 %v10693_v7  ;;  %v12152_v7 = vpack.c.b16 %v949_v19, %v17959_v41 }
 0x126   : > { %v12128_v61 = vadd.f32 %v1893_v37, %v1549_v5  ;;  %v10692_v5 = vld [vmem:[%s17540_s1 + $0x88] sm:$0xff] }
 0x127   : > { %v1102_v8 = vpack.c.b16 %v1005_v18, %v953_v32  ;;  %17960 = vst [vmem:[#allocation61_spill] sm:$0xff] %v12152_v7  ;;  %v710_v18 = vor.u32 %v708_v15, %v707_v40 }
 0x129   : > { %2053 = vmatpush.bf16.msrb.mxu1 %v10692_v5 }
 0x12b   : > { %v12142_v37 = vpop.f32.mrf.mxu2  ;;  %v1355_v46 = vpop.f32.mrf.mxu0 }
 0x12c   : > { %v12144_v39 = vpop.f32.mrf.mxu3  ;;  %v1454_v56 = vpop.f32.mrf.mxu1 }
 0x12d   : > { %v1455_v0 = vadd.f32 %v1454_v56, %v1355_v46  ;;  %2054 = vmatpush.bf16.msrb.mxu1 %v10691_v33  ;;  %v857_v56 = vsel %vm11560_vm6, %v822_v53, %v12059_v9  ;;  %v1007_v33 = vunpack.c.h.b16 %v12115_v45  ;;  %v17963_v9 = vunpack.c.l.b16 %v12049_v21 }
 0x12e   : > { %1394 = vmatmul.bf16.gmra.mxu0 %v1102_v8  ;;  %v12163_v8 = vsel %vm516_vm0, %v12095_v31, %v710_v18  ;;  %v12176_v35 = vunpack.c.l.b16 %v857_v56 }
 0x12f   : > { %1493 = vmatmul.bf16.gmra.mxu1 %v1103_v42  ;;  %17961 = vst [vmem:[#allocation62_spill] sm:$0xff] %v12163_v8  ;;  %v17622_v15 = vunpack.c.l.b16 %v12163_v8  ;;  %v1106_v23 = vpack.c.b16 %v12070_v16, %v17963_v9 }
 0x130   : > { %1592 = vmatmul.bf16.gmra.mxu2 %v1104_v60  ;;  %17962 = vst [vmem:[#allocation63_spill] sm:$0xff] %v12176_v35 }
 0x131   : > { %1937 = vmatmul.bf16.gmra.mxu3 %v12152_v7  ;;  %v1105_v40 = vpack.c.b16 %v17622_v15, %v1007_v33 }
 0x133   : > { %v1553_v19 = vpop.f32.mrf.mxu2  ;;  %v1357_v20 = vpop.f32.mrf.mxu0 }
 0x134   : > { %v1898_v47 = vpop.f32.mrf.mxu3  ;;  %v1554_v5 = vadd.f32 %v1553_v19, %v1455_v0  ;;  %v1456_v46 = vpop.f32.mrf.mxu1  ;;  %v951_v0 = vunpack.c.h.b16 %v12093_v3  ;;  %v1107_v19 = vpack.c.b16 %v12176_v35, %v1008_v1 }
 0x135   : > { %v12165_v42 = vadd.f32 %v1456_v46, %v1357_v20  ;;  %v17965_v46 = vshll.u32 %v11427_v25, 16 }
 0x136   : > { %v12170_v60 = vadd.f32 %v1898_v47, %v1554_v5  ;;  %v12188_v3 = vpack.c.b16 %v953_v32, %v951_v0  ;;  %v10727_v5 = vld [vmem:[%s17540_s1 + $0x1a0] sm:$0xff] }
 0x137   : > { %2367 = vmatpush.bf16.msrb.mxu2 %v10727_v5  ;;  %v758_v56 = vrot.slane %v17965_v46, 1 }
 0x138   : > { %17964 = vst [vmem:[#allocation64_spill] sm:$0xff] %v12188_v3 }
 0x13b   : > { %v12178_v31 = vpop.f32.mrf.mxu2  ;;  %v1360_v18 = vpop.f32.mrf.mxu0 }
 0x13c   : > { %v12180_v41 = vpop.f32.mrf.mxu3  ;;  %v1459_v53 = vpop.f32.mrf.mxu1 }
 0x13d   : > { %v1460_v47 = vadd.f32 %v1459_v53, %v1360_v18  ;;  %v17967_v18 = vshll.u32 %v11503_v55, 16 }
 0x13e   : > { %1399 = vmatmul.bf16.gmra.mxu0 %v1105_v40  ;;  %v17966_v40 = vshrl.u32 %v11427_v25, 16  ;;  %v11209_v25 = vld [vmem:[%s11389_s17] sm:$0xff] }
 0x13f   : > { %1498 = vmatmul.bf16.gmra.mxu1 %v1106_v23  ;;  %v760_v53 = vrot.slane %v17967_v18, 1 }
 0x140   : > { %1597 = vmatmul.bf16.gmra.mxu2 %v1107_v19  ;;  %v759_v23 = vor.u32 %v758_v56, %v17966_v40  ;;  %v17968_v56 = vshrl.u32 %v11503_v55, 16  ;;  %v890_v55 = vunpack.c.l.b16 %v11547_v12 }
 0x141   : > { %1942 = vmatmul.bf16.gmra.mxu3 %v12188_v3 }
 0x143   : > { %v1558_v21 = vpop.f32.mrf.mxu2  ;;  %v1362_v32 = vpop.f32.mrf.mxu0 }
 0x144   : > { %v1903_v20 = vpop.f32.mrf.mxu3  ;;  %v1559_v33 = vadd.f32 %v1558_v21, %v1460_v47  ;;  %v1461_v0 = vpop.f32.mrf.mxu1  ;;  %v761_v47 = vsel %vm757_vm3, %v759_v23, %v760_v53  ;;  %v10737_v21 = vld [vmem:[%s17540_s1 + $0x1f0] sm:$0xff] }
 0x145   : > { %v12196_v1 = vadd.f32 %v1461_v0, %v1362_v32  ;;  %2464 = vmatpush.bf16.msrb.mxu3 %v10737_v21 }
 0x146   : > { %v12198_v9 = vadd.f32 %v1903_v20, %v1559_v33  ;;  %v762_v33 = vor.u32 %v760_v53, %v17968_v56 }
 0x148   : > { %v845_v23 = vsel %vm11560_vm6, %v762_v33, %v11210_v54 }
 0x149   : > { %v888_v53 = vunpack.c.l.b16 %v845_v23 }
 0x14b   : > { %v12204_v19 = vpop.f32.mrf.mxu2  ;;  %v1365_v46 = vpop.f32.mrf.mxu0  ;;  %v1607_v56 = vpack.c.b16 %v890_v55, %v888_v53 }
 0x14c   : > { %v12206_v5 = vpop.f32.mrf.mxu3  ;;  %v1464_v15 = vpop.f32.mrf.mxu1 }
 0x14d   : > { %v1465_v20 = vadd.f32 %v1464_v15, %v1365_v46  ;;  %v10745_v15 = vld [vmem:[%s17540_s1 + $0x230] sm:$0xff] }
 0x14e   : > { %1956 = vmatmul.bf16.vlgmr.msrb.gmra.mxu0 %v11209_v25  ;;  %v17969_v25 = vunpack.c.l.b16 %v11398_v14 }
 0x14f   : > { %2055 = vmatmul.bf16.vlgmr.msrb.gmra.mxu1 %v761_v47  ;;  %2563 = vmatpush.bf16.msra.mxu0 %v10745_v15 }
 0x150   : > { %v1606_v54 = vpack.c.b16 %v17969_v25, %v11470_v43  ;;  %v892_v43 = vunpack.c.h.b16 %v11547_v12  ;;  %v17970_v25 = vunpack.c.l.b16 %v11407_v17 }
 0x153   : > { %v1563_v32 = vpop.f32.mrf.mxu2  ;;  %v1367_v18 = vpop.f32.mrf.mxu0 }
 0x154   : > { %v1908_v0 = vpop.f32.mrf.mxu3  ;;  %v1564_v40 = vadd.f32 %v1563_v32, %v1465_v20  ;;  %v1466_v35 = vpop.f32.mrf.mxu1 }
 0x155   : > { %v12221_v46 = vadd.f32 %v1466_v35, %v1367_v18  ;;  %v10726_v35 = vld [vmem:[%s17540_s1 + $0x198] sm:$0xff] }
 0x156   : > { %v12223_v21 = vadd.f32 %v1908_v0, %v1564_v40  ;;  %2368 = vmatpush.bf16.msrb.mxu2 %v10726_v35  ;;  %v10736_v35 = vld [vmem:[%s17540_s1 + $0x1e8] sm:$0xff] }
 0x157   : > { %2465 = vmatpush.bf16.msrb.mxu3 %v10736_v35 }
 0x15b   : > { %v12226_v47 = vpop.f32.mrf.mxu2  ;;  %v1370_v33 = vpop.f32.mrf.mxu0 }
 0x15c   : > { %v12228_v20 = vpop.f32.mrf.mxu3  ;;  %v1469_v32 = vpop.f32.mrf.mxu1 }
 0x15d   : > { %v1470_v36 = vadd.f32 %v1469_v32, %v1370_v33 }
 0x15e   : > { %1961 = vmatmul.bf16.gmra.mxu0 %v1606_v54  ;;  %v1609_v54 = vpack.c.b16 %v11442_v29, %v17970_v25 }
 0x15f   : > { %2060 = vmatmul.bf16.gmra.mxu1 %v1607_v56  ;;  %v1610_v56 = vpack.c.b16 %v11581_v50, %v892_v43  ;;  %v10744_v50 = vld [vmem:[%s17540_s1 + $0x228] sm:$0xff] }
 0x160   : > { %2564 = vmatpush.bf16.msra.mxu0 %v10744_v50 }
 0x163   : > { %v1568_v0 = vpop.f32.mrf.mxu2  ;;  %v1372_v23 = vpop.f32.mrf.mxu0 }
 0x164   : > { %v1913_v40 = vpop.f32.mrf.mxu3  ;;  %v1569_v18 = vadd.f32 %v1568_v0, %v1470_v36  ;;  %v1471_v15 = vpop.f32.mrf.mxu1 }
 0x165   : > { %v12236_v16 = vadd.f32 %v1471_v15, %v1372_v23 }
 0x166   : > { %v12238_v14 = vadd.f32 %v1913_v40, %v1569_v18 }
 0x16b   : > { %v12241_v55 = vpop.f32.mrf.mxu2  ;;  %v1375_v33 = vpop.f32.mrf.mxu0 }
 0x16c   : > { %v12243_v53 = vpop.f32.mrf.mxu3  ;;  %v1474_v36 = vpop.f32.mrf.mxu1 }
 0x16d   : > { %v1475_v32 = vadd.f32 %v1474_v36, %v1375_v33 }
 0x16e   : > { %1966 = vmatmul.bf16.gmra.mxu0 %v1609_v54 }
 0x16f   : > { %2065 = vmatmul.bf16.gmra.mxu1 %v1610_v56 }
 0x173   : > { %v1573_v12 = vpop.f32.mrf.mxu2  ;;  %v1377_v18 = vpop.f32.mrf.mxu0 }
 0x174   : > { %v1918_v0 = vpop.f32.mrf.mxu3  ;;  %v1574_v40 = vadd.f32 %v1573_v12, %v1475_v32  ;;  %v1476_v23 = vpop.f32.mrf.mxu1 }
 0x175   : > { %v12252_v17 = vadd.f32 %v1476_v23, %v1377_v18  ;;  %v10725_v18 = vld [vmem:[%s17540_s1 + $0x190] sm:$0xff]  ;;  %v902_v23 = vunpack.c.l.b16 %v11647_v58 }
 0x176   : > { %v12254_v29 = vadd.f32 %v1918_v0, %v1574_v40  ;;  %2369 = vmatpush.bf16.msrb.mxu2 %v10725_v18 }
 0x17b   : > { %v12259_v15 = vpop.f32.mrf.mxu2  ;;  %v1380_v25 = vpop.f32.mrf.mxu0 }
 0x17c   : > { %v12261_v43 = vpop.f32.mrf.mxu3  ;;  %v1479_v54 = vpop.f32.mrf.mxu1 }
 0x17d   : > { %v1480_v56 = vadd.f32 %v1479_v54, %v1380_v25  ;;  %v17971_v54 = vunpack.c.l.b16 %v11596_v27 }
 0x17e   : > { %1971 = vmatmul.bf16.gmra.mxu0 %v11488_v48 }
 0x17f   : > { %2070 = vmatmul.bf16.gmra.mxu1 %v11572_v38 }
 0x183   : > { %v1578_v33 = vpop.f32.mrf.mxu2  ;;  %v1382_v35 = vpop.f32.mrf.mxu0 }
 0x184   : > { %v1923_v36 = vpop.f32.mrf.mxu3  ;;  %v1579_v32 = vadd.f32 %v1578_v33, %v1480_v56  ;;  %v1481_v12 = vpop.f32.mrf.mxu1  ;;  %v12280_v56 = vpack.c.b16 %v17971_v54, %v11491_v49  ;;  %v12283_v33 = vpack.c.b16 %v902_v23, %v11604_v2  ;;  %v10735_v49 = vld [vmem:[%s17540_s1 + $0x1e0] sm:$0xff]  ;;  %v904_v23 = vunpack.c.h.b16 %v11647_v58 }
 0x185   : > { %v12265_v0 = vadd.f32 %v1481_v12, %v1382_v35  ;;  %2466 = vmatpush.bf16.msrb.mxu3 %v10735_v49 }
 0x186   : > { %v12267_v40 = vadd.f32 %v1923_v36, %v1579_v32 }
 0x18b   : > { %v12273_v50 = vpop.f32.mrf.mxu2  ;;  %v1385_v36 = vpop.f32.mrf.mxu0 }
 0x18c   : > { %v12275_v25 = vpop.f32.mrf.mxu3  ;;  %v1484_v32 = vpop.f32.mrf.mxu1 }
 0x18d   : > { %v1485_v35 = vadd.f32 %v1484_v32, %v1385_v36  ;;  %v17974_v32 = vunpack.c.l.b16 %v11599_v34 }
 0x18e   : > { %1976 = vmatmul.bf16.gmra.mxu0 %v12280_v56 }
 0x18f   : > { %2075 = vmatmul.bf16.gmra.mxu1 %v12283_v33 }
 0x193   : > { %v1583_v12 = vpop.f32.mrf.mxu2  ;;  %v1387_v45 = vpop.f32.mrf.mxu0 }
 0x194   : > { %v1928_v18 = vpop.f32.mrf.mxu3  ;;  %v1584_v8 = vadd.f32 %v1583_v12, %v1485_v35  ;;  %v1486_v3 = vpop.f32.mrf.mxu1  ;;  %v12302_v35 = vpack.c.b16 %v11620_v13, %v17974_v32  ;;  %v12305_v12 = vpack.c.b16 %v11662_v30, %v904_v23  ;;  %v10724_v23 = vld [vmem:[%s17540_s1 + $0x188] sm:$0xff] }
 0x195   : > { %v12290_v27 = vadd.f32 %v1486_v3, %v1387_v45  ;;  %2370 = vmatpush.bf16.msrb.mxu2 %v10724_v23  ;;  %v914_v23 = vunpack.c.l.b16 %v11731_v4 }
 0x196   : > { %v12292_v2 = vadd.f32 %v1928_v18, %v1584_v8  ;;  %v10743_v8 = vld [vmem:[%s17540_s1 + $0x220] sm:$0xff] }
 0x197   : > { %2565 = vmatpush.bf16.msra.mxu0 %v10743_v8 }
 0x19b   : > { %v12295_v54 = vpop.f32.mrf.mxu2  ;;  %v1390_v7 = vpop.f32.mrf.mxu0 }
 0x19c   : > { %17972 = vst [vmem:[#allocation65_spill] sm:$0xff] %v12295_v54  ;;  %v12297_v36 = vpop.f32.mrf.mxu3  ;;  %v1489_v45 = vpop.f32.mrf.mxu1 }
 0x19d   : > { %17973 = vst [vmem:[#allocation66_spill] sm:$0xff] %v12297_v36  ;;  %v1490_v3 = vadd.f32 %v1489_v45, %v1390_v7 }
 0x19e   : > { %1981 = vmatmul.bf16.gmra.mxu0 %v12302_v35 }
 0x19f   : > { %2080 = vmatmul.bf16.gmra.mxu1 %v12305_v12 }
 0x1a3   : > { %v1588_v58 = vpop.f32.mrf.mxu2  ;;  %v1392_v13 = vpop.f32.mrf.mxu0 }
 0x1a4   : > { %v1933_v34 = vpop.f32.mrf.mxu3  ;;  %v1589_v18 = vadd.f32 %v1588_v58, %v1490_v3  ;;  %v1491_v49 = vpop.f32.mrf.mxu1 }
 0x1a5   : > { %v12312_v32 = vadd.f32 %v1491_v49, %v1392_v13 }
 0x1a6   : > { %v12314_v30 = vadd.f32 %v1933_v34, %v1589_v18 }
 0x1a7   : > { %17975 = vst [vmem:[#allocation67_spill] sm:$0xff] %v12312_v32 }
 0x1a8   : > { %17976 = vst [vmem:[#allocation68_spill] sm:$0xff] %v12314_v30  ;;  %v17988_v30 = vld [vmem:[#allocation22_spill] sm:$0xff] }
 0x1ab   : > { %v12319_v7 = vpop.f32.mrf.mxu2  ;;  %v1395_v8 = vpop.f32.mrf.mxu0 }
 0x1ac   : > { %17977 = vst [vmem:[#allocation69_spill] sm:$0xff] %v12319_v7  ;;  %v12321_v45 = vpop.f32.mrf.mxu3  ;;  %v1494_v36 = vpop.f32.mrf.mxu1 }
 0x1ad   : > { %17978 = vst [vmem:[#allocation70_spill] sm:$0xff] %v12321_v45  ;;  %v1495_v54 = vadd.f32 %v1494_v36, %v1395_v8  ;;  %v10734_v45 = vld [vmem:[%s17540_s1 + $0x1d8] sm:$0xff] }
 0x1ae   : > { %1986 = vmatmul.bf16.gmra.mxu0 %v11635_v26  ;;  %2467 = vmatpush.bf16.msrb.mxu3 %v10734_v45  ;;  %v10742_v45 = vld [vmem:[%s17540_s1 + $0x218] sm:$0xff] }
 0x1af   : > { %2085 = vmatmul.bf16.gmra.mxu1 %v11657_v28  ;;  %2566 = vmatpush.bf16.msra.mxu0 %v10742_v45 }
 0x1b3   : > { %v1593_v3 = vpop.f32.mrf.mxu2  ;;  %v1397_v18 = vpop.f32.mrf.mxu0 }
 0x1b4   : > { %v1938_v58 = vpop.f32.mrf.mxu3  ;;  %v1594_v34 = vadd.f32 %v1593_v3, %v1495_v54  ;;  %v1496_v13 = vpop.f32.mrf.mxu1  ;;  %v17983_v54 = vunpack.c.l.b16 %v11681_v63 }
 0x1b5   : > { %v12325_v49 = vadd.f32 %v1496_v13, %v1397_v18  ;;  %v12343_v18 = vpack.c.b16 %v914_v23, %v11689_v62  ;;  %v916_v23 = vunpack.c.h.b16 %v11731_v4  ;;  %v17990_v4 = vld [vmem:[#allocation6_spill] sm:$0xff] }
 0x1b6   : > { %v12327_v32 = vadd.f32 %v1938_v58, %v1594_v34  ;;  %v12340_v3 = vpack.c.b16 %v17983_v54, %v11637_v44 }
 0x1b7   : > { %17979 = vst [vmem:[#allocation71_spill] sm:$0xff] %v12325_v49 }
 0x1b8   : > { %17980 = vst [vmem:[#allocation72_spill] sm:$0xff] %v12327_v32  ;;  %v12361_v32 = vpack.c.b16 %v11746_v57, %v916_v23  ;;  %v17991_v57 = vld [vmem:[#allocation24_spill] sm:$0xff]  ;;  %v17993_v23 = vld [vmem:[#allocation27_spill] sm:$0xff] }
 0x1ba   : > { %17987 = vst [vmem:[#allocation77_spill] sm:$0xff] %v12361_v32 }
 0x1bb   : > { %v12333_v36 = vpop.f32.mrf.mxu2  ;;  %v1400_v58 = vpop.f32.mrf.mxu0 }
 0x1bc   : > { %17981 = vst [vmem:[#allocation73_spill] sm:$0xff] %v12333_v36  ;;  %v12335_v8 = vpop.f32.mrf.mxu3  ;;  %v1499_v34 = vpop.f32.mrf.mxu1 }
 0x1bd   : > { %17982 = vst [vmem:[#allocation74_spill] sm:$0xff] %v12335_v8  ;;  %v1500_v13 = vadd.f32 %v1499_v34, %v1400_v58  ;;  %v17986_v58 = vunpack.c.l.b16 %v11684_v22 }
 0x1be   : > { %1991 = vmatmul.bf16.gmra.mxu0 %v12340_v3 }
 0x1bf   : > { %2090 = vmatmul.bf16.gmra.mxu1 %v12343_v18  ;;  %v12358_v34 = vpack.c.b16 %v11706_v24, %v17986_v58 }
 0x1c3   : > { %v1598_v8 = vpop.f32.mrf.mxu2  ;;  %v1402_v44 = vpop.f32.mrf.mxu0 }
 0x1c4   : > { %v1943_v36 = vpop.f32.mrf.mxu3  ;;  %v1599_v63 = vadd.f32 %v1598_v8, %v1500_v13  ;;  %v1501_v54 = vpop.f32.mrf.mxu1  ;;  %v10723_v13 = vld [vmem:[%s17540_s1 + $0x180] sm:$0xff] }
 0x1c5   : > { %v12350_v49 = vadd.f32 %v1501_v54, %v1402_v44  ;;  %2371 = vmatpush.bf16.msrb.mxu2 %v10723_v13  ;;  %v17996_v13 = vld [vmem:[#allocation13_spill] sm:$0xff] }
 0x1c6   : > { %v12352_v62 = vadd.f32 %v1943_v36, %v1599_v63 }
 0x1c7   : > { %17984 = vst [vmem:[#allocation75_spill] sm:$0xff] %v12350_v49 }
 0x1c8   : > { %17985 = vst [vmem:[#allocation76_spill] sm:$0xff] %v12352_v62  ;;  %2372 = vmatmul.bf16.vlgmr.msrb.gmra.mxu2 %v17990_v4  ;;  %v10732_v4 = vld [vmem:[%s17540_s1 + $0x1c8] sm:$0xff]  ;;  %v18006_v62 = vld [vmem:[#allocation33_spill] sm:$0xff] }
 0x1cb   : > { %v1957_v45 = vpop.f32.mrf.mxu0 }
 0x1cc   : > { %v2056_v7 = vpop.f32.mrf.mxu1  ;;  %v1958_v8 = vadd.f32 %v1957_v45, %v17988_v30  ;;  %v10733_v30 = vld [vmem:[%s17540_s1 + $0x1d0] sm:$0xff] }
 0x1cd   : > { %2468 = vmatpush.bf16.msrb.mxu3 %v10733_v30  ;;  %v17998_v30 = vld [vmem:[#allocation30_spill] sm:$0xff] }
 0x1ce   : > { %v12367_v36 = vadd.f32 %v2056_v7, %v1958_v8  ;;  %1996 = vmatmul.bf16.gmra.mxu0 %v12358_v34  ;;  %v17995_v8 = vld [vmem:[#allocation10_spill] sm:$0xff] }
 0x1cf   : > { %2095 = vmatmul.bf16.gmra.mxu1 %v12361_v32 }
 0x1d0   : > { %17989 = vst [vmem:[#allocation22_spill] sm:$0xff] %v12367_v36 }
 0x1d1   : > { %2469 = vmatpush.bf16.msrb.mxu3 %v10732_v4  ;;  %v18002_v4 = vld [vmem:[#allocation15_spill] sm:$0xff] }
 0x1d3   : > { %v1959_v22 = vpop.f32.mrf.mxu0 }
 0x1d4   : > { %v2058_v24 = vpop.f32.mrf.mxu1  ;;  %v1960_v63 = vadd.f32 %v1959_v22, %v17991_v57  ;;  %v10741_v22 = vld [vmem:[%s17540_s1 + $0x210] sm:$0xff] }
 0x1d5   : > { %2567 = vmatpush.bf16.msra.mxu0 %v10741_v22  ;;  %v18003_v22 = vunpack.c.l.b16 %v18002_v4 }
 0x1d6   : > { %v12373_v44 = vadd.f32 %v2058_v24, %v1960_v63  ;;  %v17997_v24 = vld [vmem:[#allocation8_spill] sm:$0xff] }
 0x1d8   : > { %17992 = vst [vmem:[#allocation6_spill] sm:$0xff] %v12373_v44  ;;  %2377 = vmatmul.bf16.gmra.mxu2 %v17997_v24  ;;  %v18001_v44 = vld [vmem:[#allocation11_spill] sm:$0xff]  ;;  %v18004_v24 = vld [vmem:[#allocation17_spill] sm:$0xff] }
 0x1d9   : > { %v12401_v36 = vpack.c.b16 %v18003_v22, %v18001_v44  ;;  %v18008_v44 = vld [vmem:[#allocation9_spill] sm:$0xff]  ;;  %v18011_v22 = vld [vmem:[#allocation16_spill] sm:$0xff] }
 0x1db   : > { %v1962_v7 = vpop.f32.mrf.mxu0 }
 0x1dc   : > { %v2061_v54 = vpop.f32.mrf.mxu1  ;;  %v1963_v58 = vadd.f32 %v1962_v7, %v17993_v23  ;;  %v17999_v23 = vld [vmem:[#allocation23_spill] sm:$0xff] }
 0x1de   : > { %v12379_v45 = vadd.f32 %v2061_v54, %v1963_v58  ;;  %2001 = vmatmul.bf16.gmra.mxu0 %v17995_v8  ;;  %v10731_v54 = vld [vmem:[%s17540_s1 + $0x1c0] sm:$0xff]  ;;  %v926_v58 = vunpack.c.l.b16 %v17999_v23 }
 0x1df   : > { %2100 = vmatmul.bf16.gmra.mxu1 %v17996_v13  ;;  %2470 = vmatpush.bf16.msrb.mxu3 %v10731_v54  ;;  %v18009_v54 = vld [vmem:[#allocation37_spill] sm:$0xff] }
 0x1e0   : > { %17994 = vst [vmem:[#allocation24_spill] sm:$0xff] %v12379_v45  ;;  %v12404_v49 = vpack.c.b16 %v926_v58, %v18004_v24  ;;  %v18012_v24 = vunpack.c.l.b16 %v18011_v22 }
 0x1e2   : > { %2471 = vmatmul.bf16.vlgmr.msrb.gmra.mxu3 %v11488_v48  ;;  %18005 = vst [vmem:[#allocation10_spill] sm:$0xff] %v12404_v49  ;;  %v10787_v48 = vld [vmem:[%s17542_s3 + $0x138] sm:$0xff] }
 0x1e3   : > { %v1964_v57 = vpop.f32.mrf.mxu0  ;;  %3894 = vmatpush.bf16.msra.mxu2 %v10787_v48  ;;  %v18014_v48 = vld [vmem:[#allocation28_spill] sm:$0xff] }
 0x1e4   : > { %v2063_v63 = vpop.f32.mrf.mxu1  ;;  %v1965_v7 = vadd.f32 %v1964_v57, %v17998_v30 }
 0x1e6   : > { %v12395_v45 = vadd.f32 %v2063_v63, %v1965_v7 }
 0x1e8   : > { %18000 = vst [vmem:[#allocation27_spill] sm:$0xff] %v12395_v45  ;;  %2382 = vmatmul.bf16.gmra.mxu2 %v18008_v44 }
 0x1eb   : > { %v1967_v57 = vpop.f32.mrf.mxu0 }
 0x1ec   : > { %v2066_v30 = vpop.f32.mrf.mxu1  ;;  %v1968_v13 = vadd.f32 %v1967_v57, %v18006_v62  ;;  %v10779_v62 = vld [vmem:[%s17542_s3 + $0xf8] sm:$0xff]  ;;  %v18013_v57 = vld [vmem:[#allocation19_spill] sm:$0xff] }
 0x1ed   : > { %3810 = vmatpush.bf16.msra.mxu1 %v10779_v62 }
 0x1ee   : > { %v12407_v32 = vadd.f32 %v2066_v30, %v1968_v13  ;;  %2006 = vmatmul.bf16.gmra.mxu0 %v12401_v36  ;;  %v928_v13 = vunpack.c.h.b16 %v17999_v23  ;;  %v12426_v30 = vpack.c.b16 %v18013_v57, %v18012_v24  ;;  %v18017_v23 = vld [vmem:[#allocation7_spill] sm:$0xff]  ;;  %v18020_v57 = vld [vmem:[#allocation20_spill] sm:$0xff] }
 0x1ef   : > { %2105 = vmatmul.bf16.gmra.mxu1 %v12404_v49 }
 0x1f0   : > { %18007 = vst [vmem:[#allocation8_spill] sm:$0xff] %v12407_v32  ;;  %v12429_v44 = vpack.c.b16 %v18014_v48, %v928_v13  ;;  %v18015_v32 = vld [vmem:[#allocation40_spill] sm:$0xff]  ;;  %v18021_v48 = vld [vmem:[#allocation26_spill] sm:$0xff] }
 0x1f1   : > { %v10740_v13 = vld [vmem:[%s17540_s1 + $0x208] sm:$0xff] }
 0x1f2   : > { %2476 = vmatmul.bf16.gmra.mxu3 %v12280_v56  ;;  %2568 = vmatpush.bf16.msra.mxu0 %v10740_v13 }
 0x1f3   : > { %v1969_v63 = vpop.f32.mrf.mxu0 }
 0x1f4   : > { %v2068_v7 = vpop.f32.mrf.mxu1  ;;  %v1970_v58 = vadd.f32 %v1969_v63, %v18009_v54 }
 0x1f6   : > { %v12420_v4 = vadd.f32 %v2068_v7, %v1970_v58 }
 0x1f8   : > { %18010 = vst [vmem:[#allocation30_spill] sm:$0xff] %v12420_v4  ;;  %2387 = vmatmul.bf16.gmra.mxu2 %v18017_v23  ;;  %v18023_v23 = vld [vmem:[#allocation46_spill] sm:$0xff] }
 0x1fb   : > { %v1972_v63 = vpop.f32.mrf.mxu0 }
 0x1fc   : > { %v2071_v54 = vpop.f32.mrf.mxu1  ;;  %v1973_v45 = vadd.f32 %v1972_v63, %v18015_v32 }
 0x1fe   : > { %v12432_v49 = vadd.f32 %v2071_v54, %v1973_v45  ;;  %2011 = vmatmul.bf16.gmra.mxu0 %v12426_v30 }
 0x1ff   : > { %2110 = vmatmul.bf16.gmra.mxu1 %v12429_v44 }
 0x200   : > { %18016 = vst [vmem:[#allocation23_spill] sm:$0xff] %v12432_v49 }
 0x202   : > { %2481 = vmatmul.bf16.gmra.mxu3 %v12302_v35  ;;  %v10786_v35 = vld [vmem:[%s17542_s3 + $0x130] sm:$0xff] }
 0x203   : > { %v1974_v56 = vpop.f32.mrf.mxu0  ;;  %3895 = vmatpush.bf16.msra.mxu2 %v10786_v35 }
 0x204   : > { %v2073_v7 = vpop.f32.mrf.mxu1  ;;  %v1975_v58 = vadd.f32 %v1974_v56, %v11961_v6  ;;  %v18022_v6 = vld [vmem:[#allocation14_spill] sm:$0xff] }
 0x206   : > { %v12438_v62 = vadd.f32 %v2073_v7, %v1975_v58  ;;  %v18024_v7 = vld [vmem:[#allocation41_spill] sm:$0xff] }
 0x207   : > { %v938_v58 = vunpack.c.l.b16 %v18024_v7 }
 0x208   : > { %18018 = vst [vmem:[#allocation11_spill] sm:$0xff] %v12438_v62  ;;  %2392 = vmatmul.bf16.gmra.mxu2 %v18022_v6 }
 0x20b   : > { %v1977_v32 = vpop.f32.mrf.mxu0 }
 0x20c   : > { %v2076_v45 = vpop.f32.mrf.mxu1  ;;  %v1978_v22 = vadd.f32 %v1977_v32, %v11978_v10  ;;  %v10778_v10 = vld [vmem:[%s17542_s3 + $0xf0] sm:$0xff] }
 0x20d   : > { %3811 = vmatpush.bf16.msra.mxu1 %v10778_v10  ;;  %v18026_v32 = vld [vmem:[#allocation21_spill] sm:$0xff]  ;;  %v18032_v10 = vld [vmem:[#allocation18_spill] sm:$0xff] }
 0x20e   : > { %v12445_v24 = vadd.f32 %v2076_v45, %v1978_v22  ;;  %2016 = vmatmul.bf16.gmra.mxu0 %v18020_v57  ;;  %v18027_v45 = vld [vmem:[#allocation31_spill] sm:$0xff] }
 0x20f   : > { %2115 = vmatmul.bf16.gmra.mxu1 %v18021_v48  ;;  %v18028_v22 = vunpack.c.l.b16 %v18027_v45  ;;  %v18033_v45 = vld [vmem:[#allocation52_spill] sm:$0xff] }
 0x210   : > { %18019 = vst [vmem:[#allocation15_spill] sm:$0xff] %v12445_v24 }
 0x211   : > { %v12464_v6 = vpack.c.b16 %v18028_v22, %v18026_v32  ;;  %v940_v22 = vunpack.c.h.b16 %v18024_v7  ;;  %v18039_v7 = vld [vmem:[#allocation56_spill] sm:$0xff] }
 0x212   : > { %2486 = vmatmul.bf16.gmra.mxu3 %v11635_v26 }
 0x213   : > { %v1979_v63 = vpop.f32.mrf.mxu0 }
 0x214   : > { %v2078_v54 = vpop.f32.mrf.mxu1  ;;  %v1980_v56 = vadd.f32 %v1979_v63, %v18023_v23  ;;  %v18029_v63 = vld [vmem:[#allocation34_spill] sm:$0xff] }
 0x215   : > { %v12467_v23 = vpack.c.b16 %v938_v58, %v18029_v63 }
 0x216   : > { %v12455_v13 = vadd.f32 %v2078_v54, %v1980_v56  ;;  %v18030_v54 = vld [vmem:[#allocation49_spill] sm:$0xff] }
 0x218   : > { %18025 = vst [vmem:[#allocation17_spill] sm:$0xff] %v12455_v13  ;;  %2397 = vmatmul.bf16.gmra.mxu2 %v18032_v10  ;;  %v18038_v10 = vld [vmem:[#allocation44_spill] sm:$0xff] }
 0x21b   : > { %v1982_v24 = vpop.f32.mrf.mxu0 }
 0x21c   : > { %v2081_v62 = vpop.f32.mrf.mxu1  ;;  %v1983_v56 = vadd.f32 %v1982_v24, %v18030_v54  ;;  %v10739_v24 = vld [vmem:[%s17540_s1 + $0x200] sm:$0xff]  ;;  %v18037_v54 = vld [vmem:[#allocation36_spill] sm:$0xff] }
 0x21d   : > { %2569 = vmatpush.bf16.msra.mxu0 %v10739_v24 }
 0x21e   : > { %v12470_v35 = vadd.f32 %v2081_v62, %v1983_v56  ;;  %2021 = vmatmul.bf16.gmra.mxu0 %v12464_v6  ;;  %v18035_v62 = vld [vmem:[#allocation32_spill] sm:$0xff] }
 0x21f   : > { %2120 = vmatmul.bf16.gmra.mxu1 %v12467_v23  ;;  %v18036_v63 = vunpack.c.l.b16 %v18035_v62  ;;  %v18043_v62 = vld [vmem:[#allocation12_spill] sm:$0xff] }
 0x220   : > { %18031 = vst [vmem:[#allocation33_spill] sm:$0xff] %v12470_v35  ;;  %v12489_v35 = vpack.c.b16 %v18038_v10, %v940_v22  ;;  %v10785_v10 = vld [vmem:[%s17542_s3 + $0x128] sm:$0xff] }
 0x221   : > { %v12486_v56 = vpack.c.b16 %v18037_v54, %v18036_v63  ;;  %3896 = vmatpush.bf16.msra.mxu2 %v10785_v10  ;;  %v950_v10 = vunpack.c.l.b16 %v12098_v51 }
 0x222   : > { %2491 = vmatmul.bf16.gmra.mxu3 %v12340_v3  ;;  %v18042_v3 = vld [vmem:[#allocation58_spill] sm:$0xff] }
 0x223   : > { %v1984_v26 = vpop.f32.mrf.mxu0 }
 0x224   : > { %v2083_v13 = vpop.f32.mrf.mxu1  ;;  %v1985_v32 = vadd.f32 %v1984_v26, %v18033_v45 }
 0x226   : > { %v12477_v58 = vadd.f32 %v2083_v13, %v1985_v32  ;;  %v18040_v32 = vld [vmem:[#allocation54_spill] sm:$0xff] }
 0x228   : > { %18034 = vst [vmem:[#allocation9_spill] sm:$0xff] %v12477_v58  ;;  %v18041_v58 = vld [vmem:[#allocation57_spill] sm:$0xff]  ;;  %2402 = vmatmul.bf16.gmra.mxu2 %v18043_v62 }
 0x229   : > { %v1546_v49 = vadd.f32 %v18041_v58, %v18040_v32  ;;  %v18044_v32 = vld [vmem:[#allocation38_spill] sm:$0xff] }
 0x22b   : > { %v1987_v26 = vpop.f32.mrf.mxu0  ;;  %v1891_v24 = vadd.f32 %v18042_v3, %v1546_v49  ;;  %v10777_v49 = vld [vmem:[%s17542_s3 + $0xe8] sm:$0xff]  ;;  %v18045_v3 = vld [vmem:[#allocation43_spill] sm:$0xff] }
 0x22c   : > { %v2086_v45 = vpop.f32.mrf.mxu1  ;;  %v1988_v13 = vadd.f32 %v1987_v26, %v18039_v7  ;;  %v1551_v7 = vadd.f32 %v12142_v37, %v12117_v11  ;;  %3812 = vmatpush.bf16.msra.mxu1 %v10777_v49  ;;  %v18047_v11 = vld [vmem:[#allocation39_spill] sm:$0xff] }
 0x22d   : > { %v18048_v37 = vld [vmem:[#allocation47_spill] sm:$0xff] }
 0x22e   : > { %v12494_v4 = vadd.f32 %v2086_v45, %v1988_v13  ;;  %2026 = vmatmul.bf16.gmra.mxu0 %v12486_v56 }
 0x22f   : > { %2125 = vmatmul.bf16.gmra.mxu1 %v12489_v35 }
 0x232   : > { %2496 = vmatmul.bf16.gmra.mxu3 %v12358_v34  ;;  %v1896_v34 = vadd.f32 %v12144_v39, %v1551_v7 }
 0x233   : > { %v1989_v63 = vpop.f32.mrf.mxu0 }
 0x234   : > { %v12500_v22 = vpop.f32.mrf.mxu1  ;;  %v12502_v54 = vadd.f32 %v1989_v63, %v1891_v24  ;;  %v18046_v24 = vld [vmem:[#allocation29_spill] sm:$0xff] }
 0x238   : > { %2407 = vmatmul.bf16.gmra.mxu2 %v18046_v24 }
 0x23b   : > { %v1992_v58 = vpop.f32.mrf.mxu0 }
 0x23c   : > { %v2091_v26 = vpop.f32.mrf.mxu1  ;;  %v1993_v45 = vadd.f32 %v1992_v58, %v12128_v61  ;;  %v18049_v58 = vunpack.c.l.b16 %v18048_v37 }
 0x23e   : > { %v12514_v13 = vadd.f32 %v2091_v26, %v1993_v45  ;;  %2031 = vmatmul.bf16.gmra.mxu0 %v18044_v32  ;;  %v12529_v26 = vpack.c.b16 %v18049_v58, %v18047_v11  ;;  %v18050_v45 = vld [vmem:[#allocation50_spill] sm:$0xff]  ;;  %v18051_v11 = vld [vmem:[#allocation35_spill] sm:$0xff] }
 0x23f   : > { %2130 = vmatmul.bf16.gmra.mxu1 %v18045_v3  ;;  %v12532_v49 = vpack.c.b16 %v950_v10, %v18050_v45 }
 0x242   : > { %2501 = vmatmul.bf16.gmra.mxu3 %v17995_v8 }
 0x243   : > { %v1994_v62 = vpop.f32.mrf.mxu0 }
 0x244   : > { %v12520_v61 = vpop.f32.mrf.mxu1  ;;  %v12522_v63 = vadd.f32 %v1994_v62, %v1896_v34  ;;  %v1556_v34 = vadd.f32 %v12178_v31, %v12165_v42  ;;  %v18053_v42 = vld [vmem:[#allocation48_spill] sm:$0xff] }
 0x245   : > { %v18054_v31 = vunpack.c.l.b16 %v18053_v42 }
 0x246   : > { %v1901_v8 = vadd.f32 %v12180_v41, %v1556_v34  ;;  %v10784_v34 = vld [vmem:[%s17542_s3 + $0x120] sm:$0xff] }
 0x247   : > { %v12552_v45 = vpack.c.b16 %v12043_v52, %v18054_v31  ;;  %v10776_v52 = vld [vmem:[%s17542_s3 + $0xe0] sm:$0xff]  ;;  %3897 = vmatpush.bf16.msra.mxu2 %v10784_v34 }
 0x248   : > { %2412 = vmatmul.bf16.gmra.mxu2 %v18051_v11  ;;  %3813 = vmatpush.bf16.msra.mxu1 %v10776_v52  ;;  %v18060_v52 = vld [vmem:[#allocation45_spill] sm:$0xff] }
 0x24b   : > { %v1997_v39 = vpop.f32.mrf.mxu0 }
 0x24c   : > { %v2096_v7 = vpop.f32.mrf.mxu1  ;;  %v1998_v24 = vadd.f32 %v1997_v39, %v12170_v60  ;;  %v952_v60 = vunpack.c.h.b16 %v12098_v51  ;;  %v1561_v51 = vadd.f32 %v12204_v19, %v12196_v1  ;;  %v12574_v1 = vpop.f32.mrf.mxu2 }
 0x24d   : > { %v12576_v19 = vpop.f32.mrf.mxu3 }
 0x24e   : > { %v12537_v62 = vadd.f32 %v2096_v7, %v1998_v24  ;;  %2036 = vmatmul.bf16.gmra.mxu0 %v12529_v26  ;;  %v12555_v39 = vpack.c.b16 %v12135_v59, %v952_v60  ;;  %v1906_v59 = vadd.f32 %v12206_v5, %v1561_v51 }
 0x24f   : > { %2135 = vmatmul.bf16.gmra.mxu1 %v12532_v49 }
 0x252   : > { %2506 = vmatmul.bf16.gmra.mxu3 %v12401_v36 }
 0x253   : > { %v1999_v37 = vpop.f32.mrf.mxu0 }
 0x254   : > { %v12543_v10 = vpop.f32.mrf.mxu1  ;;  %v12545_v58 = vadd.f32 %v1999_v37, %v1901_v8 }
 0x255   : > { %18052 = vst [vmem:[#allocation37_spill] sm:$0xff] %v12543_v10 }
 0x25b   : > { %v2002_v41 = vpop.f32.mrf.mxu0 }
 0x25c   : > { %v2101_v7 = vpop.f32.mrf.mxu1  ;;  %v2003_v24 = vadd.f32 %v2002_v41, %v12198_v9  ;;  %v18056_v9 = vld [vmem:[#allocation25_spill] sm:$0xff]  ;;  %v2373_v41 = vpop.f32.mrf.mxu2 }
 0x25d   : > { %2417 = vmatmul.bf16.gmra.mxu2 %v18056_v9 }
 0x25e   : > { %v12563_v36 = vadd.f32 %v2101_v7, %v2003_v24  ;;  %2041 = vmatmul.bf16.gmra.mxu0 %v12552_v45  ;;  %v1566_v24 = vadd.f32 %v12226_v47, %v12221_v46 }
 0x25f   : > { %2140 = vmatmul.bf16.gmra.mxu1 %v12555_v39 }
 0x260   : > { %18055 = vst [vmem:[#allocation16_spill] sm:$0xff] %v12563_v36  ;;  %v1911_v51 = vadd.f32 %v12228_v20, %v1566_v24  ;;  %v10783_v24 = vld [vmem:[%s17542_s3 + $0x118] sm:$0xff] }
 0x261   : > { %3898 = vmatpush.bf16.msra.mxu2 %v10783_v24 }
 0x262   : > { %2511 = vmatmul.bf16.gmra.mxu3 %v12426_v30 }
 0x263   : > { %v2004_v8 = vpop.f32.mrf.mxu0 }
 0x264   : > { %v12572_v11 = vpop.f32.mrf.mxu1  ;;  %v12578_v37 = vadd.f32 %v2004_v8, %v1906_v59 }
 0x265   : > { %18057 = vst [vmem:[#allocation19_spill] sm:$0xff] %v12572_v11  ;;  %v2472_v7 = vpop.f32.mrf.mxu3 }
 0x266   : > { %18058 = vst [vmem:[#allocation28_spill] sm:$0xff] %v12578_v37  ;;  %v12582_v5 = vadd.f32 %v2472_v7, %v2373_v41  ;;  %v1571_v41 = vadd.f32 %v12241_v55, %v12236_v16  ;;  %v10775_v55 = vld [vmem:[%s17542_s3 + $0xd8] sm:$0xff] }
 0x267   : > { %3814 = vmatpush.bf16.msra.mxu1 %v10775_v55 }
 0x26b   : > { %v2007_v60 = vpop.f32.mrf.mxu0 }
 0x26c   : > { %v2106_v42 = vpop.f32.mrf.mxu1  ;;  %v2008_v31 = vadd.f32 %v2007_v60, %v12223_v21  ;;  %v2375_v21 = vpop.f32.mrf.mxu2 }
 0x26d   : > { %2422 = vmatmul.bf16.gmra.mxu2 %v18060_v52  ;;  %v2474_v8 = vpop.f32.mrf.mxu3 }
 0x26e   : > { %v12586_v34 = vadd.f32 %v2106_v42, %v2008_v31  ;;  %2570 = vmatmul.bf16.vlgmr.msra.gmra.mxu0 %v11572_v38  ;;  %v12595_v60 = vadd.f32 %v2474_v8, %v2375_v21 }
 0x270   : > { %18059 = vst [vmem:[#allocation40_spill] sm:$0xff] %v12586_v34 }
 0x272   : > { %2516 = vmatmul.bf16.gmra.mxu3 %v18020_v57  ;;  %v1916_v57 = vadd.f32 %v12243_v53, %v1571_v41 }
 0x273   : > { %v2009_v30 = vpop.f32.mrf.mxu0 }
 0x274   : > { %v12591_v59 = vpop.f32.mrf.mxu1  ;;  %v12593_v9 = vadd.f32 %v2009_v30, %v1911_v51  ;;  %v2378_v38 = vpop.f32.mrf.mxu2  ;;  %v18064_v51 = vld [vmem:[#allocation51_spill] sm:$0xff] }
 0x275   : > { %18061 = vst [vmem:[#allocation7_spill] sm:$0xff] %v12591_v59  ;;  %v2477_v31 = vpop.f32.mrf.mxu3 }
 0x276   : > { %18062 = vst [vmem:[#allocation20_spill] sm:$0xff] %v12593_v9  ;;  %v12599_v20 = vadd.f32 %v2477_v31, %v2378_v38  ;;  %v1576_v31 = vadd.f32 %v12259_v15, %v12252_v17 }
 0x278   : > { %v1921_v24 = vadd.f32 %v12261_v43, %v1576_v31 }
 0x27b   : > { %v2012_v46 = vpop.f32.mrf.mxu0 }
 0x27c   : > { %v2111_v47 = vpop.f32.mrf.mxu1  ;;  %v2013_v42 = vadd.f32 %v2012_v46, %v12238_v14  ;;  %v2380_v21 = vpop.f32.mrf.mxu2 }
 0x27d   : > { %2427 = vmatmul.bf16.gmra.mxu2 %v18064_v51  ;;  %v2479_v16 = vpop.f32.mrf.mxu3 }
 0x27e   : > { %v12603_v7 = vadd.f32 %v2111_v47, %v2013_v42  ;;  %2575 = vmatmul.bf16.gmra.mxu0 %v12283_v33  ;;  %v12618_v33 = vadd.f32 %v2479_v16, %v2380_v21 }
 0x280   : > { %18063 = vst [vmem:[#allocation26_spill] sm:$0xff] %v12603_v7 }
 0x282   : > { %2521 = vmatmul.bf16.gmra.mxu3 %v12464_v6 }
 0x283   : > { %v2014_v14 = vpop.f32.mrf.mxu0 }
 0x284   : > { %v12611_v52 = vpop.f32.mrf.mxu1  ;;  %v12613_v30 = vadd.f32 %v2014_v14, %v1916_v57  ;;  %v2383_v47 = vpop.f32.mrf.mxu2  ;;  %v18068_v57 = vld [vmem:[#allocation42_spill] sm:$0xff] }
 0x285   : > { %18065 = vst [vmem:[#allocation14_spill] sm:$0xff] %v12611_v52  ;;  %v2482_v42 = vpop.f32.mrf.mxu3 }
 0x286   : > { %18066 = vst [vmem:[#allocation46_spill] sm:$0xff] %v12613_v30  ;;  %v12622_v38 = vadd.f32 %v2482_v42, %v2383_v47  ;;  %v18072_v42 = vld [vmem:[#allocation61_spill] sm:$0xff] }
 0x28b   : > { %v2017_v8 = vpop.f32.mrf.mxu0 }
 0x28c   : > { %v2116_v53 = vpop.f32.mrf.mxu1  ;;  %v2018_v46 = vadd.f32 %v2017_v8, %v12254_v29  ;;  %v2385_v29 = vpop.f32.mrf.mxu2 }
 0x28d   : > { %2432 = vmatmul.bf16.gmra.mxu2 %v18068_v57  ;;  %v2484_v21 = vpop.f32.mrf.mxu3 }
 0x28e   : > { %v12626_v41 = vadd.f32 %v2116_v53, %v2018_v46  ;;  %2580 = vmatmul.bf16.gmra.mxu0 %v12305_v12  ;;  %v12635_v16 = vadd.f32 %v2484_v21, %v2385_v29  ;;  %v1581_v53 = vadd.f32 %v12273_v50, %v12265_v0 }
 0x290   : > { %18067 = vst [vmem:[#allocation41_spill] sm:$0xff] %v12626_v41  ;;  %v1926_v47 = vadd.f32 %v12275_v25, %v1581_v53  ;;  %v18077_v53 = vld [vmem:[#allocation66_spill] sm:$0xff] }
 0x292   : > { %2526 = vmatmul.bf16.gmra.mxu3 %v12486_v56 }
 0x293   : > { %v2019_v6 = vpop.f32.mrf.mxu0 }
 0x294   : > { %v12631_v51 = vpop.f32.mrf.mxu1  ;;  %v12633_v14 = vadd.f32 %v2019_v6, %v1921_v24  ;;  %v2388_v12 = vpop.f32.mrf.mxu2  ;;  %v10782_v6 = vld [vmem:[%s17542_s3 + $0x110] sm:$0xff] }
 0x295   : > { %18069 = vst [vmem:[#allocation21_spill] sm:$0xff] %v12631_v51  ;;  %v2487_v8 = vpop.f32.mrf.mxu3  ;;  %3899 = vmatpush.bf16.msra.mxu2 %v10782_v6 }
 0x296   : > { %18070 = vst [vmem:[#allocation31_spill] sm:$0xff] %v12633_v14  ;;  %v12639_v43 = vadd.f32 %v2487_v8, %v2388_v12  ;;  %v18107_v14 = vld [vmem:[#allocation55_spill] sm:$0xff] }
 0x29b   : > { %v2022_v17 = vpop.f32.mrf.mxu0 }
 0x29c   : > { %v2121_v15 = vpop.f32.mrf.mxu1  ;;  %v2023_v55 = vadd.f32 %v2022_v17, %v12267_v40  ;;  %v2390_v40 = vpop.f32.mrf.mxu2 }
 0x29d   : > { %2437 = vmatmul.bf16.gmra.mxu2 %v18072_v42  ;;  %v2489_v57 = vpop.f32.mrf.mxu3  ;;  %v18078_v42 = vld [vmem:[#allocation64_spill] sm:$0xff] }
 0x29e   : > { %v12643_v46 = vadd.f32 %v2121_v15, %v2023_v55  ;;  %2585 = vmatmul.bf16.gmra.mxu0 %v11657_v28  ;;  %v12655_v0 = vadd.f32 %v2489_v57, %v2390_v40  ;;  %v10774_v28 = vld [vmem:[%s17542_s3 + $0xd0] sm:$0xff] }
 0x29f   : > { %3815 = vmatpush.bf16.msra.mxu1 %v10774_v28  ;;  %v18075_v55 = vld [vmem:[#allocation65_spill] sm:$0xff] }
 0x2a0   : > { %18071 = vst [vmem:[#allocation34_spill] sm:$0xff] %v12643_v46  ;;  %v1586_v12 = vadd.f32 %v18075_v55, %v12290_v27  ;;  %v18083_v55 = vld [vmem:[#allocation69_spill] sm:$0xff] }
 0x2a2   : > { %2531 = vmatmul.bf16.gmra.mxu3 %v18044_v32 }
 0x2a3   : > { %v2024_v56 = vpop.f32.mrf.mxu0 }
 0x2a4   : > { %v12648_v31 = vpop.f32.mrf.mxu1  ;;  %v12650_v24 = vadd.f32 %v2024_v56, %v1926_v47  ;;  %v2393_v21 = vpop.f32.mrf.mxu2  ;;  %v1931_v47 = vadd.f32 %v18077_v53, %v1586_v12 }
 0x2a5   : > { %18073 = vst [vmem:[#allocation49_spill] sm:$0xff] %v12648_v31  ;;  %v2492_v17 = vpop.f32.mrf.mxu3 }
 0x2a6   : > { %18074 = vst [vmem:[#allocation18_spill] sm:$0xff] %v12650_v24  ;;  %v12662_v15 = vadd.f32 %v2492_v17, %v2393_v21  ;;  %v18082_v17 = vld [vmem:[#allocation67_spill] sm:$0xff] }
 0x2a7   : > { %v1591_v12 = vadd.f32 %v18083_v55, %v18082_v17 }
 0x2ab   : > { %v2027_v50 = vpop.f32.mrf.mxu0 }
 0x2ac   : > { %v2126_v25 = vpop.f32.mrf.mxu1  ;;  %v2028_v29 = vadd.f32 %v2027_v50, %v12292_v2  ;;  %v2395_v2 = vpop.f32.mrf.mxu2  ;;  %v18081_v50 = vld [vmem:[#allocation68_spill] sm:$0xff] }
 0x2ad   : > { %2442 = vmatmul.bf16.gmra.mxu2 %v18078_v42  ;;  %v2494_v57 = vpop.f32.mrf.mxu3  ;;  %v10795_v42 = vld [vmem:[%s17542_s3 + $0x178] sm:$0xff] }
 0x2ae   : > { %v12666_v8 = vadd.f32 %v2126_v25, %v2028_v29  ;;  %2590 = vmatmul.bf16.gmra.mxu0 %v12343_v18  ;;  %v12675_v6 = vadd.f32 %v2494_v57, %v2395_v2  ;;  %3978 = vmatpush.bf16.msra.mxu3 %v10795_v42  ;;  %v18087_v2 = vld [vmem:[#allocation59_spill] sm:$0xff] }
 0x2b0   : > { %18076 = vst [vmem:[#allocation52_spill] sm:$0xff] %v12666_v8  ;;  %v18102_v8 = vld [vmem:[#allocation10_spill] sm:$0xff] }
 0x2b2   : > { %2536 = vmatmul.bf16.gmra.mxu3 %v12529_v26  ;;  %v18086_v26 = vld [vmem:[#allocation70_spill] sm:$0xff] }
 0x2b3   : > { %v2029_v32 = vpop.f32.mrf.mxu0 }
 0x2b4   : > { %v12671_v56 = vpop.f32.mrf.mxu1  ;;  %v12673_v40 = vadd.f32 %v2029_v32, %v1931_v47  ;;  %v2398_v18 = vpop.f32.mrf.mxu2  ;;  %v18085_v47 = vld [vmem:[#allocation77_spill] sm:$0xff]  ;;  %v1936_v32 = vadd.f32 %v18086_v26, %v1591_v12  ;;  %v18090_v12 = vld [vmem:[#allocation72_spill] sm:$0xff] }
 0x2b5   : > { %18079 = vst [vmem:[#allocation32_spill] sm:$0xff] %v12671_v56  ;;  %v2497_v29 = vpop.f32.mrf.mxu3 }
 0x2b6   : > { %18080 = vst [vmem:[#allocation36_spill] sm:$0xff] %v12673_v40  ;;  %v12679_v21 = vadd.f32 %v2497_v29, %v2398_v18 }
 0x2bb   : > { %v2032_v27 = vpop.f32.mrf.mxu0 }
 0x2bc   : > { %v2131_v28 = vpop.f32.mrf.mxu1  ;;  %v2033_v25 = vadd.f32 %v2032_v27, %v18081_v50  ;;  %v2400_v18 = vpop.f32.mrf.mxu2 }
 0x2bd   : > { %2447 = vmatmul.bf16.gmra.mxu2 %v18087_v2  ;;  %v2499_v29 = vpop.f32.mrf.mxu3  ;;  %v18092_v2 = vld [vmem:[#allocation73_spill] sm:$0xff] }
 0x2be   : > { %v12683_v53 = vadd.f32 %v2131_v28, %v2033_v25  ;;  %2595 = vmatmul.bf16.gmra.mxu0 %v18085_v47  ;;  %v12695_v28 = vadd.f32 %v2499_v29, %v2400_v18  ;;  %v10781_v25 = vld [vmem:[%s17542_s3 + $0x108] sm:$0xff]  ;;  %v18094_v29 = vld [vmem:[#allocation13_spill] sm:$0xff] }
 0x2bf   : > { %3900 = vmatpush.bf16.msra.mxu2 %v10781_v25  ;;  %v18095_v25 = vld [vmem:[#allocation74_spill] sm:$0xff] }
 0x2c0   : > { %18084 = vst [vmem:[#allocation44_spill] sm:$0xff] %v12683_v53 }
 0x2c2   : > { %2541 = vmatmul.bf16.gmra.mxu3 %v12552_v45  ;;  %v10773_v45 = vld [vmem:[%s17542_s3 + $0xc8] sm:$0xff] }
 0x2c3   : > { %v2034_v57 = vpop.f32.mrf.mxu0  ;;  %3816 = vmatpush.bf16.msra.mxu1 %v10773_v45  ;;  %v18100_v45 = vld [vmem:[#allocation75_spill] sm:$0xff] }
 0x2c4   : > { %v12691_v27 = vpop.f32.mrf.mxu1  ;;  %v12693_v50 = vadd.f32 %v2034_v57, %v1936_v32  ;;  %v12702_v42 = vpop.f32.mrf.mxu2  ;;  %v18091_v32 = vld [vmem:[#allocation71_spill] sm:$0xff] }
 0x2c5   : > { %18088 = vst [vmem:[#allocation56_spill] sm:$0xff] %v12691_v27  ;;  %v12704_v26 = vpop.f32.mrf.mxu3  ;;  %v1596_v57 = vadd.f32 %v18092_v2, %v18091_v32  ;;  %v12726_v32 = vld [vmem:[%s11389_s17 + $0xa0] sm:$0xf] }
 0x2c6   : > { %18089 = vst [vmem:[#allocation54_spill] sm:$0xff] %v12693_v50 }
 0x2c7   : > { %v1941_v27 = vadd.f32 %v18095_v25, %v1596_v57  ;;  %v17634_v57 = vunpack.c.l.b16 %v12726_v32 }
 0x2cb   : > { %v2037_v17 = vpop.f32.mrf.mxu0 }
 0x2cc   : > { %v2136_v55 = vpop.f32.mrf.mxu1  ;;  %v2038_v47 = vadd.f32 %v2037_v17, %v18090_v12  ;;  %v12719_v53 = vpop.f32.mrf.mxu2 }
 0x2cd   : > { %v12721_v56 = vpop.f32.mrf.mxu3 }
 0x2ce   : > { %v12708_v18 = vadd.f32 %v2136_v55, %v2038_v47  ;;  %2600 = vmatmul.bf16.gmra.mxu0 %v18094_v29  ;;  %v18098_v55 = vld [vmem:[#allocation53_spill] sm:$0xff]  ;;  %v401_v47 = vld [vmem:[%s11389_s17 + $0x9c] sm:$0xf] }
 0x2cf   : > { %v485_v2 = vunpack.c.l.b16 %v401_v47 }
 0x2d0   : > { %18093 = vst [vmem:[#allocation57_spill] sm:$0xff] %v12708_v18  ;;  %v18099_v18 = vld [vmem:[#allocation76_spill] sm:$0xff] }
 0x2d1   : > { %v2206_v41 = vpack.c.b16 %v485_v2, %v18107_v14  ;;  %v18108_v14 = vld [vmem:[#allocation22_spill] sm:$0xff] }
 0x2d2   : > { %2546 = vmatmul.bf16.gmra.mxu3 %v18098_v55  ;;  %v1601_v55 = vadd.f32 %v12574_v1, %v18100_v45 }
 0x2d3   : > { %v2039_v50 = vpop.f32.mrf.mxu0 }
 0x2d4   : > { %v12715_v17 = vpop.f32.mrf.mxu1  ;;  %v12717_v12 = vadd.f32 %v2039_v50, %v1941_v27  ;;  %v12736_v50 = vpack.c.b16 %v17634_v57, %v485_v2  ;;  %v1946_v24 = vadd.f32 %v12576_v19, %v1601_v55  ;;  %v10794_v57 = vld [vmem:[%s17542_s3 + $0x170] sm:$0xff]  ;;  %v18105_v19 = vld [vmem:[#allocation62_spill] sm:$0xff] }
 0x2d5   : > { %18096 = vst [vmem:[#allocation58_spill] sm:$0xff] %v12715_v17  ;;  %v12730_v17 = vpop.f32.mrf.mxu2  ;;  %v12732_v27 = vpop.f32.mrf.mxu3  ;;  %3979 = vmatpush.bf16.msra.mxu3 %v10794_v57  ;;  %v18106_v55 = vunpack.c.l.b16 %v18105_v19 }
 0x2d6   : > { %18097 = vst [vmem:[#allocation12_spill] sm:$0xff] %v12717_v12  ;;  %v17635_v31 = vshrl.u32 %v12736_v50, 16 }
 0x2db   : > { %v2042_v29 = vpop.f32.mrf.mxu0 }
 0x2dc   : > { %v2141_v25 = vpop.f32.mrf.mxu1  ;;  %v2043_v40 = vadd.f32 %v2042_v29, %v18099_v18  ;;  %v715_v18 = vrot.slane %v17635_v31, 7  ;;  %v17636_v29 = vshll.u32 %v12736_v50, 16 }
 0x2dd   : > { %v12757_v45 = vpop.f32.mrf.mxu3 }
 0x2de   : > { %v12740_v12 = vadd.f32 %v2141_v25, %v2043_v40  ;;  %2605 = vmatmul.bf16.gmra.mxu0 %v18102_v8  ;;  %v718_v1 = vor.u32 %v17636_v29, %v715_v18  ;;  %v12755_v25 = vpop.f32.mrf.mxu2 }
 0x2e0   : > { %18101 = vst [vmem:[#allocation38_spill] sm:$0xff] %v12740_v12  ;;  %v756_v12 = vsel %vm11528_vm2, %v401_v47, %v718_v1  ;;  %v2750_v47 = vlaneseq }
 0x2e1   : > { %v2148_v46 = vunpack.c.l.b16 %v756_v12  ;;  %v2150_v59 = vunpack.c.h.b16 %v756_v12 }
 0x2e2   : > { %2551 = vmatmul.bf16.gmra.mxu3 %v2206_v41 }
 0x2e3   : > { %v2044_v40 = vpop.f32.mrf.mxu0  ;;  %v2205_v51 = vpack.c.b16 %v2148_v46, %v18106_v55  ;;  %v12780_v55 = vstv %s9505_s28 }
 0x2e4   : > { %v12753_v8 = vadd.f32 %v2044_v40, %v1946_v24  ;;  %v12768_v24 = vld [vmem:[%s11389_s17 + $0xa4] sm:$0xf]  ;;  %vm2754_vm7 = vcmp.ge.s32.totalorder %v12780_v55, 0  ;;  %vm2766_vm8 = vcmp.lt.s32.totalorder %v12780_v55, 16 }
 0x2e5   : > { %2452 = vmatmul.bf16.gmra.mxu2 %v2205_v51  ;;  %v487_v57 = vunpack.c.l.b16 %v12768_v24  ;;  %v12777_v46 = vpop.f32.mrf.mxu3  ;;  %v12784_v51 = vshrl.u32 %v2750_v47, 7  ;;  %v10772_v47 = vld [vmem:[%s17542_s3 + $0xc0] sm:$0xff]  ;;  %vm12804_vm9 = vmand %vm2754_vm7, %vm2766_vm8 }
 0x2e6   : > { %18103 = vst [vmem:[#allocation43_spill] sm:$0xff] %v12753_v8  ;;  %v12773_v1 = vpop.f32.mrf.mxu2  ;;  %3817 = vmatpush.bf16.msra.mxu1 %v10772_v47 }
 0x2e7   : > { %v12775_v19 = vpack.c.b16 %v487_v57, %v487_v57  ;;  %18109 = vst [vmem:[#allocation29_spill] sm:$0xff] %v12784_v51  ;;  %vm2790_vm10 = vcmp.ge.s32.totalorder %v12784_v51, 1 }
 0x2e8   : > { %vm2793_vm11 = vmand %vm12804_vm9, %vm2790_vm10 }
 0x2e9   : > { %v17637_v41 = vshrl.u32 %v12775_v19, 16 }
 0x2eb   : > { %v2571_v40 = vpop.f32.mrf.mxu0 }
 0x2ec   : > { %v2572_v29 = vadd.f32 %v2571_v40, %v12582_v5  ;;  %v722_v5 = vrot.slane %v17637_v41, 7  ;;  %v17638_v40 = vshll.u32 %v12775_v19, 16 }
 0x2ed   : > { %v12819_v11 = vpop.f32.mrf.mxu3 }
 0x2ee   : > { %v2661_v2 = vadd.f32 %v2572_v29, %v18108_v14  ;;  %2610 = vmatmul.bf16.gmra.mxu0 %v12429_v44  ;;  %v12794_v29 = vld [vmem:[%s17541_s2] ss:$0 sm:$0xff]  ;;  %v725_v14 = vor.u32 %v17638_v40, %v722_v5  ;;  %v12810_v30 = vpop.f32.mrf.mxu2  ;;  %v18112_v5 = vld [vmem:[#allocation6_spill] sm:$0xff] }
 0x2ef   : > { %v10780_v44 = vld [vmem:[%s17542_s3 + $0x100] sm:$0xff] }
 0x2f0   : > { %3901 = vmatpush.bf16.msra.mxu2 %v10780_v44  ;;  %v726_v7 = vsel %vm516_vm0, %v715_v18, %v725_v14  ;;  %v2701_v34 = vadd.f32 %v12794_v29, %v2661_v2 }
 0x2f1   : > { %v2152_v9 = vunpack.c.l.b16 %v726_v7  ;;  %v10793_v7 = vld [vmem:[%s17542_s3 + $0x168] sm:$0xff] }
 0x2f2   : > { %3980 = vmatpush.bf16.msra.mxu3 %v10793_v7 }
 0x2f3   : > { %v2573_v41 = vpop.f32.mrf.mxu0 }
 0x2f4   : > { %v2574_v52 = vadd.f32 %v2573_v41, %v12595_v60  ;;  %v2208_v60 = vpack.c.b16 %v2152_v9, %v2150_v59  ;;  %v18113_v41 = vunpack.c.l.b16 %v12726_v32  ;;  %v10792_v32 = vld [vmem:[%s17542_s3 + $0x160] sm:$0xff] }
 0x2f6   : > { %v2662_v40 = vadd.f32 %v2574_v52, %v18112_v5  ;;  %v2209_v44 = vpack.c.b16 %v487_v57, %v18113_v41  ;;  %2457 = vmatmul.bf16.gmra.mxu2 %v2208_v60  ;;  %v2868_v52 = vsel %vm2793_vm11, %v2701_v34, 0.0  ;;  %v12830_v9 = vpop.f32.mrf.mxu2  ;;  %v2739_v57 = vadd.s32 1, %v12780_v55  ;;  %3981 = vmatpush.bf16.msra.mxu3 %v10792_v32  ;;  %v12844_v5 = vpop.f32.mrf.mxu3 }
 0x2f7   : > { %18114 = vst [vmem:[#allocation39_spill] sm:$0xff] %v12830_v9  ;;  %v12839_v34 = vadd.s32 16, %v12784_v51  ;;  %v18145_v9 = vld [vmem:[#allocation15_spill] sm:$0xff] }
 0x2f8   : > { %v2702_v47 = vadd.f32 %v12794_v29, %v2662_v40  ;;  %2556 = vmatmul.bf16.gmra.mxu3 %v2209_v44  ;;  %v18115_v40 = vld [vmem:[#allocation24_spill] sm:$0xff]  ;;  %vm2755_vm12 = vcmp.ge.s32.totalorder %v2739_v57, 0  ;;  %vm2767_vm13 = vcmp.lt.s32.totalorder %v2739_v57, 16  ;;  %18117 = vst [vmem:[#allocation50_spill] sm:$0xff] %v12844_v5 }
 0x2f9   : > { %18116 = vst [vmem:[#allocation47_spill] sm:$0xff] %v12839_v34  ;;  %vm2831_vm14 = vcmp.le.s32.totalorder %v12839_v34, 16  ;;  %vm12848_vm15 = vmand %vm2755_vm12, %vm2767_vm13 }
 0x2fa   : > { %v2869_v12 = vsel %vm12804_vm9, %v2702_v47, 0.0  ;;  %v10790_v47 = vld [vmem:[%s17542_s3 + $0x150] sm:$0xff]  ;;  %vm2834_vm1 = vmand %vm12804_vm9, %vm2831_vm14 }
 0x2fb   : > { %v10969_v18 = vpack.c.bf16 %v2869_v12, %v2868_v52  ;;  %v2576_v2 = vpop.f32.mrf.mxu0  ;;  %v18121_v52 = vld [vmem:[#allocation27_spill] sm:$0xff]  ;;  %vm2796_vm4 = vmand %vm12848_vm15, %vm2790_vm10 }
 0x2fc   : > { %v2577_v59 = vadd.f32 %v2576_v2, %v12599_v20  ;;  %v10791_v20 = vld [vmem:[%s17542_s3 + $0x158] sm:$0xff]  ;;  %vm2837_vm5 = vmand %vm12848_vm15, %vm2831_vm14 }
 0x2fd   : > { %10970 = vst [vmem:[#allocation2] sm:$0xff] %v10969_v18   ;;  %3982 = vmatpush.bf16.msra.mxu3 %v10791_v20  ;;  %v10789_v18 = vld [vmem:[%s17542_s3 + $0x148] sm:$0xff]  ;;  %v10788_v20 = vld [vmem:[%s17542_s3 + $0x140] sm:$0xff] }
 0x2fe   : > { %v2663_v14 = vadd.f32 %v2577_v59, %v18115_v40  ;;  %2615 = vmatmul.bf16.gmra.mxu0 %v18021_v48  ;;  %v12852_v44 = vpop.f32.mrf.mxu2  ;;  %v12871_v57 = vpop.f32.mrf.mxu3 }
 0x2ff   : > { %18120 = vst [vmem:[#allocation35_spill] sm:$0xff] %v12852_v44 }
 0x300   : > { %v2703_v7 = vadd.f32 %v12794_v29, %v2663_v14  ;;  %18122 = vst [vmem:[#allocation48_spill] sm:$0xff] %v12871_v57 }
 0x301   : > { %3983 = vmatpush.bf16.msra.mxu3 %v10790_v47  ;;  %v10763_v47 = vld [vmem:[%s17542_s3 + $0x78] sm:$0xff] }
 0x302   : > { %v2870_v2 = vsel %vm2834_vm1, %v2703_v7, 0.0  ;;  %4375 = vmatpush.bf16.msrb.mxu2 %v10763_v47 }
 0x303   : > { %v2578_v60 = vpop.f32.mrf.mxu0 }
 0x304   : > { %v2579_v41 = vadd.f32 %v2578_v60, %v12618_v33  ;;  %v18124_v60 = vld [vmem:[#allocation8_spill] sm:$0xff] }
 0x305   : > { %3984 = vmatpush.bf16.msra.mxu3 %v10789_v18 }
 0x306   : > { %v2664_v12 = vadd.f32 %v2579_v41, %v18121_v52  ;;  %v12874_v14 = vpop.f32.mrf.mxu2 }
 0x307   : > { %18123 = vst [vmem:[#allocation25_spill] sm:$0xff] %v12874_v14 }
 0x308   : > { %v2704_v33 = vadd.f32 %v12794_v29, %v2664_v12 }
 0x309   : > { %3985 = vmatpush.bf16.msra.mxu3 %v10788_v20  ;;  %v2740_v20 = vadd.s32 2, %v12780_v55 }
 0x30a   : > { %v2871_v59 = vsel %vm2796_vm4, %v2704_v33, 0.0  ;;  %v18126_v33 = vld [vmem:[#allocation30_spill] sm:$0xff] }
 0x30b   : > { %v10974_v32 = vpack.c.bf16 %v2871_v59, %v2870_v2  ;;  %v2581_v8 = vpop.f32.mrf.mxu0  ;;  %vm2756_vm7 = vcmp.ge.s32.totalorder %v2740_v20, 0  ;;  %vm2768_vm8 = vcmp.lt.s32.totalorder %v2740_v20, 16  ;;  %v18136_v20 = vld [vmem:[#allocation11_spill] sm:$0xff] }
 0x30c   : > { %v2582_v40 = vadd.f32 %v2581_v8, %v12622_v38  ;;  %v12885_v38 = vpop.f32.mrf.mxu3  ;;  %vm12911_vm9 = vmand %vm2756_vm7, %vm2768_vm8 }
 0x30d   : > { %11131 = vst [vmem:[#allocation2 + $0x8] sm:$0xff] %v10974_v32   ;;  %vm12933_vm11 = vmand %vm12911_vm9, %vm2790_vm10 }
 0x30e   : > { %v2665_v41 = vadd.f32 %v2582_v40, %v18124_v60  ;;  %2620 = vmatmul.bf16.gmra.mxu0 %v12467_v23  ;;  %18125 = vst [vmem:[#allocation45_spill] sm:$0xff] %v12885_v38  ;;  %v12889_v2 = vpop.f32.mrf.mxu2  ;;  %v10755_v60 = vld [vmem:[%s17542_s3 + $0x38] sm:$0xff]  ;;  %vm13017_vm1 = vmand %vm12911_vm9, %vm2831_vm14 }
 0x30f   : > { %18127 = vst [vmem:[#allocation51_spill] sm:$0xff] %v12889_v2  ;;  %4291 = vmatpush.bf16.msrb.mxu1 %v10755_v60 }
 0x310   : > { %v2705_v12 = vadd.f32 %v12794_v29, %v2665_v41  ;;  %v18128_v41 = vld [vmem:[#allocation23_spill] sm:$0xff] }
 0x312   : > { %v2872_v59 = vsel %vm12848_vm15, %v2705_v12, 0.0 }
 0x313   : > { %v2583_v7 = vpop.f32.mrf.mxu0 }
 0x314   : > { %v2584_v52 = vadd.f32 %v2583_v7, %v12635_v16  ;;  %v12905_v7 = vpop.f32.mrf.mxu3 }
 0x315   : > { %18129 = vst [vmem:[#allocation42_spill] sm:$0xff] %v12905_v7 }
 0x316   : > { %v2666_v18 = vadd.f32 %v2584_v52, %v18126_v33  ;;  %v12907_v48 = vpop.f32.mrf.mxu2  ;;  %v12909_v52 = vld [vmem:[#allocation2 + $0xc] sm:$0xf] }
 0x317   : > { %18130 = vst [vmem:[#allocation61_spill] sm:$0xff] %v12907_v48 }
 0x318   : > { %v2706_v23 = vadd.f32 %v12794_v29, %v2666_v18  ;;  %18131 = vst [vmem:[#allocation65_spill] sm:$0xff] %v12909_v52 }
 0x31a   : > { %v2873_v16 = vsel %vm2837_vm5, %v2706_v23, 0.0 }
 0x31b   : > { %v10979_v32 = vpack.c.bf16 %v2873_v16, %v2872_v59  ;;  %v2586_v8 = vpop.f32.mrf.mxu0 }
 0x31c   : > { %v2587_v40 = vadd.f32 %v2586_v8, %v12639_v43  ;;  %v12945_v2 = vpop.f32.mrf.mxu3 }
 0x31d   : > { %11132 = vst [vmem:[#allocation2 + $0x10] sm:$0xff] %v10979_v32  }
 0x31e   : > { %v2667_v47 = vadd.f32 %v2587_v40, %v18128_v41  ;;  %2625 = vmatmul.bf16.gmra.mxu0 %v12489_v35  ;;  %v17639_v35 = vunpack.c.l.b16 %v12909_v52  ;;  %18141 = vst [vmem:[#allocation69_spill] sm:$0xff] %v12945_v2  ;;  %v12951_v37 = vpop.f32.mrf.mxu2 }
 0x31f   : > { %18142 = vst [vmem:[#allocation77_spill] sm:$0xff] %v12951_v37 }
 0x320   : > { %v2707_v40 = vadd.f32 %v12794_v29, %v2667_v47 }
 0x322   : > { %v2874_v14 = vsel %vm12933_vm11, %v2707_v40, 0.0  ;;  %v2741_v40 = vadd.s32 3, %v12780_v55 }
 0x323   : > { %v2588_v12 = vpop.f32.mrf.mxu0 }
 0x324   : > { %v2589_v33 = vadd.f32 %v2588_v12, %v12655_v0  ;;  %v2980_v18 = vld [vmem:[#allocation2 + $0x10] sm:$0xf]  ;;  %v2981_v23 = vld [vmem:[#allocation2 + $0x14] sm:$0xf]  ;;  %vm2757_vm12 = vcmp.ge.s32.totalorder %v2741_v40, 0  ;;  %vm2769_vm13 = vcmp.lt.s32.totalorder %v2741_v40, 16 }
 0x325   : > { %v12916_v59 = vld [vmem:[#allocation2 + $0xc] sm:$0xff]  ;;  %v3052_v16 = vunpack.c.l.b16 %v2980_v18  ;;  %v12919_v32 = vunpack.c.l.b16 %v2981_v23  ;;  %v12921_v8 = vld [vmem:[#allocation2 + $0x14] sm:$0xf]  ;;  %vm12990_vm15 = vmand %vm2757_vm12, %vm2769_vm13 }
 0x326   : > { %18134 = vst [vmem:[#allocation66_spill] sm:$0xff] %v12916_v59  ;;  %v2668_v60 = vadd.f32 %v2589_v33, %v18136_v20  ;;  %v12927_v48 = vunpack.c.l.b16 %v12921_v8  ;;  %vm2802_vm4 = vmand %vm12990_vm15, %vm2790_vm10 }
 0x327   : > { %18135 = vst [vmem:[#allocation64_spill] sm:$0xff] %v12921_v8  ;;  %v3086_v12 = vpack.c.b16 %v3052_v16, %v17639_v35  ;;  %v3087_v47 = vpack.c.b16 %v12919_v32, %v12919_v32  ;;  %v12942_v33 = vpack.c.b16 %v12919_v32, %v3052_v16  ;;  %vm13090_vm5 = vmand %vm12990_vm15, %vm2831_vm14 }
 0x328   : > { %18137 = vst [vmem:[#allocation68_spill] sm:$0xff] %v12927_v48  ;;  %v2708_v18 = vadd.f32 %v12794_v29, %v2668_v60  ;;  %v12955_v16 = vpack.c.b16 %v12927_v48, %v12927_v48  ;;  %v18144_v60 = vshll.u32 %v12916_v59, 16  ;;  %v17641_v48 = vshrl.u32 %v12916_v59, 16 }
 0x329   : > { %18140 = vst [vmem:[#allocation67_spill] sm:$0xff] %v12942_v33  ;;  %3902 = vmatmul.bf16.vlgmr.msra.gmra.mxu2 %v3086_v12  ;;  %v3124_v20 = vshrl.u32 %v3086_v12, 16  ;;  %v3127_v41 = vshll.u32 %v3086_v12, 16  ;;  %v3134_v7 = vshll.u32 %v3087_v47, 16  ;;  %v3131_v38 = vshrl.u32 %v3087_v47, 16 }
 0x32a   : > { %v2875_v35 = vsel %vm12911_vm9, %v2708_v18, 0.0  ;;  %18143 = vst [vmem:[#allocation70_spill] sm:$0xff] %v12955_v16  ;;  %v7412_v33 = vrot.slane %v18144_v60, 1 }
 0x32b   : > { %v10984_v12 = vpack.c.bf16 %v2875_v35, %v2874_v14  ;;  %v2591_v57 = vpop.f32.mrf.mxu0  ;;  %v3126_v44 = vrot.slane %v3124_v20, 7  ;;  %v3317_v2 = vrot.slane %v3127_v41, 1  ;;  %v3319_v47 = vrot.slane %v3134_v7, 1 }
 0x32c   : > { %v2592_v0 = vadd.f32 %v2591_v57, %v12662_v15  ;;  %v3133_v36 = vrot.slane %v3131_v38, 7  ;;  %v17644_v35 = vshll.u32 %v12955_v16, 16 }
 0x32d   : > { %11133 = vst [vmem:[#allocation2 + $0x18] sm:$0xff] %v10984_v12   ;;  %v3129_v18 = vor.u32 %v3127_v41, %v3126_v44  ;;  %v3318_v37 = vor.u32 %v3317_v2, %v3124_v20  ;;  %v3321_v5 = vor.u32 %v3319_v47, %v3131_v38  ;;  %v7413_v2 = vor.u32 %v7412_v33, %v17641_v48 }
 0x32e   : > { %v2669_v10 = vadd.f32 %v2592_v0, %v18145_v9  ;;  %2630 = vmatmul.bf16.gmra.mxu0 %v18045_v3  ;;  %v3136_v14 = vor.u32 %v3134_v7, %v3133_v36  ;;  %v7414_v12 = vrot.slane %v17644_v35, 1 }
 0x32f   : > { %v12968_v15 = vsel %vm11528_vm2, %v12909_v52, %v3129_v18  ;;  %v12971_v57 = vsel %vm757_vm3, %v3318_v37, %v3319_v47  ;;  %v3385_v38 = vsel %vm11560_vm6, %v3321_v5, %v2981_v23  ;;  %v10762_v37 = vld [vmem:[%s17542_s3 + $0x70] sm:$0xff]  ;;  %v13000_v18 = vpop.f32.mrf.mxu2 }
 0x330   : > { %18146 = vst [vmem:[#allocation59_spill] sm:$0xff] %v12968_v15  ;;  %3818 = vmatmul.bf16.vlgmr.msra.gmra.mxu1 %v12968_v15  ;;  %3986 = vmatmul.bf16.vlgmr.msra.gmra.mxu3 %v12971_v57  ;;  %v3137_v3 = vsel %vm516_vm0, %v3126_v44, %v3136_v14  ;;  %v12980_v9 = vunpack.c.l.b16 %v3385_v38  ;;  %v10754_v5 = vld [vmem:[%s17542_s3 + $0x30] sm:$0xff]  ;;  %v3424_v7 = vunpack.c.h.b16 %v12968_v15  ;;  %v3425_v23 = vunpack.c.h.b16 %v12971_v57  ;;  %v12994_v44 = vpop.f32.mrf.mxu3 }
 0x331   : > { %18147 = vst [vmem:[#allocation72_spill] sm:$0xff] %v12971_v57  ;;  %v3426_v36 = vunpack.c.l.b16 %v3137_v3  ;;  %4376 = vmatpush.bf16.msrb.mxu2 %v10762_v37  ;;  %4292 = vmatpush.bf16.msrb.mxu1 %v10754_v5  ;;  %v2709_v48 = vadd.f32 %v12794_v29, %v2669_v10  ;;  %v18156_v5 = vld [vmem:[#allocation17_spill] sm:$0xff]  ;;  %v13024_v10 = vsel %vm757_vm3, %v7413_v2, %v7414_v12 }
 0x332   : > { %v13005_v38 = vpack.c.b16 %v12980_v9, %v3425_v23  ;;  %18157 = vst [vmem:[#allocation74_spill] sm:$0xff] %v13024_v10  ;;  %v18163_v37 = vld [vmem:[#allocation33_spill] sm:$0xff] }
 0x333   : > { %v2593_v33 = vpop.f32.mrf.mxu0  ;;  %v13002_v14 = vpack.c.b16 %v3426_v36, %v3424_v7 }
 0x334   : > { %v2594_v47 = vadd.f32 %v2593_v33, %v12675_v6  ;;  %v2982_v0 = vld [vmem:[#allocation2 + $0x18] sm:$0xf]  ;;  %v2983_v40 = vld [vmem:[#allocation2 + $0x1c] sm:$0xf]  ;;  %18152 = vst [vmem:[#allocation73_spill] sm:$0xff] %v13005_v38  ;;  %v18158_v33 = vshrl.u32 %v12955_v16, 16 }
 0x335   : > { %18151 = vst [vmem:[#allocation71_spill] sm:$0xff] %v13002_v14  ;;  %v13007_v3 = vld [vmem:[#allocation2 + $0x18] sm:$0xf]  ;;  %v3054_v60 = vunpack.c.l.b16 %v2982_v0  ;;  %v3055_v59 = vunpack.c.l.b16 %v2983_v40  ;;  %v13010_v35 = vld [vmem:[#allocation2 + $0x1c] sm:$0xf] }
 0x336   : > { %18153 = vst [vmem:[#allocation13_spill] sm:$0xff] %v13007_v3  ;;  %v2670_v7 = vadd.f32 %v2594_v47, %v18156_v5  ;;  %v7196_v23 = vunpack.c.l.b16 %v13010_v35  ;;  %v13028_v40 = vor.u32 %v7414_v12, %v18158_v33  ;;  %v18161_v35 = vunpack.c.l.b16 %v13007_v3 }
 0x337   : > { %v13034_v43 = vpack.c.b16 %v3055_v59, %v3054_v60  ;;  %v3584_v6 = vpack.c.b16 %v3054_v60, %v12919_v32  ;;  %v2876_v33 = vsel %vm13017_vm1, %v2709_v48, 0.0 }
 0x338   : > { %18159 = vst [vmem:[#allocation53_spill] sm:$0xff] %v13028_v40  ;;  %v2710_v47 = vadd.f32 %v12794_v29, %v2670_v7  ;;  %v13040_v5 = vpack.c.b16 %v7196_v23, %v18161_v35  ;;  %v13058_v48 = vpop.f32.mrf.mxu3 }
 0x339   : > { %18160 = vst [vmem:[#allocation76_spill] sm:$0xff] %v13034_v43  ;;  %v3139_v12 = vshrl.u32 %v13034_v43, 16  ;;  %3907 = vmatmul.bf16.gmra.mxu2 %v3584_v6  ;;  %v3142_v35 = vshll.u32 %v13034_v43, 16 }
 0x33a   : > { %18162 = vst [vmem:[#allocation75_spill] sm:$0xff] %v13040_v5  ;;  %v2877_v10 = vsel %vm2802_vm4, %v2710_v47, 0.0  ;;  %v17648_v32 = vshll.u32 %v13040_v5, 16  ;;  %v17651_v38 = vshrl.u32 %v13040_v5, 16 }
 0x33b   : > { %v10989_v60 = vpack.c.bf16 %v2877_v10, %v2876_v33  ;;  %v13050_v7 = vrot.slane %v3139_v12, 7  ;;  %v2596_v3 = vpop.f32.mrf.mxu0  ;;  %v13062_v10 = vpop.f32.mrf.mxu2 }
 0x33c   : > { %v2597_v16 = vadd.f32 %v2596_v3, %v12679_v21  ;;  %v7417_v2 = vrot.slane %v17648_v32, 1 }
 0x33d   : > { %11134 = vst [vmem:[#allocation2 + $0x20] sm:$0xff] %v10989_v60   ;;  %v3144_v6 = vor.u32 %v3142_v35, %v13050_v7 }
 0x33e   : > { %v2671_v47 = vadd.f32 %v2597_v16, %v18163_v37  ;;  %2635 = vmatmul.bf16.gmra.mxu0 %v12532_v49  ;;  %v7418_v33 = vor.u32 %v7417_v2, %v17651_v38 }
 0x33f   : > { %v13068_v21 = vsel %vm11528_vm2, %v2982_v0, %v3144_v6 }
 0x340   : > { %18164 = vst [vmem:[#allocation10_spill] sm:$0xff] %v13068_v21  ;;  %v3428_v3 = vunpack.c.l.b16 %v13068_v21  ;;  %v2711_v37 = vadd.f32 %v12794_v29, %v2671_v47  ;;  %v13094_v0 = vpop.f32.mrf.mxu3 }
 0x341   : > { %18169 = vst [vmem:[#allocation55_spill] sm:$0xff] %v13094_v0 }
 0x342   : > { %v3583_v60 = vpack.c.b16 %v3428_v3, %v3426_v36  ;;  %v18166_v3 = vld [vmem:[#allocation9_spill] sm:$0xff]  ;;  %v2878_v57 = vsel %vm12990_vm15, %v2711_v37, 0.0 }
 0x343   : > { %v2598_v32 = vpop.f32.mrf.mxu0 }
 0x344   : > { %v2599_v8 = vadd.f32 %v2598_v32, %v12695_v28  ;;  %3823 = vmatmul.bf16.gmra.mxu1 %v3583_v60  ;;  %v13072_v40 = vld [vmem:[#allocation2 + $0x20] sm:$0xf]  ;;  %v13074_v16 = vld [vmem:[#allocation2 + $0x24] sm:$0xf]  ;;  %v3322_v28 = vrot.slane %v3142_v35, 1  ;;  %v2503_v35 = vadd.f32 %v12704_v26, %v12702_v42  ;;  %v13105_v32 = vpop.f32.mrf.mxu2 }
 0x345   : > { %v13076_v49 = vld [vmem:[#allocation2 + $0x20] sm:$0xf]  ;;  %v3056_v2 = vunpack.c.l.b16 %v13072_v40  ;;  %v13081_v6 = vld [vmem:[#allocation2 + $0x24] sm:$0xf]  ;;  %v18170_v43 = vunpack.c.l.b16 %v13074_v16  ;;  %18173 = vst [vmem:[#allocation24_spill] sm:$0xff] %v13105_v32 }
 0x346   : > { %18165 = vst [vmem:[#allocation62_spill] sm:$0xff] %v13076_v49  ;;  %v7197_v36 = vunpack.c.l.b16 %v13076_v49  ;;  %v2672_v38 = vadd.f32 %v2599_v8, %v18166_v3  ;;  %v18175_v42 = vunpack.c.l.b16 %v13081_v6  ;;  %v3323_v20 = vor.u32 %v3322_v28, %v3139_v12 }
 0x347   : > { %v3089_v47 = vpack.c.b16 %v3056_v2, %v3056_v2  ;;  %v3587_v5 = vpack.c.b16 %v3056_v2, %v3055_v59  ;;  %v13098_v14 = vpack.c.b16 %v18170_v43, %v3056_v2  ;;  %v2742_v59 = vadd.s32 4, %v12780_v55 }
 0x348   : > { %v13100_v8 = vpack.c.b16 %v7197_v36, %v7197_v36  ;;  %v2712_v3 = vadd.f32 %v12794_v29, %v2672_v38  ;;  %v13117_v26 = vpack.c.b16 %v18175_v42, %v7197_v36  ;;  %v13138_v28 = vpop.f32.mrf.mxu3  ;;  %v10761_v42 = vld [vmem:[%s17542_s3 + $0x68] sm:$0xff]  ;;  %v2743_v49 = vadd.s32 5, %v12780_v55 }
 0x349   : > { %18171 = vst [vmem:[#allocation22_spill] sm:$0xff] %v13098_v14  ;;  %v3149_v15 = vshll.u32 %v3089_v47, 16  ;;  %3912 = vmatmul.bf16.gmra.mxu2 %v3587_v5  ;;  %v3146_v52 = vshrl.u32 %v3089_v47, 16  ;;  %v13113_v14 = vpack.c.b16 %v7197_v36, %v7196_v23  ;;  %vm2758_vm7 = vcmp.ge.s32.totalorder %v2742_v59, 0 }
 0x34a   : > { %18172 = vst [vmem:[#allocation6_spill] sm:$0xff] %v13100_v8  ;;  %v2879_v43 = vsel %vm13090_vm5, %v2712_v3, 0.0  ;;  %v17660_v2 = vshll.u32 %v13100_v8, 16  ;;  %vm2770_vm8 = vcmp.lt.s32.totalorder %v2742_v59, 16  ;;  %4377 = vmatpush.bf16.msrb.mxu2 %v10761_v42  ;;  %vm2759_vm12 = vcmp.ge.s32.totalorder %v2743_v49, 0 }
 0x34b   : > { %18174 = vst [vmem:[#allocation27_spill] sm:$0xff] %v13113_v14  ;;  %v10994_v38 = vpack.c.bf16 %v2879_v43, %v2878_v57  ;;  %v2601_v32 = vpop.f32.mrf.mxu0  ;;  %v3324_v37 = vrot.slane %v3149_v15, 1  ;;  %v3148_v0 = vrot.slane %v3146_v52, 7  ;;  %v10803_v57 = vld [vmem:[%s17542_s3 + $0x1b8] sm:$0xff]  ;;  %vm13164_vm9 = vmand %vm2758_vm7, %vm2770_vm8  ;;  %vm2771_vm13 = vcmp.lt.s32.totalorder %v2743_v49, 16 }
 0x34c   : > { %18176 = vst [vmem:[#allocation8_spill] sm:$0xff] %v13117_v26  ;;  %v2602_v5 = vadd.f32 %v2601_v32, %v2503_v35  ;;  %v7419_v3 = vrot.slane %v17660_v2, 1  ;;  %4761 = vmatpush.bf16.msrb.mxu0 %v10803_v57  ;;  %v13151_v43 = vpop.f32.mrf.mxu2  ;;  %vm13192_vm11 = vmand %vm13164_vm9, %vm2790_vm10 }
 0x34d   : > { %11135 = vst [vmem:[#allocation2 + $0x28] sm:$0xff] %v10994_v38   ;;  %v13120_v47 = vsel %vm757_vm3, %v3323_v20, %v3324_v37  ;;  %v3151_v60 = vor.u32 %v3149_v15, %v3148_v0  ;;  %v17661_v15 = vshrl.u32 %v13100_v8, 16  ;;  %v10802_v38 = vld [vmem:[%s17542_s3 + $0x1b0] sm:$0xff]  ;;  %vm13272_vm15 = vmand %vm2759_vm12, %vm2771_vm13 }
 0x34e   : > { %18177 = vst [vmem:[#allocation30_spill] sm:$0xff] %v13120_v47  ;;  %v2673_v23 = vadd.f32 %v2602_v5, %v12494_v4  ;;  %2640 = vmatmul.bf16.gmra.mxu0 %v12555_v39  ;;  %v3429_v36 = vunpack.c.l.b16 %v13120_v47  ;;  %v3430_v4 = vunpack.c.h.b16 %v13068_v21  ;;  %v13141_v32 = vsel %vm757_vm3, %v7418_v33, %v7419_v3  ;;  %v10753_v33 = vld [vmem:[%s17542_s3 + $0x28] sm:$0xff]  ;;  %vm13306_vm1 = vmand %vm13164_vm9, %vm2831_vm14 }
 0x34f   : > { %v13132_v12 = vsel %vm516_vm0, %v13050_v7, %v3151_v60  ;;  %18178 = vst [vmem:[#allocation23_spill] sm:$0xff] %v13141_v32  ;;  %v13145_v35 = vor.u32 %v7419_v3, %v17661_v15  ;;  %v2505_v7 = vadd.f32 %v12721_v56, %v12719_v53  ;;  %v2089_v5 = vadd.f32 %v12500_v22, %v12502_v54  ;;  %v10801_v54 = vld [vmem:[%s17542_s3 + $0x1a8] sm:$0xff]  ;;  %vm13319_vm4 = vmand %vm13272_vm15, %vm2790_vm10 }
 0x350   : > { %v3585_v0 = vpack.c.b16 %v3429_v36, %v12980_v9  ;;  %v17662_v39 = vunpack.c.l.b16 %v13132_v12  ;;  %4293 = vmatpush.bf16.msrb.mxu1 %v10753_v33  ;;  %4762 = vmatpush.bf16.msrb.mxu0 %v10802_v38  ;;  %v2713_v20 = vadd.f32 %v12794_v29, %v2673_v23  ;;  %v18186_v38 = vshll.u32 %v12736_v50, 16  ;;  %v13221_v26 = vpop.f32.mrf.mxu3  ;;  %vm13434_vm5 = vmand %vm13272_vm15, %vm2831_vm14 }
 0x351   : > { %18179 = vst [vmem:[#allocation11_spill] sm:$0xff] %v13145_v35 }
 0x352   : > { %3991 = vmatmul.bf16.gmra.mxu3 %v3585_v0  ;;  %v3586_v9 = vpack.c.b16 %v17662_v39, %v3430_v4  ;;  %v3326_v0 = vor.u32 %v3324_v37, %v3146_v52  ;;  %v18184_v37 = vunpack.c.l.b16 %v13074_v16 }
 0x353   : > { %v2603_v53 = vpop.f32.mrf.mxu0 }
 0x354   : > { %v2604_v60 = vadd.f32 %v2603_v53, %v2505_v7  ;;  %3828 = vmatmul.bf16.gmra.mxu1 %v3586_v9  ;;  %v2986_v3 = vld [vmem:[#allocation2 + $0x28] sm:$0xf]  ;;  %v13174_v36 = vld [vmem:[#allocation2 + $0x2c] sm:$0xf]  ;;  %v823_v53 = vrot.slane %v18186_v38, 1  ;;  %4763 = vmatpush.bf16.msrb.mxu0 %v10801_v54  ;;  %v10800_v54 = vld [vmem:[%s17542_s3 + $0x1a0] sm:$0xff]  ;;  %v13229_v52 = vpop.f32.mrf.mxu2 }
 0x355   : > { %v7139_v59 = vld [vmem:[#allocation2 + $0x28] sm:$0xf]  ;;  %v3058_v57 = vunpack.c.l.b16 %v2986_v3  ;;  %v13177_v4 = vunpack.c.l.b16 %v13174_v36  ;;  %v13179_v15 = vld [vmem:[#allocation2 + $0x2c] sm:$0xf]  ;;  %v3386_v3 = vsel %vm11560_vm6, %v3326_v0, %v13072_v40 }
 0x356   : > { %v7199_v2 = vunpack.c.l.b16 %v7139_v59  ;;  %v2674_v22 = vadd.f32 %v2604_v60, %v2089_v5  ;;  %v13186_v7 = vunpack.c.l.b16 %v13179_v15 }
 0x357   : > { %v3090_v9 = vpack.c.b16 %v3058_v57, %v18184_v37  ;;  %v13200_v23 = vpack.c.b16 %v13177_v4, %v13177_v4  ;;  %v13203_v42 = vpack.c.b16 %v13177_v4, %v3058_v57  ;;  %v2508_v57 = vadd.f32 %v12732_v27, %v12730_v17 }
 0x358   : > { %v2714_v33 = vadd.f32 %v12794_v29, %v2674_v22  ;;  %v13209_v5 = vpack.c.b16 %v13186_v7, %v7199_v2  ;;  %v2880_v22 = vsel %vm13192_vm11, %v2713_v20, 0.0  ;;  %v3433_v27 = vunpack.c.l.b16 %v3386_v3  ;;  %4764 = vmatpush.bf16.msrb.mxu0 %v10800_v54 }
 0x359   : > { %18185 = vst [vmem:[#allocation15_spill] sm:$0xff] %v13203_v42  ;;  %v3154_v60 = vshrl.u32 %v3090_v9, 16  ;;  %3917 = vmatmul.bf16.gmra.mxu2 %v3090_v9  ;;  %v3157_v59 = vshll.u32 %v3090_v9, 16  ;;  %v17668_v37 = vshll.u32 %v13200_v23, 16  ;;  %v3161_v20 = vshrl.u32 %v13200_v23, 16 }
 0x35a   : > { %18187 = vst [vmem:[#allocation17_spill] sm:$0xff] %v13209_v5  ;;  %v2881_v38 = vsel %vm13164_vm9, %v2714_v33, 0.0  ;;  %v18188_v33 = vshrl.u32 %v12736_v50, 16  ;;  %v3431_v3 = vunpack.c.h.b16 %v13120_v47  ;;  %v10799_v50 = vld [vmem:[%s17542_s3 + $0x198] sm:$0xff] }
 0x35b   : > { %v10999_v39 = vpack.c.bf16 %v2881_v38, %v2880_v22  ;;  %v2606_v5 = vpop.f32.mrf.mxu0  ;;  %v13224_v40 = vrot.slane %v3154_v60, 7  ;;  %v3327_v0 = vrot.slane %v3157_v59, 1  ;;  %v3329_v9 = vrot.slane %v17668_v37, 1 }
 0x35c   : > { %v2607_v17 = vadd.f32 %v2606_v5, %v2508_v57  ;;  %v824_v22 = vor.u32 %v823_v53, %v18188_v33  ;;  %v18189_v38 = vshll.u32 %v12775_v19, 16  ;;  %v18190_v5 = vld [vmem:[#allocation60_spill] sm:$0xff]  ;;  %v3588_v53 = vpack.c.b16 %v3433_v27, %v3431_v3  ;;  %4765 = vmatpush.bf16.msrb.mxu0 %v10799_v50 }
 0x35d   : > { %11136 = vst [vmem:[#allocation2 + $0x30] sm:$0xff] %v10999_v39   ;;  %v3328_v32 = vor.u32 %v3327_v0, %v3154_v60  ;;  %v3331_v57 = vor.u32 %v3329_v9, %v3161_v20  ;;  %v3159_v8 = vor.u32 %v3157_v59, %v13224_v40  ;;  %v18191_v60 = vunpack.c.l.b16 %v13081_v6 }
 0x35e   : > { %v13238_v35 = vrot.slane %v18189_v38, 1  ;;  %v2675_v14 = vadd.f32 %v2607_v17, %v12514_v13  ;;  %2645 = vmatmul.bf16.gmra.mxu0 %v18190_v5  ;;  %v2510_v59 = vadd.f32 %v12757_v45, %v12755_v25  ;;  %v13269_v6 = vpack.c.b16 %v13186_v7, %v13186_v7  ;;  %v10798_v5 = vld [vmem:[%s17542_s3 + $0x190] sm:$0xff] }
 0x35f   : > { %v13245_v39 = vsel %vm757_vm3, %v3328_v32, %v3329_v9  ;;  %v13253_v0 = vpack.c.b16 %v7199_v2, %v18191_v60  ;;  %v3387_v54 = vsel %vm11560_vm6, %v3331_v57, %v13174_v36  ;;  %v13279_v25 = vsel %vm11528_vm2, %v13074_v16, %v3159_v8  ;;  %v13294_v57 = vpop.f32.mrf.mxu3 }
 0x360   : > { %v3435_v13 = vunpack.c.l.b16 %v13245_v39  ;;  %v13257_v17 = vsel %vm757_vm3, %v824_v22, %v13238_v35  ;;  %v3437_v32 = vunpack.c.h.b16 %v13245_v39  ;;  %18194 = vst [vmem:[#allocation60_spill] sm:$0xff] %v13269_v6  ;;  %v13281_v45 = vunpack.c.l.b16 %v3387_v54  ;;  %v13310_v54 = vpop.f32.mrf.mxu2  ;;  %4766 = vmatpush.bf16.msrb.mxu0 %v10798_v5  ;;  %v18441_v31 = vld [vmem:[#allocation15_spill] sm:$0xff] }
 0x361   : > { %18192 = vst [vmem:[#allocation33_spill] sm:$0xff] %v13253_v0  ;;  %v2094_v36 = vadd.f32 %v12520_v61, %v12522_v63  ;;  %v2149_v38 = vunpack.c.l.b16 %v13257_v17  ;;  %v3163_v61 = vrot.slane %v3161_v20, 7 }
 0x362   : > { %3996 = vmatmul.bf16.gmra.mxu3 %v3588_v53  ;;  %v13265_v9 = vpack.c.b16 %v3435_v13, %v3433_v27  ;;  %v13297_v63 = vpack.c.b16 %v13281_v45, %v3437_v32  ;;  %v2715_v13 = vadd.f32 %v12794_v29, %v2675_v14  ;;  %v18210_v14 = vshrl.u32 %v13253_v0, 16 }
 0x363   : > { %v2608_v2 = vpop.f32.mrf.mxu0 }
 0x364   : > { %18193 = vst [vmem:[#allocation9_spill] sm:$0xff] %v13265_v9  ;;  %v2609_v27 = vadd.f32 %v2608_v2, %v2510_v59  ;;  %3833 = vmatmul.bf16.gmra.mxu1 %v13279_v25  ;;  %v2988_v22 = vld [vmem:[#allocation2 + $0x30] sm:$0xf]  ;;  %v13286_v49 = vld [vmem:[#allocation2 + $0x34] sm:$0xf]  ;;  %v2513_v2 = vadd.f32 %v12777_v46, %v12773_v1  ;;  %v10797_v1 = vld [vmem:[%s17542_s3 + $0x188] sm:$0xff] }
 0x365   : > { %v3060_v8 = vunpack.c.l.b16 %v2988_v22  ;;  %v17669_v3 = vunpack.c.l.b16 %v13286_v49  ;;  %18197 = vst [vmem:[#allocation78_spill] sm:$0xff] %v13297_v63  ;;  %v7141_v50 = vld [vmem:[#allocation2 + $0x30] sm:$0xf]  ;;  %v13299_v53 = vld [vmem:[#allocation2 + $0x34] sm:$0xf]  ;;  %4767 = vmatpush.bf16.msrb.mxu0 %v10797_v1  ;;  %v10760_v1 = vld [vmem:[%s17542_s3 + $0x60] sm:$0xff] }
 0x366   : > { %v2676_v59 = vadd.f32 %v2609_v27, %v2094_v36  ;;  %v7201_v32 = vunpack.c.l.b16 %v7141_v50  ;;  %v18203_v50 = vld [vmem:[#allocation63_spill] sm:$0xff]  ;;  %v7202_v46 = vunpack.c.l.b16 %v13299_v53  ;;  %4378 = vmatpush.bf16.msrb.mxu2 %v10760_v1 }
 0x367   : > { %v13325_v56 = vpack.c.b16 %v17669_v3, %v3060_v8  ;;  %v3592_v36 = vpack.c.b16 %v3060_v8, %v13177_v4  ;;  %v2207_v20 = vpack.c.b16 %v2149_v38, %v18203_v50  ;;  %v18205_v3 = vshll.u32 %v13200_v23, 16 }
 0x368   : > { %v2716_v27 = vadd.f32 %v12794_v29, %v2676_v59  ;;  %v13335_v16 = vpack.c.b16 %v7201_v32, %v13186_v7  ;;  %v18206_v8 = vshll.u32 %v13253_v0, 16  ;;  %v2882_v59 = vsel %vm13306_vm1, %v2715_v13, 0.0 }
 0x369   : > { %18202 = vst [vmem:[#allocation79_spill] sm:$0xff] %v13325_v56  ;;  %3922 = vmatmul.bf16.gmra.mxu2 %v3592_v36  ;;  %v3166_v4 = vor.u32 %v18205_v3, %v3163_v61  ;;  %v13349_v7 = vpack.c.b16 %v7202_v46, %v7201_v32  ;;  %v18208_v36 = vshll.u32 %v13269_v6, 16  ;;  %v18209_v3 = vshrl.u32 %v13325_v56, 16  ;;  %v10796_v32 = vld [vmem:[%s17542_s3 + $0x180] sm:$0xff] }
 0x36a   : > { %18204 = vst [vmem:[#allocation63_spill] sm:$0xff] %v13335_v16  ;;  %v7422_v38 = vrot.slane %v18206_v8, 1  ;;  %v2883_v50 = vsel %vm13319_vm4, %v2716_v27, 0.0  ;;  %v3172_v8 = vshll.u32 %v13325_v56, 16  ;;  %v17671_v13 = vshrl.u32 %v13269_v6, 16  ;;  %4768 = vmatpush.bf16.msrb.mxu0 %v10796_v32  ;;  %v18222_v16 = vld [vmem:[#allocation50_spill] sm:$0xff] }
 0x36b   : > { %18207 = vst [vmem:[#allocation80_spill] sm:$0xff] %v13349_v7  ;;  %v7424_v37 = vrot.slane %v18208_v36, 1  ;;  %v11004_v23 = vpack.c.bf16 %v2883_v50, %v2882_v59  ;;  %v13355_v61 = vrot.slane %v18209_v3, 7  ;;  %v2611_v5 = vpop.f32.mrf.mxu0  ;;  %v13367_v50 = vsel %vm516_vm0, %v13224_v40, %v3166_v4  ;;  %v13388_v3 = vpop.f32.mrf.mxu3 }
 0x36c   : > { %v2612_v60 = vadd.f32 %v2611_v5, %v2513_v2  ;;  %v7423_v27 = vor.u32 %v7422_v38, %v18210_v14  ;;  %v17670_v2 = vshll.u32 %v13349_v7, 16  ;;  %v18211_v38 = vshrl.u32 %v12775_v19, 16 }
 0x36d   : > { %11137 = vst [vmem:[#allocation2 + $0x38] sm:$0xff] %v11004_v23   ;;  %v3174_v59 = vor.u32 %v3172_v8, %v13355_v61  ;;  %v13375_v5 = vor.u32 %v7424_v37, %v17671_v13  ;;  %v17672_v19 = vunpack.c.l.b16 %v13367_v50 }
 0x36e   : > { %v2677_v36 = vadd.f32 %v2612_v60, %v12537_v62  ;;  %2650 = vmatmul.bf16.gmra.mxu0 %v2207_v20  ;;  %v827_v23 = vor.u32 %v13238_v35, %v18211_v38  ;;  %v13382_v40 = vsel %vm757_vm3, %v7423_v27, %v7424_v37  ;;  %v13396_v20 = vpop.f32.mrf.mxu2  ;;  %v17673_v37 = vshrl.u32 %v13349_v7, 16  ;;  %v10752_v27 = vld [vmem:[%s17542_s3 + $0x20] sm:$0xff]  ;;  %v18213_v38 = vld [vmem:[#allocation37_spill] sm:$0xff] }
 0x36f   : > { %18212 = vst [vmem:[#allocation81_spill] sm:$0xff] %v13382_v40  ;;  %v13386_v4 = vsel %vm11528_vm2, %v2988_v22, %v3174_v59  ;;  %v7427_v22 = vrot.slane %v17670_v2, 1  ;;  %v2515_v60 = vadd.f32 %v12819_v11, %v12810_v30  ;;  %v2099_v11 = vadd.f32 %v18213_v38, %v12545_v58  ;;  %4294 = vmatpush.bf16.msrb.mxu1 %v10752_v27  ;;  %v18221_v40 = vld [vmem:[#allocation39_spill] sm:$0xff] }
 0x370   : > { %v3440_v35 = vunpack.c.l.b16 %v13386_v4  ;;  %v858_v14 = vsel %vm11560_vm6, %v827_v23, %v12768_v24  ;;  %v18216_v27 = vunpack.c.l.b16 %v13286_v49  ;;  %v2518_v49 = vadd.f32 %v18222_v16, %v18221_v40 }
 0x371   : > { %v7428_v1 = vor.u32 %v7427_v22, %v17673_v37  ;;  %v2153_v13 = vunpack.c.l.b16 %v858_v14  ;;  %v18223_v40 = vshrl.u32 %v13325_v56, 16 }
 0x372   : > { %4001 = vmatmul.bf16.gmra.mxu3 %v13245_v39  ;;  %v3591_v32 = vpack.c.b16 %v3440_v35, %v17672_v19  ;;  %v2151_v35 = vunpack.c.h.b16 %v13257_v17 }
 0x373   : > { %v2613_v59 = vpop.f32.mrf.mxu0  ;;  %v13457_v7 = vpop.f32.mrf.mxu3 }
 0x374   : > { %v2614_v30 = vadd.f32 %v2613_v59, %v2515_v60  ;;  %3838 = vmatmul.bf16.gmra.mxu1 %v3591_v32  ;;  %v13416_v39 = vld [vmem:[#allocation2 + $0x38] sm:$0xf]  ;;  %v13419_v2 = vld [vmem:[#allocation2 + $0x3c] sm:$0xf]  ;;  %v2717_v60 = vadd.f32 %v12794_v29, %v2677_v36  ;;  %v3332_v59 = vrot.slane %v3172_v8, 1 }
 0x375   : > { %v13421_v24 = vld [vmem:[#allocation2 + $0x38] sm:$0xf]  ;;  %v3062_v23 = vunpack.c.l.b16 %v13416_v39  ;;  %v17678_v19 = vunpack.c.l.b16 %v13419_v2  ;;  %v13425_v22 = vld [vmem:[#allocation2 + $0x3c] sm:$0xf] }
 0x376   : > { %v7203_v58 = vunpack.c.l.b16 %v13421_v24  ;;  %v2678_v32 = vadd.f32 %v2614_v30, %v2099_v11  ;;  %v17679_v17 = vunpack.c.l.b16 %v13425_v22  ;;  %v18243_v0 = vunpack.c.l.b16 %v13425_v22  ;;  %v18245_v22 = vld [vmem:[#allocation40_spill] sm:$0xff] }
 0x377   : > { %v3093_v14 = vpack.c.b16 %v3062_v23, %v3062_v23  ;;  %v3595_v37 = vpack.c.b16 %v3062_v23, %v18216_v27  ;;  %v13442_v62 = vpack.c.b16 %v17678_v19, %v3062_v23 }
 0x378   : > { %v13444_v36 = vpack.c.b16 %v7203_v58, %v7203_v58  ;;  %v2718_v8 = vadd.f32 %v12794_v29, %v2678_v32  ;;  %v13449_v11 = vpack.c.b16 %v7203_v58, %v7202_v46  ;;  %v13453_v30 = vpack.c.b16 %v17679_v17, %v7203_v58  ;;  %v13465_v17 = vpop.f32.mrf.mxu2 }
 0x379   : > { %18217 = vst [vmem:[#allocation37_spill] sm:$0xff] %v13442_v62  ;;  %v3179_v27 = vshll.u32 %v3093_v14, 16  ;;  %3927 = vmatmul.bf16.gmra.mxu2 %v3595_v37  ;;  %v3176_v23 = vshrl.u32 %v3093_v14, 16  ;;  %v2884_v32 = vsel %vm13272_vm15, %v2717_v60, 0.0  ;;  %v2744_v46 = vadd.s32 6, %v12780_v55  ;;  %v18252_v62 = vld [vmem:[#allocation20_spill] sm:$0xff] }
 0x37a   : > { %18218 = vst [vmem:[#allocation82_spill] sm:$0xff] %v13444_v36  ;;  %v17683_v19 = vshll.u32 %v13444_v36, 16  ;;  %v2885_v53 = vsel %vm13434_vm5, %v2718_v8, 0.0  ;;  %v2210_v58 = vpack.c.b16 %v2153_v13, %v2151_v35  ;;  %v3333_v37 = vor.u32 %v3332_v59, %v18223_v40  ;;  %v18225_v8 = vld [vmem:[#allocation16_spill] sm:$0xff] }
 0x37b   : > { %18219 = vst [vmem:[#allocation83_spill] sm:$0xff] %v13449_v11  ;;  %v2616_v16 = vpop.f32.mrf.mxu0  ;;  %v3334_v11 = vrot.slane %v3179_v27, 1  ;;  %v3178_v14 = vrot.slane %v3176_v23, 7  ;;  %vm2760_vm7 = vcmp.ge.s32.totalorder %v2744_v46, 0  ;;  %vm2772_vm8 = vcmp.lt.s32.totalorder %v2744_v46, 16  ;;  %v18230_v46 = vld [vmem:[#allocation48_spill] sm:$0xff] }
 0x37c   : > { %18220 = vst [vmem:[#allocation84_spill] sm:$0xff] %v13453_v30  ;;  %v11009_v30 = vpack.c.bf16 %v2885_v53, %v2884_v32  ;;  %v2617_v6 = vadd.f32 %v2616_v16, %v2518_v49  ;;  %v7429_v33 = vrot.slane %v17683_v19, 1  ;;  %v17684_v49 = vshrl.u32 %v13444_v36, 16  ;;  %v18229_v16 = vld [vmem:[#allocation35_spill] sm:$0xff]  ;;  %vm13501_vm9 = vmand %vm2760_vm7, %vm2772_vm8 }
 0x37d   : > { %v13472_v60 = vsel %vm757_vm3, %v3333_v37, %v3334_v11  ;;  %v3181_v38 = vor.u32 %v3179_v27, %v3178_v14  ;;  %v3442_v27 = vunpack.c.h.b16 %v13386_v4  ;;  %v2520_v40 = vadd.f32 %v18230_v46, %v18229_v16  ;;  %v13505_v14 = vpop.f32.mrf.mxu3  ;;  %vm2811_vm11 = vmand %vm13501_vm9, %vm2790_vm10 }
 0x37e   : > { %11138 = vst [vmem:[#allocation2 + $0x40] sm:$0xff] %v11009_v30   ;;  %v2679_v13 = vadd.f32 %v2617_v6, %v18225_v8  ;;  %2655 = vmatmul.bf16.gmra.mxu0 %v2210_v58  ;;  %v3441_v35 = vunpack.c.l.b16 %v13472_v60  ;;  %v13477_v32 = vsel %vm757_vm3, %v7428_v1, %v7429_v33  ;;  %v18227_v1 = vsel %vm11560_vm6, %v13375_v5, %v13179_v15  ;;  %v18235_v8 = vld [vmem:[#allocation19_spill] sm:$0xff]  ;;  %vm13632_vm1 = vmand %vm13501_vm9, %vm2831_vm14 }
 0x37f   : > { %18224 = vst [vmem:[#allocation39_spill] sm:$0xff] %v13472_v60  ;;  %v13481_v59 = vsel %vm516_vm0, %v13355_v61, %v3181_v38  ;;  %v13492_v53 = vunpack.c.l.b16 %v18227_v1  ;;  %v7431_v61 = vor.u32 %v7429_v33, %v17684_v49  ;;  %v7517_v58 = vunpack.c.l.b16 %v13477_v32  ;;  %v18234_v38 = vld [vmem:[#allocation28_spill] sm:$0xff] }
 0x380   : > { %18226 = vst [vmem:[#allocation50_spill] sm:$0xff] %v13477_v32  ;;  %v3593_v30 = vpack.c.b16 %v3441_v35, %v13281_v45  ;;  %v17685_v6 = vunpack.c.l.b16 %v13481_v59  ;;  %v2104_v35 = vadd.f32 %v18235_v8, %v18234_v38  ;;  %v13515_v1 = vpop.f32.mrf.mxu2  ;;  %v7519_v19 = vunpack.c.h.b16 %v13477_v32 }
 0x381   : > { %18228 = vst [vmem:[#allocation16_spill] sm:$0xff] %v13492_v53  ;;  %v13508_v5 = vpack.c.b16 %v7517_v58, %v13492_v53  ;;  %v7475_v33 = vsel %vm11560_vm6, %v7431_v61, %v13421_v24  ;;  %v2719_v61 = vadd.f32 %v12794_v29, %v2679_v13 }
 0x382   : > { %4006 = vmatmul.bf16.gmra.mxu3 %v3593_v30  ;;  %v3594_v45 = vpack.c.b16 %v17685_v6, %v3442_v27  ;;  %v13518_v49 = vunpack.c.l.b16 %v7475_v33  ;;  %v3336_v6 = vor.u32 %v3334_v11, %v3176_v23  ;;  %v18238_v11 = vunpack.c.l.b16 %v13419_v2 }
 0x383   : > { %v2618_v15 = vpop.f32.mrf.mxu0  ;;  %18233 = vst [vmem:[#allocation35_spill] sm:$0xff] %v13508_v5 }
 0x384   : > { %v2619_v30 = vadd.f32 %v2618_v15, %v2520_v40  ;;  %3843 = vmatmul.bf16.gmra.mxu1 %v3594_v45  ;;  %18236 = vst [vmem:[#allocation48_spill] sm:$0xff] %v13518_v49  ;;  %v13529_v15 = vpack.c.b16 %v13518_v49, %v7519_v19  ;;  %v13547_v19 = vld [vmem:[%s17541_s2] ss:$0 sm:$0xff] }
 0x385   : > { %v2992_v27 = vld [vmem:[#allocation2 + $0x40] sm:$0xf]  ;;  %v2993_v16 = vld [vmem:[#allocation2 + $0x44] sm:$0xf] }
 0x386   : > { %v7145_v46 = vld [vmem:[#allocation2 + $0x40] sm:$0xf]  ;;  %v3064_v58 = vunpack.c.l.b16 %v2992_v27  ;;  %v13520_v5 = vunpack.c.l.b16 %v2993_v16  ;;  %v13522_v24 = vld [vmem:[#allocation2 + $0x44] sm:$0xf]  ;;  %v2680_v40 = vadd.f32 %v2619_v30, %v2104_v35  ;;  %18237 = vst [vmem:[#allocation28_spill] sm:$0xff] %v13529_v15  ;;  %v3388_v35 = vsel %vm11560_vm6, %v3336_v6, %v13416_v39 }
 0x387   : > { %v7205_v53 = vunpack.c.l.b16 %v7145_v46  ;;  %v13526_v45 = vunpack.c.l.b16 %v13522_v24  ;;  %v18241_v46 = vld [vmem:[#allocation25_spill] sm:$0xff]  ;;  %v2886_v15 = vsel %vm2811_vm11, %v2719_v61, 0.0  ;;  %v3445_v6 = vunpack.c.l.b16 %v3388_v35  ;;  %v13570_v61 = vpop.f32.mrf.mxu3 }
 0x388   : > { %v3094_v23 = vpack.c.b16 %v3064_v58, %v18238_v11  ;;  %v13539_v33 = vpack.c.b16 %v13520_v5, %v13520_v5  ;;  %v13542_v29 = vpack.c.b16 %v13520_v5, %v3064_v58  ;;  %v2720_v13 = vadd.f32 %v13547_v19, %v2680_v40  ;;  %v18242_v58 = vld [vmem:[#allocation45_spill] sm:$0xff] }
 0x389   : > { %v13551_v38 = vpack.c.b16 %v13526_v45, %v7205_v53  ;;  %v2523_v11 = vadd.f32 %v18242_v58, %v18241_v46 }
 0x38a   : > { %18239 = vst [vmem:[#allocation19_spill] sm:$0xff] %v13542_v29  ;;  %v3184_v8 = vshrl.u32 %v3094_v23, 16  ;;  %3932 = vmatmul.bf16.gmra.mxu2 %v3094_v23  ;;  %v3187_v30 = vshll.u32 %v3094_v23, 16  ;;  %v17696_v27 = vshll.u32 %v13539_v33, 16  ;;  %v2887_v49 = vsel %vm13501_vm9, %v2720_v13, 0.0  ;;  %v10759_v13 = vld [vmem:[%s17542_s3 + $0x58] sm:$0xff] }
 0x38b   : > { %18240 = vst [vmem:[#allocation85_spill] sm:$0xff] %v13551_v38  ;;  %v11014_v40 = vpack.c.bf16 %v2887_v49, %v2886_v15  ;;  %v2621_v32 = vpop.f32.mrf.mxu0  ;;  %v13565_v29 = vpack.c.b16 %v7205_v53, %v18243_v0  ;;  %v3191_v23 = vshrl.u32 %v13539_v33, 16  ;;  %v2745_v49 = vadd.s32 7, %v12780_v55  ;;  %v13579_v53 = vpop.f32.mrf.mxu2  ;;  %4379 = vmatpush.bf16.msrb.mxu2 %v10759_v13  ;;  %v10751_v13 = vld [vmem:[%s17542_s3 + $0x18] sm:$0xff] }
 0x38c   : > { %v13561_v36 = vrot.slane %v3184_v8, 7  ;;  %v3337_v38 = vrot.slane %v3187_v30, 1  ;;  %v2622_v39 = vadd.f32 %v2621_v32, %v2523_v11  ;;  %v3339_v46 = vrot.slane %v17696_v27, 1  ;;  %18246 = vst [vmem:[#allocation45_spill] sm:$0xff] %v13579_v53  ;;  %v18248_v27 = vld [vmem:[#allocation51_spill] sm:$0xff]  ;;  %4295 = vmatpush.bf16.msrb.mxu1 %v10751_v13  ;;  %v18269_v53 = vld [vmem:[#allocation69_spill] sm:$0xff] }
 0x38d   : > { %18244 = vst [vmem:[#allocation25_spill] sm:$0xff] %v13565_v29  ;;  %v3443_v32 = vunpack.c.h.b16 %v13472_v60  ;;  %vm2761_vm12 = vcmp.ge.s32.totalorder %v2745_v49, 0  ;;  %vm2773_vm13 = vcmp.lt.s32.totalorder %v2745_v49, 16  ;;  %v3434_v13 = vunpack.c.l.b16 %v13279_v25 }
 0x38e   : > { %11139 = vst [vmem:[#allocation2 + $0x48] sm:$0xff] %v11014_v40   ;;  %v3338_v15 = vor.u32 %v3337_v38, %v3184_v8  ;;  %v2681_v0 = vadd.f32 %v2622_v39, %v18245_v22  ;;  %4769 = vmatmul.bf16.vlgmr.msrb.gmra.mxu0 %v13068_v21  ;;  %v3341_v35 = vor.u32 %v3339_v46, %v3191_v23  ;;  %vm13612_vm15 = vmand %vm2761_vm12, %vm2773_vm13 }
 0x38f   : > { %v3189_v58 = vor.u32 %v3187_v30, %v13561_v36  ;;  %v3596_v8 = vpack.c.b16 %v3445_v6, %v3443_v32  ;;  %v13589_v39 = vpack.c.b16 %v13526_v45, %v13526_v45  ;;  %vm13644_vm4 = vmand %vm13612_vm15, %vm2790_vm10 }
 0x390   : > { %v13583_v11 = vsel %vm757_vm3, %v3338_v15, %v3339_v46  ;;  %v3389_v30 = vsel %vm11560_vm6, %v3341_v35, %v2993_v16  ;;  %v18249_v46 = vld [vmem:[#allocation42_spill] sm:$0xff]  ;;  %v18251_v16 = vshll.u32 %v13565_v29, 16  ;;  %vm13748_vm5 = vmand %vm13612_vm15, %vm2831_vm14 }
 0x391   : > { %v3447_v40 = vunpack.c.l.b16 %v13583_v11  ;;  %18247 = vst [vmem:[#allocation40_spill] sm:$0xff] %v13589_v39  ;;  %v3449_v22 = vunpack.c.h.b16 %v13583_v11  ;;  %v2525_v15 = vadd.f32 %v18249_v46, %v18248_v27  ;;  %v13599_v32 = vunpack.c.l.b16 %v3389_v30  ;;  %v18253_v27 = vld [vmem:[#allocation7_spill] sm:$0xff] }
 0x392   : > { %4011 = vmatmul.bf16.gmra.mxu3 %v3596_v8  ;;  %v13606_v49 = vsel %vm11528_vm2, %v13419_v2, %v3189_v58  ;;  %v7432_v35 = vrot.slane %v18251_v16, 1  ;;  %v2109_v8 = vadd.f32 %v18253_v27, %v18252_v62  ;;  %v2721_v27 = vadd.f32 %v13547_v19, %v2681_v0  ;;  %v13638_v62 = vpop.f32.mrf.mxu3 }
 0x393   : > { %v13601_v38 = vpack.c.b16 %v3447_v40, %v3445_v6  ;;  %v2623_v60 = vpop.f32.mrf.mxu0  ;;  %v13620_v30 = vpack.c.b16 %v13599_v32, %v3449_v22  ;;  %18259 = vst [vmem:[#allocation20_spill] sm:$0xff] %v13638_v62  ;;  %v13656_v56 = vpop.f32.mrf.mxu2  ;;  %v18267_v21 = vshll.u32 %v13589_v39, 16  ;;  %v18268_v62 = vld [vmem:[#allocation61_spill] sm:$0xff]  ;;  %v18272_v22 = vunpack.c.l.b16 %v13132_v12 }
 0x394   : > { %v2624_v46 = vadd.f32 %v2623_v60, %v2525_v15  ;;  %3848 = vmatmul.bf16.gmra.mxu1 %v13606_v49 }
 0x395   : > { %18250 = vst [vmem:[#allocation51_spill] sm:$0xff] %v13601_v38  ;;  %v2994_v6 = vld [vmem:[#allocation2 + $0x48] sm:$0xf]  ;;  %v13617_v40 = vld [vmem:[#allocation2 + $0x4c] sm:$0xf]  ;;  %v3193_v38 = vrot.slane %v3191_v23, 7 }
 0x396   : > { %18256 = vst [vmem:[#allocation42_spill] sm:$0xff] %v13620_v30  ;;  %v3066_v58 = vunpack.c.l.b16 %v2994_v6  ;;  %v17710_v16 = vunpack.c.l.b16 %v13617_v40  ;;  %v7147_v60 = vld [vmem:[#allocation2 + $0x48] sm:$0xf]  ;;  %v13625_v15 = vld [vmem:[#allocation2 + $0x4c] sm:$0xf]  ;;  %v2682_v2 = vadd.f32 %v2624_v46, %v2109_v8  ;;  %v18263_v46 = vshrl.u32 %v13565_v29, 16 }
 0x397   : > { %v7207_v30 = vunpack.c.l.b16 %v7147_v60  ;;  %v18264_v9 = vunpack.c.l.b16 %v13625_v15 }
 0x398   : > { %v13650_v37 = vpack.c.b16 %v17710_v16, %v3066_v58  ;;  %v3600_v8 = vpack.c.b16 %v3066_v58, %v13520_v5  ;;  %v7433_v60 = vor.u32 %v7432_v35, %v18263_v46  ;;  %v2722_v23 = vadd.f32 %v13547_v19, %v2682_v2 }
 0x399   : > { %v13660_v42 = vpack.c.b16 %v18264_v9, %v7207_v30  ;;  %v13663_v47 = vpack.c.b16 %v7207_v30, %v13526_v45  ;;  %v7434_v16 = vrot.slane %v18267_v21, 1  ;;  %v2528_v5 = vadd.f32 %v18269_v53, %v18268_v62 }
 0x39a   : > { %18262 = vst [vmem:[#allocation7_spill] sm:$0xff] %v13650_v37  ;;  %v17714_v58 = vshrl.u32 %v13650_v37, 16  ;;  %3937 = vmatmul.bf16.gmra.mxu2 %v3600_v8  ;;  %v18270_v35 = vshll.u32 %v13539_v33, 16  ;;  %v17713_v46 = vshrl.u32 %v13589_v39, 16  ;;  %v2888_v9 = vsel %vm13632_vm1, %v2721_v27, 0.0 }
 0x39b   : > { %18265 = vst [vmem:[#allocation86_spill] sm:$0xff] %v13660_v42  ;;  %v2889_v45 = vsel %vm13644_vm4, %v2722_v23, 0.0  ;;  %v17711_v30 = vshll.u32 %v13660_v42, 16  ;;  %v13679_v21 = vsel %vm757_vm3, %v7433_v60, %v7434_v16  ;;  %v3202_v33 = vshll.u32 %v13650_v37, 16 }
 0x39c   : > { %18266 = vst [vmem:[#allocation87_spill] sm:$0xff] %v13663_v47  ;;  %v3196_v2 = vor.u32 %v18270_v35, %v3193_v38  ;;  %v11019_v53 = vpack.c.bf16 %v2889_v45, %v2888_v9  ;;  %v13683_v62 = vrot.slane %v17714_v58, 7  ;;  %v2626_v38 = vpop.f32.mrf.mxu0  ;;  %v13688_v27 = vpack.c.b16 %v3434_v13, %v18272_v22  ;;  %v18274_v9 = vld [vmem:[#allocation26_spill] sm:$0xff]  ;;  %v13723_v22 = vpop.f32.mrf.mxu2  ;;  %v18453_v34 = vld [vmem:[#allocation51_spill] sm:$0xff] }
 0x39d   : > { %18271 = vst [vmem:[#allocation61_spill] sm:$0xff] %v13679_v21  ;;  %v2627_v8 = vadd.f32 %v2626_v38, %v2528_v5  ;;  %v13692_v23 = vor.u32 %v7434_v16, %v17713_v46  ;;  %v17712_v35 = vshrl.u32 %v13660_v42, 16  ;;  %v7437_v5 = vrot.slane %v17711_v30, 1  ;;  %v18275_v38 = vld [vmem:[#allocation77_spill] sm:$0xff] }
 0x39e   : > { %18273 = vst [vmem:[#allocation69_spill] sm:$0xff] %v13688_v27  ;;  %v3204_v0 = vor.u32 %v3202_v33, %v13683_v62  ;;  %v13697_v60 = vsel %vm516_vm0, %v13561_v36, %v3196_v2  ;;  %4774 = vmatmul.bf16.gmra.mxu0 %v13688_v27 }
 0x39f   : > { %11140 = vst [vmem:[#allocation2 + $0x50] sm:$0xff] %v11019_v53   ;;  %v2683_v12 = vadd.f32 %v2627_v8, %v18274_v9  ;;  %v13714_v36 = vor.u32 %v7437_v5, %v17712_v35  ;;  %v17716_v2 = vunpack.c.l.b16 %v13697_v60  ;;  %v13718_v53 = vpop.f32.mrf.mxu3  ;;  %v2530_v8 = vadd.f32 %v12994_v44, %v18275_v38  ;;  %v18276_v9 = vld [vmem:[#allocation46_spill] sm:$0xff]  ;;  %v13735_v44 = vpop.f32.mrf.mxu1 }
 0x3a0   : > { %v13710_v13 = vsel %vm11528_vm2, %v2994_v6, %v3204_v0  ;;  %v18277_v5 = vld [vmem:[#allocation14_spill] sm:$0xff]  ;;  %v18280_v38 = vunpack.c.l.b16 %v13617_v40 }
 0x3a1   : > { %v3452_v45 = vunpack.c.l.b16 %v13710_v13  ;;  %v2114_v30 = vadd.f32 %v18277_v5, %v18276_v9  ;;  %v2723_v9 = vadd.f32 %v13547_v19, %v2683_v12  ;;  %v18284_v12 = vunpack.c.l.b16 %v13625_v15 }
 0x3a2   : > { %4016 = vmatmul.bf16.gmra.mxu3 %v13583_v11 }
 0x3a3   : > { %v3599_v6 = vpack.c.b16 %v3452_v45, %v17716_v2 }
 0x3a4   : > { %v2628_v0 = vpop.f32.mrf.mxu0 }
 0x3a5   : > { %v2629_v35 = vadd.f32 %v2628_v0, %v2530_v8  ;;  %3853 = vmatmul.bf16.gmra.mxu1 %v3599_v6  ;;  %v3342_v6 = vrot.slane %v3202_v33, 1  ;;  %v3436_v33 = vunpack.c.h.b16 %v13279_v25  ;;  %v2890_v25 = vsel %vm13612_vm15, %v2723_v9, 0.0 }
 0x3a6   : > { %v13729_v46 = vld [vmem:[#allocation2 + $0x50] sm:$0xf]  ;;  %v13731_v16 = vld [vmem:[#allocation2 + $0x54] sm:$0xf] }
 0x3a7   : > { %v13733_v58 = vld [vmem:[#allocation2 + $0x50] sm:$0xf]  ;;  %v3068_v11 = vunpack.c.l.b16 %v13729_v46  ;;  %v13739_v21 = vld [vmem:[#allocation2 + $0x54] sm:$0xf]  ;;  %v2684_v8 = vadd.f32 %v2629_v35, %v2114_v30  ;;  %v18281_v42 = vunpack.c.l.b16 %v13731_v16 }
 0x3a8   : > { %v7209_v45 = vunpack.c.l.b16 %v13733_v58  ;;  %v18286_v29 = vunpack.c.l.b16 %v13739_v21 }
 0x3a9   : > { %v3097_v2 = vpack.c.b16 %v3068_v11, %v3068_v11  ;;  %v3603_v47 = vpack.c.b16 %v3068_v11, %v18280_v38  ;;  %v13756_v39 = vpack.c.b16 %v18281_v42, %v3068_v11  ;;  %v2724_v35 = vadd.f32 %v13547_v19, %v2684_v8 }
 0x3aa   : > { %v13758_v30 = vpack.c.b16 %v7209_v45, %v7209_v45  ;;  %v13764_v0 = vpack.c.b16 %v7209_v45, %v18284_v12  ;;  %v13768_v27 = vpack.c.b16 %v18286_v29, %v7209_v45  ;;  %v2533_v11 = vadd.f32 %v13058_v48, %v13000_v18  ;;  %v13778_v12 = vpop.f32.mrf.mxu3 }
 0x3ab   : > { %18282 = vst [vmem:[#allocation26_spill] sm:$0xff] %v13756_v39  ;;  %v3209_v40 = vshll.u32 %v3097_v2, 16  ;;  %3942 = vmatmul.bf16.gmra.mxu2 %v3603_v47  ;;  %v3206_v38 = vshrl.u32 %v3097_v2, 16  ;;  %v2891_v15 = vsel %vm13748_vm5, %v2724_v35, 0.0  ;;  %v2746_v8 = vadd.s32 8, %v12780_v55 }
 0x3ac   : > { %18283 = vst [vmem:[#allocation77_spill] sm:$0xff] %v13758_v30  ;;  %v11024_v29 = vpack.c.bf16 %v2891_v15, %v2890_v25  ;;  %v2631_v45 = vpop.f32.mrf.mxu0  ;;  %v18288_v47 = vshrl.u32 %v13650_v37, 16  ;;  %v3903_v39 = vpop.f32.mrf.mxu2  ;;  %v18289_v18 = vunpack.c.l.b16 %v13367_v50  ;;  %v18290_v63 = vshll.u32 %v13758_v30, 16  ;;  %v18292_v15 = vld [vmem:[#allocation41_spill] sm:$0xff] }
 0x3ad   : > { %18285 = vst [vmem:[#allocation46_spill] sm:$0xff] %v13764_v0  ;;  %v3208_v42 = vrot.slane %v3206_v38, 7  ;;  %v2632_v0 = vadd.f32 %v2631_v45, %v2533_v11  ;;  %v3819_v5 = vpop.f32.mrf.mxu1  ;;  %vm2762_vm7 = vcmp.ge.s32.totalorder %v2746_v8, 0  ;;  %vm2774_vm8 = vcmp.lt.s32.totalorder %v2746_v8, 16 }
 0x3ae   : > { %18287 = vst [vmem:[#allocation14_spill] sm:$0xff] %v13768_v27  ;;  %v3343_v2 = vor.u32 %v3342_v6, %v18288_v47  ;;  %v3344_v27 = vrot.slane %v3209_v40, 1  ;;  %v13784_v48 = vpack.c.b16 %v18289_v18, %v3436_v33  ;;  %v7439_v9 = vrot.slane %v18290_v63, 1  ;;  %v10758_v6 = vld [vmem:[%s17542_s3 + $0x50] sm:$0xff]  ;;  %v18296_v63 = vld [vmem:[#allocation55_spill] sm:$0xff]  ;;  %vm13829_vm9 = vmand %vm2762_vm7, %vm2774_vm8 }
 0x3af   : > { %11141 = vst [vmem:[#allocation2 + $0x58] sm:$0xff] %v11024_v29   ;;  %v3211_v25 = vor.u32 %v3209_v40, %v3208_v42  ;;  %v2685_v11 = vadd.f32 %v2632_v0, %v18292_v15  ;;  %v3904_v45 = vadd.f32 %v3903_v39, %v3819_v5  ;;  %4380 = vmatpush.bf16.msrb.mxu2 %v10758_v6  ;;  %v10750_v40 = vld [vmem:[%s17542_s3 + $0x10] sm:$0xff]  ;;  %v17727_v42 = vshrl.u32 %v13758_v30, 16  ;;  %vm2817_vm11 = vmand %vm13829_vm9, %vm2790_vm10 }
 0x3b0   : > { %v13789_v35 = vsel %vm757_vm3, %v3343_v2, %v3344_v27  ;;  %4779 = vmatmul.bf16.gmra.mxu0 %v13784_v48  ;;  %v13807_v0 = vsel %vm757_vm3, %v13714_v36, %v7439_v9  ;;  %v3454_v29 = vunpack.c.h.b16 %v13710_v13  ;;  %4296 = vmatpush.bf16.msrb.mxu1 %v10750_v40  ;;  %v18298_v6 = vld [vmem:[#allocation21_spill] sm:$0xff]  ;;  %vm13946_vm1 = vmand %vm13829_vm9, %vm2831_vm14 }
 0x3b1   : > { %18291 = vst [vmem:[#allocation88_spill] sm:$0xff] %v13789_v35  ;;  %v3453_v50 = vunpack.c.l.b16 %v13789_v35  ;;  %v13799_v33 = vsel %vm516_vm0, %v13683_v62, %v3211_v25  ;;  %v18294_v62 = vsel %vm11560_vm6, %v13692_v23, %v13522_v24  ;;  %v7441_v18 = vor.u32 %v7439_v9, %v17727_v42  ;;  %v18297_v25 = vld [vmem:[#allocation31_spill] sm:$0xff] }
 0x3b2   : > { %18293 = vst [vmem:[#allocation41_spill] sm:$0xff] %v13807_v0  ;;  %v17728_v47 = vunpack.c.l.b16 %v13799_v33  ;;  %v13817_v2 = vunpack.c.l.b16 %v18294_v62  ;;  %v7529_v36 = vunpack.c.l.b16 %v13807_v0  ;;  %v2119_v15 = vadd.f32 %v18298_v6, %v18297_v25 }
 0x3b3   : > { %v3601_v39 = vpack.c.b16 %v3453_v50, %v13599_v32  ;;  %v2535_v32 = vadd.f32 %v18296_v63, %v13062_v10  ;;  %v3987_v50 = vpop.f32.mrf.mxu3  ;;  %v3346_v9 = vor.u32 %v3344_v27, %v3206_v38  ;;  %v7477_v10 = vsel %vm11560_vm6, %v7441_v18, %v13733_v58 }
 0x3b4   : > { %18295 = vst [vmem:[#allocation89_spill] sm:$0xff] %v13817_v2  ;;  %v3602_v5 = vpack.c.b16 %v17728_v47, %v3454_v29  ;;  %v2633_v23 = vpop.f32.mrf.mxu0  ;;  %v13834_v40 = vpack.c.b16 %v7529_v36, %v13817_v2  ;;  %v13839_v29 = vadd.f32 %v3987_v50, %v3904_v45  ;;  %v3905_v62 = vpop.f32.mrf.mxu2  ;;  %v7531_v6 = vunpack.c.h.b16 %v13807_v0 }
 0x3b5   : > { %4021 = vmatmul.bf16.gmra.mxu3 %v3601_v39  ;;  %v2634_v39 = vadd.f32 %v2633_v23, %v2535_v32  ;;  %v13842_v42 = vunpack.c.l.b16 %v7477_v10  ;;  %v2725_v27 = vadd.f32 %v13547_v19, %v2685_v11  ;;  %v3821_v38 = vpop.f32.mrf.mxu1  ;;  %v18306_v11 = vunpack.c.l.b16 %v13731_v16 }
 0x3b6   : > { %18301 = vst [vmem:[#allocation55_spill] sm:$0xff] %v13834_v40  ;;  %3858 = vmatmul.bf16.gmra.mxu1 %v3602_v5  ;;  %v2998_v8 = vld [vmem:[#allocation2 + $0x58] sm:$0xf]  ;;  %v2999_v63 = vld [vmem:[#allocation2 + $0x5c] sm:$0xf]  ;;  %v13849_v18 = vadd.f32 %v3905_v62, %v3821_v38  ;;  %v18309_v38 = vld [vmem:[#allocation24_spill] sm:$0xff] }
 0x3b7   : > { %18302 = vst [vmem:[#allocation31_spill] sm:$0xff] %v13839_v29  ;;  %v7151_v25 = vld [vmem:[#allocation2 + $0x58] sm:$0xf]  ;;  %v3070_v36 = vunpack.c.l.b16 %v2998_v8  ;;  %v13845_v47 = vunpack.c.l.b16 %v2999_v63  ;;  %v13847_v58 = vld [vmem:[#allocation2 + $0x5c] sm:$0xf]  ;;  %v2686_v45 = vadd.f32 %v2634_v39, %v2119_v15  ;;  %v13855_v5 = vpack.c.b16 %v13842_v42, %v7531_v6 }
 0x3b8   : > { %18303 = vst [vmem:[#allocation21_spill] sm:$0xff] %v13842_v42  ;;  %v7211_v40 = vunpack.c.l.b16 %v7151_v25  ;;  %v13852_v32 = vunpack.c.l.b16 %v13847_v58  ;;  %v3390_v39 = vsel %vm11560_vm6, %v3346_v9, %v13729_v46 }
 0x3b9   : > { %18304 = vst [vmem:[#allocation90_spill] sm:$0xff] %v13849_v18  ;;  %v3098_v23 = vpack.c.b16 %v3070_v36, %v18306_v11  ;;  %v13865_v50 = vpack.c.b16 %v13845_v47, %v13845_v47  ;;  %v13868_v15 = vpack.c.b16 %v13845_v47, %v3070_v36  ;;  %v2726_v10 = vadd.f32 %v13547_v19, %v2686_v45 }
 0x3ba   : > { %18305 = vst [vmem:[#allocation91_spill] sm:$0xff] %v13855_v5  ;;  %v13875_v62 = vpack.c.b16 %v13852_v32, %v7211_v40  ;;  %v2538_v11 = vadd.f32 %v13138_v28, %v18309_v38  ;;  %v2892_v5 = vsel %vm2817_vm11, %v2725_v27, 0.0  ;;  %v2747_v45 = vadd.s32 9, %v12780_v55  ;;  %v18312_v38 = vld [vmem:[#allocation34_spill] sm:$0xff] }
 0x3bb   : > { %18307 = vst [vmem:[#allocation92_spill] sm:$0xff] %v13868_v15  ;;  %v3214_v8 = vshrl.u32 %v3098_v23, 16  ;;  %3947 = vmatmul.bf16.gmra.mxu2 %v3098_v23  ;;  %v3217_v25 = vshll.u32 %v3098_v23, 16  ;;  %v17739_v6 = vshll.u32 %v13865_v50, 16  ;;  %v2893_v36 = vsel %vm13829_vm9, %v2726_v10, 0.0 }
 0x3bc   : > { %18308 = vst [vmem:[#allocation93_spill] sm:$0xff] %v13875_v62  ;;  %v11029_v42 = vpack.c.bf16 %v2893_v36, %v2892_v5  ;;  %v2636_v0 = vpop.f32.mrf.mxu0  ;;  %v3457_v46 = vunpack.c.l.b16 %v3390_v39  ;;  %v3908_v30 = vpop.f32.mrf.mxu2  ;;  %v3221_v23 = vshrl.u32 %v13865_v50, 16  ;;  %v18310_v28 = vunpack.c.l.b16 %v13739_v21 }
 0x3bd   : > { %v13883_v9 = vrot.slane %v3214_v8, 7  ;;  %v3347_v62 = vrot.slane %v3217_v25, 1  ;;  %v2637_v2 = vadd.f32 %v2636_v0, %v2538_v11  ;;  %v3349_v15 = vrot.slane %v17739_v6, 1 }
 0x3be   : > { %v13890_v27 = vpack.c.b16 %v7211_v40, %v18310_v28  ;;  %11142 = vst [vmem:[#allocation2 + $0x60] sm:$0xff] %v11029_v42   ;;  %v3455_v39 = vunpack.c.h.b16 %v13789_v35  ;;  %vm2763_vm12 = vcmp.ge.s32.totalorder %v2747_v45, 0  ;;  %vm2775_vm13 = vcmp.lt.s32.totalorder %v2747_v45, 16 }
 0x3bf   : > { %v3348_v10 = vor.u32 %v3347_v62, %v3214_v8  ;;  %v2687_v5 = vadd.f32 %v2637_v2, %v18312_v38  ;;  %v3351_v36 = vor.u32 %v3349_v15, %v3221_v23  ;;  %v3219_v0 = vor.u32 %v3217_v25, %v13883_v9  ;;  %v18315_v38 = vld [vmem:[#allocation49_spill] sm:$0xff]  ;;  %vm13924_vm15 = vmand %vm2763_vm12, %vm2775_vm13 }
 0x3c0   : > { %18311 = vst [vmem:[#allocation24_spill] sm:$0xff] %v13890_v27  ;;  %4784 = vmatmul.bf16.gmra.mxu0 %v13386_v4  ;;  %v3604_v37 = vpack.c.b16 %v3457_v46, %v3455_v39  ;;  %v13906_v8 = vpack.c.b16 %v13852_v32, %v13852_v32  ;;  %vm13958_vm4 = vmand %vm13924_vm15, %vm2790_vm10 }
 0x3c1   : > { %v13897_v11 = vsel %vm757_vm3, %v3348_v10, %v3349_v15  ;;  %v3824_v42 = vpop.f32.mrf.mxu1  ;;  %v3391_v62 = vsel %vm11560_vm6, %v3351_v36, %v2999_v63  ;;  %v2540_v15 = vadd.f32 %v13221_v26, %v13151_v43  ;;  %v18314_v10 = vld [vmem:[#allocation18_spill] sm:$0xff]  ;;  %v13919_v63 = vsel %vm11528_vm2, %v13731_v16, %v3219_v0  ;;  %vm14067_vm5 = vmand %vm13924_vm15, %vm2831_vm14 }
 0x3c2   : > { %v3459_v21 = vunpack.c.l.b16 %v13897_v11  ;;  %v3461_v2 = vunpack.c.h.b16 %v13897_v11  ;;  %18313 = vst [vmem:[#allocation34_spill] sm:$0xff] %v13906_v8  ;;  %v13910_v25 = vadd.f32 %v3908_v30, %v3824_v42  ;;  %v13912_v28 = vunpack.c.l.b16 %v3391_v62 }
 0x3c3   : > { %v2124_v39 = vadd.f32 %v18315_v38, %v18314_v10  ;;  %v2727_v38 = vadd.f32 %v13547_v19, %v2687_v5  ;;  %v3446_v62 = vunpack.c.l.b16 %v13606_v49  ;;  %v18332_v5 = vunpack.c.l.b16 %v13481_v59  ;;  %v10749_v59 = vld [vmem:[%s17542_s3 + $0x8] sm:$0xff] }
 0x3c4   : > { %v2638_v6 = vpop.f32.mrf.mxu0  ;;  %v13921_v36 = vpack.c.b16 %v3459_v21, %v3457_v46  ;;  %v3910_v43 = vpop.f32.mrf.mxu2  ;;  %v13932_v42 = vpack.c.b16 %v13912_v28, %v3461_v2  ;;  %v18320_v46 = vshll.u32 %v13890_v27, 16  ;;  %v3223_v21 = vrot.slane %v3221_v23, 7  ;;  %4297 = vmatpush.bf16.msrb.mxu1 %v10749_v59  ;;  %v18335_v59 = vld [vmem:[#allocation32_spill] sm:$0xff] }
 0x3c5   : > { %4026 = vmatmul.bf16.gmra.mxu3 %v3604_v37  ;;  %v2639_v40 = vadd.f32 %v2638_v6, %v2540_v15  ;;  %v3000_v37 = vld [vmem:[#allocation2 + $0x60] sm:$0xf]  ;;  %v13929_v30 = vld [vmem:[#allocation2 + $0x64] sm:$0xf]  ;;  %v2543_v23 = vadd.f32 %v13294_v57, %v13229_v52 }
 0x3c6   : > { %18316 = vst [vmem:[#allocation18_spill] sm:$0xff] %v13921_v36  ;;  %3863 = vmatmul.bf16.gmra.mxu1 %v13919_v63  ;;  %v7442_v0 = vrot.slane %v18320_v46, 1  ;;  %v3072_v6 = vunpack.c.l.b16 %v3000_v37  ;;  %v7153_v15 = vld [vmem:[#allocation2 + $0x60] sm:$0xf]  ;;  %v13939_v10 = vld [vmem:[#allocation2 + $0x64] sm:$0xf]  ;;  %v18325_v24 = vunpack.c.l.b16 %v13929_v30 }
 0x3c7   : > { %18319 = vst [vmem:[#allocation49_spill] sm:$0xff] %v13932_v42  ;;  %v2688_v46 = vadd.f32 %v2639_v40, %v2124_v39  ;;  %v7213_v16 = vunpack.c.l.b16 %v7153_v15  ;;  %v17744_v45 = vunpack.c.l.b16 %v13939_v10  ;;  %v18328_v15 = vshrl.u32 %v13890_v27, 16 }
 0x3c8   : > { %v13964_v42 = vpack.c.b16 %v18325_v24, %v3072_v6  ;;  %v3608_v40 = vpack.c.b16 %v3072_v6, %v13845_v47  ;;  %v18329_v24 = vshll.u32 %v13865_v50, 16  ;;  %v17747_v47 = vshrl.u32 %v13906_v8, 16 }
 0x3c9   : > { %v2728_v39 = vadd.f32 %v13547_v19, %v2688_v46  ;;  %v13970_v52 = vpack.c.b16 %v17744_v45, %v7213_v16  ;;  %v13973_v57 = vpack.c.b16 %v7213_v16, %v13852_v32  ;;  %v7443_v36 = vor.u32 %v7442_v0, %v18328_v15  ;;  %v3826_v35 = vpop.f32.mrf.mxu1 }
 0x3ca   : > { %v17748_v18 = vshrl.u32 %v13964_v42, 16  ;;  %v3226_v29 = vor.u32 %v18329_v24, %v3223_v21  ;;  %v18330_v6 = vshll.u32 %v13906_v8, 16  ;;  %v2894_v45 = vsel %vm13946_vm1, %v2727_v38, 0.0 }
 0x3cb   : > { %18326 = vst [vmem:[#allocation94_spill] sm:$0xff] %v13970_v52  ;;  %3952 = vmatmul.bf16.gmra.mxu2 %v3608_v40  ;;  %v2895_v32 = vsel %vm13958_vm4, %v2728_v39, 0.0  ;;  %v13987_v16 = vadd.f32 %v3910_v43, %v3826_v35  ;;  %v17745_v0 = vshll.u32 %v13970_v52, 16  ;;  %v3232_v21 = vshll.u32 %v13964_v42, 16  ;;  %v14006_v43 = vpop.f32.mrf.mxu3 }
 0x3cc   : > { %18327 = vst [vmem:[#allocation95_spill] sm:$0xff] %v13973_v57  ;;  %v7444_v46 = vrot.slane %v18330_v6, 1  ;;  %v11034_v15 = vpack.c.bf16 %v2895_v32, %v2894_v45  ;;  %v13992_v50 = vrot.slane %v17748_v18, 7  ;;  %v2641_v40 = vpop.f32.mrf.mxu0  ;;  %v3913_v38 = vpop.f32.mrf.mxu2  ;;  %v14000_v39 = vpack.c.b16 %v3446_v62, %v18332_v5 }
 0x3cd   : > { %v2642_v2 = vadd.f32 %v2641_v40, %v2543_v23  ;;  %v14011_v6 = vsel %vm516_vm0, %v13883_v9, %v3226_v29  ;;  %v17746_v62 = vshrl.u32 %v13970_v52, 16  ;;  %v7447_v23 = vrot.slane %v17745_v0, 1 }
 0x3ce   : > { %v13996_v24 = vsel %vm757_vm3, %v7443_v36, %v7444_v46  ;;  %v14004_v35 = vor.u32 %v7444_v46, %v17747_v47  ;;  %11143 = vst [vmem:[#allocation2 + $0x68] sm:$0xff] %v11034_v15   ;;  %v3234_v45 = vor.u32 %v3232_v21, %v13992_v50  ;;  %v10757_v36 = vld [vmem:[%s17542_s3 + $0x48] sm:$0xff]  ;;  %v17750_v40 = vunpack.c.l.b16 %v14011_v6 }
 0x3cf   : > { %18331 = vst [vmem:[#allocation96_spill] sm:$0xff] %v13996_v24  ;;  %v18333_v46 = vld [vmem:[#allocation52_spill] sm:$0xff]  ;;  %4381 = vmatpush.bf16.msrb.mxu2 %v10757_v36  ;;  %v14034_v15 = vor.u32 %v7447_v23, %v17746_v62 }
 0x3d0   : > { %v2689_v32 = vadd.f32 %v2642_v2, %v18333_v46  ;;  %4789 = vmatmul.bf16.gmra.mxu0 %v14000_v39  ;;  %v14030_v9 = vsel %vm11528_vm2, %v3000_v37, %v3234_v45  ;;  %v2545_v46 = vadd.f32 %v13388_v3, %v13310_v54  ;;  %v18334_v36 = vld [vmem:[#allocation36_spill] sm:$0xff] }
 0x3d1   : > { %v3464_v2 = vunpack.c.l.b16 %v14030_v9  ;;  %v3829_v5 = vpop.f32.mrf.mxu1  ;;  %v2129_v23 = vadd.f32 %v18335_v59, %v18334_v36  ;;  %v18341_v36 = vunpack.c.l.b16 %v13939_v10 }
 0x3d2   : > { %v14040_v0 = vadd.f32 %v3913_v38, %v3829_v5 }
 0x3d3   : > { %v3607_v37 = vpack.c.b16 %v3464_v2, %v17750_v40  ;;  %v18338_v40 = vunpack.c.l.b16 %v13929_v30  ;;  %v2548_v30 = vadd.f32 %v13457_v7, %v13396_v20  ;;  %v18345_v20 = vshrl.u32 %v13964_v42, 16 }
 0x3d4   : > { %v2643_v45 = vpop.f32.mrf.mxu0  ;;  %v3915_v47 = vpop.f32.mrf.mxu2 }
 0x3d5   : > { %4031 = vmatmul.bf16.gmra.mxu3 %v13897_v11  ;;  %v2644_v62 = vadd.f32 %v2643_v45, %v2545_v46  ;;  %v14047_v29 = vld [vmem:[#allocation2 + $0x68] sm:$0xf]  ;;  %v14049_v18 = vld [vmem:[#allocation2 + $0x6c] sm:$0xf]  ;;  %v3992_v54 = vpop.f32.mrf.mxu3  ;;  %v3352_v11 = vrot.slane %v3232_v21, 1  ;;  %v2729_v46 = vadd.f32 %v13547_v19, %v2689_v32 }
 0x3d6   : > { %3868 = vmatmul.bf16.gmra.mxu1 %v3607_v37  ;;  %v14051_v24 = vld [vmem:[#allocation2 + $0x68] sm:$0xf]  ;;  %v3074_v3 = vunpack.c.l.b16 %v14047_v29  ;;  %v14055_v2 = vld [vmem:[#allocation2 + $0x6c] sm:$0xf]  ;;  %v14060_v45 = vadd.f32 %v3992_v54, %v13910_v25 }
 0x3d7   : > { %v7215_v5 = vunpack.c.l.b16 %v14051_v24  ;;  %v2690_v37 = vadd.f32 %v2644_v62, %v2129_v23  ;;  %v18339_v62 = vunpack.c.l.b16 %v14049_v18  ;;  %v3448_v23 = vunpack.c.h.b16 %v13606_v49 }
 0x3d8   : > { %v14071_v59 = vpack.c.b16 %v3074_v3, %v3074_v3  ;;  %v3611_v38 = vpack.c.b16 %v3074_v3, %v18338_v40  ;;  %v18343_v52 = vunpack.c.l.b16 %v14055_v2  ;;  %v2896_v10 = vsel %vm13924_vm15, %v2729_v46, 0.0 }
 0x3d9   : > { %v14077_v32 = vpack.c.b16 %v18339_v62, %v3074_v3  ;;  %v14079_v25 = vpack.c.b16 %v7215_v5, %v7215_v5  ;;  %v2730_v54 = vadd.f32 %v13547_v19, %v2690_v37  ;;  %v14085_v57 = vpack.c.b16 %v7215_v5, %v18341_v36  ;;  %v3831_v40 = vpop.f32.mrf.mxu1 }
 0x3da   : > { %v14089_v8 = vpack.c.b16 %v18343_v52, %v7215_v5  ;;  %v3239_v3 = vshll.u32 %v14071_v59, 16  ;;  %v3236_v62 = vshrl.u32 %v14071_v59, 16  ;;  %v14100_v36 = vadd.f32 %v3915_v47, %v3831_v40 }
 0x3db   : > { %18340 = vst [vmem:[#allocation52_spill] sm:$0xff] %v14079_v25  ;;  %3957 = vmatmul.bf16.gmra.mxu2 %v3611_v38  ;;  %v2897_v37 = vsel %vm14067_vm5, %v2730_v54, 0.0  ;;  %v2748_v52 = vadd.s32 10, %v12780_v55  ;;  %v18346_v49 = vunpack.c.l.b16 %v13697_v60  ;;  %v18347_v46 = vshll.u32 %v14079_v25, 16 }
 0x3dc   : > { %18342 = vst [vmem:[#allocation36_spill] sm:$0xff] %v14085_v57  ;;  %v11039_v5 = vpack.c.bf16 %v2897_v37, %v2896_v10  ;;  %v2646_v7 = vpop.f32.mrf.mxu0  ;;  %v3354_v38 = vrot.slane %v3239_v3, 1  ;;  %v3238_v57 = vrot.slane %v3236_v62, 7  ;;  %v3918_v27 = vpop.f32.mrf.mxu2  ;;  %v18348_v10 = vld [vmem:[#allocation44_spill] sm:$0xff] }
 0x3dd   : > { %18344 = vst [vmem:[#allocation32_spill] sm:$0xff] %v14089_v8  ;;  %v3353_v8 = vor.u32 %v3352_v11, %v18345_v20  ;;  %v2647_v59 = vadd.f32 %v2646_v7, %v2548_v30  ;;  %v14107_v26 = vpack.c.b16 %v18346_v49, %v3448_v23  ;;  %v7449_v21 = vrot.slane %v18347_v46, 1  ;;  %v3994_v47 = vpop.f32.mrf.mxu3  ;;  %v18352_v46 = vld [vmem:[#allocation54_spill] sm:$0xff] }
 0x3de   : > { %11144 = vst [vmem:[#allocation2 + $0x70] sm:$0xff] %v11039_v5   ;;  %v3241_v40 = vor.u32 %v3239_v3, %v3238_v57  ;;  %v14116_v11 = vadd.f32 %v3994_v47, %v13987_v16  ;;  %vm2764_vm7 = vcmp.ge.s32.totalorder %v2748_v52, 0  ;;  %v17759_v30 = vshrl.u32 %v14079_v25, 16 }
 0x3df   : > { %v14112_v54 = vsel %vm757_vm3, %v3353_v8, %v3354_v38  ;;  %v2691_v37 = vadd.f32 %v2647_v59, %v18348_v10  ;;  %v14127_v8 = vsel %vm757_vm3, %v14034_v15, %v7449_v21  ;;  %vm2776_vm8 = vcmp.lt.s32.totalorder %v2748_v52, 16 }
 0x3e0   : > { %4794 = vmatmul.bf16.gmra.mxu0 %v14107_v26  ;;  %v3465_v60 = vunpack.c.l.b16 %v14112_v54  ;;  %v14122_v23 = vsel %vm516_vm0, %v13992_v50, %v3241_v40  ;;  %18349 = vst [vmem:[#allocation44_spill] sm:$0xff] %v14127_v8  ;;  %v3466_v16 = vunpack.c.h.b16 %v14030_v9  ;;  %v18350_v50 = vsel %vm11560_vm6, %v14004_v35, %v13847_v58  ;;  %v10771_v58 = vld [vmem:[%s17542_s3 + $0xb8] sm:$0xff]  ;;  %v10756_v35 = vld [vmem:[%s17542_s3 + $0x40] sm:$0xff]  ;;  %vm14158_vm9 = vmand %vm2764_vm7, %vm2776_vm8 }
 0x3e1   : > { %v17760_v3 = vunpack.c.l.b16 %v14122_v23  ;;  %v3834_v49 = vpop.f32.mrf.mxu1  ;;  %v14137_v5 = vunpack.c.l.b16 %v18350_v50  ;;  %v7451_v7 = vor.u32 %v7449_v21, %v17759_v30  ;;  %v7541_v15 = vunpack.c.l.b16 %v14127_v8  ;;  %v18353_v21 = vld [vmem:[#allocation56_spill] sm:$0xff]  ;;  %4459 = vmatpush.bf16.msrb.mxu3 %v10771_v58  ;;  %4382 = vmatpush.bf16.msrb.mxu2 %v10756_v35  ;;  %vm14192_vm11 = vmand %vm14158_vm9, %vm2790_vm10 }
 0x3e2   : > { %v3609_v57 = vpack.c.b16 %v3465_v60, %v13912_v28  ;;  %v2550_v28 = vadd.f32 %v13505_v14, %v13465_v17  ;;  %v14144_v20 = vadd.f32 %v3918_v27, %v3834_v49  ;;  %v2134_v47 = vadd.f32 %v18353_v21, %v18352_v46  ;;  %vm14301_vm1 = vmand %vm14158_vm9, %vm2831_vm14 }
 0x3e3   : > { %18351 = vst [vmem:[#allocation97_spill] sm:$0xff] %v14137_v5  ;;  %v3610_v59 = vpack.c.b16 %v17760_v3, %v3466_v16  ;;  %v14163_v27 = vpack.c.b16 %v7541_v15, %v14137_v5  ;;  %v7479_v40 = vsel %vm11560_vm6, %v7451_v7, %v14051_v24  ;;  %v3356_v16 = vor.u32 %v3354_v38, %v3236_v62 }
 0x3e4   : > { %v2648_v14 = vpop.f32.mrf.mxu0  ;;  %v3920_v60 = vpop.f32.mrf.mxu2  ;;  %v7543_v50 = vunpack.c.h.b16 %v14127_v8  ;;  %v14171_v46 = vunpack.c.l.b16 %v7479_v40  ;;  %v2731_v15 = vadd.f32 %v13547_v19, %v2691_v37  ;;  %v18361_v58 = vunpack.c.l.b16 %v14049_v18 }
 0x3e5   : > { %4036 = vmatmul.bf16.gmra.mxu3 %v3609_v57  ;;  %18356 = vst [vmem:[#allocation54_spill] sm:$0xff] %v14163_v27  ;;  %v2649_v10 = vadd.f32 %v2648_v14, %v2550_v28  ;;  %v3004_v57 = vld [vmem:[#allocation2 + $0x70] sm:$0xf]  ;;  %v14168_v49 = vld [vmem:[#allocation2 + $0x74] sm:$0xf]  ;;  %v3997_v21 = vpop.f32.mrf.mxu3  ;;  %v3392_v40 = vsel %vm11560_vm6, %v3356_v16, %v14047_v29 }
 0x3e6   : > { %3873 = vmatmul.bf16.gmra.mxu1 %v3610_v59  ;;  %v7157_v52 = vld [vmem:[#allocation2 + $0x70] sm:$0xf]  ;;  %v3076_v30 = vunpack.c.l.b16 %v3004_v57  ;;  %v14175_v3 = vunpack.c.l.b16 %v14168_v49  ;;  %v14177_v7 = vld [vmem:[#allocation2 + $0x74] sm:$0xf]  ;;  %v14180_v38 = vadd.f32 %v3997_v21, %v14040_v0  ;;  %v14186_v59 = vpack.c.b16 %v14171_v46, %v7543_v50 }
 0x3e7   : > { %v7217_v24 = vunpack.c.l.b16 %v7157_v52  ;;  %v2692_v62 = vadd.f32 %v2649_v10, %v2134_v47  ;;  %v14183_v28 = vunpack.c.l.b16 %v14177_v7 }
 0x3e8   : > { %18358 = vst [vmem:[#allocation98_spill] sm:$0xff] %v14186_v59  ;;  %v3102_v35 = vpack.c.b16 %v3076_v30, %v18361_v58  ;;  %v14200_v0 = vpack.c.b16 %v14175_v3, %v14175_v3  ;;  %v14203_v47 = vpack.c.b16 %v14175_v3, %v3076_v30  ;;  %v2553_v58 = vadd.f32 %v13570_v61, %v13515_v1 }
 0x3e9   : > { %18357 = vst [vmem:[#allocation56_spill] sm:$0xff] %v14183_v28  ;;  %v2732_v14 = vadd.f32 %v13547_v19, %v2692_v62  ;;  %v14210_v10 = vpack.c.b16 %v14183_v28, %v7217_v24  ;;  %v3836_v57 = vpop.f32.mrf.mxu1  ;;  %v2898_v30 = vsel %vm14192_vm11, %v2731_v15, 0.0  ;;  %v18365_v15 = vunpack.c.l.b16 %v14055_v2 }
 0x3ea   : > { %18362 = vst [vmem:[#allocation99_spill] sm:$0xff] %v14203_v47  ;;  %v3244_v52 = vshrl.u32 %v3102_v35, 16  ;;  %v3247_v50 = vshll.u32 %v3102_v35, 16  ;;  %v14219_v59 = vadd.f32 %v3920_v60, %v3836_v57  ;;  %v3251_v21 = vshrl.u32 %v14200_v0, 16 }
 0x3eb   : > { %18363 = vst [vmem:[#allocation100_spill] sm:$0xff] %v14210_v10  ;;  %3962 = vmatmul.bf16.gmra.mxu2 %v3102_v35  ;;  %v2899_v62 = vsel %vm14158_vm9, %v2732_v14, 0.0  ;;  %v3469_v10 = vunpack.c.l.b16 %v3392_v40  ;;  %v18364_v1 = vshll.u32 %v14200_v0, 16  ;;  %v14228_v37 = vpack.c.b16 %v7217_v24, %v18365_v15  ;;  %v10748_v40 = vld [vmem:[%s17542_s3] sm:$0xff] }
 0x3ec   : > { %v11044_v29 = vpack.c.bf16 %v2899_v62, %v2898_v30  ;;  %v2651_v16 = vpop.f32.mrf.mxu0  ;;  %v14221_v27 = vrot.slane %v3244_v52, 7  ;;  %v3357_v8 = vrot.slane %v3247_v50, 1  ;;  %v3923_v5 = vpop.f32.mrf.mxu2  ;;  %v2749_v14 = vadd.s32 11, %v12780_v55  ;;  %4298 = vmatpush.bf16.msrb.mxu1 %v10748_v40 }
 0x3ed   : > { %v2652_v35 = vadd.f32 %v2651_v16, %v2553_v58  ;;  %v3359_v61 = vrot.slane %v18364_v1, 1  ;;  %18366 = vst [vmem:[#allocation101_spill] sm:$0xff] %v14228_v37  ;;  %v3999_v60 = vpop.f32.mrf.mxu3  ;;  %v18367_v58 = vld [vmem:[#allocation57_spill] sm:$0xff]  ;;  %v3467_v2 = vunpack.c.h.b16 %v14112_v54  ;;  %v18368_v16 = vld [vmem:[#allocation12_spill] sm:$0xff] }
 0x3ee   : > { %11145 = vst [vmem:[#allocation2 + $0x78] sm:$0xff] %v11044_v29   ;;  %v3358_v57 = vor.u32 %v3357_v8, %v3244_v52  ;;  %v14236_v62 = vadd.f32 %v3999_v60, %v14100_v36  ;;  %v18369_v29 = vld [vmem:[#allocation58_spill] sm:$0xff]  ;;  %v3249_v55 = vor.u32 %v3247_v50, %v14221_v27  ;;  %v14248_v52 = vpack.c.b16 %v14183_v28, %v14183_v28  ;;  %v18370_v36 = vld [vmem:[#allocation45_spill] sm:$0xff] }
 0x3ef   : > { %v2693_v30 = vadd.f32 %v2652_v35, %v18367_v58  ;;  %v3361_v24 = vor.u32 %v3359_v61, %v3251_v21  ;;  %v2139_v1 = vadd.f32 %v18369_v29, %v18368_v16  ;;  %v18371_v35 = vld [vmem:[#allocation20_spill] sm:$0xff]  ;;  %v3612_v60 = vpack.c.b16 %v3469_v10, %v3467_v2 }
 0x3f0   : > { %4799 = vmatmul.bf16.gmra.mxu0 %v13710_v13  ;;  %v14244_v8 = vsel %vm757_vm3, %v3358_v57, %v3359_v61  ;;  %v2555_v15 = vadd.f32 %v18371_v35, %v18370_v36  ;;  %vm2765_vm12 = vcmp.ge.s32.totalorder %v2749_v14, 0  ;;  %vm2777_vm13 = vcmp.lt.s32.totalorder %v2749_v14, 16 }
 0x3f1   : > { %v3471_v58 = vunpack.c.l.b16 %v14244_v8  ;;  %v3839_v47 = vpop.f32.mrf.mxu1  ;;  %v3473_v50 = vunpack.c.h.b16 %v14244_v8  ;;  %v3393_v61 = vsel %vm11560_vm6, %v3361_v24, %v14168_v49  ;;  %v3458_v57 = vunpack.c.l.b16 %v13919_v63  ;;  %vm14273_vm15 = vmand %vm2765_vm12, %vm2777_vm13 }
 0x3f2   : > { %v14259_v40 = vadd.f32 %v3923_v5, %v3839_v47  ;;  %v14261_v16 = vunpack.c.l.b16 %v3393_v61  ;;  %v14267_v36 = vsel %vm11528_vm2, %v14049_v18, %v3249_v55  ;;  %v3253_v35 = vrot.slane %v3251_v21, 7  ;;  %vm14321_vm4 = vmand %vm14273_vm15, %vm2790_vm10 }
 0x3f3   : > { %v14269_v25 = vpack.c.b16 %v3471_v58, %v3469_v10  ;;  %v7373_v49 = vshll.u32 %v14248_v52, 16  ;;  %v7370_v10 = vshrl.u32 %v14248_v52, 16  ;;  %v18376_v21 = vshll.u32 %v14228_v37, 16  ;;  %vm14458_vm5 = vmand %vm14273_vm15, %vm2831_vm14 }
 0x3f4   : > { %v2653_v29 = vpop.f32.mrf.mxu0  ;;  %v3925_v47 = vpop.f32.mrf.mxu2  ;;  %v14283_v18 = vpack.c.b16 %v14261_v16, %v3473_v50  ;;  %v2558_v14 = vadd.f32 %v13718_v53, %v13656_v56  ;;  %v18381_v53 = vunpack.c.l.b16 %v13799_v33  ;;  %v10770_v50 = vld [vmem:[%s17542_s3 + $0xb0] sm:$0xff]  ;;  %v18409_v5 = vunpack.c.l.b16 %v14011_v6  ;;  %v10764_v6 = vld [vmem:[%s17542_s3 + $0x80] sm:$0xff] }
 0x3f5   : > { %4041 = vmatmul.bf16.gmra.mxu3 %v3612_v60  ;;  %18372 = vst [vmem:[#allocation57_spill] sm:$0xff] %v14269_v25  ;;  %v2654_v24 = vadd.f32 %v2653_v29, %v2555_v15  ;;  %v14278_v60 = vld [vmem:[#allocation2 + $0x78] sm:$0xf]  ;;  %v14280_v61 = vld [vmem:[#allocation2 + $0x7c] sm:$0xf]  ;;  %v7452_v55 = vrot.slane %v18376_v21, 1  ;;  %v2733_v15 = vadd.f32 %v13547_v19, %v2693_v30  ;;  %v4002_v58 = vpop.f32.mrf.mxu3 }
 0x3f6   : > { %3878 = vmatmul.bf16.gmra.mxu1 %v14267_v36  ;;  %18375 = vst [vmem:[#allocation12_spill] sm:$0xff] %v14283_v18  ;;  %v3078_v29 = vunpack.c.l.b16 %v14278_v60  ;;  %v14293_v28 = vld [vmem:[#allocation2 + $0x78] sm:$0xf]  ;;  %v14295_v25 = vld [vmem:[#allocation2 + $0x7c] sm:$0xf]  ;;  %v14306_v19 = vadd.f32 %v4002_v58, %v14144_v20  ;;  %v14310_v30 = vpack.c.b16 %v3458_v57, %v18381_v53  ;;  %v18382_v21 = vshrl.u32 %v14228_v37, 16  ;;  %4460 = vmatpush.bf16.msrb.mxu3 %v10770_v50 }
 0x3f7   : > { %18377 = vst [vmem:[#allocation58_spill] sm:$0xff] %v14293_v28  ;;  %v2694_v56 = vadd.f32 %v2654_v24, %v2139_v1  ;;  %v18385_v20 = vunpack.c.l.b16 %v14280_v61  ;;  %v18387_v57 = vshll.u32 %v14200_v0, 16  ;;  %v7454_v58 = vrot.slane %v7373_v49, 1 }
 0x3f8   : > { %18378 = vst [vmem:[#allocation45_spill] sm:$0xff] %v14295_v25  ;;  %v7453_v2 = vor.u32 %v7452_v55, %v18382_v21  ;;  %v3616_v1 = vpack.c.b16 %v3078_v29, %v14175_v3  ;;  %v14335_v55 = vld [vmem:[%s17541_s2] ss:$0 sm:$0xff]  ;;  %v7372_v21 = vrot.slane %v7370_v10, 7  ;;  %v2900_v3 = vsel %vm14301_vm1, %v2733_v15, 0.0 }
 0x3f9   : > { %v14327_v33 = vpack.c.b16 %v18385_v20, %v3078_v29  ;;  %v3256_v24 = vor.u32 %v18387_v57, %v3253_v35  ;;  %v2734_v53 = vadd.f32 %v14335_v55, %v2694_v56  ;;  %v3841_v29 = vpop.f32.mrf.mxu1  ;;  %v7456_v57 = vor.u32 %v7454_v58, %v7370_v10  ;;  %v10769_v20 = vld [vmem:[%s17542_s3 + $0xa8] sm:$0xff] }
 0x3fa   : > { %v14344_v35 = vsel %vm757_vm3, %v7453_v2, %v7454_v58  ;;  %v14348_v50 = vadd.f32 %v3925_v47, %v3841_v29  ;;  %4461 = vmatpush.bf16.msrb.mxu3 %v10769_v20  ;;  %v18394_v20 = vld [vmem:[#allocation38_spill] sm:$0xff] }
 0x3fb   : > { %18386 = vst [vmem:[#allocation20_spill] sm:$0xff] %v14327_v33  ;;  %v17772_v0 = vshrl.u32 %v14327_v33, 16  ;;  %3967 = vmatmul.bf16.gmra.mxu2 %v3616_v1  ;;  %v2901_v56 = vsel %vm14321_vm4, %v2734_v53, 0.0  ;;  %v7597_v52 = vunpack.c.l.b16 %v14344_v35  ;;  %v7599_v15 = vunpack.c.h.b16 %v14344_v35 }
 0x3fc   : > { %18388 = vst [vmem:[#allocation102_spill] sm:$0xff] %v14344_v35  ;;  %v11049_v51 = vpack.c.bf16 %v2901_v56, %v2900_v3  ;;  %v3262_v2 = vshll.u32 %v14327_v33, 16  ;;  %v2656_v10 = vpop.f32.mrf.mxu0  ;;  %v7480_v47 = vsel %vm11560_vm6, %v7456_v57, %v14177_v7  ;;  %v3928_v58 = vpop.f32.mrf.mxu2  ;;  %v18391_v3 = vunpack.c.l.b16 %v14293_v28 }
 0x3fd   : > { %v14357_v1 = vrot.slane %v17772_v0, 7  ;;  %v2657_v17 = vadd.f32 %v2656_v10, %v2558_v14  ;;  %v14364_v53 = vpack.c.b16 %v7597_v52, %v14171_v46  ;;  %v14366_v29 = vunpack.c.l.b16 %v7480_v47  ;;  %v4004_v35 = vpop.f32.mrf.mxu3  ;;  %v10768_v52 = vld [vmem:[%s17542_s3 + $0xa0] sm:$0xff] }
 0x3fe   : > { %v18392_v56 = vunpack.c.l.b16 %v14295_v25  ;;  %11146 = vst [vmem:[#allocation2 + $0x80] sm:$0xff] %v11049_v51   ;;  %v14376_v18 = vsel %vm516_vm0, %v14221_v27, %v3256_v24  ;;  %v7375_v14 = vor.u32 %v7373_v49, %v7372_v21  ;;  %v14381_v57 = vadd.f32 %v4004_v35, %v14219_v59  ;;  %v10819_v51 = vld [vmem:[%s17542_s3 + $0x238] sm:$0xff]  ;;  %4462 = vmatpush.bf16.msrb.mxu3 %v10768_v52 }
 0x3ff   : > { %18389 = vst [vmem:[#allocation103_spill] sm:$0xff] %v14364_v53  ;;  %v3264_v7 = vor.u32 %v3262_v2, %v14357_v1  ;;  %v2695_v46 = vadd.f32 %v2657_v17, %v18394_v20  ;;  %v14391_v27 = vpack.c.b16 %v14366_v29, %v7599_v15  ;;  %v18396_v24 = vshrl.u32 %v14228_v37, 16  ;;  %4929 = vmatpush.bf16.msra.mxu2 %v10819_v51  ;;  %v10767_v20 = vld [vmem:[%s17542_s3 + $0x98] sm:$0xff]  ;;  %v18399_v51 = vld [vmem:[#allocation43_spill] sm:$0xff] }
 0x400   : > { %18390 = vst [vmem:[#allocation104_spill] sm:$0xff] %v14366_v29  ;;  %v14372_v0 = vpack.c.b16 %v18392_v56, %v18391_v3  ;;  %4804 = vmatmul.bf16.gmra.mxu0 %v14310_v30  ;;  %v17777_v35 = vunpack.c.l.b16 %v14376_v18  ;;  %v2560_v3 = vadd.f32 %v13778_v12, %v13723_v22 }
 0x401   : > { %18395 = vst [vmem:[#allocation38_spill] sm:$0xff] %v14391_v27  ;;  %v14397_v59 = vsel %vm11528_vm2, %v14278_v60, %v3264_v7  ;;  %v14401_v21 = vrot.slane %v18396_v24, 7  ;;  %v3844_v17 = vpop.f32.mrf.mxu1  ;;  %v2144_v24 = vadd.f32 %v13735_v44, %v18399_v51  ;;  %v3362_v44 = vrot.slane %v3262_v2, 1 }
 0x402   : > { %18393 = vst [vmem:[#allocation105_spill] sm:$0xff] %v14372_v0  ;;  %v17775_v49 = vshrl.u32 %v14372_v0, 16  ;;  %v3526_v10 = vunpack.c.l.b16 %v14397_v59  ;;  %v17776_v15 = vshll.u32 %v14372_v0, 16  ;;  %v14416_v56 = vadd.f32 %v3928_v58, %v3844_v17  ;;  %4463 = vmatpush.bf16.msrb.mxu3 %v10767_v20 }
 0x403   : > { %18397 = vst [vmem:[#allocation106_spill] sm:$0xff] %v14401_v21  ;;  %v14412_v60 = vsel %vm516_vm0, %v14401_v21, %v7375_v14  ;;  %v2976_v21 = vld [vmem:[#allocation2] sm:$0xf] }
 0x404   : > { %v14408_v47 = vrot.slane %v17775_v49, 7  ;;  %18398 = vst [vmem:[#allocation107_spill] sm:$0xff] %v14412_v60  ;;  %v3615_v7 = vpack.c.b16 %v3526_v10, %v17777_v35  ;;  %v2658_v14 = vpop.f32.mrf.mxu0  ;;  %v3930_v12 = vpop.f32.mrf.mxu2 }
 0x405   : > { %4046 = vmatmul.bf16.gmra.mxu3 %v14244_v8  ;;  %v2659_v22 = vadd.f32 %v2658_v14, %v2560_v3  ;;  %v14429_v58 = vld [vmem:[#allocation2 + $0x80] sm:$0xf]  ;;  %v10811_v8 = vld [vmem:[%s17542_s3 + $0x1f8] sm:$0xff]  ;;  %v14434_v10 = vld [vmem:[#allocation2 + $0x84] sm:$0xf]  ;;  %v4007_v3 = vpop.f32.mrf.mxu3 }
 0x406   : > { %v7383_v52 = vor.u32 %v17776_v15, %v14408_v47  ;;  %3883 = vmatmul.bf16.gmra.mxu1 %v3615_v7  ;;  %v3080_v7 = vunpack.c.l.b16 %v14429_v58  ;;  %v17783_v14 = vunpack.c.l.b16 %v14434_v10  ;;  %v7161_v20 = vld [vmem:[#allocation2 + $0x80] sm:$0xf]  ;;  %v2735_v15 = vadd.f32 %v14335_v55, %v2695_v46 }
 0x407   : > { %v2696_v35 = vadd.f32 %v2659_v22, %v2144_v24  ;;  %v14447_v25 = vadd.f32 %v4007_v3, %v14259_v40  ;;  %4845 = vmatpush.bf16.msra.mxu1 %v10811_v8  ;;  %v14452_v2 = vunpack.c.l.b16 %v7161_v20  ;;  %v18403_v24 = vunpack.c.l.b16 %v14280_v61 }
 0x408   : > { %v14440_v49 = vsel %vm11528_vm2, %v14293_v28, %v7383_v52  ;;  %v10766_v52 = vld [vmem:[%s17542_s3 + $0x90] sm:$0xff]  ;;  %v3105_v46 = vpack.c.b16 %v3080_v7, %v3080_v7  ;;  %v14466_v22 = vpack.c.b16 %v17783_v14, %v3080_v7  ;;  %v18405_v8 = vunpack.c.l.b16 %v14412_v60 }
 0x409   : > { %v8491_v51 = vunpack.c.l.b16 %v14440_v49  ;;  %18400 = vst [vmem:[#allocation43_spill] sm:$0xff] %v14452_v2  ;;  %v3619_v40 = vpack.c.b16 %v3080_v7, %v18403_v24  ;;  %v3460_v20 = vunpack.c.h.b16 %v13919_v63  ;;  %v2736_v28 = vadd.f32 %v14335_v55, %v2696_v35  ;;  %4464 = vmatpush.bf16.msrb.mxu3 %v10766_v52  ;;  %v3846_v0 = vpop.f32.mrf.mxu1  ;;  %v10765_v63 = vld [vmem:[%s17542_s3 + $0x88] sm:$0xff] }
 0x40a   : > { %18404 = vst [vmem:[#allocation108_spill] sm:$0xff] %v14466_v22  ;;  %v14476_v29 = vpack.c.b16 %v14452_v2, %v14452_v2  ;;  %v3269_v61 = vshll.u32 %v3105_v46, 16  ;;  %v3266_v24 = vshrl.u32 %v3105_v46, 16  ;;  %v2902_v7 = vsel %vm14273_vm15, %v2735_v15, 0.0 }
 0x40b   : > { %v14470_v3 = vpack.c.b16 %v8491_v51, %v18405_v8  ;;  %3972 = vmatmul.bf16.gmra.mxu2 %v3619_v40  ;;  %v2903_v51 = vsel %vm14458_vm5, %v2736_v28, 0.0  ;;  %v14482_v8 = vadd.f32 %v3930_v12, %v3846_v0  ;;  %v18408_v52 = vshrl.u32 %v14327_v33, 16 }
 0x40c   : > { %18407 = vst [vmem:[#allocation110_spill] sm:$0xff] %v14476_v29  ;;  %v17784_v55 = vshrl.u32 %v14476_v29, 16  ;;  %v11054_v35 = vpack.c.bf16 %v2903_v51, %v2902_v7  ;;  %v3364_v14 = vrot.slane %v3269_v61, 1  ;;  %v3268_v46 = vrot.slane %v3266_v24, 7 }
 0x40d   : > { %18406 = vst [vmem:[#allocation109_spill] sm:$0xff] %v14470_v3  ;;  %v3363_v40 = vor.u32 %v3362_v44, %v18408_v52  ;;  %v3933_v3 = vpop.f32.mrf.mxu2  ;;  %v14492_v15 = vpack.c.b16 %v18409_v5, %v3460_v20  ;;  %4465 = vmatpush.bf16.msrb.mxu3 %v10765_v63  ;;  %v4009_v28 = vpop.f32.mrf.mxu3  ;;  %v3528_v63 = vunpack.c.h.b16 %v14397_v59 }
 0x40e   : > { %11147 = vst [vmem:[#allocation2 + $0x88] sm:$0xff] %v11054_v35   ;;  %v3271_v12 = vor.u32 %v3269_v61, %v3268_v46  ;;  %v7387_v17 = vrot.slane %v17784_v55, 7  ;;  %v14500_v7 = vadd.f32 %v4009_v28, %v14348_v50  ;;  %v17785_v61 = vshll.u32 %v14476_v29, 16  ;;  %v14521_v46 = vld [vmem:[#allocation2] sm:$0xff] }
 0x40f   : > { %v14495_v0 = vsel %vm757_vm3, %v3363_v40, %v3364_v14  ;;  %v3112_v2 = vshll.u32 %v14521_v46, 16 }
 0x410   : > { %18410 = vst [vmem:[#allocation111_spill] sm:$0xff] %v14495_v0  ;;  %4809 = vmatmul.bf16.gmra.mxu0 %v14492_v15  ;;  %v3527_v44 = vunpack.c.l.b16 %v14495_v0  ;;  %v14509_v20 = vsel %vm516_vm0, %v14357_v1, %v3271_v12  ;;  %v7390_v52 = vor.u32 %v17785_v61, %v7387_v17  ;;  %v3366_v17 = vor.u32 %v3364_v14, %v3266_v24  ;;  %v14530_v61 = vld [vmem:[#allocation2 + $0x8] sm:$0xf] }
 0x411   : > { %v17786_v50 = vunpack.c.l.b16 %v14509_v20  ;;  %4466 = vmatpush.bf16.msrb.mxu3 %v10764_v6  ;;  %v3849_v35 = vpop.f32.mrf.mxu1  ;;  %v3050_v24 = vunpack.c.l.b16 %v14530_v61 }
 0x412   : > { %v3617_v51 = vpack.c.b16 %v3527_v44, %v14261_v16  ;;  %v14517_v40 = vadd.f32 %v3933_v3, %v3849_v35  ;;  %v7391_v16 = vsel %vm516_vm0, %v14408_v47, %v7390_v52  ;;  %v8493_v44 = vunpack.c.h.b16 %v14440_v49 }
 0x413   : > { %v3618_v1 = vpack.c.b16 %v17786_v50, %v3528_v63  ;;  %v8495_v6 = vunpack.c.l.b16 %v7391_v16  ;;  %v17790_v63 = vshrl.u32 %v14521_v46, 16  ;;  %v18412_v47 = vunpack.c.l.b16 %v14434_v10 }
 0x414   : > { %v3085_v29 = vpack.c.b16 %v3050_v24, %v3050_v24 }
 0x415   : > { %4051 = vmatmul.bf16.gmra.mxu3 %v3617_v51  ;;  %v3935_v5 = vpop.f32.mrf.mxu2  ;;  %v3010_v28 = vld [vmem:[#allocation2 + $0x88] sm:$0xf]  ;;  %v3011_v12 = vld [vmem:[#allocation2 + $0x8c] sm:$0xf]  ;;  %v4012_v55 = vpop.f32.mrf.mxu3  ;;  %v14532_v50 = vpack.c.b16 %v8495_v6, %v8493_v44  ;;  %v3111_v44 = vrot.slane %v17790_v63, 7 }
 0x416   : > { %3888 = vmatmul.bf16.gmra.mxu1 %v3618_v1  ;;  %v3082_v3 = vunpack.c.l.b16 %v3010_v28  ;;  %v3083_v35 = vunpack.c.l.b16 %v3011_v12  ;;  %v14527_v51 = vadd.f32 %v4012_v55, %v14416_v56  ;;  %v3394_v56 = vsel %vm11560_vm6, %v3366_v17, %v14429_v58 }
 0x417   : > { %18411 = vst [vmem:[#allocation112_spill] sm:$0xff] %v14532_v50 }
 0x418   : > { %v14536_v52 = vpack.c.b16 %v3082_v3, %v18412_v47  ;;  %v14538_v1 = vpack.c.b16 %v3083_v35, %v3083_v35  ;;  %v14540_v49 = vpack.c.b16 %v3083_v35, %v3082_v3  ;;  %v3531_v47 = vunpack.c.l.b16 %v3394_v56  ;;  %v10818_v56 = vld [vmem:[%s17542_s3 + $0x230] sm:$0xff] }
 0x419   : > { %v3851_v14 = vpop.f32.mrf.mxu1  ;;  %4930 = vmatpush.bf16.msra.mxu2 %v10818_v56 }
 0x41a   : > { %18413 = vst [vmem:[#allocation113_spill] sm:$0xff] %v14540_v49  ;;  %v17791_v55 = vshll.u32 %v14536_v52, 16  ;;  %v17792_v16 = vshll.u32 %v14538_v1, 16  ;;  %v3936_v28 = vadd.f32 %v3935_v5, %v3851_v14  ;;  %v17793_v6 = vshrl.u32 %v14536_v52, 16  ;;  %v10810_v49 = vld [vmem:[%s17542_s3 + $0x1f0] sm:$0xff] }
 0x41b   : > { %4383 = vmatmul.bf16.vlgmr.msrb.gmra.mxu2 %v14521_v46  ;;  %v17794_v3 = vshrl.u32 %v14538_v1, 16  ;;  %4846 = vmatpush.bf16.msra.mxu1 %v10810_v49 }
 0x41c   : > { %v3367_v35 = vrot.slane %v17791_v55, 1  ;;  %v3369_v58 = vrot.slane %v17792_v16, 1  ;;  %v3529_v55 = vunpack.c.h.b16 %v14495_v0  ;;  %v3114_v16 = vor.u32 %v3112_v2, %v3111_v44  ;;  %v18443_v0 = vld [vmem:[#allocation9_spill] sm:$0xff] }
 0x41d   : > { %v3938_v17 = vpop.f32.mrf.mxu2  ;;  %v4014_v50 = vpop.f32.mrf.mxu3 }
 0x41e   : > { %v3368_v5 = vor.u32 %v3367_v35, %v17793_v6  ;;  %v3371_v14 = vor.u32 %v3369_v58, %v17794_v3  ;;  %v14563_v63 = vadd.f32 %v4014_v50, %v14482_v8  ;;  %v3620_v6 = vpack.c.b16 %v3531_v47, %v3529_v55 }
 0x41f   : > { %v3116_v8 = vshrl.u32 %v3085_v29, 16 }
 0x420   : > { %4814 = vmatmul.bf16.gmra.mxu0 %v14030_v9  ;;  %v3370_v27 = vsel %vm757_vm3, %v3368_v5, %v3369_v58  ;;  %v3395_v35 = vsel %vm11560_vm6, %v3371_v14, %v3011_v12  ;;  %v3300_v58 = vsel %vm11528_vm2, %v2976_v21, %v3114_v16 }
 0x421   : > { %v4546_v3 = vunpack.c.l.b16 %v3370_v27  ;;  %v4548_v50 = vunpack.c.h.b16 %v3370_v27  ;;  %v4550_v60 = vunpack.c.l.b16 %v3395_v35  ;;  %v3118_v14 = vrot.slane %v3116_v8, 7 }
 0x422   : > { %v3854_v53 = vpop.f32.mrf.mxu1  ;;  %v3119_v27 = vshll.u32 %v3085_v29, 16 }
 0x423   : > { %v3939_v37 = vadd.f32 %v3938_v17, %v3854_v53  ;;  %v14576_v22 = vpack.c.b16 %v4546_v3, %v3531_v47  ;;  %v14580_v12 = vpack.c.b16 %v4550_v60, %v4548_v50  ;;  %v3470_v3 = vunpack.c.l.b16 %v14267_v36 }
 0x424   : > { %v3121_v35 = vor.u32 %v3119_v27, %v3118_v14  ;;  %v3312_v60 = vrot.slane %v3112_v2, 1  ;;  %v18418_v50 = vunpack.c.l.b16 %v14122_v23 }
 0x425   : > { %4056 = vmatmul.bf16.gmra.mxu3 %v3620_v6  ;;  %18414 = vst [vmem:[#allocation114_spill] sm:$0xff] %v14576_v22  ;;  %v3940_v55 = vpop.f32.mrf.mxu2  ;;  %v4017_v5 = vpop.f32.mrf.mxu3  ;;  %v18416_v6 = vld [vmem:[#allocation65_spill] sm:$0xff] }
 0x426   : > { %18415 = vst [vmem:[#allocation115_spill] sm:$0xff] %v14580_v12  ;;  %4299 = vmatmul.bf16.vlgmr.msrb.gmra.mxu1 %v3300_v58  ;;  %v14583_v53 = vadd.f32 %v4017_v5, %v14517_v40  ;;  %v18417_v17 = vunpack.c.l.b16 %v18416_v6  ;;  %v14590_v58 = vpack.c.b16 %v3470_v3, %v18418_v50  ;;  %v3314_v12 = vrot.slane %v3119_v27, 1  ;;  %v18421_v50 = vld [vmem:[#allocation67_spill] sm:$0xff] }
 0x427   : > { %v3122_v40 = vsel %vm516_vm0, %v3111_v44, %v3121_v35  ;;  %v18420_v6 = vshrl.u32 %v14521_v46, 16 }
 0x428   : > { %v4065_v56 = vpack.c.b16 %v18417_v17, %v3050_v24  ;;  %v18419_v24 = vld [vmem:[#allocation59_spill] sm:$0xff] }
 0x429   : > { %v3422_v5 = vunpack.c.l.b16 %v18419_v24  ;;  %v3313_v14 = vor.u32 %v3312_v60, %v18420_v6 }
 0x42a   : > { %v3856_v47 = vpop.f32.mrf.mxu1 }
 0x42b   : > { %4388 = vmatmul.bf16.gmra.mxu2 %v4065_v56  ;;  %v3941_v21 = vadd.f32 %v3940_v55, %v3856_v47  ;;  %v3420_v55 = vunpack.c.l.b16 %v3122_v40  ;;  %v3315_v17 = vsel %vm757_vm3, %v3313_v14, %v3314_v12  ;;  %v3472_v47 = vunpack.c.h.b16 %v14267_v36  ;;  %v10817_v36 = vld [vmem:[%s17542_s3 + $0x228] sm:$0xff] }
 0x42c   : > { %v18423_v40 = vunpack.c.l.b16 %v14376_v18  ;;  %4931 = vmatpush.bf16.msra.mxu2 %v10817_v36  ;;  %v18430_v36 = vshll.u32 %v14536_v52, 16 }
 0x42d   : > { %v4019_v49 = vpop.f32.mrf.mxu3  ;;  %v4064_v56 = vpack.c.b16 %v3422_v5, %v3420_v55 }
 0x42e   : > { %v3943_v16 = vpop.f32.mrf.mxu2  ;;  %v14593_v29 = vadd.f32 %v4019_v49, %v3936_v28  ;;  %v3316_v28 = vor.u32 %v3314_v12, %v3116_v8  ;;  %v14607_v49 = vpop.f32.mrf.mxu0  ;;  %v14611_v24 = vpack.c.b16 %v18423_v40, %v3472_v47 }
 0x42f   : > { %18422 = vst [vmem:[#allocation65_spill] sm:$0xff] %v14607_v49 }
 0x430   : > { %4819 = vmatmul.bf16.gmra.mxu0 %v14590_v58  ;;  %v3384_v60 = vsel %vm11560_vm6, %v3316_v28, %v14530_v61  ;;  %v10809_v61 = vld [vmem:[%s17542_s3 + $0x1e8] sm:$0xff] }
 0x431   : > { %v3421_v6 = vunpack.c.l.b16 %v3384_v60  ;;  %4847 = vmatpush.bf16.msra.mxu1 %v10809_v61  ;;  %v18427_v28 = vld [vmem:[#allocation76_spill] sm:$0xff]  ;;  %v18428_v60 = vshrl.u32 %v14536_v52, 16 }
 0x433   : > { %v3859_v2 = vpop.f32.mrf.mxu1  ;;  %v3276_v40 = vrot.slane %v18428_v60, 7  ;;  %v18435_v60 = vunpack.c.l.b16 %v14509_v20  ;;  %v18438_v20 = vld [vmem:[#allocation30_spill] sm:$0xff] }
 0x434   : > { %v3944_v23 = vadd.f32 %v3943_v16, %v3859_v2 }
 0x435   : > { %4467 = vmatmul.bf16.vlgmr.msrb.gmra.mxu3 %v3315_v17  ;;  %v18425_v17 = vld [vmem:[#allocation71_spill] sm:$0xff] }
 0x436   : > { %v3945_v3 = vpop.f32.mrf.mxu2  ;;  %4304 = vmatmul.bf16.gmra.mxu1 %v4064_v56 }
 0x438   : > { %v4022_v27 = vpop.f32.mrf.mxu3 }
 0x439   : > { %v14600_v44 = vadd.f32 %v4022_v27, %v3939_v37  ;;  %v18424_v37 = vld [vmem:[#allocation72_spill] sm:$0xff] }
 0x43a   : > { %v3423_v5 = vunpack.c.l.b16 %v18424_v37 }
 0x43b   : > { %v3861_v35 = vpop.f32.mrf.mxu1  ;;  %4393 = vmatmul.bf16.gmra.mxu2 %v18421_v50 }
 0x43c   : > { %v3946_v46 = vadd.f32 %v3945_v3, %v3861_v35  ;;  %v4066_v18 = vpack.c.b16 %v3423_v5, %v3421_v6  ;;  %v14624_v3 = vpop.f32.mrf.mxu0  ;;  %v18431_v6 = vld [vmem:[#allocation73_spill] sm:$0xff] }
 0x43d   : > { %18426 = vst [vmem:[#allocation59_spill] sm:$0xff] %v14624_v3 }
 0x43e   : > { %v3948_v16 = vpop.f32.mrf.mxu2 }
 0x440   : > { %v4024_v8 = vpop.f32.mrf.mxu3  ;;  %4824 = vmatmul.bf16.gmra.mxu0 %v14611_v24 }
 0x441   : > { %v14617_v12 = vadd.f32 %v4024_v8, %v3941_v21 }
 0x443   : > { %v3864_v14 = vpop.f32.mrf.mxu1 }
 0x444   : > { %v3949_v55 = vadd.f32 %v3948_v16, %v3864_v14  ;;  %v14634_v16 = vpop.f32.mrf.mxu0 }
 0x445   : > { %4472 = vmatmul.bf16.gmra.mxu3 %v4066_v18  ;;  %18429 = vst [vmem:[#allocation67_spill] sm:$0xff] %v14634_v16  ;;  %v18432_v18 = vld [vmem:[#allocation10_spill] sm:$0xff] }
 0x446   : > { %v3950_v2 = vpop.f32.mrf.mxu2  ;;  %4309 = vmatmul.bf16.gmra.mxu1 %v18425_v17 }
 0x448   : > { %v4027_v56 = vpop.f32.mrf.mxu3 }
 0x449   : > { %v14626_v21 = vadd.f32 %v4027_v56, %v3944_v23  ;;  %v3279_v23 = vor.u32 %v18430_v36, %v3276_v40  ;;  %v18433_v56 = vld [vmem:[#allocation22_spill] sm:$0xff] }
 0x44b   : > { %v3866_v27 = vpop.f32.mrf.mxu1  ;;  %4398 = vmatmul.bf16.gmra.mxu2 %v18427_v28 }
 0x44c   : > { %v3951_v47 = vadd.f32 %v3950_v2, %v3866_v27  ;;  %v14646_v27 = vpop.f32.mrf.mxu0 }
 0x44d   : > { %18434 = vst [vmem:[#allocation72_spill] sm:$0xff] %v14646_v27 }
 0x44e   : > { %v3953_v35 = vpop.f32.mrf.mxu2 }
 0x450   : > { %v4029_v50 = vpop.f32.mrf.mxu3  ;;  %4829 = vmatmul.bf16.gmra.mxu0 %v14397_v59 }
 0x451   : > { %v14631_v37 = vadd.f32 %v4029_v50, %v3946_v46  ;;  %v3311_v46 = vsel %vm11528_vm2, %v14434_v10, %v3279_v23  ;;  %v18436_v10 = vshrl.u32 %v14538_v1, 16 }
 0x452   : > { %v4545_v59 = vunpack.c.l.b16 %v3311_v46 }
 0x453   : > { %v3869_v5 = vpop.f32.mrf.mxu1 }
 0x454   : > { %v3954_v8 = vadd.f32 %v3953_v35, %v3869_v5  ;;  %v10816_v35 = vld [vmem:[%s17542_s3 + $0x220] sm:$0xff]  ;;  %v4602_v5 = vpack.c.b16 %v4545_v59, %v18435_v60  ;;  %v14663_v59 = vpop.f32.mrf.mxu0  ;;  %v18440_v60 = vld [vmem:[#allocation69_spill] sm:$0xff] }
 0x455   : > { %4477 = vmatmul.bf16.gmra.mxu3 %v18431_v6  ;;  %4932 = vmatpush.bf16.msra.mxu2 %v10816_v35  ;;  %v10808_v6 = vld [vmem:[%s17542_s3 + $0x1e0] sm:$0xff]  ;;  %18439 = vst [vmem:[#allocation71_spill] sm:$0xff] %v14663_v59 }
 0x456   : > { %v3955_v61 = vpop.f32.mrf.mxu2  ;;  %4314 = vmatmul.bf16.gmra.mxu1 %v18432_v18  ;;  %v18437_v18 = vshll.u32 %v14538_v1, 16 }
 0x457   : > { %4848 = vmatpush.bf16.msra.mxu1 %v10808_v6 }
 0x458   : > { %v4032_v14 = vpop.f32.mrf.mxu3 }
 0x459   : > { %v14643_v2 = vadd.f32 %v4032_v14, %v3949_v55  ;;  %v3283_v55 = vrot.slane %v18436_v10, 7  ;;  %v4547_v10 = vunpack.c.h.b16 %v3311_v46 }
 0x45b   : > { %v3871_v17 = vpop.f32.mrf.mxu1  ;;  %4403 = vmatmul.bf16.gmra.mxu2 %v18433_v56  ;;  %v3286_v14 = vor.u32 %v18437_v18, %v3283_v55 }
 0x45c   : > { %v3956_v52 = vadd.f32 %v3955_v61, %v3871_v17  ;;  %v14670_v18 = vpop.f32.mrf.mxu0 }
 0x45d   : > { %18442 = vst [vmem:[#allocation76_spill] sm:$0xff] %v14670_v18 }
 0x45e   : > { %v3958_v50 = vpop.f32.mrf.mxu2 }
 0x460   : > { %v4034_v36 = vpop.f32.mrf.mxu3  ;;  %4834 = vmatmul.bf16.gmra.mxu0 %v4602_v5  ;;  %v3287_v5 = vsel %vm516_vm0, %v3276_v40, %v3286_v14 }
 0x461   : > { %v14655_v23 = vadd.f32 %v4034_v36, %v3951_v47  ;;  %v4549_v41 = vunpack.c.l.b16 %v3287_v5  ;;  %v10807_v5 = vld [vmem:[%s17542_s3 + $0x1d8] sm:$0xff] }
 0x462   : > { %4849 = vmatpush.bf16.msra.mxu1 %v10807_v5 }
 0x463   : > { %v3874_v61 = vpop.f32.mrf.mxu1 }
 0x464   : > { %v3959_v17 = vadd.f32 %v3958_v50, %v3874_v61  ;;  %v4605_v50 = vpack.c.b16 %v4549_v41, %v4547_v10  ;;  %v10815_v41 = vld [vmem:[%s17542_s3 + $0x218] sm:$0xff] }
 0x465   : > { %4482 = vmatmul.bf16.gmra.mxu3 %v18438_v20  ;;  %4933 = vmatpush.bf16.msra.mxu2 %v10815_v41 }
 0x466   : > { %v3960_v35 = vpop.f32.mrf.mxu2  ;;  %4319 = vmatmul.bf16.gmra.mxu1 %v18440_v60 }
 0x468   : > { %v4037_v47 = vpop.f32.mrf.mxu3 }
 0x469   : > { %v14667_v36 = vadd.f32 %v4037_v47, %v3954_v8 }
 0x46b   : > { %v3876_v6 = vpop.f32.mrf.mxu1  ;;  %4408 = vmatmul.bf16.gmra.mxu2 %v18441_v31 }
 0x46c   : > { %v3961_v1 = vadd.f32 %v3960_v35, %v3876_v6  ;;  %v18444_v35 = vld [vmem:[#allocation79_spill] sm:$0xff] }
 0x46e   : > { %v3963_v55 = vpop.f32.mrf.mxu2 }
 0x470   : > { %v4039_v61 = vpop.f32.mrf.mxu3  ;;  %4839 = vmatmul.bf16.gmra.mxu0 %v4605_v50 }
 0x471   : > { %v14672_v22 = vadd.f32 %v4039_v61, %v3956_v52 }
 0x473   : > { %v3879_v60 = vpop.f32.mrf.mxu1 }
 0x474   : > { %v3964_v33 = vadd.f32 %v3963_v55, %v3879_v60  ;;  %v18445_v55 = vld [vmem:[#allocation78_spill] sm:$0xff] }
 0x475   : > { %4487 = vmatmul.bf16.gmra.mxu3 %v18443_v0 }
 0x476   : > { %v3965_v40 = vpop.f32.mrf.mxu2  ;;  %4324 = vmatmul.bf16.gmra.mxu1 %v13784_v48 }
 0x478   : > { %v4042_v8 = vpop.f32.mrf.mxu3 }
 0x479   : > { %v14676_v46 = vadd.f32 %v4042_v8, %v3959_v17  ;;  %v18446_v8 = vld [vmem:[#allocation37_spill] sm:$0xff] }
 0x47b   : > { %v3881_v14 = vpop.f32.mrf.mxu1  ;;  %4413 = vmatmul.bf16.gmra.mxu2 %v18444_v35 }
 0x47c   : > { %v3966_v52 = vadd.f32 %v3965_v40, %v3881_v14 }
 0x47e   : > { %v3968_v47 = vpop.f32.mrf.mxu2 }
 0x480   : > { %v4044_v10 = vpop.f32.mrf.mxu3 }
 0x481   : > { %v14685_v6 = vadd.f32 %v4044_v10, %v3961_v1  ;;  %v18448_v10 = vld [vmem:[#allocation39_spill] sm:$0xff] }
 0x483   : > { %v3884_v48 = vpop.f32.mrf.mxu1 }
 0x484   : > { %v3969_v17 = vadd.f32 %v3968_v47, %v3884_v48 }
 0x485   : > { %4492 = vmatmul.bf16.gmra.mxu3 %v18445_v55 }
 0x486   : > { %v3970_v50 = vpop.f32.mrf.mxu2  ;;  %4329 = vmatmul.bf16.gmra.mxu1 %v13386_v4 }
 0x488   : > { %v4047_v61 = vpop.f32.mrf.mxu3 }
 0x489   : > { %v14689_v60 = vadd.f32 %v4047_v61, %v3964_v33  ;;  %v10814_v33 = vld [vmem:[%s17542_s3 + $0x210] sm:$0xff]  ;;  %v18450_v61 = vld [vmem:[#allocation19_spill] sm:$0xff] }
 0x48a   : > { %4934 = vmatpush.bf16.msra.mxu2 %v10814_v33 }
 0x48b   : > { %v3886_v40 = vpop.f32.mrf.mxu1  ;;  %4418 = vmatmul.bf16.gmra.mxu2 %v18446_v8 }
 0x48c   : > { %v3971_v41 = vadd.f32 %v3970_v50, %v3886_v40 }
 0x48e   : > { %v3973_v14 = vpop.f32.mrf.mxu2 }
 0x490   : > { %v4049_v18 = vpop.f32.mrf.mxu3 }
 0x491   : > { %v14692_v59 = vadd.f32 %v4049_v18, %v3966_v52  ;;  %v10806_v52 = vld [vmem:[%s17542_s3 + $0x1d0] sm:$0xff] }
 0x492   : > { %4850 = vmatpush.bf16.msra.mxu1 %v10806_v52  ;;  %v18455_v52 = vld [vmem:[#allocation7_spill] sm:$0xff] }
 0x493   : > { %18447 = vst [vmem:[#allocation73_spill] sm:$0xff] %v14692_v59  ;;  %v3889_v1 = vpop.f32.mrf.mxu1  ;;  %v18456_v59 = vld [vmem:[#allocation42_spill] sm:$0xff] }
 0x494   : > { %v3974_v5 = vadd.f32 %v3973_v14, %v3889_v1  ;;  %v18452_v1 = vld [vmem:[#allocation31_spill] sm:$0xff] }
 0x495   : > { %4497 = vmatmul.bf16.gmra.mxu3 %v18448_v10 }
 0x496   : > { %v3975_v47 = vpop.f32.mrf.mxu2  ;;  %4334 = vmatmul.bf16.gmra.mxu1 %v14000_v39 }
 0x498   : > { %v4052_v48 = vpop.f32.mrf.mxu3 }
 0x499   : > { %v14696_v4 = vadd.f32 %v4052_v48, %v3969_v17 }
 0x49b   : > { %18449 = vst [vmem:[#allocation10_spill] sm:$0xff] %v14696_v4  ;;  %v3891_v50 = vpop.f32.mrf.mxu1  ;;  %4423 = vmatmul.bf16.gmra.mxu2 %v18450_v61 }
 0x49c   : > { %v3976_v18 = vadd.f32 %v3975_v47, %v3891_v50  ;;  %v18454_v50 = vld [vmem:[#allocation90_spill] sm:$0xff] }
 0x49d   : > { %v3990_v3 = vadd.f32 %v14006_v43, %v18454_v50  ;;  %v10813_v43 = vld [vmem:[%s17542_s3 + $0x208] sm:$0xff] }
 0x49e   : > { %v4384_v40 = vpop.f32.mrf.mxu2  ;;  %4935 = vmatpush.bf16.msra.mxu2 %v10813_v43 }
 0x4a0   : > { %v4054_v14 = vpop.f32.mrf.mxu3 }
 0x4a1   : > { %v14705_v39 = vadd.f32 %v4054_v14, %v3971_v41 }
 0x4a3   : > { %18451 = vst [vmem:[#allocation22_spill] sm:$0xff] %v14705_v39  ;;  %v4300_v17 = vpop.f32.mrf.mxu1 }
 0x4a4   : > { %v4301_v48 = vadd.f32 %v4300_v17, %v18452_v1 }
 0x4a5   : > { %4502 = vmatmul.bf16.gmra.mxu3 %v18453_v34 }
 0x4a6   : > { %4339 = vmatmul.bf16.gmra.mxu1 %v14107_v26  ;;  %v4386_v33 = vpop.f32.mrf.mxu2  ;;  %v4385_v27 = vadd.f32 %v4384_v40, %v4301_v48 }
 0x4a8   : > { %v4057_v16 = vpop.f32.mrf.mxu3 }
 0x4a9   : > { %v14710_v47 = vadd.f32 %v4057_v16, %v3974_v5 }
 0x4ab   : > { %v4302_v49 = vpop.f32.mrf.mxu1  ;;  %4428 = vmatmul.bf16.gmra.mxu2 %v18455_v52 }
 0x4ac   : > { %v4303_v41 = vadd.f32 %v4302_v49, %v3990_v3  ;;  %v10805_v3 = vld [vmem:[%s17542_s3 + $0x1c8] sm:$0xff] }
 0x4ad   : > { %4851 = vmatpush.bf16.msra.mxu1 %v10805_v3 }
 0x4ae   : > { %v4389_v14 = vpop.f32.mrf.mxu2  ;;  %v4387_v39 = vadd.f32 %v4386_v33, %v4303_v41 }
 0x4b0   : > { %v4059_v4 = vpop.f32.mrf.mxu3 }
 0x4b1   : > { %v14715_v17 = vadd.f32 %v4059_v4, %v3976_v18  ;;  %v18458_v4 = vld [vmem:[#allocation26_spill] sm:$0xff] }
 0x4b3   : > { %v4305_v1 = vpop.f32.mrf.mxu1 }
 0x4b4   : > { %v4306_v26 = vadd.f32 %v4305_v1, %v14060_v45 }
 0x4b5   : > { %4507 = vmatmul.bf16.gmra.mxu3 %v18456_v59 }
 0x4b6   : > { %4344 = vmatmul.bf16.gmra.mxu1 %v13710_v13  ;;  %v4391_v16 = vpop.f32.mrf.mxu2  ;;  %v4390_v5 = vadd.f32 %v4389_v14, %v4306_v26  ;;  %v18459_v14 = vld [vmem:[#allocation88_spill] sm:$0xff] }
 0x4b8   : > { %v4468_v40 = vpop.f32.mrf.mxu3 }
 0x4b9   : > { %v14723_v49 = vadd.f32 %v4468_v40, %v4385_v27 }
 0x4bb   : > { %18457 = vst [vmem:[#allocation30_spill] sm:$0xff] %v14723_v49  ;;  %v4307_v45 = vpop.f32.mrf.mxu1  ;;  %4433 = vmatmul.bf16.gmra.mxu2 %v18458_v4  ;;  %v18460_v49 = vld [vmem:[#allocation92_spill] sm:$0xff] }
 0x4bc   : > { %v4308_v13 = vadd.f32 %v4307_v45, %v14116_v11 }
 0x4be   : > { %v4394_v18 = vpop.f32.mrf.mxu2  ;;  %v4392_v48 = vadd.f32 %v4391_v16, %v4308_v13 }
 0x4c0   : > { %v4470_v33 = vpop.f32.mrf.mxu3 }
 0x4c1   : > { %v14730_v50 = vadd.f32 %v4470_v33, %v4387_v39  ;;  %v10812_v33 = vld [vmem:[%s17542_s3 + $0x200] sm:$0xff] }
 0x4c2   : > { %4936 = vmatpush.bf16.msra.mxu2 %v10812_v33 }
 0x4c3   : > { %v4310_v41 = vpop.f32.mrf.mxu1 }
 0x4c4   : > { %v4311_v27 = vadd.f32 %v4310_v41, %v14180_v38  ;;  %v10852_v38 = vld [vmem:[%s17544_s5 + $0xf8] sm:$0xff] }
 0x4c5   : > { %4512 = vmatmul.bf16.gmra.mxu3 %v18459_v14 }
 0x4c6   : > { %4349 = vmatmul.bf16.gmra.mxu1 %v14310_v30  ;;  %v4396_v1 = vpop.f32.mrf.mxu2  ;;  %v4395_v26 = vadd.f32 %v4394_v18, %v4311_v27  ;;  %6029 = vmatpush.bf16.msra.mxu3 %v10852_v38 }
 0x4c8   : > { %v4473_v43 = vpop.f32.mrf.mxu3 }
 0x4c9   : > { %v14735_v40 = vadd.f32 %v4473_v43, %v4390_v5  ;;  %v18461_v5 = vld [vmem:[#allocation18_spill] sm:$0xff] }
 0x4cb   : > { %v4312_v3 = vpop.f32.mrf.mxu1  ;;  %4438 = vmatmul.bf16.gmra.mxu2 %v18460_v49 }
 0x4cc   : > { %v4313_v11 = vadd.f32 %v4312_v3, %v14236_v62  ;;  %v10860_v62 = vld [vmem:[%s17544_s5 + $0x138] sm:$0xff] }
 0x4cd   : > { %6098 = vmatpush.bf16.msra.mxu0 %v10860_v62 }
 0x4ce   : > { %v4399_v16 = vpop.f32.mrf.mxu2  ;;  %v4397_v39 = vadd.f32 %v4396_v1, %v4313_v11 }
 0x4d0   : > { %v4475_v45 = vpop.f32.mrf.mxu3 }
 0x4d1   : > { %v14739_v13 = vadd.f32 %v4475_v45, %v4392_v48 }
 0x4d3   : > { %v4315_v30 = vpop.f32.mrf.mxu1 }
 0x4d4   : > { %v4316_v18 = vadd.f32 %v4315_v30, %v14306_v19  ;;  %v10804_v19 = vld [vmem:[%s17542_s3 + $0x1c0] sm:$0xff]  ;;  %v18462_v30 = vld [vmem:[#allocation49_spill] sm:$0xff] }
 0x4d5   : > { %4517 = vmatmul.bf16.gmra.mxu3 %v18461_v5  ;;  %4852 = vmatpush.bf16.msra.mxu1 %v10804_v19 }
 0x4d6   : > { %4354 = vmatmul.bf16.gmra.mxu1 %v14492_v15  ;;  %v4401_v48 = vpop.f32.mrf.mxu2  ;;  %v14753_v41 = vadd.f32 %v4399_v16, %v4316_v18 }
 0x4d8   : > { %v4478_v27 = vpop.f32.mrf.mxu3 }
 0x4d9   : > { %v14755_v1 = vadd.f32 %v4478_v27, %v4395_v26 }
 0x4db   : > { %v4317_v43 = vpop.f32.mrf.mxu1  ;;  %4443 = vmatmul.bf16.gmra.mxu2 %v13964_v42 }
 0x4dc   : > { %v4318_v3 = vadd.f32 %v4317_v43, %v14381_v57 }
 0x4de   : > { %v4404_v11 = vpop.f32.mrf.mxu2  ;;  %v14762_v15 = vadd.f32 %v4401_v48, %v4318_v3 }
 0x4e0   : > { %v4480_v16 = vpop.f32.mrf.mxu3 }
 0x4e1   : > { %v14764_v45 = vadd.f32 %v4480_v16, %v4397_v39  ;;  %v10851_v39 = vld [vmem:[%s17544_s5 + $0xf0] sm:$0xff] }
 0x4e2   : > { %6030 = vmatpush.bf16.msra.mxu3 %v10851_v39 }
 0x4e3   : > { %v4320_v38 = vpop.f32.mrf.mxu1 }
 0x4e4   : > { %v4321_v26 = vadd.f32 %v4320_v38, %v14447_v25 }
 0x4e5   : > { %4522 = vmatmul.bf16.gmra.mxu3 %v18462_v30 }
 0x4e6   : > { %4359 = vmatmul.bf16.gmra.mxu1 %v14030_v9  ;;  %v4406_v18 = vpop.f32.mrf.mxu2  ;;  %v14769_v33 = vadd.f32 %v4404_v11, %v4321_v26  ;;  %v10859_v9 = vld [vmem:[%s17544_s5 + $0x130] sm:$0xff]  ;;  %v18463_v11 = vld [vmem:[#allocation99_spill] sm:$0xff] }
 0x4e7   : > { %6099 = vmatpush.bf16.msra.mxu0 %v10859_v9 }
 0x4eb   : > { %v4322_v62 = vpop.f32.mrf.mxu1  ;;  %4448 = vmatmul.bf16.gmra.mxu2 %v14077_v32 }
 0x4ec   : > { %v4323_v57 = vadd.f32 %v4322_v62, %v14500_v7 }
 0x4ee   : > { %v4409_v48 = vpop.f32.mrf.mxu2  ;;  %v14773_v27 = vadd.f32 %v4406_v18, %v4323_v57  ;;  %v18464_v57 = vld [vmem:[#allocation57_spill] sm:$0xff] }
 0x4f3   : > { %v4325_v25 = vpop.f32.mrf.mxu1 }
 0x4f4   : > { %v4326_v19 = vadd.f32 %v4325_v25, %v14527_v51 }
 0x4f5   : > { %4527 = vmatmul.bf16.gmra.mxu3 %v14112_v54 }
 0x4f6   : > { %4364 = vmatmul.bf16.gmra.mxu1 %v14590_v58  ;;  %v4411_v7 = vpop.f32.mrf.mxu2  ;;  %v14784_v43 = vadd.f32 %v4409_v48, %v4326_v19 }
 0x4fb   : > { %v4327_v3 = vpop.f32.mrf.mxu1  ;;  %4453 = vmatmul.bf16.gmra.mxu2 %v18463_v11 }
 0x4fc   : > { %v4328_v16 = vadd.f32 %v4327_v3, %v14563_v63  ;;  %v10850_v63 = vld [vmem:[%s17544_s5 + $0xe8] sm:$0xff] }
 0x4fd   : > { %6031 = vmatpush.bf16.msra.mxu3 %v10850_v63 }
 0x4fe   : > { %v4414_v38 = vpop.f32.mrf.mxu2  ;;  %v14788_v26 = vadd.f32 %v4411_v7, %v4328_v16  ;;  %v18465_v7 = vld [vmem:[#allocation12_spill] sm:$0xff] }
 0x503   : > { %v4330_v18 = vpop.f32.mrf.mxu1 }
 0x504   : > { %v4331_v62 = vadd.f32 %v4330_v18, %v14583_v53  ;;  %v10858_v53 = vld [vmem:[%s17544_s5 + $0x128] sm:$0xff] }
 0x505   : > { %4532 = vmatmul.bf16.gmra.mxu3 %v18464_v57  ;;  %6100 = vmatpush.bf16.msra.mxu0 %v10858_v53 }
 0x506   : > { %4369 = vmatmul.bf16.gmra.mxu1 %v14611_v24  ;;  %v4416_v51 = vpop.f32.mrf.mxu2  ;;  %v14793_v58 = vadd.f32 %v4414_v38, %v4331_v62 }
 0x50b   : > { %v4332_v48 = vpop.f32.mrf.mxu1  ;;  %4937 = vmatmul.bf16.vlgmr.msra.gmra.mxu2 %v18438_v20 }
 0x50c   : > { %v4333_v39 = vadd.f32 %v4332_v48, %v14593_v29 }
 0x50e   : > { %v4419_v9 = vpop.f32.mrf.mxu2  ;;  %v14800_v25 = vadd.f32 %v4416_v51, %v4333_v39 }
 0x513   : > { %v4335_v24 = vpop.f32.mrf.mxu1 }
 0x514   : > { %v4336_v19 = vadd.f32 %v4335_v24, %v14600_v44 }
 0x515   : > { %4537 = vmatmul.bf16.gmra.mxu3 %v18465_v7 }
 0x516   : > { %v4421_v20 = vpop.f32.mrf.mxu2  ;;  %4853 = vmatmul.bf16.vlgmr.msra.gmra.mxu1 %v18427_v28  ;;  %v14808_v29 = vadd.f32 %v4419_v9, %v4336_v19  ;;  %v10849_v28 = vld [vmem:[%s17544_s5 + $0xe0] sm:$0xff] }
 0x517   : > { %6032 = vmatpush.bf16.msra.mxu3 %v10849_v28 }
 0x51b   : > { %v4337_v3 = vpop.f32.mrf.mxu1  ;;  %4942 = vmatmul.bf16.gmra.mxu2 %v18443_v0 }
 0x51c   : > { %v4338_v16 = vadd.f32 %v4337_v3, %v14617_v12 }
 0x51e   : > { %v4424_v38 = vpop.f32.mrf.mxu2  ;;  %v14812_v18 = vadd.f32 %v4421_v20, %v4338_v16 }
 0x523   : > { %v4340_v62 = vpop.f32.mrf.mxu1 }
 0x524   : > { %v4341_v51 = vadd.f32 %v4340_v62, %v14626_v21  ;;  %v10857_v21 = vld [vmem:[%s17544_s5 + $0x120] sm:$0xff] }
 0x525   : > { %6101 = vmatpush.bf16.msra.mxu0 %v10857_v21 }
 0x526   : > { %v4426_v48 = vpop.f32.mrf.mxu2  ;;  %4858 = vmatmul.bf16.gmra.mxu1 %v18433_v56  ;;  %v14816_v44 = vadd.f32 %v4424_v38, %v4341_v51 }
 0x52b   : > { %v4342_v39 = vpop.f32.mrf.mxu1  ;;  %4947 = vmatmul.bf16.gmra.mxu2 %v18445_v55 }
 0x52c   : > { %v4343_v0 = vadd.f32 %v4342_v39, %v14631_v37 }
 0x52e   : > { %v4429_v12 = vpop.f32.mrf.mxu2  ;;  %v14823_v63 = vadd.f32 %v4426_v48, %v4343_v0 }
 0x533   : > { %v4345_v56 = vpop.f32.mrf.mxu1 }
 0x534   : > { %v4346_v9 = vadd.f32 %v4345_v56, %v14643_v2  ;;  %v14858_v56 = vpop.f32.mrf.mxu0 }
 0x536   : > { %v4431_v53 = vpop.f32.mrf.mxu2  ;;  %4863 = vmatmul.bf16.gmra.mxu1 %v18441_v31  ;;  %v14830_v24 = vadd.f32 %v4429_v12, %v4346_v9  ;;  %v10848_v31 = vld [vmem:[%s17544_s5 + $0xd8] sm:$0xff] }
 0x537   : > { %6033 = vmatpush.bf16.msra.mxu3 %v10848_v31 }
 0x53b   : > { %v4347_v19 = vpop.f32.mrf.mxu1  ;;  %4952 = vmatmul.bf16.gmra.mxu2 %v18448_v10  ;;  %v10856_v10 = vld [vmem:[%s17544_s5 + $0x118] sm:$0xff] }
 0x53c   : > { %v4348_v37 = vadd.f32 %v4347_v19, %v14655_v23  ;;  %6102 = vmatpush.bf16.msra.mxu0 %v10856_v10  ;;  %v18471_v19 = vld [vmem:[#allocation73_spill] sm:$0xff] }
 0x53e   : > { %v4434_v55 = vpop.f32.mrf.mxu2  ;;  %v14834_v20 = vadd.f32 %v4431_v53, %v4348_v37  ;;  %v14872_v37 = vpop.f32.mrf.mxu0 }
 0x543   : > { %v4350_v3 = vpop.f32.mrf.mxu1 }
 0x544   : > { %v4351_v16 = vadd.f32 %v4350_v3, %v14667_v36  ;;  %v14876_v3 = vpop.f32.mrf.mxu3 }
 0x546   : > { %v4436_v38 = vpop.f32.mrf.mxu2  ;;  %4868 = vmatmul.bf16.gmra.mxu1 %v18444_v35  ;;  %v14838_v2 = vadd.f32 %v4434_v55, %v4351_v16  ;;  %v14882_v10 = vpop.f32.mrf.mxu0 }
 0x548   : > { %18466 = vst [vmem:[#allocation69_spill] sm:$0xff] %v14838_v2 }
 0x54b   : > { %v4352_v62 = vpop.f32.mrf.mxu1  ;;  %4957 = vmatmul.bf16.gmra.mxu2 %v18453_v34 }
 0x54c   : > { %v4353_v23 = vadd.f32 %v4352_v62, %v14672_v22 }
 0x54e   : > { %v4439_v36 = vpop.f32.mrf.mxu2  ;;  %v14848_v51 = vadd.f32 %v4436_v38, %v4353_v23  ;;  %v18473_v38 = vld [vmem:[#allocation10_spill] sm:$0xff] }
 0x550   : > { %18467 = vst [vmem:[#allocation15_spill] sm:$0xff] %v14848_v51 }
 0x553   : > { %v4355_v35 = vpop.f32.mrf.mxu1 }
 0x554   : > { %v4356_v48 = vadd.f32 %v4355_v35, %v14676_v46  ;;  %v18475_v35 = vld [vmem:[#allocation22_spill] sm:$0xff] }
 0x556   : > { %v4441_v28 = vpop.f32.mrf.mxu2  ;;  %4873 = vmatmul.bf16.gmra.mxu1 %v18446_v8  ;;  %v14852_v39 = vadd.f32 %v4439_v36, %v4356_v48  ;;  %v10847_v8 = vld [vmem:[%s17544_s5 + $0xd0] sm:$0xff] }
 0x557   : > { %6034 = vmatpush.bf16.msra.mxu3 %v10847_v8 }
 0x558   : > { %18468 = vst [vmem:[#allocation9_spill] sm:$0xff] %v14852_v39 }
 0x55b   : > { %v4357_v0 = vpop.f32.mrf.mxu1  ;;  %4962 = vmatmul.bf16.gmra.mxu2 %v18456_v59  ;;  %v10855_v59 = vld [vmem:[%s17544_s5 + $0x110] sm:$0xff] }
 0x55c   : > { %v4358_v34 = vadd.f32 %v4357_v0, %v14685_v6  ;;  %6103 = vmatpush.bf16.msra.mxu0 %v10855_v59 }
 0x55e   : > { %v4444_v22 = vpop.f32.mrf.mxu2  ;;  %v14856_v12 = vadd.f32 %v4441_v28, %v4358_v34  ;;  %v14890_v34 = vpop.f32.mrf.mxu0 }
 0x560   : > { %18469 = vst [vmem:[#allocation79_spill] sm:$0xff] %v14856_v12 }
 0x563   : > { %v4360_v21 = vpop.f32.mrf.mxu1 }
 0x564   : > { %v4361_v9 = vadd.f32 %v4360_v21, %v14689_v60 }
 0x566   : > { %v4446_v53 = vpop.f32.mrf.mxu2  ;;  %4878 = vmatmul.bf16.gmra.mxu1 %v18450_v61  ;;  %v14862_v46 = vadd.f32 %v4444_v22, %v4361_v9 }
 0x568   : > { %18470 = vst [vmem:[#allocation78_spill] sm:$0xff] %v14862_v46 }
 0x56b   : > { %v4362_v6 = vpop.f32.mrf.mxu1  ;;  %4967 = vmatmul.bf16.gmra.mxu2 %v18459_v14  ;;  %v14884_v14 = vpop.f32.mrf.mxu3 }
 0x56c   : > { %v4363_v60 = vadd.f32 %v4362_v6, %v18471_v19 }
 0x56e   : > { %v4449_v61 = vpop.f32.mrf.mxu2  ;;  %v14874_v55 = vadd.f32 %v4446_v53, %v4363_v60 }
 0x570   : > { %18472 = vst [vmem:[#allocation37_spill] sm:$0xff] %v14874_v55 }
 0x573   : > { %v4365_v16 = vpop.f32.mrf.mxu1 }
 0x574   : > { %v4366_v31 = vadd.f32 %v4365_v16, %v18473_v38 }
 0x576   : > { %v4451_v62 = vpop.f32.mrf.mxu2  ;;  %4883 = vmatmul.bf16.gmra.mxu1 %v18455_v52  ;;  %v14880_v23 = vadd.f32 %v4449_v61, %v4366_v31  ;;  %v14893_v52 = vpop.f32.mrf.mxu3  ;;  %v18479_v61 = vld [vmem:[#allocation65_spill] sm:$0xff] }
 0x578   : > { %18474 = vst [vmem:[#allocation39_spill] sm:$0xff] %v14880_v23  ;;  %v4484_v23 = vadd.f32 %v14876_v3, %v14753_v41 }
 0x57b   : > { %v4367_v36 = vpop.f32.mrf.mxu1  ;;  %4972 = vmatmul.bf16.gmra.mxu2 %v18461_v5  ;;  %v14899_v5 = vpop.f32.mrf.mxu0 }
 0x57c   : > { %v4368_v48 = vadd.f32 %v4367_v36, %v18475_v35  ;;  %v10844_v36 = vld [vmem:[%s17544_s5 + $0xb8] sm:$0xff] }
 0x57d   : > { %v18480_v35 = vld [vmem:[#allocation30_spill] sm:$0xff]  ;;  %6586 = vmatpush.bf16.msrb.mxu2 %v10844_v36 }
 0x57e   : > { %v4454_v28 = vpop.f32.mrf.mxu2  ;;  %v14888_v0 = vadd.f32 %v4451_v62, %v4368_v48  ;;  %v14910_v60 = vpop.f32.mrf.mxu3 }
 0x580   : > { %18476 = vst [vmem:[#allocation19_spill] sm:$0xff] %v14888_v0 }
 0x583   : > { %v4370_v22 = vpop.f32.mrf.mxu1  ;;  %v14913_v38 = vpop.f32.mrf.mxu0 }
 0x584   : > { %v4371_v21 = vadd.f32 %v4370_v22, %v14710_v47  ;;  %v10846_v47 = vld [vmem:[%s17544_s5 + $0xc8] sm:$0xff]  ;;  %v14928_v22 = vstv %s9894_s19  ;;  %s11163_s19 = smul.u32 3, %s19063_s27 }
 0x585   : > { %6035 = vmatpush.bf16.msra.mxu3 %v10846_v47  ;;  %vm5118_vm7 = vcmp.ge.s32.totalorder %v14928_v22, 0  ;;  %vm5128_vm8 = vcmp.lt.s32.totalorder %v14928_v22, 16  ;;  %v10836_v47 = vld [vmem:[%s17544_s5 + $0x78] sm:$0xff] }
 0x586   : > { %v4456_v9 = vpop.f32.mrf.mxu2  ;;  %4888 = vmatmul.bf16.gmra.mxu1 %v18458_v4  ;;  %v14896_v53 = vadd.f32 %v4454_v28, %v4371_v21  ;;  %v10854_v4 = vld [vmem:[%s17544_s5 + $0x108] sm:$0xff]  ;;  %v14917_v62 = vpop.f32.mrf.mxu3  ;;  %v14926_v28 = vld [vmem:[%s17543_s4] ss:$0 sm:$0xff]  ;;  %vm14940_vm9 = vmand %vm5118_vm7, %vm5128_vm8  ;;  %s354_s22 = sadd.s32 %s11164_s21, %s11163_s19 }
 0x587   : > { %6104 = vmatpush.bf16.msra.mxu0 %v10854_v4  ;;  %6517 = vmatpush.bf16.msrb.mxu1 %v10836_v47  ;;  %vm5148_vm11 = vmand %vm14940_vm9, %vm2790_vm10  ;;  %v5109_v47 = vadd.s32 1, %v14928_v22  ;;  %s9113_s27 = sshll.u32 %s354_s22, 3 }
 0x588   : > { %18477 = vst [vmem:[#allocation31_spill] sm:$0xff] %v14896_v53  ;;  %vm5180_vm1 = vmand %vm14940_vm9, %vm2831_vm14  ;;  %s17344_s28 = scalar_lea.vmem %s17548_s9, %s9113_s27 }
 0x589   : > { %vm5119_vm12 = vcmp.ge.s32.totalorder %v5109_v47, 0  ;;  %vm5129_vm13 = vcmp.lt.s32.totalorder %v5109_v47, 16 }
 0x58a   : > { %vm14972_vm15 = vmand %vm5119_vm12, %vm5129_vm13 }
 0x58b   : > { %v4372_v8 = vpop.f32.mrf.mxu1  ;;  %4977 = vmatmul.bf16.gmra.mxu2 %v18462_v30  ;;  %v14938_v4 = vpop.f32.mrf.mxu0  ;;  %vm5151_vm4 = vmand %vm14972_vm15, %vm2790_vm10 }
 0x58c   : > { %v4373_v59 = vadd.f32 %v4372_v8, %v14715_v17  ;;  %vm5183_vm5 = vmand %vm14972_vm15, %vm2831_vm14 }
 0x58e   : > { %v4938_v6 = vpop.f32.mrf.mxu2  ;;  %v14902_v19 = vadd.f32 %v4456_v9, %v4373_v59 }
 0x590   : > { %18478 = vst [vmem:[#allocation51_spill] sm:$0xff] %v14902_v19 }
 0x593   : > { %v4854_v30 = vpop.f32.mrf.mxu1  ;;  %v14960_v19 = vpop.f32.mrf.mxu0 }
 0x594   : > { %v4855_v16 = vadd.f32 %v4854_v30, %v18479_v61 }
 0x596   : > { %v4939_v17 = vadd.f32 %v4938_v6, %v4855_v16  ;;  %4893 = vmatmul.bf16.gmra.mxu1 %v18460_v49  ;;  %v4940_v31 = vpop.f32.mrf.mxu2  ;;  %v18481_v49 = vld [vmem:[#allocation59_spill] sm:$0xff] }
 0x598   : > { %v5013_v48 = vadd.f32 %v4939_v17, %v18480_v35  ;;  %v14946_v17 = vpop.f32.mrf.mxu3 }
 0x59a   : > { %v5047_v8 = vadd.f32 %v14926_v28, %v5013_v48  ;;  %v18485_v48 = vld [vmem:[#allocation67_spill] sm:$0xff] }
 0x59b   : > { %v4856_v21 = vpop.f32.mrf.mxu1  ;;  %4982 = vmatmul.bf16.gmra.mxu2 %v14112_v54 }
 0x59c   : > { %v4857_v9 = vadd.f32 %v4856_v21, %v18481_v49  ;;  %v5077_v61 = vmax.f32 %v5047_v8, 0.0 }
 0x59e   : > { %v4941_v59 = vadd.f32 %v4940_v31, %v4857_v9  ;;  %v4943_v6 = vpop.f32.mrf.mxu2  ;;  %v5208_v49 = vsel %vm5148_vm11, %v5077_v61, 0.0 }
 0x5a0   : > { %v5014_v54 = vadd.f32 %v4941_v59, %v14730_v50 }
 0x5a2   : > { %v5048_v16 = vadd.f32 %v14926_v28, %v5014_v54  ;;  %v10845_v54 = vld [vmem:[%s17544_s5 + $0xc0] sm:$0xff] }
 0x5a3   : > { %v4859_v36 = vpop.f32.mrf.mxu1  ;;  %6036 = vmatpush.bf16.msra.mxu3 %v10845_v54  ;;  %v14988_v54 = vpop.f32.mrf.mxu0 }
 0x5a4   : > { %v5078_v35 = vmax.f32 %v5048_v16, 0.0  ;;  %v4860_v21 = vadd.f32 %v4859_v36, %v18485_v48 }
 0x5a6   : > { %v5209_v9 = vsel %vm14940_vm9, %v5078_v35, 0.0  ;;  %v4944_v50 = vadd.f32 %v4943_v6, %v4860_v21  ;;  %4898 = vmatmul.bf16.gmra.mxu1 %v13964_v42  ;;  %v4945_v8 = vpop.f32.mrf.mxu2  ;;  %v18486_v6 = vld [vmem:[#allocation72_spill] sm:$0xff]  ;;  %v14965_v42 = vpop.f32.mrf.mxu3 }
 0x5a7   : > { %v11059_v59 = vpack.c.bf16 %v5209_v9, %v5208_v49  ;;  %v10853_v49 = vld [vmem:[%s17544_s5 + $0x100] sm:$0xff]  ;;  %v5110_v9 = vadd.s32 2, %v14928_v22 }
 0x5a8   : > { %v5015_v16 = vadd.f32 %v4944_v50, %v14735_v40  ;;  %6105 = vmatpush.bf16.msra.mxu0 %v10853_v49 }
 0x5a9   : > { %11060 = vst [vmem:[#allocation3] sm:$0xff] %v11059_v59   ;;  %vm5120_vm7 = vcmp.ge.s32.totalorder %v5110_v9, 0  ;;  %vm5130_vm8 = vcmp.lt.s32.totalorder %v5110_v9, 16 }
 0x5aa   : > { %v5049_v35 = vadd.f32 %v14926_v28, %v5015_v16  ;;  %vm15072_vm9 = vmand %vm5120_vm7, %vm5130_vm8 }
 0x5ab   : > { %v4861_v61 = vpop.f32.mrf.mxu1  ;;  %4987 = vmatmul.bf16.gmra.mxu2 %v18464_v57  ;;  %vm5154_vm11 = vmand %vm15072_vm9, %vm2790_vm10 }
 0x5ac   : > { %v4862_v36 = vadd.f32 %v4861_v61, %v18486_v6  ;;  %v5079_v50 = vmax.f32 %v5049_v35, 0.0  ;;  %v18490_v61 = vld [vmem:[#allocation71_spill] sm:$0xff] }
 0x5ae   : > { %v4946_v48 = vadd.f32 %v4945_v8, %v4862_v36  ;;  %v4948_v21 = vpop.f32.mrf.mxu2  ;;  %v5210_v35 = vsel %vm5180_vm1, %v5079_v50, 0.0  ;;  %v14999_v0 = vpop.f32.mrf.mxu3  ;;  %v10835_v50 = vld [vmem:[%s17544_s5 + $0x70] sm:$0xff]  ;;  %vm5186_vm1 = vmand %vm15072_vm9, %vm2831_vm14 }
 0x5af   : > { %6518 = vmatpush.bf16.msrb.mxu1 %v10835_v50 }
 0x5b0   : > { %v5016_v40 = vadd.f32 %v4946_v48, %v14739_v13  ;;  %v14976_v57 = vld [vmem:[#allocation3] sm:$0xff] }
 0x5b1   : > { %v17805_v47 = vshrl.u32 %v14976_v57, 16  ;;  %v17806_v36 = vshll.u32 %v14976_v57, 16 }
 0x5b2   : > { %v5050_v8 = vadd.f32 %v14926_v28, %v5016_v40 }
 0x5b3   : > { %v4864_v13 = vpop.f32.mrf.mxu1  ;;  %v5411_v30 = vrot.slane %v17805_v47, 7 }
 0x5b4   : > { %v5080_v16 = vmax.f32 %v5050_v8, 0.0  ;;  %v4865_v6 = vadd.f32 %v4864_v13, %v18490_v61  ;;  %v10843_v13 = vld [vmem:[%s17544_s5 + $0xb0] sm:$0xff] }
 0x5b5   : > { %v14997_v53 = vor.u32 %v17806_v36, %v5411_v30  ;;  %6587 = vmatpush.bf16.msrb.mxu2 %v10843_v13 }
 0x5b6   : > { %v5211_v48 = vsel %vm5151_vm4, %v5080_v16, 0.0  ;;  %v4949_v49 = vadd.f32 %v4948_v21, %v4865_v6  ;;  %4903 = vmatmul.bf16.gmra.mxu1 %v14077_v32  ;;  %v4950_v40 = vpop.f32.mrf.mxu2  ;;  %v18492_v16 = vld [vmem:[#allocation76_spill] sm:$0xff]  ;;  %v15010_v6 = vpop.f32.mrf.mxu0 }
 0x5b7   : > { %18491 = vst [vmem:[#allocation90_spill] sm:$0xff] %v14997_v53  ;;  %v11064_v8 = vpack.c.bf16 %v5211_v48, %v5210_v35  ;;  %v15016_v53 = vpop.f32.mrf.mxu3 }
 0x5b8   : > { %v5017_v21 = vadd.f32 %v4949_v49, %v14755_v1 }
 0x5b9   : > { %11148 = vst [vmem:[#allocation3 + $0x8] sm:$0xff] %v11064_v8  }
 0x5ba   : > { %v5051_v35 = vadd.f32 %v14926_v28, %v5017_v21  ;;  %v10842_v21 = vld [vmem:[%s17544_s5 + $0xa8] sm:$0xff] }
 0x5bb   : > { %v4866_v32 = vpop.f32.mrf.mxu1  ;;  %4992 = vmatmul.bf16.gmra.mxu2 %v18465_v7 }
 0x5bc   : > { %v4867_v61 = vadd.f32 %v4866_v32, %v18492_v16  ;;  %v5081_v7 = vmax.f32 %v5051_v35, 0.0  ;;  %6588 = vmatpush.bf16.msrb.mxu2 %v10842_v21 }
 0x5be   : > { %v4951_v48 = vadd.f32 %v4950_v40, %v4867_v61  ;;  %v4953_v8 = vpop.f32.mrf.mxu2 }
 0x5c0   : > { %v5018_v47 = vadd.f32 %v4951_v48, %v14764_v45  ;;  %v15014_v36 = vld [vmem:[#allocation3 + $0x8] sm:$0xf] }
 0x5c1   : > { %v15019_v1 = vunpack.c.l.b16 %v15014_v36 }
 0x5c2   : > { %v5052_v49 = vadd.f32 %v14926_v28, %v5018_v47  ;;  %v5212_v47 = vsel %vm14972_vm15, %v5081_v7, 0.0 }
 0x5c3   : > { %v4869_v13 = vpop.f32.mrf.mxu1  ;;  %v15028_v40 = vpack.c.b16 %v15019_v1, %v15019_v1 }
 0x5c4   : > { %v5082_v45 = vmax.f32 %v5052_v49, 0.0  ;;  %v4870_v50 = vadd.f32 %v4869_v13, %v14858_v56  ;;  %v15041_v13 = vpop.f32.mrf.mxu0 }
 0x5c5   : > { %v17807_v32 = vshrl.u32 %v15028_v40, 16  ;;  %v17809_v49 = vshll.u32 %v15028_v40, 16 }
 0x5c6   : > { %v5213_v16 = vsel %vm5183_vm5, %v5082_v45, 0.0  ;;  %v4954_v61 = vadd.f32 %v4953_v8, %v4870_v50  ;;  %4908 = vmatmul.bf16.gmra.mxu1 %v18463_v11  ;;  %v4955_v35 = vpop.f32.mrf.mxu2  ;;  %v10868_v11 = vld [vmem:[%s17544_s5 + $0x178] sm:$0xff]  ;;  %v10841_v8 = vld [vmem:[%s17544_s5 + $0xa0] sm:$0xff]  ;;  %v15054_v50 = vpop.f32.mrf.mxu3 }
 0x5c7   : > { %v11069_v48 = vpack.c.bf16 %v5213_v16, %v5212_v47  ;;  %v5418_v56 = vrot.slane %v17807_v32, 7  ;;  %v18493_v47 = vld [vmem:[#allocation111_spill] sm:$0xff]  ;;  %6167 = vmatpush.bf16.msrb.mxu3 %v10868_v11  ;;  %6589 = vmatpush.bf16.msrb.mxu2 %v10841_v8  ;;  %v10840_v16 = vld [vmem:[%s17544_s5 + $0x98] sm:$0xff] }
 0x5c8   : > { %v5019_v45 = vadd.f32 %v4954_v61, %v4484_v23  ;;  %v4486_v23 = vadd.f32 %v14884_v14, %v14762_v15  ;;  %v15067_v11 = vld [vmem:[#allocation3 + $0xc] sm:$0xf]  ;;  %v10834_v15 = vld [vmem:[%s17544_s5 + $0x68] sm:$0xff] }
 0x5c9   : > { %11149 = vst [vmem:[#allocation3 + $0x10] sm:$0xff] %v11069_v48   ;;  %v5421_v7 = vor.u32 %v17809_v49, %v5418_v56  ;;  %v17808_v14 = vunpack.c.l.b16 %v15067_v11  ;;  %6519 = vmatpush.bf16.msrb.mxu1 %v10834_v15  ;;  %v10833_v15 = vld [vmem:[%s17544_s5 + $0x60] sm:$0xff] }
 0x5ca   : > { %v5053_v61 = vadd.f32 %v14926_v28, %v5019_v45 }
 0x5cb   : > { %v4871_v21 = vpop.f32.mrf.mxu1  ;;  %4997 = vmatmul.bf16.gmra.mxu2 %v18493_v47  ;;  %v15058_v41 = vsel %vm516_vm0, %v5411_v30, %v5421_v7  ;;  %v10828_v30 = vld [vmem:[%s17544_s5 + $0x38] sm:$0xff] }
 0x5cc   : > { %v4872_v3 = vadd.f32 %v4871_v21, %v14872_v37  ;;  %6448 = vmatpush.bf16.msrb.mxu0 %v10828_v30  ;;  %6590 = vmatpush.bf16.msrb.mxu2 %v10840_v16  ;;  %v10839_v21 = vld [vmem:[%s17544_s5 + $0x90] sm:$0xff]  ;;  %v15088_v47 = vpop.f32.mrf.mxu0  ;;  %v10829_v37 = vld [vmem:[%s17544_s5 + $0x40] sm:$0xff] }
 0x5cd   : > { %6520 = vmatpush.bf16.msrb.mxu1 %v10833_v15  ;;  %v10837_v15 = vld [vmem:[%s17544_s5 + $0x80] sm:$0xff] }
 0x5ce   : > { %v4956_v48 = vadd.f32 %v4955_v35, %v4872_v3  ;;  %v4958_v56 = vpop.f32.mrf.mxu2  ;;  %v5083_v3 = vmax.f32 %v5053_v61, 0.0  ;;  %v15110_v32 = vpop.f32.mrf.mxu3 }
 0x5d0   : > { %v5020_v9 = vadd.f32 %v4956_v48, %v4486_v23  ;;  %v5302_v8 = vld [vmem:[#allocation3 + $0x10] sm:$0xf]  ;;  %v15076_v7 = vld [vmem:[#allocation3 + $0x14] sm:$0xf]  ;;  %6591 = vmatpush.bf16.msrb.mxu2 %v10839_v21 }
 0x5d1   : > { %v5362_v35 = vunpack.c.l.b16 %v5302_v8  ;;  %v15083_v45 = vunpack.c.l.b16 %v15076_v7 }
 0x5d2   : > { %v5054_v23 = vadd.f32 %v14926_v28, %v5020_v9 }
 0x5d3   : > { %v4874_v16 = vpop.f32.mrf.mxu1  ;;  %v15097_v48 = vpack.c.b16 %v5362_v35, %v17808_v14  ;;  %v15101_v30 = vpack.c.b16 %v15083_v45, %v15083_v45  ;;  %v15104_v8 = vpack.c.b16 %v15083_v45, %v5362_v35  ;;  %v10838_v35 = vld [vmem:[%s17544_s5 + $0x88] sm:$0xff] }
 0x5d4   : > { %v5084_v61 = vmax.f32 %v5054_v23, 0.0  ;;  %v4875_v9 = vadd.f32 %v4874_v16, %v14882_v10  ;;  %v5214_v23 = vsel %vm5154_vm11, %v5083_v3, 0.0  ;;  %v18496_v16 = vld [vmem:[#allocation20_spill] sm:$0xff]  ;;  %v4489_v3 = vadd.f32 %v14893_v52, %v14769_v33  ;;  %6592 = vmatpush.bf16.msrb.mxu2 %v10838_v35  ;;  %v18497_v52 = vld [vmem:[#allocation114_spill] sm:$0xff] }
 0x5d5   : > { %6106 = vmatmul.bf16.vlgmr.msra.gmra.mxu0 %v15097_v48  ;;  %v17812_v14 = vshrl.u32 %v15097_v48, 16  ;;  %v17810_v49 = vshrl.u32 %v15101_v30, 16  ;;  %v17813_v46 = vshll.u32 %v15097_v48, 16  ;;  %v17811_v2 = vshll.u32 %v15101_v30, 16 }
 0x5d6   : > { %v5215_v10 = vsel %vm15072_vm9, %v5084_v61, 0.0  ;;  %v4959_v21 = vadd.f32 %v4958_v56, %v4875_v9  ;;  %4913 = vmatmul.bf16.gmra.mxu1 %v18496_v16  ;;  %v4960_v55 = vpop.f32.mrf.mxu2  ;;  %v5111_v56 = vadd.s32 3, %v14928_v22  ;;  %v10832_v61 = vld [vmem:[%s17544_s5 + $0x58] sm:$0xff] }
 0x5d7   : > { %v11074_v12 = vpack.c.bf16 %v5215_v10, %v5214_v23  ;;  %v5426_v39 = vrot.slane %v17812_v14, 7  ;;  %v5433_v51 = vrot.slane %v17810_v49, 7  ;;  %6521 = vmatpush.bf16.msrb.mxu1 %v10832_v61  ;;  %v15147_v49 = vpop.f32.mrf.mxu0 }
 0x5d8   : > { %v5021_v10 = vadd.f32 %v4959_v21, %v4489_v3  ;;  %vm5121_vm12 = vcmp.ge.s32.totalorder %v5111_v56, 0  ;;  %6593 = vmatpush.bf16.msrb.mxu2 %v10837_v15  ;;  %v10831_v21 = vld [vmem:[%s17544_s5 + $0x50] sm:$0xff]  ;;  %vm5131_vm13 = vcmp.lt.s32.totalorder %v5111_v56, 16 }
 0x5d9   : > { %11150 = vst [vmem:[#allocation3 + $0x18] sm:$0xff] %v11074_v12   ;;  %v5429_v9 = vor.u32 %v17813_v46, %v5426_v39  ;;  %v5436_v23 = vor.u32 %v17811_v2, %v5433_v51  ;;  %v10867_v15 = vld [vmem:[%s17544_s5 + $0x170] sm:$0xff]  ;;  %vm15166_vm15 = vmand %vm5121_vm12, %vm5131_vm13 }
 0x5da   : > { %v5055_v61 = vadd.f32 %v14926_v28, %v5021_v10  ;;  %6168 = vmatpush.bf16.msrb.mxu3 %v10867_v15  ;;  %vm5157_vm4 = vmand %vm15166_vm15, %vm2790_vm10 }
 0x5db   : > { %v4876_v33 = vpop.f32.mrf.mxu1  ;;  %5002 = vmatmul.bf16.gmra.mxu2 %v18497_v52  ;;  %v5569_v16 = vsel %vm11528_vm2, %v15067_v11, %v5429_v9  ;;  %v15145_v12 = vsel %vm516_vm0, %v5426_v39, %v5436_v23  ;;  %v5668_v9 = vunpack.c.l.b16 %v15058_v41  ;;  %v4491_v39 = vadd.f32 %v14910_v60, %v14773_v27  ;;  %6522 = vmatpush.bf16.msrb.mxu1 %v10831_v21  ;;  %vm5189_vm5 = vmand %vm15166_vm15, %vm2831_vm14 }
 0x5dc   : > { %v4877_v51 = vadd.f32 %v4876_v33, %v14890_v34  ;;  %6037 = vmatmul.bf16.vlgmr.msra.gmra.mxu3 %v5569_v16  ;;  %v5674_v3 = vunpack.c.l.b16 %v15145_v12  ;;  %v5670_v52 = vunpack.c.l.b16 %v5569_v16  ;;  %v15161_v33 = vpop.f32.mrf.mxu3  ;;  %v5672_v12 = vunpack.c.h.b16 %v5569_v16 }
 0x5dd   : > { %v5085_v21 = vmax.f32 %v5055_v61, 0.0  ;;  %v18511_v41 = vshrl.u32 %v14976_v57, 16 }
 0x5de   : > { %v4961_v23 = vadd.f32 %v4960_v55, %v4877_v51  ;;  %v4963_v34 = vpop.f32.mrf.mxu2  ;;  %v15163_v2 = vpack.c.b16 %v5670_v52, %v5668_v9  ;;  %v10830_v51 = vld [vmem:[%s17544_s5 + $0x48] sm:$0xff]  ;;  %v15173_v46 = vpack.c.b16 %v5674_v3, %v5672_v12 }
 0x5df   : > { %6523 = vmatpush.bf16.msrb.mxu1 %v10830_v51  ;;  %v5216_v15 = vsel %vm5186_vm1, %v5085_v21, 0.0  ;;  %v4494_v51 = vadd.f32 %v14917_v62, %v14784_v43 }
 0x5e0   : > { %18499 = vst [vmem:[#allocation7_spill] sm:$0xff] %v15163_v2  ;;  %v5022_v14 = vadd.f32 %v4961_v23, %v4491_v39  ;;  %v5304_v27 = vld [vmem:[#allocation3 + $0x18] sm:$0xf]  ;;  %v5305_v60 = vld [vmem:[#allocation3 + $0x1c] sm:$0xf]  ;;  %v15192_v23 = vpop.f32.mrf.mxu0 }
 0x5e1   : > { %v5364_v55 = vunpack.c.l.b16 %v5304_v27  ;;  %v5365_v10 = vunpack.c.l.b16 %v5305_v60  ;;  %18502 = vst [vmem:[#allocation42_spill] sm:$0xff] %v15173_v46  ;;  %v18504_v46 = vld [vmem:[#allocation108_spill] sm:$0xff] }
 0x5e2   : > { %v5056_v56 = vadd.f32 %v14926_v28, %v5022_v14 }
 0x5e3   : > { %v4879_v16 = vpop.f32.mrf.mxu1  ;;  %v15184_v9 = vpack.c.b16 %v5365_v10, %v5364_v55  ;;  %v5820_v52 = vpack.c.b16 %v5364_v55, %v15083_v45  ;;  %6524 = vmatpush.bf16.msrb.mxu1 %v10829_v37 }
 0x5e4   : > { %v5086_v39 = vmax.f32 %v5056_v56, 0.0  ;;  %v4880_v61 = vadd.f32 %v4879_v16, %v14899_v5  ;;  %v15200_v56 = vpop.f32.mrf.mxu3 }
 0x5e5   : > { %18503 = vst [vmem:[#allocation26_spill] sm:$0xff] %v15184_v9  ;;  %v17814_v14 = vshrl.u32 %v15184_v9, 16  ;;  %6111 = vmatmul.bf16.gmra.mxu0 %v5820_v52  ;;  %v17815_v5 = vshll.u32 %v15184_v9, 16 }
 0x5e6   : > { %v5217_v12 = vsel %vm5157_vm4, %v5086_v39, 0.0  ;;  %v4964_v60 = vadd.f32 %v4963_v34, %v4880_v61  ;;  %4918 = vmatmul.bf16.gmra.mxu1 %v18504_v46  ;;  %v4965_v2 = vpop.f32.mrf.mxu2  ;;  %v10827_v46 = vld [vmem:[%s17544_s5 + $0x30] sm:$0xff]  ;;  %v18506_v39 = vld [vmem:[#allocation115_spill] sm:$0xff]  ;;  %v4496_v61 = vadd.f32 %v14946_v17, %v14788_v26 }
 0x5e7   : > { %v11079_v45 = vpack.c.bf16 %v5217_v12, %v5216_v15  ;;  %v5441_v55 = vrot.slane %v17814_v14, 7  ;;  %6449 = vmatpush.bf16.msrb.mxu0 %v10827_v46 }
 0x5e8   : > { %v5023_v34 = vadd.f32 %v4964_v60, %v4494_v51 }
 0x5e9   : > { %11151 = vst [vmem:[#allocation3 + $0x20] sm:$0xff] %v11079_v45   ;;  %v5444_v21 = vor.u32 %v17815_v5, %v5441_v55  ;;  %v15217_v45 = vpop.f32.mrf.mxu0  ;;  %v18509_v5 = vld [vmem:[#allocation113_spill] sm:$0xff] }
 0x5ea   : > { %v5057_v37 = vadd.f32 %v14926_v28, %v5023_v34 }
 0x5eb   : > { %v15209_v16 = vsel %vm11528_vm2, %v5304_v27, %v5444_v21  ;;  %v4881_v52 = vpop.f32.mrf.mxu1  ;;  %5007 = vmatmul.bf16.gmra.mxu2 %v18506_v39 }
 0x5ec   : > { %18505 = vst [vmem:[#allocation88_spill] sm:$0xff] %v15209_v16  ;;  %v4882_v43 = vadd.f32 %v4881_v52, %v14913_v38  ;;  %v5676_v62 = vunpack.c.l.b16 %v15209_v16  ;;  %v5087_v52 = vmax.f32 %v5057_v37, 0.0  ;;  %v15226_v17 = vpop.f32.mrf.mxu3 }
 0x5ee   : > { %v4966_v15 = vadd.f32 %v4965_v2, %v4882_v43  ;;  %v4968_v12 = vpop.f32.mrf.mxu2  ;;  %v5819_v60 = vpack.c.b16 %v5676_v62, %v5674_v3 }
 0x5f0   : > { %v5024_v27 = vadd.f32 %v4966_v15, %v4496_v61  ;;  %6042 = vmatmul.bf16.gmra.mxu3 %v5819_v60  ;;  %v15219_v51 = vld [vmem:[#allocation3 + $0x20] sm:$0xf]  ;;  %v15221_v21 = vld [vmem:[#allocation3 + $0x24] sm:$0xf]  ;;  %v18508_v61 = vshll.u32 %v14976_v57, 16  ;;  %v5218_v60 = vsel %vm15166_vm15, %v5087_v52, 0.0 }
 0x5f1   : > { %v5366_v38 = vunpack.c.l.b16 %v15219_v51  ;;  %v17816_v46 = vunpack.c.l.b16 %v15221_v21 }
 0x5f2   : > { %v5058_v26 = vadd.f32 %v14926_v28, %v5024_v27  ;;  %v5578_v37 = vrot.slane %v18508_v61, 1  ;;  %v18512_v61 = vshll.u32 %v15097_v48, 16 }
 0x5f3   : > { %v4884_v2 = vpop.f32.mrf.mxu1  ;;  %v15232_v3 = vpack.c.b16 %v5366_v38, %v5366_v38  ;;  %v5823_v34 = vpack.c.b16 %v5366_v38, %v5365_v10  ;;  %v15236_v39 = vpack.c.b16 %v17816_v46, %v5366_v38  ;;  %v18510_v38 = vshll.u32 %v15028_v40, 16 }
 0x5f4   : > { %v5088_v43 = vmax.f32 %v5058_v26, 0.0  ;;  %v4885_v62 = vadd.f32 %v4884_v2, %v14938_v4  ;;  %v5579_v52 = vor.u32 %v5578_v37, %v18511_v41  ;;  %v4501_v41 = vadd.f32 %v14999_v0, %v14800_v25  ;;  %v10826_v25 = vld [vmem:[%s17544_s5 + $0x28] sm:$0xff] }
 0x5f5   : > { %18507 = vst [vmem:[#allocation92_spill] sm:$0xff] %v15236_v39  ;;  %6116 = vmatmul.bf16.gmra.mxu0 %v5823_v34  ;;  %v17817_v15 = vshrl.u32 %v15232_v3, 16  ;;  %v5580_v46 = vrot.slane %v18510_v38, 1  ;;  %v17818_v2 = vshll.u32 %v15232_v3, 16  ;;  %v4499_v34 = vadd.f32 %v14965_v42, %v14793_v58 }
 0x5f6   : > { %v5219_v27 = vsel %vm5189_vm5, %v5088_v43, 0.0  ;;  %v4969_v14 = vadd.f32 %v4968_v12, %v4885_v62  ;;  %4923 = vmatmul.bf16.gmra.mxu1 %v18509_v5  ;;  %v4970_v10 = vpop.f32.mrf.mxu2  ;;  %v5112_v12 = vadd.s32 4, %v14928_v22  ;;  %v10866_v43 = vld [vmem:[%s17544_s5 + $0x168] sm:$0xff]  ;;  %v15260_v62 = vpop.f32.mrf.mxu0  ;;  %6450 = vmatpush.bf16.msrb.mxu0 %v10826_v25 }
 0x5f7   : > { %v11084_v26 = vpack.c.bf16 %v5219_v27, %v5218_v60  ;;  %v5448_v4 = vrot.slane %v17817_v15, 7  ;;  %v5583_v60 = vrot.slane %v18512_v61, 1  ;;  %v5581_v58 = vsel %vm757_vm3, %v5579_v52, %v5580_v46  ;;  %6169 = vmatpush.bf16.msrb.mxu3 %v10866_v43  ;;  %v15273_v15 = vpop.f32.mrf.mxu3 }
 0x5f8   : > { %v5025_v27 = vadd.f32 %v4969_v14, %v4499_v34  ;;  %vm5122_vm7 = vcmp.ge.s32.totalorder %v5112_v12, 0  ;;  %vm5132_vm8 = vcmp.lt.s32.totalorder %v5112_v12, 16  ;;  %v18513_v14 = vshrl.u32 %v15028_v40, 16 }
 0x5f9   : > { %11152 = vst [vmem:[#allocation3 + $0x28] sm:$0xff] %v11084_v26   ;;  %v5451_v5 = vor.u32 %v17818_v2, %v5448_v4  ;;  %v5678_v26 = vunpack.c.h.b16 %v15209_v16  ;;  %v18514_v43 = vshrl.u32 %v15097_v48, 16  ;;  %vm15285_vm9 = vmand %vm5122_vm7, %vm5132_vm8 }
 0x5fa   : > { %v5582_v34 = vor.u32 %v5580_v46, %v18513_v14  ;;  %vm5160_vm11 = vmand %vm15285_vm9, %vm2790_vm10 }
 0x5fb   : > { %v4886_v42 = vpop.f32.mrf.mxu1  ;;  %6594 = vmatmul.bf16.vlgmr.msrb.gmra.mxu2 %v5581_v58  ;;  %v15266_v37 = vsel %vm516_vm0, %v5441_v55, %v5451_v5  ;;  %v5059_v55 = vadd.f32 %v14926_v28, %v5025_v27  ;;  %v5584_v61 = vor.u32 %v5583_v60, %v18514_v43  ;;  %vm5192_vm1 = vmand %vm15285_vm9, %vm2831_vm14 }
 0x5fc   : > { %v4887_v38 = vadd.f32 %v4886_v42, %v14960_v19  ;;  %v17819_v4 = vunpack.c.l.b16 %v15266_v37 }
 0x5fd   : > { %v5089_v60 = vmax.f32 %v5059_v55, 0.0 }
 0x5fe   : > { %v4971_v52 = vadd.f32 %v4970_v10, %v4887_v38  ;;  %v4973_v5 = vpop.f32.mrf.mxu2  ;;  %v5822_v19 = vpack.c.b16 %v17819_v4, %v5678_v26  ;;  %v18517_v10 = vshll.u32 %v15101_v30, 16 }
 0x600   : > { %v5026_v40 = vadd.f32 %v4971_v52, %v4501_v41  ;;  %6047 = vmatmul.bf16.gmra.mxu3 %v5822_v19  ;;  %v5308_v46 = vld [vmem:[#allocation3 + $0x28] sm:$0xf]  ;;  %v5585_v12 = vrot.slane %v18517_v10, 1  ;;  %v15291_v27 = vld [vmem:[#allocation3 + $0x2c] sm:$0xf]  ;;  %v5638_v41 = vsel %vm11560_vm6, %v5582_v34, %v15014_v36  ;;  %v18519_v52 = vunpack.c.l.b16 %v15221_v21 }
 0x601   : > { %v5368_v58 = vunpack.c.l.b16 %v5308_v46  ;;  %v15294_v48 = vunpack.c.l.b16 %v15291_v27 }
 0x602   : > { %v5060_v42 = vadd.f32 %v14926_v28, %v5026_v40  ;;  %v15298_v38 = vsel %vm757_vm3, %v5584_v61, %v5585_v12  ;;  %v15318_v61 = vpop.f32.mrf.mxu0  ;;  %v5669_v40 = vunpack.c.l.b16 %v5638_v41 }
 0x603   : > { %v4889_v14 = vpop.f32.mrf.mxu1  ;;  %v15309_v19 = vpack.c.b16 %v5368_v58, %v18519_v52  ;;  %v15313_v55 = vpack.c.b16 %v15294_v48, %v15294_v48  ;;  %v15316_v43 = vpack.c.b16 %v15294_v48, %v5368_v58  ;;  %v5671_v46 = vunpack.c.l.b16 %v15298_v38 }
 0x604   : > { %v5090_v36 = vmax.f32 %v5060_v42, 0.0  ;;  %v4890_v34 = vadd.f32 %v4889_v14, %v14988_v54  ;;  %v5220_v52 = vsel %vm5160_vm11, %v5089_v60, 0.0  ;;  %v15329_v54 = vpop.f32.mrf.mxu3 }
 0x605   : > { %18520 = vst [vmem:[#allocation18_spill] sm:$0xff] %v15316_v43  ;;  %v17822_v25 = vshrl.u32 %v15309_v19, 16  ;;  %6121 = vmatmul.bf16.gmra.mxu0 %v15309_v19  ;;  %v17823_v10 = vshrl.u32 %v15313_v55, 16  ;;  %v5457_v42 = vshll.u32 %v15309_v19, 16  ;;  %v5464_v60 = vshll.u32 %v15313_v55, 16 }
 0x606   : > { %v5221_v2 = vsel %vm15285_vm9, %v5090_v36, 0.0  ;;  %v4974_v58 = vadd.f32 %v4973_v5, %v4890_v34  ;;  %v4975_v4 = vpop.f32.mrf.mxu2  ;;  %6525 = vmatmul.bf16.vlgmr.msrb.gmra.mxu1 %v14976_v57  ;;  %v4504_v36 = vadd.f32 %v15016_v53, %v14808_v29  ;;  %v5113_v5 = vadd.s32 5, %v14928_v22 }
 0x607   : > { %v11089_v14 = vpack.c.bf16 %v5221_v2, %v5220_v52  ;;  %v5456_v41 = vrot.slane %v17822_v25, 7  ;;  %v5463_v16 = vrot.slane %v17823_v10, 7  ;;  %v6240_v57 = vpack.c.b16 %v5671_v46, %v5669_v40 }
 0x608   : > { %v5027_v52 = vadd.f32 %v4974_v58, %v4504_v36  ;;  %vm5123_vm12 = vcmp.ge.s32.totalorder %v5113_v5, 0  ;;  %vm5133_vm13 = vcmp.lt.s32.totalorder %v5113_v5, 16 }
 0x609   : > { %11153 = vst [vmem:[#allocation3 + $0x30] sm:$0xff] %v11089_v14   ;;  %v5459_v34 = vor.u32 %v5457_v42, %v5456_v41  ;;  %v5466_v2 = vor.u32 %v5464_v60, %v5463_v16  ;;  %v4506_v16 = vadd.f32 %v15054_v50, %v14812_v18  ;;  %vm15365_vm15 = vmand %vm5123_vm12, %vm5133_vm13 }
 0x60a   : > { %v15351_v14 = vpop.f32.mrf.mxu0  ;;  %v5061_v58 = vadd.f32 %v14926_v28, %v5027_v52  ;;  %vm5163_vm4 = vmand %vm15365_vm15, %vm2790_vm10 }
 0x60b   : > { %v4891_v25 = vpop.f32.mrf.mxu1  ;;  %6599 = vmatmul.bf16.gmra.mxu2 %v6240_v57  ;;  %v5571_v10 = vsel %vm11528_vm2, %v15221_v21, %v5459_v34  ;;  %v15347_v43 = vsel %vm516_vm0, %v5456_v41, %v5466_v2  ;;  %v18521_v41 = vshrl.u32 %v15101_v30, 16  ;;  %vm5195_vm5 = vmand %vm15365_vm15, %vm2831_vm14  ;;  %v18530_v34 = vshrl.u32 %v15184_v9, 16 }
 0x60c   : > { %v4892_v29 = vadd.f32 %v4891_v25, %v15010_v6  ;;  %v5682_v53 = vunpack.c.l.b16 %v5571_v10  ;;  %v5684_v40 = vunpack.c.h.b16 %v5571_v10  ;;  %v5686_v46 = vunpack.c.l.b16 %v15347_v43  ;;  %v10865_v6 = vld [vmem:[%s17544_s5 + $0x160] sm:$0xff]  ;;  %v15371_v30 = vpop.f32.mrf.mxu3 }
 0x60d   : > { %v5587_v57 = vor.u32 %v5585_v12, %v18521_v41  ;;  %v18522_v25 = vunpack.c.l.b16 %v15266_v37  ;;  %6170 = vmatpush.bf16.msrb.mxu3 %v10865_v6  ;;  %v5091_v52 = vmax.f32 %v5061_v58, 0.0  ;;  %v18526_v58 = vunpack.c.l.b16 %v15067_v11 }
 0x60e   : > { %v4976_v36 = vadd.f32 %v4975_v4, %v4892_v29  ;;  %v4978_v21 = vpop.f32.mrf.mxu2  ;;  %v15369_v4 = vpack.c.b16 %v5686_v46, %v5684_v40 }
 0x60f   : > { %v15363_v5 = vpack.c.b16 %v5682_v53, %v18522_v25  ;;  %v5222_v6 = vsel %vm5192_vm1, %v5091_v52, 0.0 }
 0x610   : > { %v5028_v43 = vadd.f32 %v4976_v36, %v4506_v16  ;;  %6052 = vmatmul.bf16.gmra.mxu3 %v5571_v10  ;;  %v5310_v18 = vld [vmem:[#allocation3 + $0x30] sm:$0xf]  ;;  %v5311_v50 = vld [vmem:[#allocation3 + $0x34] sm:$0xf]  ;;  %v5639_v10 = vsel %vm11560_vm6, %v5587_v57, %v15076_v7  ;;  %v6239_v36 = vpack.c.b16 %v18526_v58, %v15019_v1  ;;  %v5673_v7 = vunpack.c.h.b16 %v15298_v38 }
 0x611   : > { %v5370_v12 = vunpack.c.l.b16 %v5310_v18  ;;  %v5371_v2 = vunpack.c.l.b16 %v5311_v50  ;;  %v15394_v57 = vunpack.c.l.b16 %v5639_v10  ;;  %v4509_v1 = vadd.f32 %v15110_v32, %v14816_v44 }
 0x612   : > { %v5062_v37 = vadd.f32 %v14926_v28, %v5028_v43  ;;  %v15399_v11 = vpop.f32.mrf.mxu0 }
 0x613   : > { %v4894_v29 = vpop.f32.mrf.mxu1  ;;  %v15385_v53 = vpack.c.b16 %v5371_v2, %v5370_v12  ;;  %v5828_v40 = vpack.c.b16 %v5370_v12, %v15294_v48  ;;  %v6243_v52 = vpack.c.b16 %v15394_v57, %v5673_v7 }
 0x614   : > { %v5092_v16 = vmax.f32 %v5062_v37, 0.0  ;;  %v4895_v0 = vadd.f32 %v4894_v29, %v15041_v13  ;;  %v15409_v29 = vpop.f32.mrf.mxu3 }
 0x615   : > { %18525 = vst [vmem:[#allocation49_spill] sm:$0xff] %v15385_v53  ;;  %v17826_v41 = vshrl.u32 %v15385_v53, 16  ;;  %6126 = vmatmul.bf16.gmra.mxu0 %v5828_v40  ;;  %v17834_v12 = vshll.u32 %v15385_v53, 16 }
 0x616   : > { %v5223_v25 = vsel %vm5163_vm4, %v5092_v16, 0.0  ;;  %v4979_v43 = vadd.f32 %v4978_v21, %v4895_v0  ;;  %v4980_v50 = vpop.f32.mrf.mxu2  ;;  %6530 = vmatmul.bf16.gmra.mxu1 %v6239_v36  ;;  %v10825_v21 = vld [vmem:[%s17544_s5 + $0x20] sm:$0xff]  ;;  %v4511_v0 = vadd.f32 %v15161_v33, %v14823_v63 }
 0x617   : > { %v11094_v48 = vpack.c.bf16 %v5223_v25, %v5222_v6  ;;  %v5471_v13 = vrot.slane %v17826_v41, 7  ;;  %6451 = vmatpush.bf16.msrb.mxu0 %v10825_v21 }
 0x618   : > { %v5029_v10 = vadd.f32 %v4979_v43, %v4509_v1 }
 0x619   : > { %11154 = vst [vmem:[#allocation3 + $0x38] sm:$0xff] %v11094_v48   ;;  %v5474_v37 = vor.u32 %v17834_v12, %v5471_v13 }
 0x61a   : > { %v5063_v58 = vadd.f32 %v14926_v28, %v5029_v10  ;;  %v15426_v1 = vpop.f32.mrf.mxu0 }
 0x61b   : > { %v15413_v40 = vsel %vm11528_vm2, %v5310_v18, %v5474_v37  ;;  %v4896_v16 = vpop.f32.mrf.mxu1  ;;  %6604 = vmatmul.bf16.gmra.mxu2 %v6243_v52 }
 0x61c   : > { %18527 = vst [vmem:[#allocation99_spill] sm:$0xff] %v15413_v40  ;;  %v4897_v44 = vadd.f32 %v4896_v16, %v15088_v47  ;;  %v5688_v32 = vunpack.c.l.b16 %v15413_v40  ;;  %v5093_v37 = vmax.f32 %v5063_v58, 0.0  ;;  %v18528_v16 = vshll.u32 %v15184_v9, 16 }
 0x61e   : > { %v4981_v36 = vadd.f32 %v4980_v50, %v4897_v44  ;;  %v4983_v7 = vpop.f32.mrf.mxu2  ;;  %v5827_v6 = vpack.c.b16 %v5688_v32, %v5686_v46  ;;  %v5588_v44 = vrot.slane %v18528_v16, 1  ;;  %v15442_v32 = vpop.f32.mrf.mxu3  ;;  %v5224_v58 = vsel %vm15365_vm15, %v5093_v37, 0.0 }
 0x620   : > { %v5030_v25 = vadd.f32 %v4981_v36, %v4511_v0  ;;  %6057 = vmatmul.bf16.gmra.mxu3 %v5827_v6  ;;  %v15420_v43 = vld [vmem:[#allocation3 + $0x38] sm:$0xf]  ;;  %v15422_v18 = vld [vmem:[#allocation3 + $0x3c] sm:$0xf]  ;;  %v5589_v37 = vor.u32 %v5588_v44, %v18530_v34 }
 0x621   : > { %v5372_v48 = vunpack.c.l.b16 %v15420_v43  ;;  %v5373_v47 = vunpack.c.l.b16 %v15422_v18 }
 0x622   : > { %v5064_v63 = vadd.f32 %v14926_v28, %v5030_v25  ;;  %v18529_v25 = vshll.u32 %v15232_v3, 16  ;;  %v15472_v44 = vpop.f32.mrf.mxu0 }
 0x623   : > { %v4899_v33 = vpop.f32.mrf.mxu1  ;;  %v15433_v46 = vpack.c.b16 %v5372_v48, %v5372_v48  ;;  %v5831_v50 = vpack.c.b16 %v5372_v48, %v5371_v2  ;;  %v15437_v52 = vpack.c.b16 %v5373_v47, %v5372_v48 }
 0x624   : > { %v5094_v21 = vmax.f32 %v5064_v63, 0.0  ;;  %v4900_v10 = vadd.f32 %v4899_v33, %v15147_v49  ;;  %v5590_v48 = vrot.slane %v18529_v25, 1  ;;  %v5690_v25 = vunpack.c.h.b16 %v15413_v40 }
 0x625   : > { %6131 = vmatmul.bf16.gmra.mxu0 %v5831_v50  ;;  %v17825_v0 = vshrl.u32 %v15433_v46, 16  ;;  %v17831_v33 = vshll.u32 %v15433_v46, 16  ;;  %v4514_v50 = vadd.f32 %v15200_v56, %v14830_v24 }
 0x626   : > { %v5225_v36 = vsel %vm5195_vm5, %v5094_v21, 0.0  ;;  %v4984_v2 = vadd.f32 %v4983_v7, %v4900_v10  ;;  %v4985_v6 = vpop.f32.mrf.mxu2  ;;  %6535 = vmatmul.bf16.gmra.mxu1 %v15104_v8  ;;  %v5114_v7 = vadd.s32 6, %v14928_v22  ;;  %v10864_v21 = vld [vmem:[%s17544_s5 + $0x158] sm:$0xff]  ;;  %v5593_v10 = vrot.slane %v5457_v42, 1 }
 0x627   : > { %v11099_v49 = vpack.c.bf16 %v5225_v36, %v5224_v58  ;;  %v5478_v63 = vrot.slane %v17825_v0, 7  ;;  %v15466_v58 = vsel %vm757_vm3, %v5589_v37, %v5590_v48  ;;  %6171 = vmatpush.bf16.msrb.mxu3 %v10864_v21  ;;  %v4516_v42 = vadd.f32 %v15226_v17, %v14834_v20  ;;  %v10824_v21 = vld [vmem:[%s17544_s5 + $0x18] sm:$0xff]  ;;  %v15489_v20 = vpop.f32.mrf.mxu3  ;;  %v18536_v0 = vld [vmem:[#allocation69_spill] sm:$0xff] }
 0x628   : > { %v5031_v16 = vadd.f32 %v4984_v2, %v4514_v50  ;;  %vm5124_vm7 = vcmp.ge.s32.totalorder %v5114_v7, 0  ;;  %vm5134_vm8 = vcmp.lt.s32.totalorder %v5114_v7, 16  ;;  %v18531_v2 = vshrl.u32 %v15232_v3, 16  ;;  %6452 = vmatpush.bf16.msrb.mxu0 %v10824_v21 }
 0x629   : > { %11155 = vst [vmem:[#allocation3 + $0x40] sm:$0xff] %v11099_v49   ;;  %v5481_v8 = vor.u32 %v17831_v33, %v5478_v63  ;;  %vm15491_vm9 = vmand %vm5124_vm7, %vm5134_vm8 }
 0x62a   : > { %v5592_v63 = vor.u32 %v5590_v48, %v18531_v2  ;;  %v5065_v34 = vadd.f32 %v14926_v28, %v5031_v16  ;;  %vm5166_vm11 = vmand %vm15491_vm9, %vm2790_vm10 }
 0x62b   : > { %v4901_v24 = vpop.f32.mrf.mxu1  ;;  %6609 = vmatmul.bf16.gmra.mxu2 %v15466_v58  ;;  %v15470_v56 = vsel %vm516_vm0, %v5471_v13, %v5481_v8  ;;  %v18532_v13 = vshrl.u32 %v15309_v19, 16  ;;  %vm5198_vm1 = vmand %vm15491_vm9, %vm2831_vm14 }
 0x62c   : > { %v4902_v36 = vadd.f32 %v4901_v24, %v15192_v23  ;;  %v5692_v49 = vunpack.c.l.b16 %v15470_v56  ;;  %v5095_v16 = vmax.f32 %v5065_v34, 0.0 }
 0x62d   : > { %v5594_v50 = vor.u32 %v5593_v10, %v18532_v13 }
 0x62e   : > { %v4986_v37 = vadd.f32 %v4985_v6, %v4902_v36  ;;  %v4988_v8 = vpop.f32.mrf.mxu2  ;;  %v5830_v23 = vpack.c.b16 %v5692_v49, %v5690_v25  ;;  %v5595_v6 = vrot.slane %v5464_v60, 1  ;;  %v5640_v25 = vsel %vm11560_vm6, %v5592_v63, %v15219_v51 }
 0x62f   : > { %v15544_v41 = vpop.f32.mrf.mxu3 }
 0x630   : > { %v5032_v3 = vadd.f32 %v4986_v37, %v4516_v42  ;;  %6062 = vmatmul.bf16.gmra.mxu3 %v5830_v23  ;;  %v5314_v19 = vld [vmem:[#allocation3 + $0x40] sm:$0xf]  ;;  %v15497_v48 = vld [vmem:[#allocation3 + $0x44] sm:$0xf]  ;;  %v15504_v36 = vsel %vm757_vm3, %v5594_v50, %v5595_v6  ;;  %v15527_v50 = vunpack.c.l.b16 %v5640_v25  ;;  %v15531_v37 = vpop.f32.mrf.mxu0  ;;  %v5226_v23 = vsel %vm5166_vm11, %v5095_v16, 0.0 }
 0x631   : > { %v5374_v7 = vunpack.c.l.b16 %v5314_v19  ;;  %v15500_v10 = vunpack.c.l.b16 %v15497_v48  ;;  %v5683_v34 = vunpack.c.l.b16 %v15504_v36  ;;  %v4519_v16 = vadd.f32 %v15273_v15, %v18536_v0 }
 0x632   : > { %v5066_v24 = vadd.f32 %v14926_v28, %v5032_v3 }
 0x633   : > { %v4904_v60 = vpop.f32.mrf.mxu1  ;;  %v15515_v42 = vpack.c.b16 %v5374_v7, %v5373_v47  ;;  %v15519_v28 = vpack.c.b16 %v15500_v10, %v15500_v10  ;;  %v15522_v2 = vpack.c.b16 %v15500_v10, %v5374_v7 }
 0x634   : > { %v5096_v13 = vmax.f32 %v5066_v24, 0.0  ;;  %v4905_v51 = vadd.f32 %v4904_v60, %v15217_v45 }
 0x635   : > { %18535 = vst [vmem:[#allocation57_spill] sm:$0xff] %v15522_v2  ;;  %v17828_v63 = vshrl.u32 %v15515_v42, 16  ;;  %6136 = vmatmul.bf16.gmra.mxu0 %v15515_v42  ;;  %v17827_v47 = vshrl.u32 %v15519_v28, 16  ;;  %v17829_v45 = vshll.u32 %v15515_v42, 16  ;;  %v17830_v60 = vshll.u32 %v15519_v28, 16 }
 0x636   : > { %v5227_v21 = vsel %vm15491_vm9, %v5096_v13, 0.0  ;;  %v4989_v3 = vadd.f32 %v4988_v8, %v4905_v51  ;;  %v4990_v19 = vpop.f32.mrf.mxu2  ;;  %6540 = vmatmul.bf16.gmra.mxu1 %v15184_v9  ;;  %v5115_v8 = vadd.s32 7, %v14928_v22  ;;  %v15548_v13 = vpack.c.b16 %v5683_v34, %v15527_v50 }
 0x637   : > { %v11104_v7 = vpack.c.bf16 %v5227_v21, %v5226_v23  ;;  %v5486_v24 = vrot.slane %v17828_v63, 7  ;;  %v5493_v25 = vrot.slane %v17827_v47, 7 }
 0x638   : > { %v5033_v21 = vadd.f32 %v4989_v3, %v4519_v16  ;;  %vm5125_vm12 = vcmp.ge.s32.totalorder %v5115_v8, 0  ;;  %vm5135_vm13 = vcmp.lt.s32.totalorder %v5115_v8, 16  ;;  %v15568_v16 = vld [vmem:[%s17543_s4] ss:$0 sm:$0xff]  ;;  %v10863_v8 = vld [vmem:[%s17544_s5 + $0x150] sm:$0xff] }
 0x639   : > { %11156 = vst [vmem:[#allocation3 + $0x48] sm:$0xff] %v11104_v7   ;;  %v5489_v51 = vor.u32 %v17829_v45, %v5486_v24  ;;  %v5496_v23 = vor.u32 %v17830_v60, %v5493_v25  ;;  %v18537_v25 = vld [vmem:[#allocation15_spill] sm:$0xff]  ;;  %vm15582_vm15 = vmand %vm5125_vm12, %vm5135_vm13  ;;  %6172 = vmatpush.bf16.msrb.mxu3 %v10863_v8 }
 0x63a   : > { %v4521_v3 = vadd.f32 %v15329_v54, %v18537_v25  ;;  %v15580_v54 = vpop.f32.mrf.mxu0  ;;  %vm5169_vm4 = vmand %vm15582_vm15, %vm2790_vm10 }
 0x63b   : > { %v4906_v47 = vpop.f32.mrf.mxu1  ;;  %6614 = vmatmul.bf16.gmra.mxu2 %v15548_v13  ;;  %v5573_v15 = vsel %vm11528_vm2, %v15422_v18, %v5489_v51  ;;  %v15559_v0 = vsel %vm516_vm0, %v5486_v24, %v5496_v23  ;;  %v5067_v18 = vadd.f32 %v15568_v16, %v5033_v21  ;;  %vm5201_vm5 = vmand %vm15582_vm15, %vm2831_vm14 }
 0x63c   : > { %v4907_v34 = vadd.f32 %v4906_v47, %v15260_v62  ;;  %v5694_v7 = vunpack.c.l.b16 %v5573_v15  ;;  %v5696_v63 = vunpack.c.h.b16 %v5573_v15  ;;  %v5698_v45 = vunpack.c.l.b16 %v15559_v0 }
 0x63d   : > { %v18538_v62 = vshrl.u32 %v15313_v55, 16 }
 0x63e   : > { %v4991_v24 = vadd.f32 %v4990_v19, %v4907_v34  ;;  %v4993_v51 = vpop.f32.mrf.mxu2  ;;  %v15578_v23 = vpack.c.b16 %v5694_v7, %v5692_v49  ;;  %v15586_v55 = vpack.c.b16 %v5698_v45, %v5696_v63 }
 0x63f   : > { %v5597_v47 = vor.u32 %v5595_v6, %v18538_v62  ;;  %v5097_v62 = vmax.f32 %v5067_v18, 0.0 }
 0x640   : > { %18539 = vst [vmem:[#allocation12_spill] sm:$0xff] %v15578_v23  ;;  %v5034_v0 = vadd.f32 %v4991_v24, %v4521_v3  ;;  %6067 = vmatmul.bf16.gmra.mxu3 %v5573_v15  ;;  %v5316_v19 = vld [vmem:[#allocation3 + $0x48] sm:$0xf]  ;;  %v5317_v21 = vld [vmem:[#allocation3 + $0x4c] sm:$0xf]  ;;  %v15596_v15 = vpop.f32.mrf.mxu3 }
 0x641   : > { %18542 = vst [vmem:[#allocation73_spill] sm:$0xff] %v15586_v55  ;;  %v5376_v6 = vunpack.c.l.b16 %v5316_v19  ;;  %v5377_v34 = vunpack.c.l.b16 %v5317_v21  ;;  %v5641_v49 = vsel %vm11560_vm6, %v5597_v47, %v15291_v27  ;;  %v5685_v27 = vunpack.c.h.b16 %v15504_v36 }
 0x642   : > { %v5068_v56 = vadd.f32 %v15568_v16, %v5034_v0  ;;  %v15608_v47 = vunpack.c.l.b16 %v5641_v49  ;;  %v5228_v8 = vsel %vm5198_vm1, %v5097_v62, 0.0  ;;  %v10823_v49 = vld [vmem:[%s17544_s5 + $0x10] sm:$0xff] }
 0x643   : > { %v4909_v63 = vpop.f32.mrf.mxu1  ;;  %v15602_v7 = vpack.c.b16 %v5377_v34, %v5376_v6  ;;  %v5836_v3 = vpack.c.b16 %v5376_v6, %v15500_v10  ;;  %v18544_v6 = vld [vmem:[#allocation9_spill] sm:$0xff]  ;;  %6453 = vmatpush.bf16.msrb.mxu0 %v10823_v49 }
 0x644   : > { %v5098_v17 = vmax.f32 %v5068_v56, 0.0  ;;  %v4910_v18 = vadd.f32 %v4909_v63, %v15318_v61  ;;  %v4524_v56 = vadd.f32 %v15371_v30, %v18544_v6  ;;  %v15627_v63 = vpop.f32.mrf.mxu0 }
 0x645   : > { %18543 = vst [vmem:[#allocation10_spill] sm:$0xff] %v15602_v7  ;;  %v17832_v24 = vshrl.u32 %v15602_v7, 16  ;;  %6141 = vmatmul.bf16.gmra.mxu0 %v5836_v3  ;;  %v17833_v61 = vshll.u32 %v15602_v7, 16 }
 0x646   : > { %v5229_v0 = vsel %vm5169_vm4, %v5098_v17, 0.0  ;;  %v4994_v21 = vadd.f32 %v4993_v51, %v4910_v18  ;;  %v4995_v60 = vpop.f32.mrf.mxu2  ;;  %6545 = vmatmul.bf16.gmra.mxu1 %v15236_v39  ;;  %v15622_v51 = vpack.c.b16 %v15608_v47, %v5685_v27 }
 0x647   : > { %v11109_v33 = vpack.c.bf16 %v5229_v0, %v5228_v8  ;;  %v15613_v10 = vrot.slane %v17832_v24, 7  ;;  %v18546_v8 = vld [vmem:[#allocation79_spill] sm:$0xff] }
 0x648   : > { %v5035_v3 = vadd.f32 %v4994_v21, %v4524_v56  ;;  %v15636_v27 = vpop.f32.mrf.mxu3  ;;  %v4526_v0 = vadd.f32 %v15409_v29, %v18546_v8 }
 0x649   : > { %11157 = vst [vmem:[#allocation3 + $0x50] sm:$0xff] %v11109_v33   ;;  %v5504_v62 = vor.u32 %v17833_v61, %v15613_v10 }
 0x64a   : > { %v5069_v6 = vadd.f32 %v15568_v16, %v5035_v3 }
 0x64b   : > { %v15631_v17 = vsel %vm11528_vm2, %v5316_v19, %v5504_v62  ;;  %v4911_v30 = vpop.f32.mrf.mxu1  ;;  %6619 = vmatmul.bf16.gmra.mxu2 %v15622_v51 }
 0x64c   : > { %18545 = vst [vmem:[#allocation22_spill] sm:$0xff] %v15631_v17  ;;  %v4912_v33 = vadd.f32 %v4911_v30, %v15351_v14  ;;  %v5700_v18 = vunpack.c.l.b16 %v15631_v17  ;;  %v5099_v30 = vmax.f32 %v5069_v6, 0.0 }
 0x64e   : > { %v4996_v21 = vadd.f32 %v4995_v60, %v4912_v33  ;;  %v4998_v56 = vpop.f32.mrf.mxu2  ;;  %v5835_v24 = vpack.c.b16 %v5700_v18, %v5698_v45  ;;  %v18548_v18 = vshll.u32 %v15385_v53, 16  ;;  %v5230_v6 = vsel %vm15582_vm15, %v5099_v30, 0.0 }
 0x64f   : > { %v18552_v30 = vshrl.u32 %v15385_v53, 16 }
 0x650   : > { %v5036_v19 = vadd.f32 %v4996_v21, %v4526_v0  ;;  %6072 = vmatmul.bf16.gmra.mxu3 %v5835_v24  ;;  %v15641_v62 = vld [vmem:[#allocation3 + $0x50] sm:$0xf]  ;;  %v15643_v61 = vld [vmem:[#allocation3 + $0x54] sm:$0xf]  ;;  %v5598_v8 = vrot.slane %v18548_v18, 1  ;;  %v18551_v18 = vld [vmem:[#allocation78_spill] sm:$0xff] }
 0x651   : > { %v5378_v14 = vunpack.c.l.b16 %v15641_v62  ;;  %v17837_v49 = vunpack.c.l.b16 %v15643_v61  ;;  %v4529_v25 = vadd.f32 %v15442_v32, %v18551_v18 }
 0x652   : > { %v5070_v12 = vadd.f32 %v15568_v16, %v5036_v19  ;;  %v6107_v39 = vpop.f32.mrf.mxu0 }
 0x653   : > { %v4914_v29 = vpop.f32.mrf.mxu1  ;;  %v15652_v45 = vpack.c.b16 %v5378_v14, %v5378_v14  ;;  %v5839_v60 = vpack.c.b16 %v5378_v14, %v5377_v34  ;;  %v15656_v24 = vpack.c.b16 %v17837_v49, %v5378_v14  ;;  %v18549_v34 = vld [vmem:[#allocation18_spill] sm:$0xff]  ;;  %v18550_v14 = vshll.u32 %v15433_v46, 16 }
 0x654   : > { %v5100_v3 = vmax.f32 %v5070_v12, 0.0  ;;  %v4915_v33 = vadd.f32 %v4914_v29, %v15399_v11  ;;  %v15667_v12 = vpop.f32.mrf.mxu3 }
 0x655   : > { %18547 = vst [vmem:[#allocation65_spill] sm:$0xff] %v15656_v24  ;;  %6146 = vmatmul.bf16.gmra.mxu0 %v5839_v60  ;;  %v17838_v0 = vshrl.u32 %v15652_v45, 16  ;;  %v5600_v49 = vrot.slane %v18550_v14, 1  ;;  %v17839_v60 = vshll.u32 %v15652_v45, 16 }
 0x656   : > { %v5231_v21 = vsel %vm5201_vm5, %v5100_v3, 0.0  ;;  %v4999_v19 = vadd.f32 %v4998_v56, %v4915_v33  ;;  %v5000_v9 = vpop.f32.mrf.mxu2  ;;  %6550 = vmatmul.bf16.gmra.mxu1 %v18549_v34  ;;  %v5599_v56 = vor.u32 %v5598_v8, %v18552_v30  ;;  %v5116_v3 = vadd.s32 8, %v14928_v22 }
 0x657   : > { %v11114_v11 = vpack.c.bf16 %v5231_v21, %v5230_v6  ;;  %v5508_v29 = vrot.slane %v17838_v0, 7  ;;  %v10862_v6 = vld [vmem:[%s17544_s5 + $0x148] sm:$0xff]  ;;  %v18553_v21 = vshll.u32 %v15515_v42, 16 }
 0x658   : > { %v5037_v0 = vadd.f32 %v4999_v19, %v4529_v25  ;;  %v15685_v32 = vsel %vm757_vm3, %v5599_v56, %v5600_v49  ;;  %6173 = vmatpush.bf16.msrb.mxu3 %v10862_v6  ;;  %vm5126_vm7 = vcmp.ge.s32.totalorder %v5116_v3, 0  ;;  %vm5136_vm8 = vcmp.lt.s32.totalorder %v5116_v3, 16 }
 0x659   : > { %11158 = vst [vmem:[#allocation3 + $0x58] sm:$0xff] %v11114_v11   ;;  %v5511_v33 = vor.u32 %v17839_v60, %v5508_v29  ;;  %v5603_v14 = vrot.slane %v18553_v21, 1  ;;  %v5702_v29 = vunpack.c.h.b16 %v15631_v17  ;;  %v18554_v21 = vld [vmem:[#allocation37_spill] sm:$0xff]  ;;  %v18555_v25 = vshrl.u32 %v15433_v46, 16  ;;  %vm15707_vm9 = vmand %vm5126_vm7, %vm5136_vm8 }
 0x65a   : > { %v6109_v34 = vpop.f32.mrf.mxu0  ;;  %v4531_v19 = vadd.f32 %v15489_v20, %v18554_v21  ;;  %v18556_v60 = vshrl.u32 %v15515_v42, 16  ;;  %vm5172_vm11 = vmand %vm15707_vm9, %vm2790_vm10 }
 0x65b   : > { %v4916_v18 = vpop.f32.mrf.mxu1  ;;  %6624 = vmatmul.bf16.gmra.mxu2 %v15685_v32  ;;  %v15690_v8 = vsel %vm516_vm0, %v15613_v10, %v5511_v33  ;;  %v5602_v56 = vor.u32 %v5600_v49, %v18555_v25  ;;  %v5071_v10 = vadd.f32 %v15568_v16, %v5037_v0  ;;  %vm15811_vm1 = vmand %vm15707_vm9, %vm2831_vm14 }
 0x65c   : > { %v4917_v11 = vadd.f32 %v4916_v18, %v15426_v1  ;;  %v17841_v30 = vunpack.c.l.b16 %v15690_v8  ;;  %v5604_v55 = vor.u32 %v5603_v14, %v18556_v60  ;;  %v10822_v18 = vld [vmem:[%s17544_s5 + $0x8] sm:$0xff] }
 0x65d   : > { %6454 = vmatpush.bf16.msrb.mxu0 %v10822_v18 }
 0x65e   : > { %v5001_v33 = vadd.f32 %v5000_v9, %v4917_v11  ;;  %v5003_v6 = vpop.f32.mrf.mxu2  ;;  %v5838_v1 = vpack.c.b16 %v17841_v30, %v5702_v29  ;;  %v18560_v9 = vshll.u32 %v15519_v28, 16  ;;  %v5101_v29 = vmax.f32 %v5071_v10, 0.0 }
 0x65f   : > { %v6038_v20 = vpop.f32.mrf.mxu3 }
 0x660   : > { %v5038_v46 = vadd.f32 %v5001_v33, %v4531_v19  ;;  %v15711_v49 = vadd.f32 %v6107_v39, %v6038_v20  ;;  %6077 = vmatmul.bf16.gmra.mxu3 %v5838_v1  ;;  %v5320_v42 = vld [vmem:[#allocation3 + $0x58] sm:$0xf]  ;;  %v5605_v0 = vrot.slane %v18560_v9, 1  ;;  %v15715_v60 = vld [vmem:[#allocation3 + $0x5c] sm:$0xf]  ;;  %v5642_v19 = vsel %vm11560_vm6, %v5602_v56, %v15420_v43 }
 0x661   : > { %v5380_v14 = vunpack.c.l.b16 %v5320_v42  ;;  %v15718_v11 = vunpack.c.l.b16 %v15715_v60  ;;  %v18561_v1 = vunpack.c.l.b16 %v15643_v61 }
 0x662   : > { %18559 = vst [vmem:[#allocation30_spill] sm:$0xff] %v15711_v49  ;;  %v5072_v21 = vadd.f32 %v15568_v16, %v5038_v46  ;;  %v15721_v25 = vpop.f32.mrf.mxu0  ;;  %v15724_v39 = vsel %vm757_vm3, %v5604_v55, %v5605_v0  ;;  %v15747_v46 = vunpack.c.l.b16 %v5642_v19 }
 0x663   : > { %v4919_v33 = vpop.f32.mrf.mxu1  ;;  %v15735_v10 = vpack.c.b16 %v5380_v14, %v18561_v1  ;;  %v15739_v18 = vpack.c.b16 %v15718_v11, %v15718_v11  ;;  %v15742_v55 = vpack.c.b16 %v15718_v11, %v5380_v14  ;;  %v5695_v42 = vunpack.c.l.b16 %v15724_v39 }
 0x664   : > { %v5102_v20 = vmax.f32 %v5072_v21, 0.0  ;;  %v4920_v43 = vadd.f32 %v4919_v33, %v15472_v44  ;;  %v5232_v1 = vsel %vm5172_vm11, %v5101_v29, 0.0  ;;  %v18563_v29 = vld [vmem:[#allocation39_spill] sm:$0xff] }
 0x665   : > { %18562 = vst [vmem:[#allocation59_spill] sm:$0xff] %v15742_v55  ;;  %v17847_v56 = vshrl.u32 %v15735_v10, 16  ;;  %6151 = vmatmul.bf16.gmra.mxu0 %v15735_v10  ;;  %v17848_v9 = vshrl.u32 %v15739_v18, 16  ;;  %v17849_v44 = vshll.u32 %v15735_v10, 16  ;;  %v17850_v23 = vshll.u32 %v15739_v18, 16 }
 0x666   : > { %v5233_v30 = vsel %vm15707_vm9, %v5102_v20, 0.0  ;;  %v5004_v17 = vadd.f32 %v5003_v6, %v4920_v43  ;;  %v5005_v14 = vpop.f32.mrf.mxu2  ;;  %6555 = vmatmul.bf16.gmra.mxu1 %v15385_v53  ;;  %v4534_v40 = vadd.f32 %v15544_v41, %v18563_v29  ;;  %v5117_v6 = vadd.s32 9, %v14928_v22 }
 0x667   : > { %v11119_v21 = vpack.c.bf16 %v5233_v30, %v5232_v1  ;;  %v6040_v33 = vpop.f32.mrf.mxu3  ;;  %v5516_v19 = vrot.slane %v17847_v56, 7  ;;  %v5523_v49 = vrot.slane %v17848_v9, 7  ;;  %v15766_v43 = vpack.c.b16 %v5695_v42, %v15747_v46  ;;  %v10861_v56 = vld [vmem:[%s17544_s5 + $0x140] sm:$0xff] }
 0x668   : > { %v15762_v20 = vadd.f32 %v6109_v34, %v6040_v33  ;;  %v5039_v9 = vadd.f32 %v5004_v17, %v4534_v40  ;;  %6174 = vmatpush.bf16.msrb.mxu3 %v10861_v56  ;;  %v10821_v40 = vld [vmem:[%s17544_s5] sm:$0xff]  ;;  %vm5127_vm12 = vcmp.ge.s32.totalorder %v5117_v6, 0  ;;  %vm5137_vm13 = vcmp.lt.s32.totalorder %v5117_v6, 16 }
 0x669   : > { %11159 = vst [vmem:[#allocation3 + $0x60] sm:$0xff] %v11119_v21   ;;  %v5519_v30 = vor.u32 %v17849_v44, %v5516_v19  ;;  %v5526_v1 = vor.u32 %v17850_v23, %v5523_v49  ;;  %v18564_v17 = vld [vmem:[#allocation19_spill] sm:$0xff]  ;;  %v18565_v56 = vshrl.u32 %v15519_v28, 16  ;;  %6455 = vmatpush.bf16.msrb.mxu0 %v10821_v40  ;;  %vm15800_vm15 = vmand %vm5127_vm12, %vm5137_vm13 }
 0x66a   : > { %v15775_v41 = vpop.f32.mrf.mxu0  ;;  %v4536_v29 = vadd.f32 %v15596_v15, %v18564_v17  ;;  %vm5175_vm4 = vmand %vm15800_vm15, %vm2790_vm10 }
 0x66b   : > { %v4921_v34 = vpop.f32.mrf.mxu1  ;;  %6629 = vmatmul.bf16.gmra.mxu2 %v15766_v43  ;;  %v5575_v22 = vsel %vm11528_vm2, %v15643_v61, %v5519_v30  ;;  %v15782_v42 = vsel %vm516_vm0, %v5516_v19, %v5526_v1  ;;  %v5073_v61 = vadd.f32 %v15568_v16, %v5039_v9  ;;  %v18566_v1 = vunpack.c.l.b16 %v15690_v8  ;;  %vm15895_vm10 = vmand %vm15800_vm15, %vm2831_vm14 }
 0x66c   : > { %v4922_v49 = vadd.f32 %v4921_v34, %v15531_v37  ;;  %v5706_v21 = vunpack.c.l.b16 %v5575_v22  ;;  %v5708_v33 = vunpack.c.h.b16 %v5575_v22  ;;  %v5710_v44 = vunpack.c.l.b16 %v15782_v42 }
 0x66d   : > { %v5607_v37 = vor.u32 %v5605_v0, %v18565_v56  ;;  %v5103_v0 = vmax.f32 %v5073_v61, 0.0  ;;  %v5697_v61 = vunpack.c.h.b16 %v15724_v39 }
 0x66e   : > { %v5006_v19 = vadd.f32 %v5005_v14, %v4922_v49  ;;  %v5008_v30 = vpop.f32.mrf.mxu2  ;;  %v15796_v34 = vpack.c.b16 %v5706_v21, %v18566_v1  ;;  %v15798_v23 = vpack.c.b16 %v5710_v44, %v5708_v33 }
 0x66f   : > { %v5234_v56 = vsel %vm15811_vm1, %v5103_v0, 0.0 }
 0x670   : > { %v5040_v53 = vadd.f32 %v5006_v19, %v4536_v29  ;;  %6082 = vmatmul.bf16.gmra.mxu3 %v5575_v22  ;;  %v5322_v6 = vld [vmem:[#allocation3 + $0x60] sm:$0xf]  ;;  %v15804_v9 = vld [vmem:[#allocation3 + $0x64] sm:$0xf]  ;;  %v5643_v22 = vsel %vm11560_vm6, %v5607_v37, %v15497_v48 }
 0x671   : > { %v5382_v14 = vunpack.c.l.b16 %v5322_v6  ;;  %v5383_v28 = vunpack.c.l.b16 %v15804_v9  ;;  %v15837_v19 = vunpack.c.l.b16 %v5643_v22  ;;  %v10892_v9 = vld [vmem:[%s17544_s5 + $0x238] sm:$0xff] }
 0x672   : > { %v5074_v42 = vadd.f32 %v15568_v16, %v5040_v53  ;;  %v15816_v49 = vpop.f32.mrf.mxu0  ;;  %7011 = vmatpush.bf16.msra.mxu1 %v10892_v9 }
 0x673   : > { %v4924_v21 = vpop.f32.mrf.mxu1  ;;  %v6043_v33 = vpop.f32.mrf.mxu3  ;;  %v15827_v3 = vpack.c.b16 %v5383_v28, %v5382_v14  ;;  %v5844_v40 = vpack.c.b16 %v5382_v14, %v15718_v11 }
 0x674   : > { %v5104_v53 = vmax.f32 %v5074_v42, 0.0  ;;  %v4925_v17 = vadd.f32 %v4924_v21, %v15580_v54  ;;  %v15832_v29 = vadd.f32 %v15721_v25, %v6043_v33  ;;  %v18572_v42 = vld [vmem:[#allocation31_spill] sm:$0xff]  ;;  %v15847_v33 = vpack.c.b16 %v15837_v19, %v5697_v61 }
 0x675   : > { %18571 = vst [vmem:[#allocation29_spill] sm:$0xff] %v15827_v3  ;;  %v5529_v48 = vshrl.u32 %v15827_v3, 16  ;;  %v5532_v31 = vshll.u32 %v15827_v3, 16  ;;  %6156 = vmatmul.bf16.gmra.mxu0 %v5844_v40  ;;  %v4539_v21 = vadd.f32 %v15636_v27, %v18572_v42 }
 0x676   : > { %v5235_v37 = vsel %vm5175_vm4, %v5104_v53, 0.0  ;;  %v5009_v11 = vadd.f32 %v5008_v30, %v4925_v17  ;;  %v5010_v1 = vpop.f32.mrf.mxu2  ;;  %6560 = vmatmul.bf16.gmra.mxu1 %v15437_v52 }
 0x677   : > { %v11124_v54 = vpack.c.bf16 %v5235_v37, %v5234_v56  ;;  %v15842_v25 = vrot.slane %v5529_v48, 7  ;;  %v5618_v14 = vrot.slane %v5532_v31, 1  ;;  %v18574_v56 = vld [vmem:[#allocation51_spill] sm:$0xff] }
 0x678   : > { %v5041_v0 = vadd.f32 %v5009_v11, %v4539_v21  ;;  %v4541_v37 = vadd.f32 %v15667_v12, %v18574_v56  ;;  %v10924_v12 = vld [vmem:[%s17546_s7 + $0xf0] sm:$0xff] }
 0x679   : > { %11160 = vst [vmem:[#allocation3 + $0x68] sm:$0xff] %v11124_v54   ;;  %v5534_v22 = vor.u32 %v5532_v31, %v15842_v25  ;;  %v15850_v8 = vor.u32 %v5618_v14, %v5529_v48  ;;  %v10925_v48 = vld [vmem:[%s17546_s7 + $0xf8] sm:$0xff] }
 0x67a   : > { %v15852_v30 = vpop.f32.mrf.mxu0  ;;  %v5075_v11 = vadd.f32 %v15568_v16, %v5041_v0  ;;  %7863 = vmatpush.bf16.msra.mxu2 %v10925_v48 }
 0x67b   : > { %v4926_v40 = vpop.f32.mrf.mxu1  ;;  %v6045_v53 = vpop.f32.mrf.mxu3  ;;  %6634 = vmatmul.bf16.gmra.mxu2 %v15847_v33  ;;  %v15857_v17 = vsel %vm11528_vm2, %v5322_v6, %v5534_v22  ;;  %v10876_v22 = vld [vmem:[%s17544_s5 + $0x1b8] sm:$0xff] }
 0x67c   : > { %18573 = vst [vmem:[#allocation67_spill] sm:$0xff] %v15857_v17  ;;  %v4927_v27 = vadd.f32 %v4926_v40, %v15627_v63  ;;  %v15861_v61 = vadd.f32 %v15775_v41, %v6045_v53  ;;  %v5762_v31 = vunpack.c.l.b16 %v15857_v17  ;;  %v18576_v63 = vshll.u32 %v15739_v18, 16  ;;  %6873 = vmatpush.bf16.msra.mxu3 %v10876_v22  ;;  %v10884_v22 = vld [vmem:[%s17544_s5 + $0x1f8] sm:$0xff] }
 0x67d   : > { %v5105_v0 = vmax.f32 %v5075_v11, 0.0  ;;  %v18580_v11 = vshrl.u32 %v15739_v18, 16  ;;  %v10923_v18 = vld [vmem:[%s17546_s7 + $0xe8] sm:$0xff]  ;;  %6942 = vmatpush.bf16.msra.mxu0 %v10884_v22 }
 0x67e   : > { %v5011_v54 = vadd.f32 %v5010_v1, %v4927_v27  ;;  %v15870_v14 = vpop.f32.mrf.mxu2  ;;  %v5843_v6 = vpack.c.b16 %v5762_v31, %v5710_v44  ;;  %v15874_v41 = vrot.slane %v18576_v63, 1  ;;  %7864 = vmatpush.bf16.msra.mxu2 %v10924_v12  ;;  %v18581_v63 = vshll.u32 %v15602_v7, 16 }
 0x67f   : > { %18575 = vst [vmem:[#allocation72_spill] sm:$0xff] %v15870_v14  ;;  %v18585_v31 = vshrl.u32 %v15602_v7, 16 }
 0x680   : > { %v5042_v42 = vadd.f32 %v5011_v54, %v4541_v37  ;;  %6087 = vmatmul.bf16.gmra.mxu3 %v5843_v6  ;;  %v15876_v21 = vld [vmem:[#allocation3 + $0x68] sm:$0xf]  ;;  %v15885_v44 = vld [vmem:[#allocation3 + $0x6c] sm:$0xf]  ;;  %v5617_v54 = vor.u32 %v15874_v41, %v18580_v11 }
 0x681   : > { %v5384_v1 = vunpack.c.l.b16 %v15876_v21  ;;  %v5385_v27 = vunpack.c.l.b16 %v15885_v44 }
 0x682   : > { %v5076_v40 = vadd.f32 %v15568_v16, %v5042_v42  ;;  %v15888_v53 = vpop.f32.mrf.mxu0  ;;  %v5608_v42 = vrot.slane %v18581_v63, 1  ;;  %v18584_v63 = vshll.u32 %v15652_v45, 16  ;;  %7865 = vmatpush.bf16.msra.mxu2 %v10923_v18  ;;  %v5645_v15 = vsel %vm11560_vm6, %v5617_v54, %v15715_v60 }
 0x683   : > { %v6048_v48 = vpop.f32.mrf.mxu3  ;;  %v15899_v56 = vpop.f32.mrf.mxu1  ;;  %v5405_v37 = vpack.c.b16 %v5384_v1, %v5384_v1  ;;  %v5847_v16 = vpack.c.b16 %v5384_v1, %v5383_v28  ;;  %v15922_v28 = vpack.c.b16 %v5385_v27, %v5384_v1  ;;  %v18586_v18 = vshll.u32 %v15735_v10, 16 }
 0x684   : > { %18579 = vst [vmem:[#allocation47_spill] sm:$0xff] %v15899_v56  ;;  %v5106_v6 = vmax.f32 %v5076_v40, 0.0  ;;  %v15907_v59 = vadd.f32 %v15816_v49, %v6048_v48  ;;  %v5236_v40 = vsel %vm15800_vm15, %v5105_v0, 0.0  ;;  %v5610_v14 = vrot.slane %v18584_v63, 1 }
 0x685   : > { %18582 = vst [vmem:[#allocation71_spill] sm:$0xff] %v15922_v28  ;;  %6161 = vmatmul.bf16.gmra.mxu0 %v5847_v16  ;;  %v5536_v49 = vshrl.u32 %v5405_v37, 16  ;;  %v5539_v12 = vshll.u32 %v5405_v37, 16  ;;  %v5609_v37 = vor.u32 %v5608_v42, %v18585_v31  ;;  %v10922_v16 = vld [vmem:[%s17546_s7 + $0xe0] sm:$0xff]  ;;  %v15952_v54 = vunpack.c.l.b16 %v5645_v15  ;;  %v10891_v31 = vld [vmem:[%s17544_s5 + $0x230] sm:$0xff] }
 0x686   : > { %v5237_v48 = vsel %vm15895_vm10, %v5106_v6, 0.0  ;;  %6565 = vmatmul.bf16.gmra.mxu1 %v15522_v2  ;;  %v15929_v11 = vpop.f32.mrf.mxu2  ;;  %7866 = vmatpush.bf16.msra.mxu2 %v10922_v16 }
 0x687   : > { %18583 = vst [vmem:[#allocation76_spill] sm:$0xff] %v15929_v11  ;;  %v11129_v3 = vpack.c.bf16 %v5237_v48, %v5236_v40  ;;  %v5538_v1 = vrot.slane %v5536_v49, 7  ;;  %v5620_v0 = vrot.slane %v5539_v12, 1  ;;  %v5613_v40 = vrot.slane %v18586_v18, 1  ;;  %7012 = vmatpush.bf16.msra.mxu1 %v10891_v31  ;;  %v10890_v18 = vld [vmem:[%s17544_s5 + $0x228] sm:$0xff] }
 0x688   : > { %v15950_v60 = vsel %vm757_vm3, %v5609_v37, %v5610_v14 }
 0x689   : > { %11161 = vst [vmem:[#allocation3 + $0x70] sm:$0xff] %v11129_v3   ;;  %v5541_v6 = vor.u32 %v5539_v12, %v5538_v1  ;;  %v15943_v22 = vsel %vm757_vm3, %v15850_v8, %v5620_v0  ;;  %v5622_v9 = vor.u32 %v5620_v0, %v5536_v49  ;;  %v5764_v49 = vunpack.c.h.b16 %v15857_v17 }
 0x68a   : > { %v15947_v48 = vpop.f32.mrf.mxu0  ;;  %v5763_v42 = vunpack.c.l.b16 %v15943_v22  ;;  %v5765_v1 = vunpack.c.h.b16 %v15943_v22 }
 0x68b   : > { %v6050_v63 = vpop.f32.mrf.mxu3  ;;  %v15955_v3 = vpop.f32.mrf.mxu1  ;;  %6639 = vmatmul.bf16.gmra.mxu2 %v15950_v60  ;;  %v15960_v8 = vsel %vm516_vm0, %v15842_v25, %v5541_v6  ;;  %v5646_v12 = vsel %vm11560_vm6, %v5622_v9, %v15876_v21  ;;  %v10921_v25 = vld [vmem:[%s17546_s7 + $0xd8] sm:$0xff]  ;;  %v18588_v6 = vshrl.u32 %v15735_v10, 16  ;;  %v10920_v10 = vld [vmem:[%s17546_s7 + $0xd0] sm:$0xff]  ;;  %7013 = vmatpush.bf16.msra.mxu1 %v10890_v18 }
 0x68c   : > { %18587 = vst [vmem:[#allocation111_spill] sm:$0xff] %v15955_v3  ;;  %v15968_v15 = vadd.f32 %v15852_v30, %v6050_v63  ;;  %v17853_v0 = vunpack.c.l.b16 %v15960_v8  ;;  %v15978_v37 = vpack.c.b16 %v5763_v42, %v15952_v54  ;;  %v15980_v21 = vunpack.c.l.b16 %v5646_v12  ;;  %7867 = vmatpush.bf16.msra.mxu2 %v10921_v25  ;;  %v5298_v25 = vld [vmem:[#allocation3] sm:$0xf] }
 0x68d   : > { %v5614_v30 = vor.u32 %v5613_v40, %v18588_v6  ;;  %v18590_v42 = vshrl.u32 %v15652_v45, 16 }
 0x68e   : > { %v15984_v9 = vpop.f32.mrf.mxu2  ;;  %v5846_v16 = vpack.c.b16 %v17853_v0, %v5764_v49  ;;  %v15992_v63 = vpack.c.b16 %v15980_v21, %v5765_v1 }
 0x68f   : > { %18589 = vst [vmem:[#allocation20_spill] sm:$0xff] %v15984_v9  ;;  %v5612_v12 = vor.u32 %v5610_v14, %v18590_v42  ;;  %v16004_v1 = vsel %vm757_vm3, %v5614_v30, %v15874_v41  ;;  %v18593_v30 = vld [vmem:[#allocation90_spill] sm:$0xff] }
 0x690   : > { %6092 = vmatmul.bf16.gmra.mxu3 %v5846_v16  ;;  %v5326_v40 = vld [vmem:[#allocation3 + $0x70] sm:$0xf]  ;;  %v15999_v6 = vld [vmem:[#allocation3 + $0x74] sm:$0xf]  ;;  %v5568_v18 = vsel %vm11528_vm2, %v5298_v25, %v18593_v30  ;;  %7868 = vmatpush.bf16.msra.mxu2 %v10920_v10  ;;  %v10888_v25 = vld [vmem:[%s17544_s5 + $0x218] sm:$0xff] }
 0x691   : > { %v5386_v49 = vunpack.c.l.b16 %v5326_v40  ;;  %v5387_v31 = vunpack.c.l.b16 %v15999_v6  ;;  %v5644_v16 = vsel %vm11560_vm6, %v5612_v12, %v15641_v62  ;;  %v10889_v62 = vld [vmem:[%s17544_s5 + $0x220] sm:$0xff]  ;;  %v5707_v12 = vunpack.c.l.b16 %v16004_v1 }
 0x692   : > { %v6127_v0 = vpop.f32.mrf.mxu0  ;;  %v16037_v10 = vunpack.c.l.b16 %v5644_v16  ;;  %7014 = vmatpush.bf16.msra.mxu1 %v10889_v62  ;;  %v10918_v62 = vld [vmem:[%s17546_s7 + $0xc0] sm:$0xff] }
 0x693   : > { %v6053_v45 = vpop.f32.mrf.mxu3  ;;  %v16006_v14 = vpop.f32.mrf.mxu1  ;;  %v16013_v42 = vpack.c.b16 %v5386_v49, %v5385_v27  ;;  %v16015_v40 = vpack.c.b16 %v5387_v31, %v5387_v31  ;;  %v16017_v9 = vpack.c.b16 %v5387_v31, %v5386_v49  ;;  %v10919_v27 = vld [vmem:[%s17546_s7 + $0xc8] sm:$0xff] }
 0x694   : > { %18591 = vst [vmem:[#allocation114_spill] sm:$0xff] %v16006_v14  ;;  %v16020_v41 = vadd.f32 %v15888_v53, %v6053_v45  ;;  %v10875_v45 = vld [vmem:[%s17544_s5 + $0x1b0] sm:$0xff]  ;;  %7869 = vmatpush.bf16.msra.mxu2 %v10919_v27 }
 0x695   : > { %18592 = vst [vmem:[#allocation4_spill] sm:$0xff] %v16017_v9  ;;  %6456 = vmatmul.bf16.vlgmr.msrb.gmra.mxu0 %v5568_v18  ;;  %v17855_v49 = vshrl.u32 %v16013_v42, 16  ;;  %v17857_v30 = vshll.u32 %v16013_v42, 16  ;;  %v17856_v18 = vshll.u32 %v16015_v40, 16  ;;  %v18595_v9 = vshrl.u32 %v16015_v40, 16  ;;  %6874 = vmatpush.bf16.msra.mxu3 %v10875_v45  ;;  %v10883_v45 = vld [vmem:[%s17544_s5 + $0x1f0] sm:$0xff] }
 0x696   : > { %6570 = vmatmul.bf16.gmra.mxu1 %v15602_v7  ;;  %v16035_v31 = vpop.f32.mrf.mxu2  ;;  %6943 = vmatpush.bf16.msra.mxu0 %v10883_v45 }
 0x697   : > { %18594 = vst [vmem:[#allocation108_spill] sm:$0xff] %v16035_v31  ;;  %v5546_v53 = vrot.slane %v17855_v49, 7  ;;  %v5553_v16 = vrot.slane %v18595_v9, 7  ;;  %v16055_v31 = vpack.c.b16 %v5707_v12, %v16037_v10  ;;  %7015 = vmatpush.bf16.msra.mxu1 %v10888_v25  ;;  %v10887_v12 = vld [vmem:[%s17544_s5 + $0x210] sm:$0xff] }
 0x698   : > { %7870 = vmatpush.bf16.msra.mxu2 %v10918_v62 }
 0x699   : > { %v5549_v28 = vor.u32 %v17857_v30, %v5546_v53  ;;  %v5556_v14 = vor.u32 %v17856_v18, %v5553_v16 }
 0x69a   : > { %v6129_v17 = vpop.f32.mrf.mxu0 }
 0x69b   : > { %v6055_v49 = vpop.f32.mrf.mxu3  ;;  %v16061_v11 = vpop.f32.mrf.mxu1  ;;  %6644 = vmatmul.bf16.gmra.mxu2 %v16055_v31  ;;  %v5577_v9 = vsel %vm11528_vm2, %v15885_v44, %v5549_v28  ;;  %v5557_v18 = vsel %vm516_vm0, %v5546_v53, %v5556_v14  ;;  %7016 = vmatpush.bf16.msra.mxu1 %v10887_v12  ;;  %v10886_v28 = vld [vmem:[%s17544_s5 + $0x208] sm:$0xff]  ;;  %v18602_v12 = vld [vmem:[#allocation7_spill] sm:$0xff] }
 0x69c   : > { %18596 = vst [vmem:[#allocation115_spill] sm:$0xff] %v16061_v11  ;;  %v16068_v27 = vadd.f32 %v15947_v48, %v6055_v49  ;;  %v6657_v16 = vunpack.c.l.b16 %v5577_v9  ;;  %v6659_v25 = vunpack.c.h.b16 %v5577_v9  ;;  %v6661_v44 = vunpack.c.l.b16 %v5557_v18  ;;  %v10885_v18 = vld [vmem:[%s17544_s5 + $0x200] sm:$0xff] }
 0x69d   : > { %v18598_v48 = vunpack.c.l.b16 %v15960_v8  ;;  %v5709_v8 = vunpack.c.h.b16 %v16004_v1 }
 0x69e   : > { %v16077_v30 = vpop.f32.mrf.mxu2  ;;  %v16087_v62 = vpack.c.b16 %v6661_v44, %v6659_v25 }
 0x69f   : > { %18597 = vst [vmem:[#allocation113_spill] sm:$0xff] %v16077_v30  ;;  %v16084_v49 = vpack.c.b16 %v6657_v16, %v18598_v48  ;;  %7017 = vmatpush.bf16.msra.mxu1 %v10886_v28  ;;  %v16102_v45 = vpack.c.b16 %v15952_v54, %v5709_v8  ;;  %v10874_v54 = vld [vmem:[%s17544_s5 + $0x1a8] sm:$0xff] }
 0x6a0   : > { %6175 = vmatmul.bf16.vlgmr.msrb.gmra.mxu3 %v15298_v38  ;;  %18600 = vst [vmem:[#allocation69_spill] sm:$0xff] %v16087_v62 }
 0x6a1   : > { %18599 = vst [vmem:[#allocation5_spill] sm:$0xff] %v16084_v49  ;;  %6875 = vmatpush.bf16.msra.mxu3 %v10874_v54 }
 0x6a2   : > { %v6132_v11 = vpop.f32.mrf.mxu0 }
 0x6a3   : > { %v6058_v14 = vpop.f32.mrf.mxu3  ;;  %v16089_v53 = vpop.f32.mrf.mxu1  ;;  %7018 = vmatpush.bf16.msra.mxu1 %v10885_v18 }
 0x6a4   : > { %18601 = vst [vmem:[#allocation15_spill] sm:$0xff] %v16089_v53  ;;  %v16091_v9 = vadd.f32 %v6127_v0, %v6058_v14  ;;  %v5677_v0 = vunpack.c.l.b16 %v15466_v58 }
 0x6a5   : > { %6461 = vmatmul.bf16.gmra.mxu0 %v18602_v12  ;;  %v18606_v12 = vld [vmem:[#allocation75_spill] sm:$0xff] }
 0x6a6   : > { %6575 = vmatmul.bf16.gmra.mxu1 %v15656_v24  ;;  %v16099_v38 = vpop.f32.mrf.mxu2  ;;  %v5821_v14 = vpack.c.b16 %v5677_v0, %v15394_v57  ;;  %v18607_v8 = vshrl.u32 %v18606_v12, 16  ;;  %v18609_v57 = vld [vmem:[#allocation42_spill] sm:$0xff]  ;;  %v11215_v24 = vld [vmem:[#allocation2 + $0x24] sm:$0xf] }
 0x6a7   : > { %18603 = vst [vmem:[#allocation9_spill] sm:$0xff] %v16099_v38 }
 0x6a8   : > { %v7260_v62 = vrot.slane %v18607_v8, 7  ;;  %v11214_v8 = vld [vmem:[#allocation2 + $0x18] sm:$0xf] }
 0x6aa   : > { %v6134_v16 = vpop.f32.mrf.mxu0 }
 0x6ab   : > { %v6060_v25 = vpop.f32.mrf.mxu3  ;;  %v16105_v44 = vpop.f32.mrf.mxu1  ;;  %6649 = vmatmul.bf16.gmra.mxu2 %v16102_v45 }
 0x6ac   : > { %18604 = vst [vmem:[#allocation79_spill] sm:$0xff] %v16105_v44  ;;  %v16108_v28 = vadd.f32 %v6129_v17, %v6060_v25  ;;  %v10882_v17 = vld [vmem:[%s17544_s5 + $0x1e8] sm:$0xff]  ;;  %v18611_v25 = vshll.u32 %v18606_v12, 16  ;;  %v5679_v12 = vunpack.c.h.b16 %v15466_v58 }
 0x6ad   : > { %6944 = vmatpush.bf16.msra.mxu0 %v10882_v17 }
 0x6ae   : > { %v16110_v48 = vpop.f32.mrf.mxu2 }
 0x6af   : > { %18605 = vst [vmem:[#allocation78_spill] sm:$0xff] %v16110_v48 }
 0x6b0   : > { %6180 = vmatmul.bf16.gmra.mxu3 %v5821_v14  ;;  %v7263_v14 = vor.u32 %v18611_v25, %v7260_v62  ;;  %v18615_v25 = vld [vmem:[#allocation6_spill] sm:$0xff] }
 0x6b1   : > { %v18616_v17 = vshrl.u32 %v18615_v25, 16 }
 0x6b2   : > { %v6137_v18 = vpop.f32.mrf.mxu0 }
 0x6b3   : > { %v6063_v38 = vpop.f32.mrf.mxu3  ;;  %v16118_v44 = vpop.f32.mrf.mxu1 }
 0x6b4   : > { %18608 = vst [vmem:[#allocation37_spill] sm:$0xff] %v16118_v44  ;;  %v16120_v30 = vadd.f32 %v6132_v11, %v6063_v38  ;;  %v16133_v11 = vsel %vm11528_vm2, %v11214_v8, %v7263_v14  ;;  %v18612_v38 = vld [vmem:[#allocation33_spill] sm:$0xff]  ;;  %v5824_v14 = vpack.c.b16 %v15527_v50, %v5679_v12  ;;  %v18622_v12 = vld [vmem:[#allocation88_spill] sm:$0xff] }
 0x6b5   : > { %6466 = vmatmul.bf16.gmra.mxu0 %v18609_v57  ;;  %v18613_v48 = vshrl.u32 %v18612_v38, 16  ;;  %v18618_v8 = vshll.u32 %v18612_v38, 16 }
 0x6b6   : > { %6580 = vmatmul.bf16.gmra.mxu1 %v15742_v55  ;;  %v16127_v0 = vpop.f32.mrf.mxu2 }
 0x6b7   : > { %18610 = vst [vmem:[#allocation39_spill] sm:$0xff] %v16127_v0  ;;  %v7275_v44 = vrot.slane %v18613_v48, 7  ;;  %v7267_v0 = vrot.slane %v18616_v17, 7  ;;  %v18619_v48 = vshll.u32 %v18615_v25, 16 }
 0x6b9   : > { %v7278_v56 = vor.u32 %v18618_v8, %v7275_v44 }
 0x6ba   : > { %v6139_v54 = vpop.f32.mrf.mxu0 }
 0x6bb   : > { %v6065_v53 = vpop.f32.mrf.mxu3  ;;  %v16137_v49 = vpop.f32.mrf.mxu1  ;;  %7871 = vmatmul.bf16.vlgmr.msra.gmra.mxu2 %v16133_v11 }
 0x6bc   : > { %18614 = vst [vmem:[#allocation19_spill] sm:$0xff] %v16137_v49  ;;  %v16140_v57 = vadd.f32 %v6134_v16, %v6065_v53  ;;  %v7270_v49 = vor.u32 %v18619_v48, %v7267_v0  ;;  %v16154_v53 = vsel %vm11528_vm2, %v11215_v24, %v7278_v56  ;;  %v10873_v24 = vld [vmem:[%s17544_s5 + $0x1a0] sm:$0xff] }
 0x6bd   : > { %18620 = vst [vmem:[#allocation51_spill] sm:$0xff] %v16154_v53  ;;  %6876 = vmatpush.bf16.msra.mxu3 %v10873_v24 }
 0x6be   : > { %v16145_v3 = vpop.f32.mrf.mxu2  ;;  %v16161_v50 = vsel %vm516_vm0, %v7260_v62, %v7270_v49  ;;  %v18624_v62 = vld [vmem:[#allocation60_spill] sm:$0xff] }
 0x6bf   : > { %18617 = vst [vmem:[#allocation31_spill] sm:$0xff] %v16145_v3  ;;  %v17862_v56 = vunpack.c.l.b16 %v16161_v50  ;;  %v18625_v0 = vshrl.u32 %v18624_v62, 16  ;;  %v18628_v24 = vshll.u32 %v18624_v62, 16 }
 0x6c0   : > { %6185 = vmatmul.bf16.gmra.mxu3 %v5824_v14  ;;  %v7510_v14 = vunpack.c.l.b16 %v16154_v53 }
 0x6c1   : > { %v7282_v8 = vrot.slane %v18625_v0, 7 }
 0x6c2   : > { %v6142_v55 = vpop.f32.mrf.mxu0 }
 0x6c3   : > { %v6068_v16 = vpop.f32.mrf.mxu3  ;;  %v16156_v7 = vpop.f32.mrf.mxu1 }
 0x6c4   : > { %18621 = vst [vmem:[#allocation90_spill] sm:$0xff] %v16156_v7  ;;  %v16158_v17 = vadd.f32 %v6137_v18, %v6068_v16  ;;  %v7653_v18 = vpack.c.b16 %v7510_v14, %v17862_v56  ;;  %v7285_v7 = vor.u32 %v18628_v24, %v7282_v8 }
 0x6c5   : > { %6471 = vmatmul.bf16.gmra.mxu0 %v18622_v12 }
 0x6c6   : > { %v16165_v25 = vpop.f32.mrf.mxu2  ;;  %7019 = vmatmul.bf16.vlgmr.msra.gmra.mxu1 %v15466_v58  ;;  %v10881_v58 = vld [vmem:[%s17544_s5 + $0x1e0] sm:$0xff]  ;;  %v16189_v0 = vsel %vm516_vm0, %v7275_v44, %v7285_v7  ;;  %v5689_v44 = vunpack.c.l.b16 %v15685_v32 }
 0x6c7   : > { %18623 = vst [vmem:[#allocation7_spill] sm:$0xff] %v16165_v25  ;;  %6945 = vmatpush.bf16.msra.mxu0 %v10881_v58 }
 0x6c8   : > { %18629 = vst [vmem:[#allocation88_spill] sm:$0xff] %v16189_v0  ;;  %v5829_v24 = vpack.c.b16 %v5689_v44, %v15608_v47 }
 0x6ca   : > { %v6144_v49 = vpop.f32.mrf.mxu0 }
 0x6cb   : > { %v6070_v48 = vpop.f32.mrf.mxu3  ;;  %v16176_v16 = vpop.f32.mrf.mxu1  ;;  %7876 = vmatmul.bf16.gmra.mxu2 %v7653_v18 }
 0x6cc   : > { %18626 = vst [vmem:[#allocation42_spill] sm:$0xff] %v16176_v16  ;;  %v16178_v25 = vadd.f32 %v6139_v54, %v6070_v48  ;;  %v7512_v48 = vunpack.c.h.b16 %v16154_v53 }
 0x6ce   : > { %v16183_v3 = vpop.f32.mrf.mxu2 }
 0x6cf   : > { %18627 = vst [vmem:[#allocation6_spill] sm:$0xff] %v16183_v3  ;;  %v17863_v3 = vunpack.c.l.b16 %v16189_v0 }
 0x6d0   : > { %6190 = vmatmul.bf16.gmra.mxu3 %v15504_v36 }
 0x6d1   : > { %v7656_v36 = vpack.c.b16 %v17863_v3, %v7512_v48  ;;  %v18634_v48 = vld [vmem:[#allocation80_spill] sm:$0xff] }
 0x6d2   : > { %v6147_v14 = vpop.f32.mrf.mxu0  ;;  %v18635_v3 = vshrl.u32 %v18634_v48, 16  ;;  %v18638_v44 = vshll.u32 %v18634_v48, 16 }
 0x6d3   : > { %v6073_v56 = vpop.f32.mrf.mxu3  ;;  %v16191_v18 = vpop.f32.mrf.mxu1 }
 0x6d4   : > { %18630 = vst [vmem:[#allocation60_spill] sm:$0xff] %v16191_v18  ;;  %v16193_v54 = vadd.f32 %v6142_v55, %v6073_v56  ;;  %v7290_v18 = vrot.slane %v18635_v3, 7 }
 0x6d5   : > { %6476 = vmatmul.bf16.gmra.mxu0 %v15363_v5 }
 0x6d6   : > { %v16198_v62 = vpop.f32.mrf.mxu2  ;;  %7024 = vmatmul.bf16.gmra.mxu1 %v15548_v13  ;;  %v10872_v13 = vld [vmem:[%s17544_s5 + $0x198] sm:$0xff] }
 0x6d7   : > { %18631 = vst [vmem:[#allocation116_spill] sm:$0xff] %v16198_v62  ;;  %6877 = vmatpush.bf16.msra.mxu3 %v10872_v13 }
 0x6da   : > { %v6149_v7 = vpop.f32.mrf.mxu0 }
 0x6db   : > { %v6075_v8 = vpop.f32.mrf.mxu3  ;;  %v16204_v58 = vpop.f32.mrf.mxu1  ;;  %7881 = vmatmul.bf16.gmra.mxu2 %v7656_v36 }
 0x6dc   : > { %18632 = vst [vmem:[#allocation117_spill] sm:$0xff] %v16204_v58  ;;  %v16206_v55 = vadd.f32 %v6144_v49, %v6075_v8  ;;  %v10880_v49 = vld [vmem:[%s17544_s5 + $0x1d8] sm:$0xff]  ;;  %v7293_v8 = vor.u32 %v18638_v44, %v7290_v18 }
 0x6dd   : > { %6946 = vmatpush.bf16.msra.mxu0 %v10880_v49  ;;  %v18644_v44 = vld [vmem:[#allocation82_spill] sm:$0xff] }
 0x6de   : > { %v16208_v56 = vpop.f32.mrf.mxu2  ;;  %v18645_v49 = vshrl.u32 %v18644_v44, 16 }
 0x6df   : > { %18633 = vst [vmem:[#allocation118_spill] sm:$0xff] %v16208_v56 }
 0x6e0   : > { %6195 = vmatmul.bf16.gmra.mxu3 %v5829_v24  ;;  %v11216_v24 = vld [vmem:[#allocation2 + $0x30] sm:$0xf]  ;;  %v7297_v48 = vrot.slane %v18645_v49, 7 }
 0x6e2   : > { %v6152_v62 = vpop.f32.mrf.mxu0 }
 0x6e3   : > { %v6078_v16 = vpop.f32.mrf.mxu3  ;;  %v16216_v0 = vpop.f32.mrf.mxu1 }
 0x6e4   : > { %18636 = vst [vmem:[#allocation119_spill] sm:$0xff] %v16216_v0  ;;  %v16218_v36 = vadd.f32 %v6147_v14, %v6078_v16  ;;  %v16231_v16 = vsel %vm11528_vm2, %v11216_v24, %v7293_v8  ;;  %v18640_v14 = vld [vmem:[#allocation25_spill] sm:$0xff] }
 0x6e5   : > { %6481 = vmatmul.bf16.gmra.mxu0 %v15369_v4  ;;  %18639 = vst [vmem:[#allocation121_spill] sm:$0xff] %v16231_v16  ;;  %v18641_v13 = vshrl.u32 %v18640_v14, 16  ;;  %v18647_v24 = vshll.u32 %v18640_v14, 16 }
 0x6e6   : > { %v16224_v47 = vpop.f32.mrf.mxu2  ;;  %7029 = vmatmul.bf16.gmra.mxu1 %v15622_v51  ;;  %v5691_v51 = vunpack.c.h.b16 %v15685_v32 }
 0x6e7   : > { %18637 = vst [vmem:[#allocation120_spill] sm:$0xff] %v16224_v47  ;;  %v7305_v56 = vrot.slane %v18641_v13, 7  ;;  %v18648_v13 = vshll.u32 %v18644_v44, 16 }
 0x6e8   : > { %v5832_v8 = vpack.c.b16 %v15747_v46, %v5691_v51  ;;  %v18652_v51 = vld [vmem:[#allocation99_spill] sm:$0xff] }
 0x6e9   : > { %v7308_v38 = vor.u32 %v18647_v24, %v7305_v56 }
 0x6ea   : > { %v6154_v3 = vpop.f32.mrf.mxu0 }
 0x6eb   : > { %v6080_v0 = vpop.f32.mrf.mxu3  ;;  %v16235_v58 = vpop.f32.mrf.mxu1  ;;  %7886 = vmatmul.bf16.gmra.mxu2 %v16231_v16  ;;  %v11217_v16 = vld [vmem:[#allocation2 + $0x3c] sm:$0xf] }
 0x6ec   : > { %18642 = vst [vmem:[#allocation122_spill] sm:$0xff] %v16235_v58  ;;  %v16238_v47 = vadd.f32 %v6149_v7, %v6080_v0  ;;  %v7300_v58 = vor.u32 %v18648_v13, %v7297_v48  ;;  %v16252_v0 = vsel %vm11528_vm2, %v11217_v16, %v7308_v38  ;;  %v10871_v38 = vld [vmem:[%s17544_s5 + $0x190] sm:$0xff] }
 0x6ed   : > { %18649 = vst [vmem:[#allocation124_spill] sm:$0xff] %v16252_v0  ;;  %6878 = vmatpush.bf16.msra.mxu3 %v10871_v38 }
 0x6ee   : > { %18643 = vst [vmem:[#allocation123_spill] sm:$0xff] %v16238_v47  ;;  %v16243_v53 = vpop.f32.mrf.mxu2  ;;  %v16259_v46 = vsel %vm516_vm0, %v7290_v18, %v7300_v58  ;;  %v18654_v58 = vld [vmem:[#allocation40_spill] sm:$0xff] }
 0x6ef   : > { %18646 = vst [vmem:[#allocation82_spill] sm:$0xff] %v16243_v53  ;;  %v17872_v48 = vunpack.c.l.b16 %v16259_v46  ;;  %v18655_v16 = vshrl.u32 %v18654_v58, 16  ;;  %v18658_v38 = vshll.u32 %v18654_v58, 16 }
 0x6f0   : > { %6200 = vmatmul.bf16.gmra.mxu3 %v5832_v8  ;;  %18651 = vst [vmem:[#allocation126_spill] sm:$0xff] %v16259_v46  ;;  %v7522_v8 = vunpack.c.l.b16 %v16252_v0 }
 0x6f1   : > { %v7312_v24 = vrot.slane %v18655_v16, 7 }
 0x6f2   : > { %v6157_v2 = vpop.f32.mrf.mxu0 }
 0x6f3   : > { %v6083_v7 = vpop.f32.mrf.mxu3  ;;  %v16254_v47 = vpop.f32.mrf.mxu1 }
 0x6f4   : > { %18650 = vst [vmem:[#allocation125_spill] sm:$0xff] %v16254_v47  ;;  %v16256_v49 = vadd.f32 %v6152_v62, %v6083_v7  ;;  %v7661_v62 = vpack.c.b16 %v7522_v8, %v17872_v48  ;;  %v7315_v47 = vor.u32 %v18658_v38, %v7312_v24 }
 0x6f5   : > { %6486 = vmatmul.bf16.gmra.mxu0 %v18652_v51 }
 0x6f6   : > { %v16263_v44 = vpop.f32.mrf.mxu2  ;;  %7034 = vmatmul.bf16.gmra.mxu1 %v15685_v32  ;;  %v10879_v32 = vld [vmem:[%s17544_s5 + $0x1d0] sm:$0xff]  ;;  %v16287_v16 = vsel %vm516_vm0, %v7305_v56, %v7315_v47  ;;  %v5701_v47 = vunpack.c.l.b16 %v15950_v60 }
 0x6f7   : > { %18653 = vst [vmem:[#allocation99_spill] sm:$0xff] %v16263_v44  ;;  %6947 = vmatpush.bf16.msra.mxu0 %v10879_v32 }
 0x6f8   : > { %18659 = vst [vmem:[#allocation128_spill] sm:$0xff] %v16287_v16  ;;  %v5837_v38 = vpack.c.b16 %v5701_v47, %v15837_v19 }
 0x6fa   : > { %v6159_v18 = vpop.f32.mrf.mxu0 }
 0x6fb   : > { %v6085_v13 = vpop.f32.mrf.mxu3  ;;  %v16274_v7 = vpop.f32.mrf.mxu1  ;;  %7891 = vmatmul.bf16.gmra.mxu2 %v7661_v62 }
 0x6fc   : > { %18656 = vst [vmem:[#allocation40_spill] sm:$0xff] %v16274_v7  ;;  %v16276_v44 = vadd.f32 %v6154_v3, %v6085_v13  ;;  %v18661_v13 = vld [vmem:[#allocation12_spill] sm:$0xff]  ;;  %v7524_v7 = vunpack.c.h.b16 %v16252_v0 }
 0x6fe   : > { %v16281_v53 = vpop.f32.mrf.mxu2 }
 0x6ff   : > { %18657 = vst [vmem:[#allocation127_spill] sm:$0xff] %v16281_v53  ;;  %v17873_v53 = vunpack.c.l.b16 %v16287_v16 }
 0x700   : > { %6205 = vmatmul.bf16.gmra.mxu3 %v15724_v39 }
 0x701   : > { %v7664_v39 = vpack.c.b16 %v17873_v53, %v7524_v7  ;;  %v18666_v7 = vld [vmem:[#allocation86_spill] sm:$0xff] }
 0x702   : > { %v6162_v8 = vpop.f32.mrf.mxu0  ;;  %v18667_v53 = vshrl.u32 %v18666_v7, 16  ;;  %v18672_v19 = vshll.u32 %v18666_v7, 16  ;;  %v18678_v7 = vld [vmem:[#allocation77_spill] sm:$0xff] }
 0x703   : > { %v6088_v48 = vpop.f32.mrf.mxu3  ;;  %v16289_v62 = vpop.f32.mrf.mxu1  ;;  %v18679_v14 = vshrl.u32 %v18678_v7, 16 }
 0x704   : > { %18660 = vst [vmem:[#allocation129_spill] sm:$0xff] %v16289_v62  ;;  %v16291_v3 = vadd.f32 %v6157_v2, %v6088_v48  ;;  %v7320_v62 = vrot.slane %v18667_v53, 7 }
 0x705   : > { %6491 = vmatmul.bf16.gmra.mxu0 %v18661_v13  ;;  %v7327_v46 = vrot.slane %v18679_v14, 7  ;;  %v18684_v14 = vld [vmem:[#allocation30_spill] sm:$0xff] }
 0x706   : > { %v16296_v58 = vpop.f32.mrf.mxu2  ;;  %7039 = vmatmul.bf16.gmra.mxu1 %v15766_v43  ;;  %v10870_v43 = vld [vmem:[%s17544_s5 + $0x188] sm:$0xff]  ;;  %v7323_v47 = vor.u32 %v18672_v19, %v7320_v62  ;;  %v5703_v19 = vunpack.c.h.b16 %v15950_v60 }
 0x707   : > { %18662 = vst [vmem:[#allocation12_spill] sm:$0xff] %v16296_v58  ;;  %6879 = vmatpush.bf16.msra.mxu3 %v10870_v43  ;;  %v11218_v43 = vld [vmem:[#allocation2 + $0x48] sm:$0xf] }
 0x70a   : > { %v6164_v56 = vpop.f32.mrf.mxu0 }
 0x70b   : > { %v6090_v24 = vpop.f32.mrf.mxu3  ;;  %v16302_v32 = vpop.f32.mrf.mxu1  ;;  %7896 = vmatmul.bf16.gmra.mxu2 %v7664_v39 }
 0x70c   : > { %18663 = vst [vmem:[#allocation130_spill] sm:$0xff] %v16302_v32  ;;  %v16304_v2 = vadd.f32 %v6159_v18, %v6090_v24  ;;  %v18670_v18 = vld [vmem:[#allocation73_spill] sm:$0xff] }
 0x70e   : > { %18664 = vst [vmem:[#allocation131_spill] sm:$0xff] %v16304_v2  ;;  %v16306_v48 = vpop.f32.mrf.mxu2 }
 0x70f   : > { %18665 = vst [vmem:[#allocation132_spill] sm:$0xff] %v16306_v48  ;;  %v16329_v48 = vsel %vm11528_vm2, %v11218_v43, %v7323_v47  ;;  %v5840_v47 = vpack.c.b16 %v16037_v10, %v5703_v19  ;;  %v18685_v19 = vld [vmem:[#allocation22_spill] sm:$0xff] }
 0x710   : > { %6210 = vmatmul.bf16.gmra.mxu3 %v5837_v38  ;;  %v10878_v38 = vld [vmem:[%s17544_s5 + $0x1c8] sm:$0xff]  ;;  %18673 = vst [vmem:[#allocation135_spill] sm:$0xff] %v16329_v48 }
 0x711   : > { %6948 = vmatpush.bf16.msra.mxu0 %v10878_v38  ;;  %v18682_v38 = vshll.u32 %v18678_v7, 16 }
 0x712   : > { %v6457_v58 = vpop.f32.mrf.mxu0 }
 0x713   : > { %v6093_v16 = vpop.f32.mrf.mxu3  ;;  %v16314_v0 = vpop.f32.mrf.mxu1 }
 0x714   : > { %18668 = vst [vmem:[#allocation133_spill] sm:$0xff] %v16314_v0  ;;  %v16316_v39 = vadd.f32 %v6162_v8, %v6093_v16  ;;  %v18674_v8 = vld [vmem:[#allocation24_spill] sm:$0xff] }
 0x715   : > { %6496 = vmatmul.bf16.gmra.mxu0 %v18670_v18  ;;  %v18675_v16 = vshrl.u32 %v18674_v8, 16  ;;  %v18681_v43 = vshll.u32 %v18674_v8, 16 }
 0x716   : > { %18669 = vst [vmem:[#allocation134_spill] sm:$0xff] %v16316_v39  ;;  %v16319_v24 = vpop.f32.mrf.mxu2  ;;  %7044 = vmatmul.bf16.gmra.mxu1 %v15847_v33 }
 0x717   : > { %18671 = vst [vmem:[#allocation73_spill] sm:$0xff] %v16319_v24  ;;  %v7335_v0 = vrot.slane %v18675_v16, 7 }
 0x719   : > { %v7338_v16 = vor.u32 %v18681_v43, %v7335_v0  ;;  %v10869_v43 = vld [vmem:[%s17544_s5 + $0x180] sm:$0xff] }
 0x71a   : > { %v6459_v53 = vpop.f32.mrf.mxu0  ;;  %6880 = vmatpush.bf16.msra.mxu3 %v10869_v43 }
 0x71b   : > { %v6095_v24 = vpop.f32.mrf.mxu3  ;;  %v16333_v32 = vpop.f32.mrf.mxu1  ;;  %7901 = vmatmul.bf16.gmra.mxu2 %v16329_v48  ;;  %v11219_v48 = vld [vmem:[#allocation2 + $0x54] sm:$0xf] }
 0x71c   : > { %18676 = vst [vmem:[#allocation136_spill] sm:$0xff] %v16333_v32  ;;  %v16336_v33 = vadd.f32 %v6164_v56, %v6095_v24  ;;  %v7330_v32 = vor.u32 %v18682_v38, %v7327_v46  ;;  %v16350_v56 = vsel %vm11528_vm2, %v11219_v48, %v7338_v16  ;;  %v18687_v16 = vld [vmem:[#allocation34_spill] sm:$0xff] }
 0x71d   : > { %v18688_v38 = vshrl.u32 %v18687_v16, 16 }
 0x71e   : > { %18677 = vst [vmem:[#allocation137_spill] sm:$0xff] %v16336_v33  ;;  %v16341_v39 = vpop.f32.mrf.mxu2  ;;  %v16356_v10 = vsel %vm516_vm0, %v7320_v62, %v7330_v32 }
 0x71f   : > { %18680 = vst [vmem:[#allocation77_spill] sm:$0xff] %v16341_v39  ;;  %v17884_v48 = vunpack.c.l.b16 %v16356_v10 }
 0x720   : > { %6215 = vmatmul.bf16.gmra.mxu3 %v5840_v47  ;;  %v7534_v47 = vunpack.c.l.b16 %v16350_v56 }
 0x722   : > { %v6462_v2 = vpop.f32.mrf.mxu0  ;;  %v7669_v62 = vpack.c.b16 %v7534_v47, %v17884_v48  ;;  %v10877_v47 = vld [vmem:[%s17544_s5 + $0x1c0] sm:$0xff] }
 0x723   : > { %v6176_v24 = vpop.f32.mrf.mxu3  ;;  %v16352_v33 = vpop.f32.mrf.mxu1  ;;  %6949 = vmatpush.bf16.msra.mxu0 %v10877_v47 }
 0x724   : > { %18683 = vst [vmem:[#allocation138_spill] sm:$0xff] %v16352_v33  ;;  %v6177_v39 = vadd.f32 %v6176_v24, %v18684_v14  ;;  %v7342_v24 = vrot.slane %v18688_v38, 7  ;;  %v18691_v33 = vshll.u32 %v18687_v16, 16 }
 0x725   : > { %6501 = vmatmul.bf16.gmra.mxu0 %v18685_v19 }
 0x726   : > { %v16360_v7 = vadd.f32 %v6457_v58, %v6177_v39  ;;  %v16362_v46 = vpop.f32.mrf.mxu2  ;;  %7049 = vmatmul.bf16.gmra.mxu1 %v15950_v60  ;;  %v7345_v8 = vor.u32 %v18691_v33, %v7342_v24  ;;  %v7536_v33 = vunpack.c.h.b16 %v16350_v56 }
 0x727   : > { %18686 = vst [vmem:[#allocation30_spill] sm:$0xff] %v16362_v46 }
 0x728   : > { %v16387_v38 = vsel %vm516_vm0, %v7335_v0, %v7345_v8 }
 0x72a   : > { %v6464_v32 = vpop.f32.mrf.mxu0 }
 0x72b   : > { %v6178_v58 = vpop.f32.mrf.mxu3  ;;  %v16373_v39 = vpop.f32.mrf.mxu1  ;;  %7906 = vmatmul.bf16.gmra.mxu2 %v7669_v62 }
 0x72c   : > { %18689 = vst [vmem:[#allocation22_spill] sm:$0xff] %v16373_v39  ;;  %v6179_v60 = vadd.f32 %v6178_v58, %v15762_v20 }
 0x72e   : > { %v16376_v14 = vadd.f32 %v6459_v53, %v6179_v60  ;;  %v16378_v46 = vpop.f32.mrf.mxu2 }
 0x72f   : > { %18690 = vst [vmem:[#allocation34_spill] sm:$0xff] %v16378_v46 }
 0x730   : > { %6220 = vmatmul.bf16.gmra.mxu3 %v16004_v1  ;;  %v17883_v1 = vunpack.c.l.b16 %v16387_v38 }
 0x732   : > { %v6467_v43 = vpop.f32.mrf.mxu0  ;;  %v7672_v0 = vpack.c.b16 %v17883_v1, %v7536_v33  ;;  %v18696_v33 = vld [vmem:[#allocation94_spill] sm:$0xff] }
 0x733   : > { %v6181_v62 = vpop.f32.mrf.mxu3  ;;  %v16389_v20 = vpop.f32.mrf.mxu1  ;;  %v18697_v1 = vshrl.u32 %v18696_v33, 16 }
 0x734   : > { %18692 = vst [vmem:[#allocation139_spill] sm:$0xff] %v16389_v20  ;;  %v6182_v53 = vadd.f32 %v6181_v62, %v15832_v29 }
 0x735   : > { %6506 = vmatmul.bf16.gmra.mxu0 %v15796_v34 }
 0x736   : > { %v16395_v16 = vadd.f32 %v6462_v2, %v6182_v53  ;;  %v16397_v24 = vpop.f32.mrf.mxu2  ;;  %7054 = vmatmul.bf16.gmra.mxu1 %v16055_v31  ;;  %v10909_v31 = vld [vmem:[%s17546_s7 + $0x78] sm:$0xff] }
 0x737   : > { %18693 = vst [vmem:[#allocation140_spill] sm:$0xff] %v16397_v24  ;;  %v10933_v2 = vld [vmem:[%s17546_s7 + $0x138] sm:$0xff]  ;;  %8351 = vmatpush.bf16.msrb.mxu2 %v10909_v31 }
 0x738   : > { %7932 = vmatpush.bf16.msrb.mxu3 %v10933_v2  ;;  %v10941_v2 = vld [vmem:[%s17546_s7 + $0x178] sm:$0xff] }
 0x739   : > { %8001 = vmatpush.bf16.msrb.mxu0 %v10941_v2  ;;  %v18703_v2 = vld [vmem:[#allocation106_spill] sm:$0xff] }
 0x73a   : > { %v6469_v8 = vpop.f32.mrf.mxu0 }
 0x73b   : > { %v6183_v58 = vpop.f32.mrf.mxu3  ;;  %v16402_v60 = vpop.f32.mrf.mxu1  ;;  %7911 = vmatmul.bf16.gmra.mxu2 %v7672_v0  ;;  %v7350_v0 = vrot.slane %v18697_v1, 7  ;;  %v18699_v1 = vshll.u32 %v18696_v33, 16 }
 0x73c   : > { %18694 = vst [vmem:[#allocation141_spill] sm:$0xff] %v16402_v60  ;;  %v6184_v29 = vadd.f32 %v6183_v58, %v15861_v61  ;;  %v10908_v61 = vld [vmem:[%s17546_s7 + $0x70] sm:$0xff]  ;;  %v10906_v60 = vld [vmem:[%s17546_s7 + $0x60] sm:$0xff] }
 0x73d   : > { %v7353_v31 = vor.u32 %v18699_v1, %v7350_v0  ;;  %8352 = vmatpush.bf16.msrb.mxu2 %v10908_v61 }
 0x73e   : > { %v16405_v47 = vadd.f32 %v6464_v32, %v6184_v29  ;;  %v16407_v62 = vpop.f32.mrf.mxu2 }
 0x73f   : > { %18695 = vst [vmem:[#allocation142_spill] sm:$0xff] %v16407_v62 }
 0x740   : > { %6225 = vmatmul.bf16.gmra.mxu3 %v15978_v37 }
 0x742   : > { %v6472_v53 = vpop.f32.mrf.mxu0 }
 0x743   : > { %v6186_v32 = vpop.f32.mrf.mxu3  ;;  %v16421_v37 = vpop.f32.mrf.mxu1 }
 0x744   : > { %v6187_v58 = vadd.f32 %v6186_v32, %v15907_v59  ;;  %v10901_v59 = vld [vmem:[%s17546_s7 + $0x38] sm:$0xff] }
 0x745   : > { %6511 = vmatmul.bf16.gmra.mxu0 %v15798_v23  ;;  %8282 = vmatpush.bf16.msrb.mxu1 %v10901_v59  ;;  %v18704_v59 = vld [vmem:[#allocation101_spill] sm:$0xff] }
 0x746   : > { %v16425_v29 = vadd.f32 %v6467_v43, %v6187_v58  ;;  %7059 = vmatmul.bf16.gmra.mxu1 %v16102_v45  ;;  %v16428_v48 = vpop.f32.mrf.mxu2  ;;  %v10907_v43 = vld [vmem:[%s17546_s7 + $0x68] sm:$0xff]  ;;  %v11220_v45 = vld [vmem:[#allocation2 + $0x60] sm:$0xf] }
 0x747   : > { %18698 = vst [vmem:[#allocation143_spill] sm:$0xff] %v16428_v48  ;;  %v16443_v58 = vsel %vm11528_vm2, %v11220_v45, %v7353_v31  ;;  %v18700_v48 = vld [vmem:[#allocation52_spill] sm:$0xff]  ;;  %8353 = vmatpush.bf16.msrb.mxu2 %v10907_v43  ;;  %v18705_v45 = vshll.u32 %v18704_v59, 16 }
 0x748   : > { %v18701_v62 = vshrl.u32 %v18700_v48, 16  ;;  %v11221_v43 = vld [vmem:[#allocation2 + $0x6c] sm:$0xf] }
 0x749   : > { %v7368_v20 = vor.u32 %v18705_v45, %v18703_v2  ;;  %v10904_v45 = vld [vmem:[%s17546_s7 + $0x50] sm:$0xff] }
 0x74a   : > { %v6474_v32 = vpop.f32.mrf.mxu0  ;;  %v7357_v24 = vrot.slane %v18701_v62, 7  ;;  %v10900_v62 = vld [vmem:[%s17546_s7 + $0x30] sm:$0xff] }
 0x74b   : > { %v6188_v61 = vpop.f32.mrf.mxu3  ;;  %v16445_v1 = vpop.f32.mrf.mxu1  ;;  %7916 = vmatmul.bf16.gmra.mxu2 %v16443_v58  ;;  %v16472_v59 = vsel %vm11528_vm2, %v11221_v43, %v7368_v20  ;;  %8283 = vmatpush.bf16.msrb.mxu1 %v10900_v62  ;;  %v18709_v20 = vld [vmem:[#allocation26_spill] sm:$0xff]  ;;  %v18710_v62 = vshll.u32 %v16013_v42, 16 }
 0x74c   : > { %v6189_v33 = vadd.f32 %v6188_v61, %v15968_v15  ;;  %v18706_v15 = vshll.u32 %v18700_v48, 16  ;;  %8354 = vmatpush.bf16.msrb.mxu2 %v10906_v60  ;;  %18707 = vst [vmem:[#allocation106_spill] sm:$0xff] %v16472_v59  ;;  %v10899_v48 = vld [vmem:[%s17546_s7 + $0x28] sm:$0xff] }
 0x74d   : > { %v5623_v43 = vrot.slane %v18710_v62, 1  ;;  %v18713_v62 = vshll.u32 %v16015_v40, 16 }
 0x74e   : > { %v16454_v46 = vadd.f32 %v6469_v8, %v6189_v33  ;;  %v16456_v31 = vpop.f32.mrf.mxu2  ;;  %v7360_v61 = vor.u32 %v18706_v15, %v7357_v24  ;;  %v10905_v8 = vld [vmem:[%s17546_s7 + $0x58] sm:$0xff]  ;;  %v7596_v15 = vunpack.c.l.b16 %v16472_v59 }
 0x74f   : > { %18702 = vst [vmem:[#allocation52_spill] sm:$0xff] %v16456_v31  ;;  %8284 = vmatpush.bf16.msrb.mxu1 %v10899_v48 }
 0x750   : > { %6230 = vmatmul.bf16.gmra.mxu3 %v15992_v63  ;;  %v16481_v60 = vsel %vm516_vm0, %v7350_v0, %v7360_v61  ;;  %8355 = vmatpush.bf16.msrb.mxu2 %v10905_v8  ;;  %v10898_v61 = vld [vmem:[%s17546_s7 + $0x20] sm:$0xff]  ;;  %v10903_v8 = vld [vmem:[%s17546_s7 + $0x48] sm:$0xff] }
 0x751   : > { %18708 = vst [vmem:[#allocation144_spill] sm:$0xff] %v16481_v60  ;;  %v17886_v0 = vunpack.c.l.b16 %v16481_v60 }
 0x752   : > { %v6477_v33 = vpop.f32.mrf.mxu0 }
 0x753   : > { %v6191_v63 = vpop.f32.mrf.mxu3  ;;  %v16474_v2 = vpop.f32.mrf.mxu1  ;;  %8285 = vmatpush.bf16.msrb.mxu1 %v10898_v61 }
 0x754   : > { %v6192_v24 = vadd.f32 %v6191_v63, %v16020_v41  ;;  %8356 = vmatpush.bf16.msrb.mxu2 %v10904_v45  ;;  %v18712_v63 = vshrl.u32 %v16013_v42, 16 }
 0x755   : > { %6950 = vmatmul.bf16.vlgmr.msra.gmra.mxu0 %v18709_v20 }
 0x756   : > { %v16490_v31 = vadd.f32 %v6472_v53, %v6192_v24  ;;  %7064 = vmatmul.bf16.gmra.mxu1 %v15943_v22  ;;  %v16493_v41 = vpop.f32.mrf.mxu2  ;;  %v7677_v53 = vpack.c.b16 %v7596_v15, %v17886_v0  ;;  %v5624_v22 = vor.u32 %v5623_v43, %v18712_v63  ;;  %v10932_v24 = vld [vmem:[%s17546_s7 + $0x130] sm:$0xff]  ;;  %v10897_v15 = vld [vmem:[%s17546_s7 + $0x18] sm:$0xff]  ;;  %v10902_v43 = vld [vmem:[%s17546_s7 + $0x40] sm:$0xff] }
 0x757   : > { %18711 = vst [vmem:[#allocation26_spill] sm:$0xff] %v16493_v41  ;;  %v5625_v41 = vrot.slane %v18713_v62, 1  ;;  %7933 = vmatpush.bf16.msrb.mxu3 %v10932_v24  ;;  %8286 = vmatpush.bf16.msrb.mxu1 %v10897_v15  ;;  %v18715_v15 = vld [vmem:[#allocation92_spill] sm:$0xff] }
 0x758   : > { %8357 = vmatpush.bf16.msrb.mxu2 %v10903_v8  ;;  %v10940_v8 = vld [vmem:[%s17546_s7 + $0x170] sm:$0xff] }
 0x759   : > { %v5626_v63 = vsel %vm757_vm3, %v5624_v22, %v5625_v41  ;;  %8002 = vmatpush.bf16.msrb.mxu0 %v10940_v8 }
 0x75a   : > { %v6479_v48 = vpop.f32.mrf.mxu0  ;;  %v6658_v61 = vunpack.c.l.b16 %v5626_v63 }
 0x75b   : > { %v6193_v45 = vpop.f32.mrf.mxu3  ;;  %v16509_v20 = vpop.f32.mrf.mxu1  ;;  %7921 = vmatmul.bf16.gmra.mxu2 %v7677_v53 }
 0x75c   : > { %v6194_v42 = vadd.f32 %v6193_v45, %v16068_v27  ;;  %8358 = vmatpush.bf16.msrb.mxu2 %v10902_v43  ;;  %v10896_v27 = vld [vmem:[%s17546_s7 + $0x10] sm:$0xff]  ;;  %v6716_v62 = vpack.c.b16 %v6658_v61, %v15980_v21 }
 0x75d   : > { %8287 = vmatpush.bf16.msrb.mxu1 %v10896_v27  ;;  %v10894_v27 = vld [vmem:[%s17546_s7] sm:$0xff] }
 0x75e   : > { %v16521_v0 = vadd.f32 %v6474_v32, %v6194_v42  ;;  %v16523_v53 = vpop.f32.mrf.mxu2  ;;  %v7598_v42 = vunpack.c.h.b16 %v16472_v59  ;;  %v7132_v59 = vld [vmem:[#allocation2 + $0xc] sm:$0xf] }
 0x75f   : > { %18714 = vst [vmem:[#allocation145_spill] sm:$0xff] %v16523_v53  ;;  %v18717_v53 = vld [vmem:[#allocation107_spill] sm:$0xff] }
 0x760   : > { %6881 = vmatmul.bf16.vlgmr.msra.gmra.mxu3 %v18622_v12  ;;  %v10895_v12 = vld [vmem:[%s17546_s7 + $0x8] sm:$0xff]  ;;  %v18718_v39 = vunpack.c.l.b16 %v18717_v53 }
 0x761   : > { %8288 = vmatpush.bf16.msrb.mxu1 %v10895_v12 }
 0x762   : > { %v6482_v24 = vpop.f32.mrf.mxu0  ;;  %v7680_v60 = vpack.c.b16 %v18718_v39, %v7598_v42 }
 0x763   : > { %v6196_v22 = vpop.f32.mrf.mxu3  ;;  %v16532_v32 = vpop.f32.mrf.mxu1 }
 0x764   : > { %v6197_v45 = vadd.f32 %v6196_v22, %v16091_v9  ;;  %v18719_v9 = vshrl.u32 %v16015_v40, 16  ;;  %v6660_v40 = vunpack.c.h.b16 %v5626_v63  ;;  %v10939_v63 = vld [vmem:[%s17546_s7 + $0x168] sm:$0xff] }
 0x765   : > { %6955 = vmatmul.bf16.gmra.mxu0 %v18715_v15  ;;  %8289 = vmatpush.bf16.msrb.mxu1 %v10894_v27 }
 0x766   : > { %v16541_v43 = vadd.f32 %v6477_v33, %v6197_v45  ;;  %7069 = vmatmul.bf16.gmra.mxu1 %v6716_v62  ;;  %v16543_v8 = vpop.f32.mrf.mxu2  ;;  %v5627_v21 = vor.u32 %v5625_v41, %v18719_v9  ;;  %v10931_v41 = vld [vmem:[%s17546_s7 + $0x128] sm:$0xff]  ;;  %8003 = vmatpush.bf16.msrb.mxu0 %v10939_v63 }
 0x767   : > { %18716 = vst [vmem:[#allocation92_spill] sm:$0xff] %v16543_v8  ;;  %7934 = vmatpush.bf16.msrb.mxu3 %v10931_v41  ;;  %v18758_v8 = vld [vmem:[#allocation83_spill] sm:$0xff] }
 0x768   : > { %v5647_v12 = vsel %vm11560_vm6, %v5627_v21, %v15999_v6 }
 0x769   : > { %v6662_v39 = vunpack.c.l.b16 %v5647_v12  ;;  %v18723_v12 = vld [vmem:[#allocation66_spill] sm:$0xff] }
 0x76a   : > { %v6484_v61 = vpop.f32.mrf.mxu0 }
 0x76b   : > { %v6198_v22 = vpop.f32.mrf.mxu3  ;;  %v16552_v15 = vpop.f32.mrf.mxu1  ;;  %7926 = vmatmul.bf16.gmra.mxu2 %v7680_v60  ;;  %v6719_v6 = vpack.c.b16 %v6662_v39, %v6660_v40  ;;  %v18724_v40 = vshrl.u32 %v18723_v12, 16 }
 0x76c   : > { %v6199_v33 = vadd.f32 %v6198_v22, %v16108_v28 }
 0x76e   : > { %v16558_v45 = vadd.f32 %v6479_v48, %v6199_v33  ;;  %v16560_v62 = vpop.f32.mrf.mxu2  ;;  %v18721_v48 = vld [vmem:[#allocation18_spill] sm:$0xff]  ;;  %v11222_v33 = vld [vmem:[#allocation2 + $0xc] sm:$0xff] }
 0x76f   : > { %18720 = vst [vmem:[#allocation107_spill] sm:$0xff] %v16560_v62 }
 0x770   : > { %6886 = vmatmul.bf16.gmra.mxu3 %v15363_v5 }
 0x772   : > { %v6487_v60 = vpop.f32.mrf.mxu0 }
 0x773   : > { %v6201_v53 = vpop.f32.mrf.mxu3  ;;  %v16566_v28 = vpop.f32.mrf.mxu1 }
 0x774   : > { %v6202_v42 = vadd.f32 %v6201_v53, %v16120_v30  ;;  %v18726_v53 = vshll.u32 %v18723_v12, 16 }
 0x775   : > { %6960 = vmatmul.bf16.gmra.mxu0 %v18721_v48 }
 0x776   : > { %v16570_v27 = vadd.f32 %v6482_v24, %v6202_v42  ;;  %7074 = vmatmul.bf16.gmra.mxu1 %v6719_v6  ;;  %v16572_v5 = vpop.f32.mrf.mxu2  ;;  %v7245_v24 = vrot.slane %v18724_v40, 7 }
 0x777   : > { %18722 = vst [vmem:[#allocation18_spill] sm:$0xff] %v16572_v5 }
 0x778   : > { %v7248_v42 = vor.u32 %v18726_v53, %v7245_v24  ;;  %v10930_v53 = vld [vmem:[%s17546_s7 + $0x120] sm:$0xff] }
 0x779   : > { %7935 = vmatpush.bf16.msrb.mxu3 %v10930_v53  ;;  %v10938_v53 = vld [vmem:[%s17546_s7 + $0x160] sm:$0xff] }
 0x77a   : > { %v6489_v9 = vpop.f32.mrf.mxu0  ;;  %8004 = vmatpush.bf16.msrb.mxu0 %v10938_v53 }
 0x77b   : > { %v6203_v21 = vpop.f32.mrf.mxu3  ;;  %v16577_v22 = vpop.f32.mrf.mxu1  ;;  %8359 = vmatmul.bf16.vlgmr.msrb.gmra.mxu2 %v11222_v33 }
 0x77c   : > { %v6204_v30 = vadd.f32 %v6203_v21, %v16140_v57  ;;  %v18727_v57 = vld [vmem:[#allocation49_spill] sm:$0xff] }
 0x77e   : > { %v16582_v39 = vadd.f32 %v6484_v61, %v6204_v30  ;;  %v16584_v41 = vpop.f32.mrf.mxu2  ;;  %v7402_v61 = vsel %vm11528_vm2, %v7132_v59, %v7248_v42 }
 0x77f   : > { %18725 = vst [vmem:[#allocation66_spill] sm:$0xff] %v16584_v41  ;;  %v18731_v41 = vld [vmem:[#allocation68_spill] sm:$0xff] }
 0x780   : > { %6891 = vmatmul.bf16.gmra.mxu3 %v15369_v4  ;;  %v18729_v4 = vld [vmem:[#allocation70_spill] sm:$0xff] }
 0x781   : > { %v18730_v12 = vshrl.u32 %v18729_v4, 16 }
 0x782   : > { %v6492_v6 = vpop.f32.mrf.mxu0 }
 0x783   : > { %v6206_v48 = vpop.f32.mrf.mxu3  ;;  %v16589_v63 = vpop.f32.mrf.mxu1  ;;  %v7252_v40 = vrot.slane %v18730_v12, 7 }
 0x784   : > { %v6207_v33 = vadd.f32 %v6206_v48, %v16158_v17  ;;  %v18732_v17 = vld [vmem:[#allocation13_spill] sm:$0xff] }
 0x785   : > { %6965 = vmatmul.bf16.gmra.mxu0 %v18727_v57  ;;  %v18733_v48 = vunpack.c.l.b16 %v18732_v17 }
 0x786   : > { %v16595_v21 = vadd.f32 %v6487_v60, %v6207_v33  ;;  %v16597_v30 = vpop.f32.mrf.mxu2  ;;  %8290 = vmatmul.bf16.vlgmr.msrb.gmra.mxu1 %v7402_v61  ;;  %v18734_v60 = vshll.u32 %v18729_v4, 16 }
 0x787   : > { %18728 = vst [vmem:[#allocation49_spill] sm:$0xff] %v16597_v30  ;;  %v8073_v5 = vpack.c.b16 %v18733_v48, %v18731_v41  ;;  %v7504_v41 = vunpack.c.l.b16 %v16133_v11 }
 0x788   : > { %v7255_v42 = vor.u32 %v18734_v60, %v7252_v40 }
 0x78a   : > { %v6494_v57 = vpop.f32.mrf.mxu0  ;;  %v7256_v30 = vsel %vm516_vm0, %v7245_v24, %v7255_v42  ;;  %v18737_v42 = vld [vmem:[#allocation27_spill] sm:$0xff] }
 0x78b   : > { %v6208_v35 = vpop.f32.mrf.mxu3  ;;  %v16607_v59 = vpop.f32.mrf.mxu1  ;;  %8364 = vmatmul.bf16.gmra.mxu2 %v8073_v5  ;;  %v7502_v17 = vunpack.c.l.b16 %v7256_v30 }
 0x78c   : > { %v6209_v33 = vadd.f32 %v6208_v35, %v16178_v25 }
 0x78e   : > { %v16612_v61 = vadd.f32 %v6489_v9, %v6209_v33  ;;  %v16614_v12 = vpop.f32.mrf.mxu2  ;;  %v8072_v9 = vpack.c.b16 %v7504_v41, %v7502_v17 }
 0x78f   : > { %18735 = vst [vmem:[#allocation70_spill] sm:$0xff] %v16614_v12 }
 0x790   : > { %6896 = vmatmul.bf16.gmra.mxu3 %v18652_v51 }
 0x792   : > { %v6497_v5 = vpop.f32.mrf.mxu0 }
 0x793   : > { %v6211_v4 = vpop.f32.mrf.mxu3  ;;  %v16622_v40 = vpop.f32.mrf.mxu1 }
 0x794   : > { %v6212_v25 = vadd.f32 %v6211_v4, %v16193_v54 }
 0x795   : > { %6970 = vmatmul.bf16.gmra.mxu0 %v15437_v52  ;;  %v10929_v52 = vld [vmem:[%s17546_s7 + $0x118] sm:$0xff] }
 0x796   : > { %v16626_v24 = vadd.f32 %v6492_v6, %v6212_v25  ;;  %v16628_v51 = vpop.f32.mrf.mxu2  ;;  %8295 = vmatmul.bf16.gmra.mxu1 %v8072_v9  ;;  %v7506_v6 = vunpack.c.h.b16 %v16133_v11  ;;  %7936 = vmatpush.bf16.msrb.mxu3 %v10929_v52  ;;  %v18740_v25 = vld [vmem:[#allocation57_spill] sm:$0xff]  ;;  %v10937_v11 = vld [vmem:[%s17546_s7 + $0x158] sm:$0xff] }
 0x797   : > { %18736 = vst [vmem:[#allocation68_spill] sm:$0xff] %v16628_v51  ;;  %8005 = vmatpush.bf16.msrb.mxu0 %v10937_v11 }
 0x79a   : > { %v6499_v48 = vpop.f32.mrf.mxu0 }
 0x79b   : > { %v6213_v35 = vpop.f32.mrf.mxu3  ;;  %v16630_v60 = vpop.f32.mrf.mxu1  ;;  %8369 = vmatmul.bf16.gmra.mxu2 %v18737_v42 }
 0x79c   : > { %v6214_v30 = vadd.f32 %v6213_v35, %v16206_v55  ;;  %v18739_v55 = vunpack.c.l.b16 %v16161_v50  ;;  %v18743_v50 = vld [vmem:[#allocation123_spill] sm:$0xff] }
 0x79e   : > { %v16634_v33 = vadd.f32 %v6494_v57, %v6214_v30  ;;  %v16636_v53 = vpop.f32.mrf.mxu2  ;;  %v8075_v57 = vpack.c.b16 %v18739_v55, %v7506_v6 }
 0x79f   : > { %18738 = vst [vmem:[#allocation13_spill] sm:$0xff] %v16636_v53  ;;  %v18747_v53 = vld [vmem:[#allocation51_spill] sm:$0xff] }
 0x7a0   : > { %6901 = vmatmul.bf16.gmra.mxu3 %v18661_v13 }
 0x7a2   : > { %v6502_v54 = vpop.f32.mrf.mxu0 }
 0x7a3   : > { %v6216_v41 = vpop.f32.mrf.mxu3  ;;  %v16643_v17 = vpop.f32.mrf.mxu1 }
 0x7a4   : > { %v6217_v4 = vadd.f32 %v6216_v41, %v16218_v36  ;;  %v18742_v36 = vld [vmem:[#allocation33_spill] sm:$0xff] }
 0x7a5   : > { %6975 = vmatmul.bf16.gmra.mxu0 %v18740_v25  ;;  %v18745_v25 = vld [vmem:[#allocation10_spill] sm:$0xff] }
 0x7a6   : > { %v16649_v9 = vadd.f32 %v6497_v5, %v6217_v4  ;;  %v16651_v13 = vpop.f32.mrf.mxu2  ;;  %8300 = vmatmul.bf16.gmra.mxu1 %v8075_v57 }
 0x7a7   : > { %18741 = vst [vmem:[#allocation27_spill] sm:$0xff] %v16651_v13 }
 0x7aa   : > { %v6504_v35 = vpop.f32.mrf.mxu0 }
 0x7ab   : > { %v6218_v42 = vpop.f32.mrf.mxu3  ;;  %v16656_v30 = vpop.f32.mrf.mxu1  ;;  %8374 = vmatmul.bf16.gmra.mxu2 %v18742_v36 }
 0x7ac   : > { %v6219_v52 = vadd.f32 %v6218_v42, %v18743_v50 }
 0x7ae   : > { %v16660_v6 = vadd.f32 %v6499_v48, %v6219_v52  ;;  %v16662_v5 = vpop.f32.mrf.mxu2  ;;  %v10928_v48 = vld [vmem:[%s17546_s7 + $0x110] sm:$0xff]  ;;  %v18748_v52 = vld [vmem:[#allocation63_spill] sm:$0xff] }
 0x7af   : > { %18744 = vst [vmem:[#allocation57_spill] sm:$0xff] %v16662_v5  ;;  %7937 = vmatpush.bf16.msrb.mxu3 %v10928_v48 }
 0x7b0   : > { %6906 = vmatmul.bf16.gmra.mxu3 %v18670_v18 }
 0x7b2   : > { %v6507_v41 = vpop.f32.mrf.mxu0 }
 0x7b3   : > { %v6221_v4 = vpop.f32.mrf.mxu3  ;;  %v16665_v55 = vpop.f32.mrf.mxu1 }
 0x7b4   : > { %v6222_v57 = vadd.f32 %v6221_v4, %v16256_v49 }
 0x7b5   : > { %6980 = vmatmul.bf16.gmra.mxu0 %v18745_v25 }
 0x7b6   : > { %v16669_v11 = vadd.f32 %v6502_v54, %v6222_v57  ;;  %v16671_v13 = vpop.f32.mrf.mxu2  ;;  %8305 = vmatmul.bf16.gmra.mxu1 %v18747_v53  ;;  %v18751_v57 = vld [vmem:[#allocation121_spill] sm:$0xff] }
 0x7b7   : > { %18746 = vst [vmem:[#allocation33_spill] sm:$0xff] %v16671_v13  ;;  %v7516_v25 = vunpack.c.l.b16 %v18751_v57  ;;  %v10936_v13 = vld [vmem:[%s17546_s7 + $0x150] sm:$0xff] }
 0x7b8   : > { %8006 = vmatpush.bf16.msrb.mxu0 %v10936_v13 }
 0x7ba   : > { %v6509_v42 = vpop.f32.mrf.mxu0 }
 0x7bb   : > { %v6223_v18 = vpop.f32.mrf.mxu3  ;;  %v16677_v50 = vpop.f32.mrf.mxu1  ;;  %8379 = vmatmul.bf16.gmra.mxu2 %v18748_v52 }
 0x7bc   : > { %v6224_v49 = vadd.f32 %v6223_v18, %v16276_v44  ;;  %v18752_v44 = vld [vmem:[#allocation88_spill] sm:$0xff] }
 0x7be   : > { %v16681_v4 = vadd.f32 %v6504_v35, %v6224_v49  ;;  %v16683_v54 = vpop.f32.mrf.mxu2  ;;  %v18753_v35 = vunpack.c.l.b16 %v18752_v44  ;;  %v18755_v49 = vld [vmem:[#allocation65_spill] sm:$0xff]  ;;  %v10927_v44 = vld [vmem:[%s17546_s7 + $0x108] sm:$0xff] }
 0x7bf   : > { %18750 = vst [vmem:[#allocation10_spill] sm:$0xff] %v16683_v54  ;;  %7938 = vmatpush.bf16.msrb.mxu3 %v10927_v44 }
 0x7c0   : > { %18749 = vst [vmem:[#allocation123_spill] sm:$0xff] %v16681_v4  ;;  %6911 = vmatmul.bf16.gmra.mxu3 %v18685_v19  ;;  %v16695_v18 = vpack.c.b16 %v7516_v25, %v18753_v35  ;;  %v18759_v4 = vld [vmem:[#allocation131_spill] sm:$0xff] }
 0x7c2   : > { %v6512_v48 = vpop.f32.mrf.mxu0  ;;  %18754 = vst [vmem:[#allocation63_spill] sm:$0xff] %v16695_v18 }
 0x7c3   : > { %v6226_v5 = vpop.f32.mrf.mxu3  ;;  %v16690_v51 = vpop.f32.mrf.mxu1 }
 0x7c4   : > { %v6227_v12 = vadd.f32 %v6226_v5, %v16291_v3 }
 0x7c5   : > { %6985 = vmatmul.bf16.gmra.mxu0 %v18755_v49  ;;  %v18762_v49 = vld [vmem:[#allocation134_spill] sm:$0xff] }
 0x7c6   : > { %v16698_v54 = vadd.f32 %v6507_v41, %v6227_v12  ;;  %v16700_v19 = vpop.f32.mrf.mxu2  ;;  %8310 = vmatmul.bf16.gmra.mxu1 %v16695_v18  ;;  %v7518_v12 = vunpack.c.h.b16 %v18751_v57 }
 0x7c7   : > { %18757 = vst [vmem:[#allocation88_spill] sm:$0xff] %v16700_v19 }
 0x7c8   : > { %18756 = vst [vmem:[#allocation121_spill] sm:$0xff] %v16698_v54  ;;  %v18764_v54 = vld [vmem:[#allocation126_spill] sm:$0xff] }
 0x7ca   : > { %v6514_v53 = vpop.f32.mrf.mxu0 }
 0x7cb   : > { %v6228_v62 = vpop.f32.mrf.mxu3  ;;  %v16703_v13 = vpop.f32.mrf.mxu1  ;;  %8384 = vmatmul.bf16.gmra.mxu2 %v18758_v8 }
 0x7cc   : > { %v6229_v3 = vadd.f32 %v6228_v62, %v18759_v4  ;;  %v18765_v62 = vunpack.c.l.b16 %v18764_v54  ;;  %v18767_v4 = vld [vmem:[#allocation59_spill] sm:$0xff]  ;;  %v18771_v54 = vld [vmem:[#allocation137_spill] sm:$0xff] }
 0x7ce   : > { %v16707_v5 = vadd.f32 %v6509_v42, %v6229_v3  ;;  %v16709_v25 = vpop.f32.mrf.mxu2  ;;  %v16721_v42 = vpack.c.b16 %v18765_v62, %v7518_v12 }
 0x7cf   : > { %18761 = vst [vmem:[#allocation83_spill] sm:$0xff] %v16709_v25  ;;  %v18770_v25 = vld [vmem:[#allocation25_spill] sm:$0xff] }
 0x7d0   : > { %18760 = vst [vmem:[#allocation65_spill] sm:$0xff] %v16707_v5  ;;  %6916 = vmatmul.bf16.gmra.mxu3 %v15796_v34  ;;  %v18775_v5 = vld [vmem:[#allocation29_spill] sm:$0xff] }
 0x7d1   : > { %18766 = vst [vmem:[#allocation134_spill] sm:$0xff] %v16721_v42 }
 0x7d2   : > { %v6951_v41 = vpop.f32.mrf.mxu0 }
 0x7d3   : > { %v6231_v35 = vpop.f32.mrf.mxu3  ;;  %v16717_v18 = vpop.f32.mrf.mxu1 }
 0x7d4   : > { %v6232_v19 = vadd.f32 %v6231_v35, %v18762_v49  ;;  %18763 = vst [vmem:[#allocation131_spill] sm:$0xff] %v16717_v18  ;;  %v10935_v35 = vld [vmem:[%s17546_s7 + $0x148] sm:$0xff] }
 0x7d5   : > { %6990 = vmatmul.bf16.gmra.mxu0 %v18767_v4 }
 0x7d6   : > { %v16724_v34 = vadd.f32 %v6512_v48, %v6232_v19  ;;  %v16726_v57 = vpop.f32.mrf.mxu2  ;;  %8315 = vmatmul.bf16.gmra.mxu1 %v16721_v42  ;;  %8007 = vmatpush.bf16.msrb.mxu0 %v10935_v35  ;;  %v18774_v19 = vld [vmem:[#allocation47_spill] sm:$0xff] }
 0x7d7   : > { %18769 = vst [vmem:[#allocation59_spill] sm:$0xff] %v16726_v57  ;;  %v6527_v4 = vadd.f32 %v18774_v19, %v16360_v7 }
 0x7d8   : > { %18768 = vst [vmem:[#allocation126_spill] sm:$0xff] %v16724_v34 }
 0x7da   : > { %v6953_v3 = vpop.f32.mrf.mxu0 }
 0x7db   : > { %v6233_v49 = vpop.f32.mrf.mxu3  ;;  %8389 = vmatmul.bf16.gmra.mxu2 %v18770_v25  ;;  %v16736_v62 = vpop.f32.mrf.mxu1  ;;  %v18776_v25 = vld [vmem:[#allocation72_spill] sm:$0xff] }
 0x7dc   : > { %v6234_v12 = vadd.f32 %v6233_v49, %v18771_v54  ;;  %v6596_v18 = vadd.f32 %v18776_v25, %v6527_v4  ;;  %v18781_v25 = vld [vmem:[#allocation87_spill] sm:$0xff] }
 0x7dd   : > { %v18783_v4 = vld [vmem:[#allocation135_spill] sm:$0xff] }
 0x7de   : > { %v16734_v44 = vadd.f32 %v6514_v53, %v6234_v12  ;;  %v16738_v48 = vpop.f32.mrf.mxu2  ;;  %v18777_v53 = vld [vmem:[#allocation124_spill] sm:$0xff] }
 0x7df   : > { %18773 = vst [vmem:[#allocation146_spill] sm:$0xff] %v16738_v48 }
 0x7e0   : > { %18772 = vst [vmem:[#allocation137_spill] sm:$0xff] %v16734_v44  ;;  %6921 = vmatmul.bf16.gmra.mxu3 %v15798_v23  ;;  %v18780_v23 = vld [vmem:[#allocation111_spill] sm:$0xff] }
 0x7e1   : > { %v6529_v7 = vadd.f32 %v18780_v23, %v16376_v14  ;;  %v18787_v23 = vld [vmem:[#allocation114_spill] sm:$0xff] }
 0x7e2   : > { %v6956_v57 = vpop.f32.mrf.mxu0  ;;  %v6532_v48 = vadd.f32 %v18787_v23, %v16395_v16  ;;  %v18793_v23 = vld [vmem:[#allocation115_spill] sm:$0xff] }
 0x7e3   : > { %v6882_v42 = vpop.f32.mrf.mxu3  ;;  %v16751_v12 = vpop.f32.mrf.mxu1 }
 0x7e4   : > { %v6952_v34 = vadd.f32 %v6951_v41, %v6882_v42  ;;  %v18782_v42 = vld [vmem:[#allocation76_spill] sm:$0xff] }
 0x7e5   : > { %6995 = vmatmul.bf16.gmra.mxu0 %v18775_v5  ;;  %v10926_v5 = vld [vmem:[%s17546_s7 + $0x100] sm:$0xff] }
 0x7e6   : > { %v7021_v35 = vadd.f32 %v16421_v37, %v6952_v34  ;;  %8320 = vmatmul.bf16.gmra.mxu1 %v18777_v53  ;;  %v16747_v49 = vpop.f32.mrf.mxu2  ;;  %7939 = vmatpush.bf16.msrb.mxu3 %v10926_v5  ;;  %v6598_v34 = vadd.f32 %v18782_v42, %v6529_v7  ;;  %v18788_v5 = vld [vmem:[#allocation128_spill] sm:$0xff] }
 0x7e7   : > { %18778 = vst [vmem:[#allocation47_spill] sm:$0xff] %v16747_v49  ;;  %v18785_v49 = vld [vmem:[#allocation67_spill] sm:$0xff]  ;;  %v18791_v42 = vld [vmem:[#allocation20_spill] sm:$0xff] }
 0x7e8   : > { %v16749_v54 = vadd.f32 %v7021_v35, %v6596_v18  ;;  %v7528_v35 = vunpack.c.l.b16 %v18783_v4 }
 0x7ea   : > { %18779 = vst [vmem:[#allocation29_spill] sm:$0xff] %v16749_v54  ;;  %v6958_v19 = vpop.f32.mrf.mxu0 }
 0x7eb   : > { %v6884_v41 = vpop.f32.mrf.mxu3  ;;  %8394 = vmatmul.bf16.gmra.mxu2 %v18781_v25  ;;  %v16769_v53 = vpop.f32.mrf.mxu1 }
 0x7ec   : > { %v6954_v37 = vadd.f32 %v6953_v3, %v6884_v41  ;;  %v10934_v3 = vld [vmem:[%s17546_s7 + $0x140] sm:$0xff]  ;;  %v18789_v41 = vunpack.c.l.b16 %v18788_v5 }
 0x7ed   : > { %8008 = vmatpush.bf16.msrb.mxu0 %v10934_v3 }
 0x7ee   : > { %v7023_v18 = vadd.f32 %v16445_v1, %v6954_v37  ;;  %v16765_v14 = vpop.f32.mrf.mxu2  ;;  %v16776_v37 = vpack.c.b16 %v7528_v35, %v18789_v41  ;;  %v18794_v35 = vld [vmem:[#allocation46_spill] sm:$0xff]  ;;  %v18795_v41 = vld [vmem:[#allocation108_spill] sm:$0xff] }
 0x7ef   : > { %18786 = vst [vmem:[#allocation111_spill] sm:$0xff] %v16765_v14 }
 0x7f0   : > { %v16762_v54 = vadd.f32 %v7023_v18, %v6598_v34  ;;  %6926 = vmatmul.bf16.gmra.mxu3 %v18785_v49  ;;  %v18790_v49 = vld [vmem:[#allocation71_spill] sm:$0xff]  ;;  %v6601_v34 = vadd.f32 %v18791_v42, %v6532_v48  ;;  %v7530_v42 = vunpack.c.h.b16 %v18783_v4 }
 0x7f2   : > { %18784 = vst [vmem:[#allocation72_spill] sm:$0xff] %v16762_v54  ;;  %v6961_v44 = vpop.f32.mrf.mxu0  ;;  %v6534_v54 = vadd.f32 %v18793_v23, %v16405_v47  ;;  %v18798_v47 = vld [vmem:[#allocation15_spill] sm:$0xff]  ;;  %v10965_v23 = vld [vmem:[%s17546_s7 + $0x238] sm:$0xff] }
 0x7f3   : > { %v6887_v7 = vpop.f32.mrf.mxu3  ;;  %v16789_v3 = vpop.f32.mrf.mxu1  ;;  %8845 = vmatpush.bf16.msra.mxu2 %v10965_v23 }
 0x7f4   : > { %v6957_v1 = vadd.f32 %v6956_v57, %v6887_v7  ;;  %v6603_v48 = vadd.f32 %v18795_v41, %v6534_v54  ;;  %v10917_v54 = vld [vmem:[%s17546_s7 + $0xb8] sm:$0xff]  ;;  %v18800_v41 = vld [vmem:[#allocation4_spill] sm:$0xff] }
 0x7f5   : > { %7000 = vmatmul.bf16.gmra.mxu0 %v18790_v49  ;;  %v18797_v49 = vld [vmem:[#allocation5_spill] sm:$0xff]  ;;  %8420 = vmatpush.bf16.msra.mxu3 %v10917_v54  ;;  %v10949_v54 = vld [vmem:[%s17546_s7 + $0x1b8] sm:$0xff] }
 0x7f6   : > { %v7026_v16 = vadd.f32 %v16474_v2, %v6957_v1  ;;  %8325 = vmatmul.bf16.gmra.mxu1 %v16776_v37  ;;  %v16786_v57 = vpop.f32.mrf.mxu2  ;;  %8707 = vmatpush.bf16.msra.mxu0 %v10949_v54 }
 0x7f8   : > { %v16782_v18 = vadd.f32 %v7026_v16, %v6601_v34  ;;  %v6537_v34 = vadd.f32 %v18798_v47, %v16425_v29  ;;  %v10964_v29 = vld [vmem:[%s17546_s7 + $0x230] sm:$0xff] }
 0x7f9   : > { %8846 = vmatpush.bf16.msra.mxu2 %v10964_v29  ;;  %v18805_v29 = vld [vmem:[#allocation9_spill] sm:$0xff] }
 0x7fa   : > { %18792 = vst [vmem:[#allocation87_spill] sm:$0xff] %v16782_v18  ;;  %v6963_v14 = vpop.f32.mrf.mxu0  ;;  %v7540_v18 = vunpack.c.l.b16 %v16443_v58 }
 0x7fb   : > { %v6889_v7 = vpop.f32.mrf.mxu3  ;;  %8399 = vmatmul.bf16.gmra.mxu2 %v18794_v35 }
 0x7fc   : > { %v6959_v5 = vadd.f32 %v6958_v19, %v6889_v7  ;;  %v18799_v7 = vunpack.c.l.b16 %v16356_v10 }
 0x7fe   : > { %v7028_v2 = vadd.f32 %v16509_v20, %v6959_v5  ;;  %v16807_v5 = vpack.c.b16 %v18799_v7, %v7530_v42  ;;  %v16812_v4 = vpop.f32.mrf.mxu2  ;;  %v18803_v42 = vld [vmem:[#allocation79_spill] sm:$0xff] }
 0x7ff   : > { %v6539_v47 = vadd.f32 %v18803_v42, %v16454_v46  ;;  %v10962_v46 = vld [vmem:[%s17546_s7 + $0x220] sm:$0xff] }
 0x800   : > { %v16793_v1 = vadd.f32 %v7028_v2, %v6603_v48  ;;  %6931 = vmatmul.bf16.gmra.mxu3 %v18797_v49  ;;  %v16815_v48 = vpop.f32.mrf.mxu1  ;;  %v18801_v2 = vld [vmem:[#allocation113_spill] sm:$0xff] }
 0x801   : > { %v6606_v49 = vadd.f32 %v18801_v2, %v6537_v34 }
 0x802   : > { %18796 = vst [vmem:[#allocation76_spill] sm:$0xff] %v16793_v1  ;;  %v6966_v16 = vpop.f32.mrf.mxu0 }
 0x803   : > { %v6892_v19 = vpop.f32.mrf.mxu3 }
 0x804   : > { %v6962_v20 = vadd.f32 %v6961_v44, %v6892_v19  ;;  %v10957_v19 = vld [vmem:[%s17546_s7 + $0x1f8] sm:$0xff] }
 0x805   : > { %7005 = vmatmul.bf16.gmra.mxu0 %v18800_v41  ;;  %8776 = vmatpush.bf16.msra.mxu1 %v10957_v19  ;;  %v6608_v41 = vadd.f32 %v18805_v29, %v6539_v47 }
 0x806   : > { %v7031_v44 = vadd.f32 %v16532_v32, %v6962_v20  ;;  %8330 = vmatmul.bf16.gmra.mxu1 %v16807_v5  ;;  %v10963_v32 = vld [vmem:[%s17546_s7 + $0x228] sm:$0xff] }
 0x807   : > { %v18804_v20 = vld [vmem:[#allocation24_spill] sm:$0xff]  ;;  %8847 = vmatpush.bf16.msra.mxu2 %v10963_v32  ;;  %v10956_v32 = vld [vmem:[%s17546_s7 + $0x1f0] sm:$0xff] }
 0x808   : > { %v16820_v10 = vadd.f32 %v7031_v44, %v6606_v49  ;;  %v16839_v49 = vpop.f32.mrf.mxu2  ;;  %v16841_v44 = vpop.f32.mrf.mxu1 }
 0x809   : > { %8777 = vmatpush.bf16.msra.mxu1 %v10956_v32 }
 0x80a   : > { %18802 = vst [vmem:[#allocation135_spill] sm:$0xff] %v16820_v10  ;;  %v6968_v23 = vpop.f32.mrf.mxu0  ;;  %v18807_v10 = vld [vmem:[#allocation69_spill] sm:$0xff] }
 0x80b   : > { %v6894_v34 = vpop.f32.mrf.mxu3  ;;  %8404 = vmatmul.bf16.gmra.mxu2 %v18804_v20 }
 0x80c   : > { %v6964_v7 = vadd.f32 %v6963_v14, %v6894_v34  ;;  %8848 = vmatpush.bf16.msra.mxu2 %v10962_v46  ;;  %v18808_v14 = vld [vmem:[#allocation37_spill] sm:$0xff]  ;;  %v18810_v46 = vld [vmem:[#allocation78_spill] sm:$0xff] }
 0x80d   : > { %v6542_v54 = vadd.f32 %v18808_v14, %v16490_v31  ;;  %v10960_v31 = vld [vmem:[%s17546_s7 + $0x210] sm:$0xff]  ;;  %v18813_v14 = vld [vmem:[#allocation19_spill] sm:$0xff] }
 0x80e   : > { %v7033_v2 = vadd.f32 %v16552_v15, %v6964_v7  ;;  %v10961_v15 = vld [vmem:[%s17546_s7 + $0x218] sm:$0xff]  ;;  %v18809_v7 = vld [vmem:[#allocation23_spill] sm:$0xff]  ;;  %v6544_v32 = vadd.f32 %v18813_v14, %v16521_v0 }
 0x80f   : > { %v6611_v29 = vadd.f32 %v18810_v46, %v6542_v54  ;;  %v10954_v54 = vld [vmem:[%s17546_s7 + $0x1e0] sm:$0xff]  ;;  %v10953_v0 = vld [vmem:[%s17546_s7 + $0x1d8] sm:$0xff] }
 0x810   : > { %v16843_v42 = vadd.f32 %v7033_v2, %v6608_v41  ;;  %6936 = vmatmul.bf16.gmra.mxu3 %v18807_v10  ;;  %v10955_v10 = vld [vmem:[%s17546_s7 + $0x1e8] sm:$0xff]  ;;  %8849 = vmatpush.bf16.msra.mxu2 %v10961_v15  ;;  %v16870_v15 = vpop.f32.mrf.mxu1  ;;  %v18814_v46 = vld [vmem:[#allocation95_spill] sm:$0xff] }
 0x811   : > { %8778 = vmatpush.bf16.msra.mxu1 %v10955_v10  ;;  %v10916_v10 = vld [vmem:[%s17546_s7 + $0xb0] sm:$0xff] }
 0x812   : > { %18806 = vst [vmem:[#allocation67_spill] sm:$0xff] %v16843_v42  ;;  %v6971_v19 = vpop.f32.mrf.mxu0  ;;  %8421 = vmatpush.bf16.msra.mxu3 %v10916_v10  ;;  %v18816_v42 = vld [vmem:[#allocation81_spill] sm:$0xff] }
 0x813   : > { %v6897_v47 = vpop.f32.mrf.mxu3  ;;  %v7511_v1 = vunpack.c.l.b16 %v18816_v42 }
 0x814   : > { %v6967_v34 = vadd.f32 %v6966_v16, %v6897_v47  ;;  %v16866_v16 = vpop.f32.mrf.mxu2  ;;  %8850 = vmatpush.bf16.msra.mxu2 %v10960_v31 }
 0x815   : > { %8009 = vmatmul.bf16.vlgmr.msrb.gmra.mxu0 %v18809_v7  ;;  %18812 = vst [vmem:[#allocation128_spill] sm:$0xff] %v16866_v16  ;;  %8779 = vmatpush.bf16.msra.mxu1 %v10954_v54  ;;  %v18818_v54 = vld [vmem:[#allocation75_spill] sm:$0xff] }
 0x816   : > { %v7036_v41 = vadd.f32 %v16566_v28, %v6967_v34  ;;  %8335 = vmatmul.bf16.gmra.mxu1 %v16350_v56  ;;  %v10959_v28 = vld [vmem:[%s17546_s7 + $0x208] sm:$0xff] }
 0x818   : > { %v16864_v2 = vadd.f32 %v7036_v41, %v6611_v29  ;;  %8851 = vmatpush.bf16.msra.mxu2 %v10959_v28  ;;  %v10958_v29 = vld [vmem:[%s17546_s7 + $0x200] sm:$0xff] }
 0x819   : > { %v18815_v41 = vld [vmem:[#allocation39_spill] sm:$0xff]  ;;  %8780 = vmatpush.bf16.msra.mxu1 %v10953_v0  ;;  %v10948_v0 = vld [vmem:[%s17546_s7 + $0x1b0] sm:$0xff] }
 0x81a   : > { %18811 = vst [vmem:[#allocation114_spill] sm:$0xff] %v16864_v2  ;;  %v6973_v47 = vpop.f32.mrf.mxu0  ;;  %v6613_v14 = vadd.f32 %v18815_v41, %v6544_v32  ;;  %v18819_v28 = vld [vmem:[#allocation11_spill] sm:$0xff]  ;;  %v18822_v32 = vld [vmem:[#allocation90_spill] sm:$0xff]  ;;  %8708 = vmatpush.bf16.msra.mxu0 %v10948_v0 }
 0x81b   : > { %v6899_v34 = vpop.f32.mrf.mxu3  ;;  %8409 = vmatmul.bf16.gmra.mxu2 %v18814_v46 }
 0x81c   : > { %v6969_v31 = vadd.f32 %v6968_v23, %v6899_v34  ;;  %v18820_v34 = vld [vmem:[#allocation62_spill] sm:$0xff]  ;;  %8852 = vmatpush.bf16.msra.mxu2 %v10958_v29  ;;  %v16910_v41 = vpop.f32.mrf.mxu2 }
 0x81d   : > { %v18821_v10 = vsel %vm11560_vm6, %v18819_v28, %v18820_v34  ;;  %18823 = vst [vmem:[#allocation20_spill] sm:$0xff] %v16910_v41  ;;  %v16913_v28 = vpop.f32.mrf.mxu1  ;;  %v18824_v34 = vunpack.c.l.b16 %v16387_v38  ;;  %v18827_v38 = vld [vmem:[#allocation42_spill] sm:$0xff] }
 0x81e   : > { %v7038_v2 = vadd.f32 %v16577_v22, %v6969_v31  ;;  %v16900_v16 = vunpack.c.l.b16 %v18821_v10  ;;  %v6547_v22 = vadd.f32 %v18822_v32, %v16541_v43  ;;  %v10951_v10 = vld [vmem:[%s17546_s7 + $0x1c8] sm:$0xff]  ;;  %v18825_v32 = vld [vmem:[#allocation31_spill] sm:$0xff] }
 0x81f   : > { %v16917_v43 = vpack.c.b16 %v7540_v18, %v18824_v34  ;;  %v6549_v18 = vadd.f32 %v18827_v38, %v16558_v45  ;;  %v7513_v45 = vunpack.c.h.b16 %v18816_v42  ;;  %v18833_v38 = vld [vmem:[#allocation60_spill] sm:$0xff] }
 0x820   : > { %v16892_v23 = vadd.f32 %v7038_v2, %v6613_v14  ;;  %7940 = vmatmul.bf16.vlgmr.msrb.gmra.mxu3 %v18818_v54  ;;  %v10952_v2 = vld [vmem:[%s17546_s7 + $0x1d0] sm:$0xff]  ;;  %v7655_v54 = vpack.c.b16 %v7511_v1, %v16900_v16 }
 0x821   : > { %8781 = vmatpush.bf16.msra.mxu1 %v10952_v2  ;;  %v10950_v2 = vld [vmem:[%s17546_s7 + $0x1c0] sm:$0xff] }
 0x822   : > { %18817 = vst [vmem:[#allocation71_spill] sm:$0xff] %v16892_v23  ;;  %v6976_v31 = vpop.f32.mrf.mxu0  ;;  %v6616_v23 = vadd.f32 %v18825_v32, %v6547_v22  ;;  %v7542_v32 = vunpack.c.h.b16 %v16443_v58 }
 0x823   : > { %v6902_v14 = vpop.f32.mrf.mxu3 }
 0x824   : > { %v6972_v29 = vadd.f32 %v6971_v19, %v6902_v14  ;;  %v18828_v14 = vld [vmem:[#allocation36_spill] sm:$0xff]  ;;  %v16933_v22 = vpop.f32.mrf.mxu2 }
 0x825   : > { %8014 = vmatmul.bf16.gmra.mxu0 %v7655_v54  ;;  %8782 = vmatpush.bf16.msra.mxu1 %v10951_v10  ;;  %18829 = vst [vmem:[#allocation46_spill] sm:$0xff] %v16933_v22  ;;  %v18832_v10 = vld [vmem:[#allocation8_spill] sm:$0xff] }
 0x826   : > { %v7041_v41 = vadd.f32 %v16589_v63, %v6972_v29  ;;  %8340 = vmatmul.bf16.gmra.mxu1 %v16917_v43  ;;  %v16935_v63 = vpop.f32.mrf.mxu1 }
 0x828   : > { %v16925_v1 = vadd.f32 %v7041_v41, %v6616_v23  ;;  %v18830_v23 = vld [vmem:[#allocation7_spill] sm:$0xff] }
 0x829   : > { %8783 = vmatpush.bf16.msra.mxu1 %v10950_v2  ;;  %v6618_v41 = vadd.f32 %v18830_v23, %v6549_v18  ;;  %v18834_v18 = vld [vmem:[#allocation16_spill] sm:$0xff] }
 0x82a   : > { %18826 = vst [vmem:[#allocation115_spill] sm:$0xff] %v16925_v1  ;;  %v6978_v19 = vpop.f32.mrf.mxu0  ;;  %v7658_v23 = vpack.c.b16 %v18834_v18, %v7513_v45 }
 0x82b   : > { %v6904_v0 = vpop.f32.mrf.mxu3  ;;  %8414 = vmatmul.bf16.gmra.mxu2 %v18828_v14 }
 0x82c   : > { %v6974_v54 = vadd.f32 %v6973_v47, %v6904_v0  ;;  %v6552_v47 = vadd.f32 %v18833_v38, %v16570_v27  ;;  %v10915_v0 = vld [vmem:[%s17546_s7 + $0xa8] sm:$0xff]  ;;  %v16957_v27 = vpop.f32.mrf.mxu2 }
 0x82d   : > { %8422 = vmatpush.bf16.msra.mxu3 %v10915_v0 }
 0x82e   : > { %v7043_v29 = vadd.f32 %v16607_v59, %v6974_v54  ;;  %v18835_v54 = vld [vmem:[#allocation144_spill] sm:$0xff]  ;;  %v16959_v38 = vpop.f32.mrf.mxu1 }
 0x82f   : > { %v18836_v22 = vunpack.c.l.b16 %v18835_v54 }
 0x830   : > { %v16940_v34 = vadd.f32 %v7043_v29, %v6618_v41  ;;  %7945 = vmatmul.bf16.gmra.mxu3 %v18832_v10  ;;  %v18837_v29 = vld [vmem:[#allocation6_spill] sm:$0xff] }
 0x831   : > { %v16952_v41 = vpack.c.b16 %v18836_v22, %v7542_v32  ;;  %v6621_v58 = vadd.f32 %v18837_v29, %v6552_v47  ;;  %v10947_v22 = vld [vmem:[%s17546_s7 + $0x1a8] sm:$0xff] }
 0x832   : > { %18831 = vst [vmem:[#allocation108_spill] sm:$0xff] %v16940_v34  ;;  %v6981_v2 = vpop.f32.mrf.mxu0  ;;  %8709 = vmatpush.bf16.msra.mxu0 %v10947_v22  ;;  %v18840_v47 = vld [vmem:[#allocation116_spill] sm:$0xff]  ;;  %v18845_v22 = vld [vmem:[#allocation118_spill] sm:$0xff] }
 0x833   : > { %v6907_v1 = vpop.f32.mrf.mxu3 }
 0x834   : > { %v6977_v59 = vadd.f32 %v6976_v31, %v6907_v1  ;;  %v18839_v31 = vld [vmem:[#allocation117_spill] sm:$0xff]  ;;  %v16974_v54 = vpop.f32.mrf.mxu2 }
 0x835   : > { %8019 = vmatmul.bf16.gmra.mxu0 %v7658_v23  ;;  %v6554_v1 = vadd.f32 %v18839_v31, %v16582_v39  ;;  %v18843_v39 = vld [vmem:[#allocation119_spill] sm:$0xff] }
 0x836   : > { %v7046_v10 = vadd.f32 %v16622_v40, %v6977_v59  ;;  %8345 = vmatmul.bf16.gmra.mxu1 %v16952_v41  ;;  %v18842_v59 = vld [vmem:[#allocation17_spill] sm:$0xff]  ;;  %v6557_v29 = vadd.f32 %v18843_v39, %v16595_v21  ;;  %v10914_v21 = vld [vmem:[%s17546_s7 + $0xa0] sm:$0xff] }
 0x837   : > { %v6623_v0 = vadd.f32 %v18840_v47, %v6554_v1  ;;  %8423 = vmatpush.bf16.msra.mxu3 %v10914_v21  ;;  %v18854_v21 = vld [vmem:[#allocation48_spill] sm:$0xff] }
 0x838   : > { %v16961_v34 = vadd.f32 %v7046_v10, %v6621_v58  ;;  %v16978_v58 = vpop.f32.mrf.mxu1  ;;  %v6626_v1 = vadd.f32 %v18845_v22, %v6557_v29  ;;  %v18852_v22 = vld [vmem:[#allocation80_spill] sm:$0xff] }
 0x83a   : > { %18838 = vst [vmem:[#allocation5_spill] sm:$0xff] %v16961_v34  ;;  %v6983_v45 = vpop.f32.mrf.mxu0 }
 0x83b   : > { %v6909_v32 = vpop.f32.mrf.mxu3  ;;  %8853 = vmatmul.bf16.vlgmr.msra.gmra.mxu2 %v18816_v42 }
 0x83c   : > { %v6979_v40 = vadd.f32 %v6978_v19, %v6909_v32  ;;  %v18844_v19 = vld [vmem:[#allocation50_spill] sm:$0xff] }
 0x83e   : > { %v7048_v18 = vadd.f32 %v16630_v60, %v6979_v40  ;;  %v18847_v40 = vld [vmem:[#allocation122_spill] sm:$0xff] }
 0x83f   : > { %v6559_v47 = vadd.f32 %v18847_v40, %v16612_v61 }
 0x840   : > { %v16971_v23 = vadd.f32 %v7048_v18, %v6623_v0  ;;  %7950 = vmatmul.bf16.gmra.mxu3 %v18842_v59  ;;  %v16991_v18 = vpop.f32.mrf.mxu2  ;;  %v18848_v59 = vld [vmem:[#allocation35_spill] sm:$0xff]  ;;  %v16994_v39 = vpop.f32.mrf.mxu1 }
 0x842   : > { %18841 = vst [vmem:[#allocation15_spill] sm:$0xff] %v16971_v23  ;;  %v6986_v10 = vpop.f32.mrf.mxu0 }
 0x843   : > { %v6912_v31 = vpop.f32.mrf.mxu3 }
 0x844   : > { %v6982_v34 = vadd.f32 %v6981_v2, %v6912_v31  ;;  %v18850_v31 = vld [vmem:[#allocation61_spill] sm:$0xff] }
 0x845   : > { %8024 = vmatmul.bf16.gmra.mxu0 %v18844_v19  ;;  %v7523_v61 = vunpack.c.l.b16 %v18850_v31 }
 0x846   : > { %v7051_v60 = vadd.f32 %v16643_v17, %v6982_v34  ;;  %8784 = vmatmul.bf16.vlgmr.msra.gmra.mxu1 %v18742_v36  ;;  %v18849_v36 = vld [vmem:[#allocation120_spill] sm:$0xff] }
 0x847   : > { %v6628_v34 = vadd.f32 %v18849_v36, %v6559_v47  ;;  %v18855_v36 = vld [vmem:[#allocation82_spill] sm:$0xff] }
 0x848   : > { %v16984_v32 = vadd.f32 %v7051_v60, %v6626_v1  ;;  %v18853_v1 = vld [vmem:[#allocation125_spill] sm:$0xff] }
 0x849   : > { %v6562_v60 = vadd.f32 %v18853_v1, %v16626_v24 }
 0x84a   : > { %18846 = vst [vmem:[#allocation4_spill] sm:$0xff] %v16984_v32  ;;  %v6988_v0 = vpop.f32.mrf.mxu0  ;;  %v10946_v32 = vld [vmem:[%s17546_s7 + $0x1a0] sm:$0xff] }
 0x84b   : > { %v6914_v2 = vpop.f32.mrf.mxu3  ;;  %8858 = vmatmul.bf16.gmra.mxu2 %v18848_v59  ;;  %8710 = vmatpush.bf16.msra.mxu0 %v10946_v32 }
 0x84c   : > { %v6984_v17 = vadd.f32 %v6983_v45, %v6914_v2  ;;  %v7663_v2 = vpack.c.b16 %v7523_v61, %v18854_v21 }
 0x84e   : > { %v7053_v29 = vadd.f32 %v16656_v30, %v6984_v17  ;;  %v17008_v30 = vpop.f32.mrf.mxu2  ;;  %v17010_v17 = vpop.f32.mrf.mxu1 }
 0x850   : > { %v16999_v19 = vadd.f32 %v7053_v29, %v6628_v34  ;;  %7955 = vmatmul.bf16.gmra.mxu3 %v18852_v22  ;;  %v6631_v34 = vadd.f32 %v18855_v36, %v6562_v60  ;;  %v18857_v22 = vld [vmem:[#allocation40_spill] sm:$0xff] }
 0x851   : > { %v6564_v1 = vadd.f32 %v18857_v22, %v16634_v33  ;;  %v18863_v33 = vld [vmem:[#allocation129_spill] sm:$0xff] }
 0x852   : > { %18851 = vst [vmem:[#allocation113_spill] sm:$0xff] %v16999_v19  ;;  %v6991_v40 = vpop.f32.mrf.mxu0  ;;  %v6567_v36 = vadd.f32 %v18863_v33, %v16649_v9 }
 0x853   : > { %v6917_v45 = vpop.f32.mrf.mxu3 }
 0x854   : > { %v6987_v47 = vadd.f32 %v6986_v10, %v6917_v45  ;;  %v18858_v10 = vld [vmem:[#allocation28_spill] sm:$0xff]  ;;  %v18859_v45 = vld [vmem:[#allocation99_spill] sm:$0xff] }
 0x855   : > { %8029 = vmatmul.bf16.gmra.mxu0 %v7663_v2  ;;  %v6633_v21 = vadd.f32 %v18859_v45, %v6564_v1 }
 0x856   : > { %v7056_v29 = vadd.f32 %v16665_v55, %v6987_v47  ;;  %8789 = vmatmul.bf16.gmra.mxu1 %v18748_v52  ;;  %v17022_v23 = vpop.f32.mrf.mxu2  ;;  %v7525_v55 = vunpack.c.h.b16 %v18850_v31  ;;  %v17025_v60 = vpop.f32.mrf.mxu1  ;;  %v18862_v47 = vld [vmem:[#allocation84_spill] sm:$0xff] }
 0x857   : > { %18860 = vst [vmem:[#allocation24_spill] sm:$0xff] %v17022_v23 }
 0x858   : > { %v17015_v24 = vadd.f32 %v7056_v29, %v6631_v34 }
 0x85a   : > { %18856 = vst [vmem:[#allocation79_spill] sm:$0xff] %v17015_v24  ;;  %v6993_v19 = vpop.f32.mrf.mxu0 }
 0x85b   : > { %v6919_v61 = vpop.f32.mrf.mxu3  ;;  %8863 = vmatmul.bf16.gmra.mxu2 %v18858_v10 }
 0x85c   : > { %v6989_v32 = vadd.f32 %v6988_v0, %v6919_v61  ;;  %v10913_v0 = vld [vmem:[%s17546_s7 + $0x98] sm:$0xff]  ;;  %v18865_v61 = vld [vmem:[#allocation127_spill] sm:$0xff] }
 0x85d   : > { %8424 = vmatpush.bf16.msra.mxu3 %v10913_v0 }
 0x85e   : > { %v7058_v2 = vadd.f32 %v16677_v50, %v6989_v32  ;;  %v18864_v50 = vld [vmem:[#allocation89_spill] sm:$0xff]  ;;  %v6636_v32 = vadd.f32 %v18865_v61, %v6567_v36  ;;  %v17041_v9 = vpop.f32.mrf.mxu2  ;;  %v17045_v33 = vpop.f32.mrf.mxu1 }
 0x85f   : > { %v7666_v22 = vpack.c.b16 %v18864_v50, %v7525_v55  ;;  %18867 = vst [vmem:[#allocation37_spill] sm:$0xff] %v17041_v9  ;;  %v18872_v50 = vld [vmem:[#allocation85_spill] sm:$0xff] }
 0x860   : > { %v17027_v52 = vadd.f32 %v7058_v2, %v6633_v21  ;;  %7960 = vmatmul.bf16.gmra.mxu3 %v18862_v47  ;;  %v18868_v2 = vld [vmem:[#allocation130_spill] sm:$0xff]  ;;  %18869 = vst [vmem:[#allocation23_spill] sm:$0xff] %v17045_v33 }
 0x861   : > { %v6569_v47 = vadd.f32 %v18868_v2, %v16660_v6  ;;  %v18873_v6 = vld [vmem:[#allocation133_spill] sm:$0xff]  ;;  %v18973_v33 = vld [vmem:[#allocation134_spill] sm:$0xff] }
 0x862   : > { %18861 = vst [vmem:[#allocation9_spill] sm:$0xff] %v17027_v52  ;;  %v6996_v34 = vpop.f32.mrf.mxu0 }
 0x863   : > { %v6922_v29 = vpop.f32.mrf.mxu3 }
 0x864   : > { %v6992_v1 = vadd.f32 %v6991_v40, %v6922_v29  ;;  %v10945_v40 = vld [vmem:[%s17546_s7 + $0x198] sm:$0xff] }
 0x865   : > { %8034 = vmatmul.bf16.gmra.mxu0 %v7666_v22  ;;  %v6572_v22 = vadd.f32 %v18873_v6, %v16669_v11  ;;  %v10912_v6 = vld [vmem:[%s17546_s7 + $0x90] sm:$0xff] }
 0x866   : > { %v7061_v45 = vadd.f32 %v16690_v51, %v6992_v1  ;;  %8794 = vmatmul.bf16.gmra.mxu1 %v18758_v8  ;;  %8711 = vmatpush.bf16.msra.mxu0 %v10945_v40  ;;  %v18870_v8 = vld [vmem:[#allocation12_spill] sm:$0xff]  ;;  %v17058_v61 = vpop.f32.mrf.mxu2 }
 0x867   : > { %v6638_v36 = vadd.f32 %v18870_v8, %v6569_v47  ;;  %18874 = vst [vmem:[#allocation19_spill] sm:$0xff] %v17058_v61  ;;  %v18877_v40 = vld [vmem:[#allocation132_spill] sm:$0xff]  ;;  %8425 = vmatpush.bf16.msra.mxu3 %v10912_v6  ;;  %v18892_v6 = vld [vmem:[#allocation21_spill] sm:$0xff] }
 0x868   : > { %v17039_v21 = vadd.f32 %v7061_v45, %v6636_v32  ;;  %v17060_v45 = vpop.f32.mrf.mxu1  ;;  %v6641_v47 = vadd.f32 %v18877_v40, %v6572_v22 }
 0x869   : > { %18875 = vst [vmem:[#allocation95_spill] sm:$0xff] %v17060_v45  ;;  %v7505_v45 = vunpack.c.l.b16 %v18809_v7 }
 0x86a   : > { %18866 = vst [vmem:[#allocation69_spill] sm:$0xff] %v17039_v21  ;;  %v6998_v52 = vpop.f32.mrf.mxu0 }
 0x86b   : > { %v6924_v55 = vpop.f32.mrf.mxu3  ;;  %8868 = vmatmul.bf16.gmra.mxu2 %v18850_v31 }
 0x86c   : > { %v6994_v51 = vadd.f32 %v6993_v19, %v6924_v55  ;;  %v18876_v19 = vld [vmem:[#allocation41_spill] sm:$0xff]  ;;  %v18878_v55 = vld [vmem:[#allocation131_spill] sm:$0xff] }
 0x86e   : > { %v7063_v0 = vadd.f32 %v16703_v13, %v6994_v51  ;;  %v18879_v51 = vld [vmem:[#allocation25_spill] sm:$0xff]  ;;  %v17074_v22 = vpop.f32.mrf.mxu2 }
 0x86f   : > { %18884 = vst [vmem:[#allocation81_spill] sm:$0xff] %v17074_v22 }
 0x870   : > { %v17053_v29 = vadd.f32 %v7063_v0, %v6638_v36  ;;  %7965 = vmatmul.bf16.gmra.mxu3 %v18872_v50  ;;  %v18881_v36 = vld [vmem:[#allocation123_spill] sm:$0xff]  ;;  %v18882_v0 = vld [vmem:[#allocation136_spill] sm:$0xff] }
 0x871   : > { %v6574_v11 = vadd.f32 %v18882_v0, %v18881_v36  ;;  %v18889_v36 = vld [vmem:[#allocation86_spill] sm:$0xff]  ;;  %v18890_v0 = vld [vmem:[#allocation121_spill] sm:$0xff] }
 0x872   : > { %18871 = vst [vmem:[#allocation78_spill] sm:$0xff] %v17053_v29  ;;  %v7001_v1 = vpop.f32.mrf.mxu0 }
 0x873   : > { %v6927_v32 = vpop.f32.mrf.mxu3 }
 0x874   : > { %v6997_v2 = vadd.f32 %v6996_v34, %v6927_v32  ;;  %v18883_v34 = vld [vmem:[#allocation55_spill] sm:$0xff] }
 0x875   : > { %8039 = vmatmul.bf16.gmra.mxu0 %v18876_v19  ;;  %v18886_v19 = vld [vmem:[#allocation73_spill] sm:$0xff] }
 0x876   : > { %v7066_v13 = vadd.f32 %v18878_v55, %v6997_v2  ;;  %8799 = vmatmul.bf16.gmra.mxu1 %v18879_v51  ;;  %v17076_v2 = vpop.f32.mrf.mxu1  ;;  %v6643_v40 = vadd.f32 %v18886_v19, %v6574_v11  ;;  %v18887_v55 = vld [vmem:[#allocation96_spill] sm:$0xff] }
 0x877   : > { %18885 = vst [vmem:[#allocation75_spill] sm:$0xff] %v17076_v2 }
 0x878   : > { %v17066_v8 = vadd.f32 %v7066_v13, %v6641_v47  ;;  %v7535_v13 = vunpack.c.l.b16 %v18887_v55 }
 0x87a   : > { %18880 = vst [vmem:[#allocation39_spill] sm:$0xff] %v17066_v8  ;;  %v7003_v50 = vpop.f32.mrf.mxu0  ;;  %v18891_v8 = vld [vmem:[#allocation138_spill] sm:$0xff]  ;;  %v7671_v22 = vpack.c.b16 %v7535_v13, %v18892_v6 }
 0x87b   : > { %v6929_v29 = vpop.f32.mrf.mxu3  ;;  %8873 = vmatmul.bf16.gmra.mxu2 %v18883_v34  ;;  %v6577_v21 = vadd.f32 %v18891_v8, %v18890_v0  ;;  %v18898_v0 = vld [vmem:[#allocation22_spill] sm:$0xff] }
 0x87c   : > { %v6999_v32 = vadd.f32 %v6998_v52, %v6929_v29  ;;  %v10944_v52 = vld [vmem:[%s17546_s7 + $0x190] sm:$0xff]  ;;  %v18902_v6 = vld [vmem:[#allocation14_spill] sm:$0xff] }
 0x87d   : > { %8712 = vmatpush.bf16.msra.mxu0 %v10944_v52  ;;  %v18900_v52 = vld [vmem:[#allocation30_spill] sm:$0xff] }
 0x87e   : > { %v7068_v47 = vadd.f32 %v16736_v62, %v6999_v32  ;;  %v18893_v62 = vld [vmem:[#allocation77_spill] sm:$0xff]  ;;  %v17095_v8 = vpop.f32.mrf.mxu1 }
 0x87f   : > { %v6646_v32 = vadd.f32 %v18893_v62, %v6577_v21  ;;  %18895 = vst [vmem:[#allocation90_spill] sm:$0xff] %v17095_v8  ;;  %v18948_v8 = vld [vmem:[#allocation51_spill] sm:$0xff] }
 0x880   : > { %v17081_v51 = vadd.f32 %v7068_v47, %v6643_v40  ;;  %7970 = vmatmul.bf16.gmra.mxu3 %v18889_v36  ;;  %v17093_v40 = vpop.f32.mrf.mxu2  ;;  %v18897_v36 = vld [vmem:[#allocation65_spill] sm:$0xff] }
 0x881   : > { %18894 = vst [vmem:[#allocation62_spill] sm:$0xff] %v17093_v40 }
 0x882   : > { %18888 = vst [vmem:[#allocation11_spill] sm:$0xff] %v17081_v51  ;;  %v7006_v24 = vpop.f32.mrf.mxu0  ;;  %v6579_v51 = vadd.f32 %v18898_v0, %v18897_v36  ;;  %v18907_v0 = vld [vmem:[#allocation97_spill] sm:$0xff] }
 0x883   : > { %v6932_v29 = vpop.f32.mrf.mxu3 }
 0x884   : > { %v7002_v11 = vadd.f32 %v7001_v1, %v6932_v29  ;;  %v18899_v1 = vld [vmem:[#allocation91_spill] sm:$0xff]  ;;  %v6648_v21 = vadd.f32 %v18900_v52, %v6579_v51  ;;  %v18908_v52 = vld [vmem:[#allocation34_spill] sm:$0xff] }
 0x885   : > { %8044 = vmatmul.bf16.gmra.mxu0 %v7671_v22 }
 0x886   : > { %v7071_v19 = vadd.f32 %v16751_v12, %v7002_v11  ;;  %8804 = vmatmul.bf16.gmra.mxu1 %v18781_v25  ;;  %v7537_v25 = vunpack.c.h.b16 %v18887_v55  ;;  %v10911_v11 = vld [vmem:[%s17546_s7 + $0x88] sm:$0xff] }
 0x887   : > { %8426 = vmatpush.bf16.msra.mxu3 %v10911_v11  ;;  %v18911_v11 = vld [vmem:[#allocation141_spill] sm:$0xff] }
 0x888   : > { %v17097_v47 = vadd.f32 %v7071_v19, %v6646_v32  ;;  %v17111_v62 = vpop.f32.mrf.mxu2  ;;  %v18904_v32 = vld [vmem:[#allocation126_spill] sm:$0xff]  ;;  %v18905_v19 = vld [vmem:[#allocation139_spill] sm:$0xff] }
 0x889   : > { %18903 = vst [vmem:[#allocation36_spill] sm:$0xff] %v17111_v62  ;;  %v6582_v36 = vadd.f32 %v18905_v19, %v18904_v32  ;;  %v18910_v19 = vld [vmem:[#allocation137_spill] sm:$0xff] }
 0x88a   : > { %18896 = vst [vmem:[#allocation31_spill] sm:$0xff] %v17097_v47  ;;  %v7008_v61 = vpop.f32.mrf.mxu0 }
 0x88b   : > { %v6934_v13 = vpop.f32.mrf.mxu3  ;;  %8878 = vmatmul.bf16.gmra.mxu2 %v18899_v1 }
 0x88c   : > { %v7004_v22 = vadd.f32 %v7003_v50, %v6934_v13  ;;  %v17115_v50 = vpop.f32.mrf.mxu1  ;;  %v7674_v13 = vpack.c.b16 %v18907_v0, %v7537_v25 }
 0x88d   : > { %18906 = vst [vmem:[#allocation7_spill] sm:$0xff] %v17115_v50  ;;  %v18947_v50 = vld [vmem:[#allocation107_spill] sm:$0xff] }
 0x88e   : > { %v7073_v12 = vadd.f32 %v16769_v53, %v7004_v22 }
 0x890   : > { %v17105_v29 = vadd.f32 %v7073_v12, %v6648_v21  ;;  %7975 = vmatmul.bf16.gmra.mxu3 %v18902_v6  ;;  %v6651_v21 = vadd.f32 %v18908_v52, %v6582_v36  ;;  %v10943_v6 = vld [vmem:[%s17546_s7 + $0x188] sm:$0xff]  ;;  %v17128_v25 = vpop.f32.mrf.mxu2 }
 0x891   : > { %8713 = vmatpush.bf16.msra.mxu0 %v10943_v6  ;;  %18912 = vst [vmem:[#allocation60_spill] sm:$0xff] %v17128_v25 }
 0x892   : > { %18901 = vst [vmem:[#allocation42_spill] sm:$0xff] %v17105_v29  ;;  %v8010_v51 = vpop.f32.mrf.mxu0  ;;  %v6584_v29 = vadd.f32 %v18911_v11, %v18910_v19  ;;  %v18919_v11 = vld [vmem:[#allocation44_spill] sm:$0xff] }
 0x893   : > { %v6937_v53 = vpop.f32.mrf.mxu3 }
 0x894   : > { %v7007_v22 = vadd.f32 %v7006_v24, %v6937_v53  ;;  %v17131_v36 = vpop.f32.mrf.mxu1 }
 0x895   : > { %8049 = vmatmul.bf16.gmra.mxu0 %v7674_v13  ;;  %18913 = vst [vmem:[#allocation16_spill] sm:$0xff] %v17131_v36 }
 0x896   : > { %v7076_v12 = vadd.f32 %v16789_v3, %v7007_v22  ;;  %8809 = vmatmul.bf16.gmra.mxu1 %v18794_v35  ;;  %v18914_v35 = vld [vmem:[#allocation140_spill] sm:$0xff]  ;;  %v18916_v22 = vld [vmem:[#allocation93_spill] sm:$0xff] }
 0x897   : > { %v6653_v53 = vadd.f32 %v18914_v35, %v6584_v29 }
 0x898   : > { %v17124_v32 = vadd.f32 %v7076_v12, %v6651_v21  ;;  %v18917_v12 = vld [vmem:[#allocation142_spill] sm:$0xff]  ;;  %v17139_v19 = vpop.f32.mrf.mxu2 }
 0x899   : > { %18918 = vst [vmem:[#allocation6_spill] sm:$0xff] %v17139_v19 }
 0x89a   : > { %18909 = vst [vmem:[#allocation8_spill] sm:$0xff] %v17124_v32  ;;  %v8012_v47 = vpop.f32.mrf.mxu0 }
 0x89b   : > { %v6939_v24 = vpop.f32.mrf.mxu3  ;;  %8883 = vmatmul.bf16.gmra.mxu2 %v18887_v55 }
 0x89c   : > { %v7009_v3 = vadd.f32 %v7008_v61, %v6939_v24  ;;  %v17142_v32 = vpop.f32.mrf.mxu1  ;;  %v18921_v24 = vld [vmem:[#allocation54_spill] sm:$0xff] }
 0x89d   : > { %18920 = vst [vmem:[#allocation117_spill] sm:$0xff] %v17142_v32 }
 0x89e   : > { %v7078_v0 = vadd.f32 %v16815_v48, %v7009_v3  ;;  %v10910_v48 = vld [vmem:[%s17546_s7 + $0x80] sm:$0xff] }
 0x89f   : > { %8427 = vmatpush.bf16.msra.mxu3 %v10910_v48  ;;  %v18922_v3 = vld [vmem:[#allocation143_spill] sm:$0xff] }
 0x8a0   : > { %v17135_v13 = vadd.f32 %v7078_v0, %v6653_v53  ;;  %7980 = vmatmul.bf16.gmra.mxu3 %v18916_v22  ;;  %v17157_v0 = vpop.f32.mrf.mxu2  ;;  %v18925_v22 = vld [vmem:[#allocation94_spill] sm:$0xff]  ;;  %v18927_v48 = vld [vmem:[#allocation103_spill] sm:$0xff] }
 0x8a1   : > { %18923 = vst [vmem:[#allocation116_spill] sm:$0xff] %v17157_v0  ;;  %v18930_v0 = vld [vmem:[#allocation98_spill] sm:$0xff] }
 0x8a2   : > { %18915 = vst [vmem:[#allocation144_spill] sm:$0xff] %v17135_v13  ;;  %v8015_v52 = vpop.f32.mrf.mxu0 }
 0x8a3   : > { %v7941_v21 = vpop.f32.mrf.mxu3 }
 0x8a4   : > { %v7942_v6 = vadd.f32 %v7941_v21, %v18917_v12 }
 0x8a5   : > { %8054 = vmatmul.bf16.gmra.mxu0 %v18919_v11 }
 0x8a6   : > { %v17144_v25 = vadd.f32 %v8010_v51, %v7942_v6  ;;  %8814 = vmatmul.bf16.gmra.mxu1 %v18804_v20  ;;  %v10942_v51 = vld [vmem:[%s17546_s7 + $0x180] sm:$0xff]  ;;  %v17159_v20 = vpop.f32.mrf.mxu1  ;;  %v18926_v6 = vld [vmem:[#allocation52_spill] sm:$0xff] }
 0x8a7   : > { %18924 = vst [vmem:[#allocation17_spill] sm:$0xff] %v17159_v20  ;;  %8714 = vmatpush.bf16.msra.mxu0 %v10942_v51  ;;  %v18932_v20 = vld [vmem:[#allocation32_spill] sm:$0xff] }
 0x8aa   : > { %v8017_v61 = vpop.f32.mrf.mxu0 }
 0x8ab   : > { %v7943_v29 = vpop.f32.mrf.mxu3  ;;  %8888 = vmatmul.bf16.gmra.mxu2 %v18921_v24 }
 0x8ac   : > { %v7944_v35 = vadd.f32 %v7943_v29, %v18922_v3 }
 0x8ae   : > { %v17152_v53 = vadd.f32 %v8012_v47, %v7944_v35  ;;  %v17167_v47 = vpop.f32.mrf.mxu2  ;;  %v17169_v3 = vpop.f32.mrf.mxu1 }
 0x8af   : > { %18928 = vst [vmem:[#allocation119_spill] sm:$0xff] %v17167_v47  ;;  %v18936_v47 = vld [vmem:[#allocation38_spill] sm:$0xff] }
 0x8b0   : > { %7985 = vmatmul.bf16.gmra.mxu3 %v18925_v22  ;;  %18929 = vst [vmem:[#allocation50_spill] sm:$0xff] %v17169_v3  ;;  %v18931_v22 = vld [vmem:[#allocation26_spill] sm:$0xff] }
 0x8b2   : > { %v8020_v21 = vpop.f32.mrf.mxu0 }
 0x8b3   : > { %v7946_v12 = vpop.f32.mrf.mxu3 }
 0x8b4   : > { %v7947_v11 = vadd.f32 %v7946_v12, %v18926_v6 }
 0x8b5   : > { %8059 = vmatmul.bf16.gmra.mxu0 %v18927_v48 }
 0x8b6   : > { %v17164_v29 = vadd.f32 %v8015_v52, %v7947_v11  ;;  %8819 = vmatmul.bf16.gmra.mxu1 %v18814_v46  ;;  %v17176_v6 = vpop.f32.mrf.mxu2  ;;  %v17178_v11 = vpop.f32.mrf.mxu1  ;;  %v18935_v46 = vld [vmem:[#allocation145_spill] sm:$0xff] }
 0x8b7   : > { %18933 = vst [vmem:[#allocation118_spill] sm:$0xff] %v17176_v6 }
 0x8b8   : > { %18934 = vst [vmem:[#allocation122_spill] sm:$0xff] %v17178_v11 }
 0x8ba   : > { %v8022_v35 = vpop.f32.mrf.mxu0 }
 0x8bb   : > { %v7948_v13 = vpop.f32.mrf.mxu3  ;;  %8893 = vmatmul.bf16.gmra.mxu2 %v18930_v0 }
 0x8bc   : > { %v7949_v51 = vadd.f32 %v7948_v13, %v18931_v22  ;;  %v18938_v22 = vld [vmem:[#allocation92_spill] sm:$0xff] }
 0x8be   : > { %v17173_v19 = vadd.f32 %v8017_v61, %v7949_v51  ;;  %v18937_v61 = vld [vmem:[#allocation102_spill] sm:$0xff]  ;;  %v18939_v51 = vld [vmem:[#allocation105_spill] sm:$0xff]  ;;  %v17189_v36 = vpop.f32.mrf.mxu2  ;;  %v17191_v11 = vpop.f32.mrf.mxu1 }
 0x8bf   : > { %v18940_v62 = vshll.u32 %v18939_v51, 16  ;;  %18941 = vst [vmem:[#allocation35_spill] sm:$0xff] %v17189_v36 }
 0x8c0   : > { %7990 = vmatmul.bf16.gmra.mxu3 %v18932_v20  ;;  %18942 = vst [vmem:[#allocation120_spill] sm:$0xff] %v17191_v11 }
 0x8c1   : > { %v7457_v6 = vrot.slane %v18940_v62, 1 }
 0x8c2   : > { %v8025_v12 = vpop.f32.mrf.mxu0 }
 0x8c3   : > { %v7951_v52 = vpop.f32.mrf.mxu3 }
 0x8c4   : > { %v7952_v48 = vadd.f32 %v7951_v52, %v18935_v46 }
 0x8c5   : > { %8064 = vmatmul.bf16.gmra.mxu0 %v18936_v47  ;;  %v18943_v47 = vld [vmem:[#allocation110_spill] sm:$0xff] }
 0x8c6   : > { %v17182_v3 = vadd.f32 %v8020_v21, %v7952_v48  ;;  %8824 = vmatmul.bf16.gmra.mxu1 %v18828_v14  ;;  %v18944_v21 = vshll.u32 %v18943_v47, 16  ;;  %v18945_v48 = vld [vmem:[#allocation100_spill] sm:$0xff]  ;;  %v18946_v14 = vshrl.u32 %v18939_v51, 16 }
 0x8c8   : > { %v7459_v46 = vrot.slane %v18944_v21, 1  ;;  %v7458_v40 = vor.u32 %v7457_v6, %v18946_v14  ;;  %v17208_v21 = vpop.f32.mrf.mxu1 }
 0x8c9   : > { %18951 = vst [vmem:[#allocation80_spill] sm:$0xff] %v17208_v21 }
 0x8ca   : > { %v8027_v32 = vpop.f32.mrf.mxu0 }
 0x8cb   : > { %v7953_v13 = vpop.f32.mrf.mxu3  ;;  %8898 = vmatmul.bf16.gmra.mxu2 %v18937_v61 }
 0x8cc   : > { %v7954_v20 = vadd.f32 %v7953_v13, %v18938_v22  ;;  %v7460_v13 = vsel %vm757_vm3, %v7458_v40, %v7459_v46  ;;  %v18953_v40 = vld [vmem:[#allocation18_spill] sm:$0xff] }
 0x8cd   : > { %v8492_v36 = vunpack.c.l.b16 %v7460_v13 }
 0x8ce   : > { %v17193_v52 = vadd.f32 %v8022_v35, %v7954_v20  ;;  %v18949_v35 = vld [vmem:[#allocation101_spill] sm:$0xff]  ;;  %v17206_v20 = vpop.f32.mrf.mxu2 }
 0x8cf   : > { %18950 = vst [vmem:[#allocation61_spill] sm:$0xff] %v17206_v20  ;;  %v11223_v20 = vld [vmem:[#allocation2 + $0x80] sm:$0xf] }
 0x8d0   : > { %7995 = vmatmul.bf16.gmra.mxu3 %v18945_v48  ;;  %v18952_v48 = vld [vmem:[#allocation104_spill] sm:$0xff] }
 0x8d1   : > { %v8550_v51 = vpack.c.b16 %v8492_v36, %v18952_v48 }
 0x8d2   : > { %v8030_v61 = vpop.f32.mrf.mxu0 }
 0x8d3   : > { %v7956_v22 = vpop.f32.mrf.mxu3 }
 0x8d4   : > { %v7957_v62 = vadd.f32 %v7956_v22, %v18947_v50 }
 0x8d5   : > { %8715 = vmatmul.bf16.vlgmr.msra.gmra.mxu0 %v18948_v8  ;;  %v18954_v8 = vshrl.u32 %v18943_v47, 16  ;;  %v18962_v47 = vld [vmem:[#allocation63_spill] sm:$0xff] }
 0x8d6   : > { %v17203_v11 = vadd.f32 %v8025_v12, %v7957_v62  ;;  %8829 = vmatmul.bf16.gmra.mxu1 %v18949_v35  ;;  %v18955_v12 = vld [vmem:[#allocation74_spill] sm:$0xff]  ;;  %v17217_v22 = vpop.f32.mrf.mxu2  ;;  %v17219_v62 = vpop.f32.mrf.mxu1 }
 0x8d7   : > { %v7461_v50 = vor.u32 %v7459_v46, %v18954_v8  ;;  %18956 = vst [vmem:[#allocation125_spill] sm:$0xff] %v17217_v22 }
 0x8d8   : > { %18957 = vst [vmem:[#allocation48_spill] sm:$0xff] %v17219_v62 }
 0x8d9   : > { %v7481_v36 = vsel %vm11560_vm6, %v7461_v50, %v11223_v20 }
 0x8da   : > { %v8032_v6 = vpop.f32.mrf.mxu0  ;;  %v8496_v46 = vunpack.c.l.b16 %v7481_v36  ;;  %v18967_v36 = vld [vmem:[#allocation64_spill] sm:$0xff] }
 0x8db   : > { %v7958_v14 = vpop.f32.mrf.mxu3  ;;  %8903 = vmatmul.bf16.gmra.mxu2 %v8550_v51  ;;  %v18958_v51 = vld [vmem:[#allocation66_spill] sm:$0xff] }
 0x8dc   : > { %v7959_v2 = vadd.f32 %v7958_v14, %v18953_v40  ;;  %v18959_v14 = vld [vmem:[#allocation56_spill] sm:$0xff] }
 0x8de   : > { %v17212_v9 = vadd.f32 %v8027_v32, %v7959_v2  ;;  %v18960_v2 = vld [vmem:[#allocation58_spill] sm:$0xff]  ;;  %v17231_v23 = vpop.f32.mrf.mxu2  ;;  %v17233_v50 = vpop.f32.mrf.mxu1 }
 0x8df   : > { %v18961_v32 = vunpack.c.l.b16 %v18960_v2  ;;  %18963 = vst [vmem:[#allocation82_spill] sm:$0xff] %v17231_v23  ;;  %v18972_v23 = vld [vmem:[#allocation43_spill] sm:$0xff] }
 0x8e0   : > { %8428 = vmatmul.bf16.vlgmr.msra.gmra.mxu3 %v18955_v12  ;;  %v8494_v12 = vunpack.c.h.b16 %v7460_v13  ;;  %18964 = vst [vmem:[#allocation40_spill] sm:$0xff] %v17233_v50 }
 0x8e1   : > { %v8549_v40 = vpack.c.b16 %v18961_v32, %v18959_v14  ;;  %v18966_v14 = vld [vmem:[#allocation53_spill] sm:$0xff] }
 0x8e2   : > { %v8035_v35 = vpop.f32.mrf.mxu0  ;;  %v8553_v22 = vpack.c.b16 %v8496_v46, %v8494_v12  ;;  %v18970_v12 = vld [vmem:[#allocation45_spill] sm:$0xff] }
 0x8e3   : > { %v7961_v48 = vpop.f32.mrf.mxu3 }
 0x8e4   : > { %v7962_v21 = vadd.f32 %v7961_v48, %v18958_v51  ;;  %v18965_v48 = vld [vmem:[#allocation49_spill] sm:$0xff] }
 0x8e5   : > { %8720 = vmatmul.bf16.gmra.mxu0 %v18962_v47  ;;  %v18969_v47 = vld [vmem:[#allocation70_spill] sm:$0xff] }
 0x8e6   : > { %v17228_v8 = vadd.f32 %v8030_v61, %v7962_v21  ;;  %8834 = vmatmul.bf16.gmra.mxu1 %v8549_v40  ;;  %v18968_v61 = vsel %vm11560_vm6, %v18966_v14, %v18967_v36  ;;  %v7507_v14 = vunpack.c.h.b16 %v18809_v7 }
 0x8e7   : > { %v7503_v21 = vunpack.c.l.b16 %v18968_v61 }
 0x8e8   : > { %v8077_v61 = vpack.c.b16 %v16900_v16, %v7507_v14  ;;  %v18979_v16 = vld [vmem:[#allocation57_spill] sm:$0xff] }
 0x8e9   : > { %v8074_v13 = vpack.c.b16 %v7505_v45, %v7503_v21 }
 0x8ea   : > { %v8037_v62 = vpop.f32.mrf.mxu0 }
 0x8eb   : > { %v7963_v20 = vpop.f32.mrf.mxu3  ;;  %8908 = vmatmul.bf16.gmra.mxu2 %v8553_v22  ;;  %v18971_v22 = vunpack.c.l.b16 %v18970_v12 }
 0x8ec   : > { %v7964_v51 = vadd.f32 %v7963_v20, %v18965_v48  ;;  %v17248_v20 = vpop.f32.mrf.mxu1 }
 0x8ed   : > { %v8552_v50 = vpack.c.b16 %v18972_v23, %v18971_v22  ;;  %18974 = vst [vmem:[#allocation28_spill] sm:$0xff] %v17248_v20 }
 0x8ee   : > { %v17241_v2 = vadd.f32 %v8032_v6, %v7964_v51  ;;  %v18975_v51 = vld [vmem:[#allocation68_spill] sm:$0xff] }
 0x8f0   : > { %8433 = vmatmul.bf16.gmra.mxu3 %v8074_v13  ;;  %v18976_v13 = vld [vmem:[#allocation13_spill] sm:$0xff] }
 0x8f2   : > { %v8040_v32 = vpop.f32.mrf.mxu0 }
 0x8f3   : > { %v7966_v40 = vpop.f32.mrf.mxu3 }
 0x8f4   : > { %v7967_v46 = vadd.f32 %v7966_v40, %v18969_v47  ;;  %v18977_v40 = vld [vmem:[#allocation124_spill] sm:$0xff] }
 0x8f5   : > { %8725 = vmatmul.bf16.gmra.mxu0 %v18973_v33 }
 0x8f6   : > { %v17250_v26 = vadd.f32 %v8035_v35, %v7967_v46  ;;  %8839 = vmatmul.bf16.gmra.mxu1 %v8552_v50  ;;  %v18978_v46 = vld [vmem:[#allocation27_spill] sm:$0xff] }
 0x8fa   : > { %v8042_v48 = vpop.f32.mrf.mxu0 }
 0x8fb   : > { %v7968_v6 = vpop.f32.mrf.mxu3 }
 0x8fc   : > { %v7969_v45 = vadd.f32 %v7968_v6, %v18975_v51 }
 0x8fe   : > { %v17254_v36 = vadd.f32 %v8037_v62, %v7969_v45 }
 0x900   : > { %8438 = vmatmul.bf16.gmra.mxu3 %v8077_v61 }
 0x902   : > { %v8045_v21 = vpop.f32.mrf.mxu0 }
 0x903   : > { %v7971_v23 = vpop.f32.mrf.mxu3 }
 0x904   : > { %v7972_v33 = vadd.f32 %v7971_v23, %v18976_v13 }
 0x905   : > { %8730 = vmatmul.bf16.gmra.mxu0 %v18977_v40 }
 0x906   : > { %v17259_v35 = vadd.f32 %v8040_v32, %v7972_v33  ;;  %v18980_v32 = vld [vmem:[#allocation33_spill] sm:$0xff]  ;;  %v18981_v33 = vld [vmem:[#allocation10_spill] sm:$0xff] }
 0x90a   : > { %v8047_v50 = vpop.f32.mrf.mxu0 }
 0x90b   : > { %v7973_v47 = vpop.f32.mrf.mxu3 }
 0x90c   : > { %v7974_v12 = vadd.f32 %v7973_v47, %v18978_v46 }
 0x90e   : > { %v17262_v22 = vadd.f32 %v8042_v48, %v7974_v12 }
 0x910   : > { %8443 = vmatmul.bf16.gmra.mxu3 %v18816_v42 }
 0x912   : > { %v8050_v7 = vpop.f32.mrf.mxu0 }
 0x913   : > { %v7976_v62 = vpop.f32.mrf.mxu3 }
 0x914   : > { %v7977_v6 = vadd.f32 %v7976_v62, %v18979_v16 }
 0x915   : > { %8735 = vmatmul.bf16.gmra.mxu0 %v16776_v37 }
 0x916   : > { %v17267_v51 = vadd.f32 %v8045_v21, %v7977_v6  ;;  %v18982_v21 = vld [vmem:[#allocation88_spill] sm:$0xff] }
 0x91a   : > { %v8052_v45 = vpop.f32.mrf.mxu0 }
 0x91b   : > { %v7978_v14 = vpop.f32.mrf.mxu3 }
 0x91c   : > { %v7979_v61 = vadd.f32 %v7978_v14, %v18980_v32  ;;  %v8854_v14 = vpop.f32.mrf.mxu2 }
 0x91e   : > { %v17270_v23 = vadd.f32 %v8047_v50, %v7979_v61  ;;  %v8785_v50 = vpop.f32.mrf.mxu1 }
 0x920   : > { %8448 = vmatmul.bf16.gmra.mxu3 %v18848_v59  ;;  %v18983_v59 = vld [vmem:[#allocation83_spill] sm:$0xff] }
 0x922   : > { %v8055_v48 = vpop.f32.mrf.mxu0 }
 0x923   : > { %v7981_v13 = vpop.f32.mrf.mxu3 }
 0x924   : > { %v7982_v42 = vadd.f32 %v7981_v13, %v18981_v33  ;;  %v18984_v13 = vld [vmem:[#allocation59_spill] sm:$0xff] }
 0x925   : > { %8740 = vmatmul.bf16.gmra.mxu0 %v16807_v5 }
 0x926   : > { %v17275_v40 = vadd.f32 %v8050_v7, %v7982_v42  ;;  %v8787_v7 = vpop.f32.mrf.mxu1 }
 0x92a   : > { %v8057_v47 = vpop.f32.mrf.mxu0 }
 0x92b   : > { %v7983_v37 = vpop.f32.mrf.mxu3 }
 0x92c   : > { %v7984_v46 = vadd.f32 %v7983_v37, %v18982_v21  ;;  %v18985_v21 = vld [vmem:[#allocation146_spill] sm:$0xff] }
 0x92e   : > { %v17278_v12 = vadd.f32 %v8052_v45, %v7984_v46  ;;  %v8856_v45 = vpop.f32.mrf.mxu2 }
 0x930   : > { %8453 = vmatmul.bf16.gmra.mxu3 %v18858_v10 }
 0x932   : > { %v8060_v62 = vpop.f32.mrf.mxu0 }
 0x933   : > { %v7986_v16 = vpop.f32.mrf.mxu3 }
 0x934   : > { %v7987_v6 = vadd.f32 %v7986_v16, %v18983_v59  ;;  %v8790_v16 = vpop.f32.mrf.mxu1 }
 0x935   : > { %8745 = vmatmul.bf16.gmra.mxu0 %v16350_v56 }
 0x936   : > { %v17283_v32 = vadd.f32 %v8055_v48, %v7987_v6  ;;  %v17293_v48 = vpop.f32.mrf.mxu2 }
 0x93a   : > { %v8062_v5 = vpop.f32.mrf.mxu0 }
 0x93b   : > { %v7988_v61 = vpop.f32.mrf.mxu3 }
 0x93c   : > { %v7989_v33 = vadd.f32 %v7988_v61, %v18984_v13 }
 0x93e   : > { %v17286_v42 = vadd.f32 %v8057_v47, %v7989_v33  ;;  %v18986_v47 = vld [vmem:[#allocation47_spill] sm:$0xff] }
 0x940   : > { %8458 = vmatmul.bf16.gmra.mxu3 %v18850_v31  ;;  %v17298_v31 = vpop.f32.mrf.mxu1 }
 0x942   : > { %v8065_v10 = vpop.f32.mrf.mxu0 }
 0x943   : > { %v7991_v37 = vpop.f32.mrf.mxu3 }
 0x944   : > { %v7992_v46 = vadd.f32 %v7991_v37, %v18985_v21  ;;  %v17301_v37 = vpop.f32.mrf.mxu2 }
 0x945   : > { %8750 = vmatmul.bf16.gmra.mxu0 %v16917_v43 }
 0x946   : > { %v17291_v56 = vadd.f32 %v8060_v62, %v7992_v46  ;;  %v18987_v62 = vld [vmem:[#allocation111_spill] sm:$0xff] }
 0x948   : > { %v17308_v20 = vpop.f32.mrf.mxu1 }
 0x94a   : > { %v8067_v59 = vpop.f32.mrf.mxu0 }
 0x94b   : > { %v7993_v6 = vpop.f32.mrf.mxu3 }
 0x94c   : > { %v7994_v61 = vadd.f32 %v7993_v6, %v18986_v47 }
 0x94e   : > { %v17296_v13 = vadd.f32 %v8062_v5, %v7994_v61  ;;  %v17312_v61 = vpop.f32.mrf.mxu2 }
 0x950   : > { %8463 = vmatmul.bf16.gmra.mxu3 %v18883_v34 }
 0x952   : > { %v8716_v33 = vpop.f32.mrf.mxu0 }
 0x953   : > { %v7996_v43 = vpop.f32.mrf.mxu3 }
 0x954   : > { %v7997_v21 = vadd.f32 %v7996_v43, %v18987_v62  ;;  %v8292_v43 = vadd.f32 %v16841_v44, %v17144_v25  ;;  %v17331_v44 = vld [vmem:[%s17547_s8] ss:$0 sm:$0xff]  ;;  %v8294_v25 = vadd.f32 %v16870_v15, %v17152_v53 }
 0x955   : > { %8755 = vmatmul.bf16.gmra.mxu0 %v16952_v41  ;;  %v8786_v41 = vadd.f32 %v8785_v50, %v8716_v33  ;;  %v18990_v33 = vld [vmem:[#allocation29_spill] sm:$0xff] }
 0x956   : > { %v17305_v46 = vadd.f32 %v8065_v10, %v7997_v21  ;;  %v8361_v62 = vadd.f32 %v16812_v4, %v8292_v43  ;;  %v17321_v21 = vpop.f32.mrf.mxu1  ;;  %v17336_v50 = vpop.f32.mrf.mxu2 }
 0x958   : > { %18988 = vst [vmem:[#allocation99_spill] sm:$0xff] %v17305_v46 }
 0x95a   : > { %v8718_v5 = vpop.f32.mrf.mxu0 }
 0x95b   : > { %v7998_v6 = vpop.f32.mrf.mxu3  ;;  %v8788_v43 = vadd.f32 %v8787_v7, %v8718_v5  ;;  %v8297_v5 = vadd.f32 %v16913_v28, %v17164_v29  ;;  %v18993_v29 = vld [vmem:[#allocation109_spill] sm:$0xff] }
 0x95c   : > { %v7999_v47 = vadd.f32 %v7998_v6, %v16786_v57  ;;  %v17326_v57 = vld [vmem:[%s17545_s6] ss:$0 sm:$0xff] }
 0x95d   : > { %v8857_v15 = vadd.f32 %v8856_v45, %v8788_v43  ;;  %v18992_v43 = vld [vmem:[#allocation128_spill] sm:$0xff] }
 0x95e   : > { %v17314_v34 = vadd.f32 %v8067_v59, %v7999_v47  ;;  %v8855_v59 = vadd.f32 %v8854_v14, %v8786_v41  ;;  %v7108_v47 = vadd.f32 %v17326_v57, %v18990_v33 }
 0x960   : > { %8468 = vmatmul.bf16.gmra.mxu3 %v18899_v1  ;;  %v18989_v1 = vld [vmem:[#allocation106_spill] sm:$0xff] }
 0x962   : > { %v8721_v10 = vpop.f32.mrf.mxu0 }
 0x963   : > { %v8429_v46 = vpop.f32.mrf.mxu3  ;;  %v8791_v33 = vadd.f32 %v8790_v16, %v8721_v10  ;;  %v8299_v16 = vadd.f32 %v16935_v63, %v17173_v19  ;;  %v8302_v19 = vadd.f32 %v16959_v38, %v17182_v3 }
 0x964   : > { %v8430_v6 = vadd.f32 %v8429_v46, %v8361_v62  ;;  %v8363_v62 = vadd.f32 %v16839_v49, %v8294_v25  ;;  %v17356_v49 = vpop.f32.mrf.mxu2 }
 0x965   : > { %8760 = vmatmul.bf16.gmra.mxu0 %v18989_v1  ;;  %v18991_v1 = vld [vmem:[#allocation72_spill] sm:$0xff] }
 0x966   : > { %v8914_v4 = vadd.f32 %v8855_v59, %v8430_v6  ;;  %v17348_v6 = vpop.f32.mrf.mxu1 }
 0x968   : > { %v8942_v14 = vadd.f32 %v17331_v44, %v8914_v4  ;;  %v7109_v4 = vadd.f32 %v17326_v57, %v18991_v1 }
 0x96a   : > { %v8966_v46 = vadd.f32 %v8942_v14, %v7108_v47  ;;  %v8723_v41 = vpop.f32.mrf.mxu0  ;;  %v8366_v14 = vadd.f32 %v18992_v43, %v8297_v5 }
 0x96b   : > { %v8431_v59 = vpop.f32.mrf.mxu3 }
 0x96c   : > { %8990 = vst [vmem:[%s17344_s28] sm:$0xff] %v8966_v46  ;;  %v8432_v53 = vadd.f32 %v8431_v59, %v8363_v62  ;;  %v8860_v62 = vadd.f32 %v17293_v48, %v8791_v33  ;;  %v18995_v48 = vld [vmem:[#allocation20_spill] sm:$0xff]  ;;  %v8871_v33 = vpop.f32.mrf.mxu2 }
 0x96e   : > { %v8915_v7 = vadd.f32 %v8857_v15, %v8432_v53  ;;  %v8802_v10 = vpop.f32.mrf.mxu1  ;;  %v8793_v53 = vadd.f32 %v17298_v31, %v8723_v41 }
 0x970   : > { %v8943_v47 = vadd.f32 %v17331_v44, %v8915_v7  ;;  %8473 = vmatmul.bf16.gmra.mxu3 %v18887_v55  ;;  %v18994_v55 = vld [vmem:[#allocation87_spill] sm:$0xff] }
 0x971   : > { %v7110_v15 = vadd.f32 %v17326_v57, %v18994_v55 }
 0x972   : > { %v8967_v45 = vadd.f32 %v8943_v47, %v7109_v4  ;;  %v8726_v25 = vpop.f32.mrf.mxu0  ;;  %v8368_v4 = vadd.f32 %v18995_v48, %v8299_v16 }
 0x973   : > { %v8434_v46 = vpop.f32.mrf.mxu3  ;;  %v8796_v41 = vadd.f32 %v17308_v20, %v8726_v25  ;;  %v8304_v20 = vadd.f32 %v16978_v58, %v17193_v52  ;;  %v18999_v25 = vld [vmem:[#allocation135_spill] sm:$0xff]  ;;  %v8307_v58 = vadd.f32 %v16994_v39, %v17203_v11 }
 0x974   : > { %8991 = vst [vmem:[%s17344_s28 + $0x8] sm:$0xff] %v8967_v45  ;;  %v8435_v28 = vadd.f32 %v8434_v46, %v8366_v14  ;;  %v8862_v45 = vadd.f32 %v17301_v37, %v8793_v53  ;;  %v18996_v14 = vld [vmem:[#allocation76_spill] sm:$0xff]  ;;  %v8874_v3 = vpop.f32.mrf.mxu2 }
 0x975   : > { %8765 = vmatmul.bf16.gmra.mxu0 %v18993_v29  ;;  %v7111_v31 = vadd.f32 %v17326_v57, %v18996_v14  ;;  %v8865_v55 = vadd.f32 %v17312_v61, %v8796_v41  ;;  %v8373_v61 = vadd.f32 %v16957_v27, %v8304_v20  ;;  %v19000_v14 = vld [vmem:[#allocation67_spill] sm:$0xff] }
 0x976   : > { %v8916_v59 = vadd.f32 %v8860_v62, %v8435_v28  ;;  %v8805_v62 = vpop.f32.mrf.mxu1 }
 0x978   : > { %v8944_v7 = vadd.f32 %v17331_v44, %v8916_v59  ;;  %v18997_v59 = vld [vmem:[#allocation46_spill] sm:$0xff] }
 0x979   : > { %v8371_v37 = vadd.f32 %v18997_v59, %v8302_v19 }
 0x97a   : > { %v8968_v5 = vadd.f32 %v8944_v7, %v7110_v15  ;;  %v8728_v1 = vpop.f32.mrf.mxu0  ;;  %v18998_v15 = vld [vmem:[#allocation112_spill] sm:$0xff] }
 0x97b   : > { %v8436_v47 = vpop.f32.mrf.mxu3  ;;  %v8798_v7 = vadd.f32 %v17321_v21, %v8728_v1  ;;  %v7113_v21 = vadd.f32 %v17326_v57, %v19000_v14 }
 0x97c   : > { %8992 = vst [vmem:[%s17344_s28 + $0x10] sm:$0xff] %v8968_v5  ;;  %v8437_v43 = vadd.f32 %v8436_v47, %v8368_v4  ;;  %v8876_v52 = vpop.f32.mrf.mxu2 }
 0x97e   : > { %v8917_v63 = vadd.f32 %v8862_v45, %v8437_v43  ;;  %v8807_v47 = vpop.f32.mrf.mxu1  ;;  %v8867_v43 = vadd.f32 %v17336_v50, %v8798_v7  ;;  %v8376_v50 = vadd.f32 %v16974_v54, %v8307_v58 }
 0x980   : > { %v8945_v46 = vadd.f32 %v17331_v44, %v8917_v63  ;;  %8478 = vmatmul.bf16.gmra.mxu3 %v18921_v24  ;;  %v7112_v24 = vadd.f32 %v17326_v57, %v18999_v25 }
 0x982   : > { %v8969_v28 = vadd.f32 %v8945_v46, %v7111_v31  ;;  %v8731_v29 = vpop.f32.mrf.mxu0 }
 0x983   : > { %v8439_v16 = vpop.f32.mrf.mxu3  ;;  %v8801_v1 = vadd.f32 %v17348_v6, %v8731_v29  ;;  %v19001_v6 = vld [vmem:[#allocation114_spill] sm:$0xff] }
 0x984   : > { %8993 = vst [vmem:[%s17344_s28 + $0x18] sm:$0xff] %v8969_v28  ;;  %v8440_v38 = vadd.f32 %v8439_v16, %v8371_v37  ;;  %v8309_v37 = vadd.f32 %v17010_v17, %v17212_v9  ;;  %v7114_v29 = vadd.f32 %v17326_v57, %v19001_v6  ;;  %v8312_v17 = vadd.f32 %v17025_v60, %v17228_v8  ;;  %v19003_v60 = vld [vmem:[#allocation23_spill] sm:$0xff] }
 0x985   : > { %8770 = vmatmul.bf16.gmra.mxu0 %v18998_v15  ;;  %v8870_v28 = vadd.f32 %v17356_v49, %v8801_v1  ;;  %v8314_v8 = vadd.f32 %v19003_v60, %v17241_v2  ;;  %v19006_v2 = vld [vmem:[#allocation95_spill] sm:$0xff] }
 0x986   : > { %v8918_v53 = vadd.f32 %v8865_v55, %v8440_v38  ;;  %v8810_v11 = vpop.f32.mrf.mxu1  ;;  %v8879_v55 = vpop.f32.mrf.mxu2  ;;  %v8378_v15 = vadd.f32 %v16991_v18, %v8309_v37  ;;  %v8381_v18 = vadd.f32 %v17008_v30, %v8312_v17  ;;  %v19005_v30 = vld [vmem:[#allocation24_spill] sm:$0xff]  ;;  %v19010_v17 = vld [vmem:[#allocation5_spill] sm:$0xff]  ;;  %v19013_v60 = vld [vmem:[#allocation15_spill] sm:$0xff] }
 0x988   : > { %v8946_v5 = vadd.f32 %v17331_v44, %v8918_v53 }
 0x98a   : > { %v8970_v48 = vadd.f32 %v8946_v5, %v7112_v24  ;;  %v8733_v4 = vpop.f32.mrf.mxu0  ;;  %v19002_v24 = vld [vmem:[#allocation71_spill] sm:$0xff] }
 0x98b   : > { %v8441_v45 = vpop.f32.mrf.mxu3  ;;  %v8803_v16 = vadd.f32 %v8802_v10, %v8733_v4  ;;  %v7115_v10 = vadd.f32 %v17326_v57, %v19002_v24 }
 0x98c   : > { %8994 = vst [vmem:[%s17344_s28 + $0x20] sm:$0xff] %v8970_v48  ;;  %v8442_v63 = vadd.f32 %v8441_v45, %v8373_v61 }
 0x98d   : > { %v8872_v49 = vadd.f32 %v8871_v33, %v8803_v16 }
 0x98e   : > { %v8919_v19 = vadd.f32 %v8867_v43, %v8442_v63  ;;  %v8812_v9 = vpop.f32.mrf.mxu1  ;;  %v8881_v61 = vpop.f32.mrf.mxu2 }
 0x990   : > { %v8947_v31 = vadd.f32 %v17331_v44, %v8919_v19  ;;  %8483 = vmatmul.bf16.gmra.mxu3 %v18930_v0  ;;  %v19004_v19 = vld [vmem:[#allocation115_spill] sm:$0xff] }
 0x991   : > { %v7116_v58 = vadd.f32 %v17326_v57, %v19004_v19 }
 0x992   : > { %v8971_v27 = vadd.f32 %v8947_v31, %v7113_v21  ;;  %v8736_v41 = vpop.f32.mrf.mxu0 }
 0x993   : > { %v8444_v46 = vpop.f32.mrf.mxu3  ;;  %v8806_v7 = vadd.f32 %v8805_v62, %v8736_v41 }
 0x994   : > { %8995 = vst [vmem:[%s17344_s28 + $0x28] sm:$0xff] %v8971_v27  ;;  %v8445_v39 = vadd.f32 %v8444_v46, %v8376_v50  ;;  %v8383_v27 = vadd.f32 %v19005_v30, %v8314_v8  ;;  %v7119_v8 = vadd.f32 %v17326_v57, %v19013_v60 }
 0x995   : > { %v8875_v45 = vadd.f32 %v8874_v3, %v8806_v7 }
 0x996   : > { %v8920_v59 = vadd.f32 %v8870_v28, %v8445_v39  ;;  %v8815_v21 = vpop.f32.mrf.mxu1  ;;  %v8884_v46 = vpop.f32.mrf.mxu2  ;;  %v8317_v39 = vadd.f32 %v19006_v2, %v17250_v26 }
 0x998   : > { %v8948_v0 = vadd.f32 %v17331_v44, %v8920_v59  ;;  %v19007_v59 = vld [vmem:[#allocation108_spill] sm:$0xff] }
 0x99a   : > { %v8972_v38 = vadd.f32 %v8948_v0, %v7114_v29  ;;  %v8738_v54 = vpop.f32.mrf.mxu0  ;;  %v19008_v0 = vld [vmem:[#allocation37_spill] sm:$0xff] }
 0x99b   : > { %v8446_v53 = vpop.f32.mrf.mxu3  ;;  %v8808_v62 = vadd.f32 %v8807_v47, %v8738_v54  ;;  %v7117_v47 = vadd.f32 %v17326_v57, %v19007_v59 }
 0x99c   : > { %8996 = vst [vmem:[%s17344_s28 + $0x30] sm:$0xff] %v8972_v38  ;;  %v8447_v20 = vadd.f32 %v8446_v53, %v8378_v15  ;;  %v8386_v38 = vadd.f32 %v19008_v0, %v8317_v39 }
 0x99d   : > { %v8877_v3 = vadd.f32 %v8876_v52, %v8808_v62 }
 0x99e   : > { %v8921_v25 = vadd.f32 %v8872_v49, %v8447_v20  ;;  %v8817_v54 = vpop.f32.mrf.mxu1  ;;  %v19009_v20 = vld [vmem:[#allocation75_spill] sm:$0xff] }
 0x99f   : > { %v8319_v26 = vadd.f32 %v19009_v20, %v17254_v36  ;;  %v19012_v36 = vld [vmem:[#allocation90_spill] sm:$0xff] }
 0x9a0   : > { %v8949_v5 = vadd.f32 %v17331_v44, %v8921_v25  ;;  %v8886_v25 = vpop.f32.mrf.mxu2 }
 0x9a2   : > { %v8973_v48 = vadd.f32 %v8949_v5, %v7115_v10  ;;  %v8741_v4 = vpop.f32.mrf.mxu0 }
 0x9a3   : > { %v8449_v33 = vpop.f32.mrf.mxu3  ;;  %v8811_v37 = vadd.f32 %v8810_v11, %v8741_v4  ;;  %v7118_v11 = vadd.f32 %v17326_v57, %v19010_v17 }
 0x9a4   : > { %8997 = vst [vmem:[%s17344_s28 + $0x38] sm:$0xff] %v8973_v48  ;;  %v8450_v43 = vadd.f32 %v8449_v33, %v8381_v18  ;;  %v19011_v48 = vld [vmem:[#allocation19_spill] sm:$0xff] }
 0x9a5   : > { %v8880_v15 = vadd.f32 %v8879_v55, %v8811_v37  ;;  %v8388_v4 = vadd.f32 %v19011_v48, %v8319_v26  ;;  %v19017_v37 = vld [vmem:[#allocation62_spill] sm:$0xff] }
 0x9a6   : > { %v8922_v63 = vadd.f32 %v8875_v45, %v8450_v43  ;;  %v8820_v45 = vpop.f32.mrf.mxu1 }
 0x9a8   : > { %v8950_v14 = vadd.f32 %v17331_v44, %v8922_v63  ;;  %v8322_v63 = vadd.f32 %v19012_v36, %v17259_v35 }
 0x9aa   : > { %v8974_v1 = vadd.f32 %v8950_v14, %v7116_v58  ;;  %v8743_v31 = vpop.f32.mrf.mxu0  ;;  %v8889_v58 = vpop.f32.mrf.mxu2 }
 0x9ab   : > { %v8451_v41 = vpop.f32.mrf.mxu3  ;;  %v8813_v24 = vadd.f32 %v8812_v9, %v8743_v31 }
 0x9ac   : > { %8998 = vst [vmem:[%s17344_s28 + $0x40] sm:$0xff] %v8974_v1  ;;  %v8452_v50 = vadd.f32 %v8451_v41, %v8383_v27  ;;  %v19014_v1 = vld [vmem:[#allocation81_spill] sm:$0xff] }
 0x9ad   : > { %v8882_v55 = vadd.f32 %v8881_v61, %v8813_v24  ;;  %v8391_v31 = vadd.f32 %v19014_v1, %v8322_v63  ;;  %v19023_v63 = vld [vmem:[#allocation60_spill] sm:$0xff] }
 0x9ae   : > { %v8923_v28 = vadd.f32 %v8877_v3, %v8452_v50  ;;  %v19015_v3 = vld [vmem:[#allocation7_spill] sm:$0xff]  ;;  %v8822_v50 = vpop.f32.mrf.mxu1 }
 0x9af   : > { %v8324_v35 = vadd.f32 %v19015_v3, %v17262_v22  ;;  %v19018_v22 = vld [vmem:[#allocation16_spill] sm:$0xff]  ;;  %v19026_v3 = vld [vmem:[#allocation6_spill] sm:$0xff] }
 0x9b0   : > { %v8951_v6 = vadd.f32 %v17331_v44, %v8923_v28  ;;  %v19016_v28 = vld [vmem:[#allocation4_spill] sm:$0xff] }
 0x9b2   : > { %v8975_v29 = vadd.f32 %v8951_v6, %v7117_v47  ;;  %v8746_v16 = vpop.f32.mrf.mxu0  ;;  %v8393_v6 = vadd.f32 %v19017_v37, %v8324_v35  ;;  %v19028_v37 = vld [vmem:[#allocation69_spill] sm:$0xff] }
 0x9b3   : > { %v8454_v52 = vpop.f32.mrf.mxu3  ;;  %v8816_v9 = vadd.f32 %v8815_v21, %v8746_v16  ;;  %v7120_v21 = vadd.f32 %v17326_v57, %v19016_v28 }
 0x9b4   : > { %8999 = vst [vmem:[%s17344_s28 + $0x48] sm:$0xff] %v8975_v29  ;;  %v8455_v53 = vadd.f32 %v8454_v52, %v8386_v38  ;;  %v8891_v29 = vpop.f32.mrf.mxu2  ;;  %v8327_v52 = vadd.f32 %v19018_v22, %v17267_v51  ;;  %v19021_v51 = vld [vmem:[#allocation117_spill] sm:$0xff] }
 0x9b5   : > { %v8885_v61 = vadd.f32 %v8884_v46, %v8816_v9 }
 0x9b6   : > { %v8924_v49 = vadd.f32 %v8880_v15, %v8455_v53  ;;  %v19019_v15 = vld [vmem:[#allocation113_spill] sm:$0xff]  ;;  %v8825_v20 = vpop.f32.mrf.mxu1 }
 0x9b7   : > { %v7121_v53 = vadd.f32 %v17326_v57, %v19019_v15 }
 0x9b8   : > { %v8952_v10 = vadd.f32 %v17331_v44, %v8924_v49 }
 0x9ba   : > { %v8976_v7 = vadd.f32 %v8952_v10, %v7118_v11  ;;  %v8748_v5 = vpop.f32.mrf.mxu0  ;;  %v19020_v11 = vld [vmem:[#allocation36_spill] sm:$0xff] }
 0x9bb   : > { %v8456_v18 = vpop.f32.mrf.mxu3  ;;  %v8818_v2 = vadd.f32 %v8817_v54, %v8748_v5  ;;  %v8396_v24 = vadd.f32 %v19020_v11, %v8327_v52 }
 0x9bc   : > { %9000 = vst [vmem:[%s17344_s28 + $0x50] sm:$0xff] %v8976_v7  ;;  %v8457_v33 = vadd.f32 %v8456_v18, %v8388_v4  ;;  %v8894_v5 = vpop.f32.mrf.mxu2  ;;  %v8329_v4 = vadd.f32 %v19021_v51, %v17270_v23  ;;  %v19022_v18 = vld [vmem:[#allocation79_spill] sm:$0xff] }
 0x9bd   : > { %v8887_v16 = vadd.f32 %v8886_v25, %v8818_v2 }
 0x9be   : > { %v8925_v43 = vadd.f32 %v8882_v55, %v8457_v33  ;;  %v7122_v55 = vadd.f32 %v17326_v57, %v19022_v18  ;;  %v8398_v60 = vadd.f32 %v19023_v63, %v8329_v4 }
 0x9c0   : > { %v8953_v19 = vadd.f32 %v17331_v44, %v8925_v43 }
 0x9c2   : > { %v8977_v62 = vadd.f32 %v8953_v19, %v7119_v8  ;;  %v8751_v14 = vpop.f32.mrf.mxu0  ;;  %v8827_v8 = vpop.f32.mrf.mxu1 }
 0x9c3   : > { %v8459_v30 = vpop.f32.mrf.mxu3  ;;  %v8821_v54 = vadd.f32 %v8820_v45, %v8751_v14  ;;  %v19024_v14 = vld [vmem:[#allocation17_spill] sm:$0xff] }
 0x9c4   : > { %9001 = vst [vmem:[%s17344_s28 + $0x58] sm:$0xff] %v8977_v62  ;;  %v8460_v27 = vadd.f32 %v8459_v30, %v8391_v31  ;;  %v8332_v23 = vadd.f32 %v19024_v14, %v17275_v40  ;;  %v8896_v1 = vpop.f32.mrf.mxu2  ;;  %v19025_v31 = vld [vmem:[#allocation9_spill] sm:$0xff]  ;;  %v19027_v40 = vld [vmem:[#allocation50_spill] sm:$0xff] }
 0x9c5   : > { %v8890_v25 = vadd.f32 %v8889_v58, %v8821_v54  ;;  %v7123_v30 = vadd.f32 %v17326_v57, %v19025_v31 }
 0x9c6   : > { %v8926_v41 = vadd.f32 %v8885_v61, %v8460_v27  ;;  %v8401_v35 = vadd.f32 %v19026_v3, %v8332_v23 }
 0x9c8   : > { %v8954_v39 = vadd.f32 %v17331_v44, %v8926_v41 }
 0x9ca   : > { %v8978_v59 = vadd.f32 %v8954_v39, %v7120_v21  ;;  %v8753_v47 = vpop.f32.mrf.mxu0  ;;  %v8830_v39 = vpop.f32.mrf.mxu1 }
 0x9cb   : > { %v8461_v46 = vpop.f32.mrf.mxu3  ;;  %v8823_v33 = vadd.f32 %v8822_v50, %v8753_v47  ;;  %v8334_v47 = vadd.f32 %v19027_v40, %v17278_v12 }
 0x9cc   : > { %9002 = vst [vmem:[%s17344_s28 + $0x60] sm:$0xff] %v8978_v59  ;;  %v8462_v0 = vadd.f32 %v8461_v46, %v8393_v6  ;;  %v7124_v6 = vadd.f32 %v17326_v57, %v19028_v37  ;;  %v19039_v37 = vld [vmem:[#allocation48_spill] sm:$0xff] }
 0x9cd   : > { %v8892_v19 = vadd.f32 %v8891_v29, %v8823_v33  ;;  %v19033_v33 = vld [vmem:[#allocation120_spill] sm:$0xff] }
 0x9ce   : > { %v8927_v38 = vadd.f32 %v8887_v16, %v8462_v0  ;;  %v8899_v16 = vpop.f32.mrf.mxu2 }
 0x9d0   : > { %v8955_v49 = vadd.f32 %v17331_v44, %v8927_v38  ;;  %v19029_v38 = vld [vmem:[#allocation116_spill] sm:$0xff] }
 0x9d1   : > { %v8403_v22 = vadd.f32 %v19029_v38, %v8334_v47 }
 0x9d2   : > { %v8979_v26 = vadd.f32 %v8955_v49, %v7121_v53  ;;  %v8756_v17 = vpop.f32.mrf.mxu0 }
 0x9d3   : > { %v8464_v10 = vpop.f32.mrf.mxu3  ;;  %v8826_v61 = vadd.f32 %v8825_v20, %v8756_v17  ;;  %v19030_v20 = vld [vmem:[#allocation122_spill] sm:$0xff] }
 0x9d4   : > { %9003 = vst [vmem:[%s17344_s28 + $0x68] sm:$0xff] %v8979_v26  ;;  %v8465_v7 = vadd.f32 %v8464_v10, %v8396_v24  ;;  %v8337_v12 = vadd.f32 %v19030_v20, %v17283_v32  ;;  %v8832_v26 = vpop.f32.mrf.mxu1  ;;  %v19031_v17 = vld [vmem:[#allocation78_spill] sm:$0xff]  ;;  %v8339_v32 = vadd.f32 %v19033_v33, %v17286_v42  ;;  %v19036_v42 = vld [vmem:[#allocation80_spill] sm:$0xff] }
 0x9d5   : > { %v8895_v21 = vadd.f32 %v8894_v5, %v8826_v61  ;;  %v7125_v11 = vadd.f32 %v17326_v57, %v19031_v17  ;;  %v19037_v61 = vld [vmem:[#allocation11_spill] sm:$0xff] }
 0x9d6   : > { %v8928_v48 = vadd.f32 %v8890_v25, %v8465_v7  ;;  %v19032_v7 = vld [vmem:[#allocation119_spill] sm:$0xff] }
 0x9d7   : > { %v8406_v5 = vadd.f32 %v19032_v7, %v8337_v12 }
 0x9d8   : > { %v8956_v45 = vadd.f32 %v17331_v44, %v8928_v48  ;;  %v8901_v48 = vpop.f32.mrf.mxu2 }
 0x9da   : > { %v8980_v43 = vadd.f32 %v8956_v45, %v7122_v55  ;;  %v8758_v36 = vpop.f32.mrf.mxu0 }
 0x9db   : > { %v8466_v9 = vpop.f32.mrf.mxu3  ;;  %v8828_v29 = vadd.f32 %v8827_v8, %v8758_v36 }
 0x9dc   : > { %9004 = vst [vmem:[%s17344_s28 + $0x70] sm:$0xff] %v8980_v43  ;;  %v8467_v58 = vadd.f32 %v8466_v9, %v8398_v60  ;;  %v19034_v43 = vld [vmem:[#allocation39_spill] sm:$0xff]  ;;  %v8835_v8 = vpop.f32.mrf.mxu1 }
 0x9dd   : > { %v8897_v15 = vadd.f32 %v8896_v1, %v8828_v29  ;;  %v7126_v36 = vadd.f32 %v17326_v57, %v19034_v43  ;;  %v19040_v29 = vld [vmem:[#allocation31_spill] sm:$0xff] }
 0x9de   : > { %v8929_v62 = vadd.f32 %v8892_v19, %v8467_v58  ;;  %v19035_v19 = vld [vmem:[#allocation118_spill] sm:$0xff] }
 0x9df   : > { %v8408_v58 = vadd.f32 %v19035_v19, %v8339_v32 }
 0x9e0   : > { %v8957_v27 = vadd.f32 %v17331_v44, %v8929_v62  ;;  %v8904_v1 = vpop.f32.mrf.mxu2 }
 0x9e2   : > { %v8981_v41 = vadd.f32 %v8957_v27, %v7123_v30  ;;  %v8761_v50 = vpop.f32.mrf.mxu0  ;;  %v8342_v30 = vadd.f32 %v19036_v42, %v17291_v56  ;;  %v7127_v27 = vadd.f32 %v17326_v57, %v19037_v61  ;;  %v8344_v56 = vadd.f32 %v19039_v37, %v17296_v13  ;;  %v19043_v13 = vld [vmem:[#allocation40_spill] sm:$0xff] }
 0x9e3   : > { %v8469_v28 = vpop.f32.mrf.mxu3  ;;  %v8831_v24 = vadd.f32 %v8830_v39, %v8761_v50 }
 0x9e4   : > { %9005 = vst [vmem:[%s17344_s28 + $0x78] sm:$0xff] %v8981_v41  ;;  %v8470_v2 = vadd.f32 %v8469_v28, %v8401_v35  ;;  %v19038_v28 = vld [vmem:[#allocation35_spill] sm:$0xff] }
 0x9e5   : > { %v8900_v4 = vadd.f32 %v8899_v16, %v8831_v24 }
 0x9e6   : > { %v8930_v59 = vadd.f32 %v8895_v21, %v8470_v2  ;;  %v8411_v21 = vadd.f32 %v19038_v28, %v8342_v30  ;;  %v8837_v2 = vpop.f32.mrf.mxu1  ;;  %v19049_v30 = vld [vmem:[#allocation144_spill] sm:$0xff] }
 0x9e8   : > { %v8958_v46 = vadd.f32 %v17331_v44, %v8930_v59 }
 0x9ea   : > { %v8982_v0 = vadd.f32 %v8958_v46, %v7124_v6  ;;  %v8763_v54 = vpop.f32.mrf.mxu0  ;;  %v8906_v6 = vpop.f32.mrf.mxu2  ;;  %v7128_v46 = vadd.f32 %v17326_v57, %v19040_v29 }
 0x9eb   : > { %v8471_v52 = vpop.f32.mrf.mxu3  ;;  %v8833_v63 = vadd.f32 %v8832_v26, %v8763_v54  ;;  %v19042_v26 = vld [vmem:[#allocation99_spill] sm:$0xff] }
 0x9ec   : > { %9006 = vst [vmem:[%s17344_s28 + $0x80] sm:$0xff] %v8982_v0  ;;  %v8472_v53 = vadd.f32 %v8471_v52, %v8403_v22  ;;  %v19041_v22 = vld [vmem:[#allocation61_spill] sm:$0xff]  ;;  %v8347_v17 = vadd.f32 %v19043_v13, %v19042_v26 }
 0x9ed   : > { %v8902_v14 = vadd.f32 %v8901_v48, %v8833_v63  ;;  %v8413_v52 = vadd.f32 %v19041_v22, %v8344_v56  ;;  %v19045_v48 = vld [vmem:[#allocation125_spill] sm:$0xff]  ;;  %v19047_v63 = vld [vmem:[#allocation8_spill] sm:$0xff] }
 0x9ee   : > { %v8931_v49 = vadd.f32 %v8897_v15, %v8472_v53  ;;  %v8840_v20 = vpop.f32.mrf.mxu1 }
 0x9f0   : > { %v8959_v10 = vadd.f32 %v17331_v44, %v8931_v49 }
 0x9f2   : > { %v8983_v25 = vadd.f32 %v8959_v10, %v7125_v11  ;;  %v8766_v45 = vpop.f32.mrf.mxu0  ;;  %v19044_v11 = vld [vmem:[#allocation42_spill] sm:$0xff]  ;;  %v8909_v7 = vpop.f32.mrf.mxu2 }
 0x9f3   : > { %v8474_v51 = vpop.f32.mrf.mxu3  ;;  %v8836_v41 = vadd.f32 %v8835_v8, %v8766_v45  ;;  %v7129_v24 = vadd.f32 %v17326_v57, %v19044_v11  ;;  %v19046_v45 = vld [vmem:[#allocation28_spill] sm:$0xff] }
 0x9f4   : > { %9007 = vst [vmem:[%s17344_s28 + $0x88] sm:$0xff] %v8983_v25  ;;  %v8475_v18 = vadd.f32 %v8474_v51, %v8406_v5  ;;  %v8416_v51 = vadd.f32 %v19045_v48, %v8347_v17  ;;  %v8349_v43 = vadd.f32 %v19046_v45, %v17314_v34  ;;  %v7131_v34 = vadd.f32 %v17326_v57, %v19049_v30 }
 0x9f5   : > { %v8905_v59 = vadd.f32 %v8904_v1, %v8836_v41 }
 0x9f6   : > { %v8932_v55 = vadd.f32 %v8900_v4, %v8475_v18 }
 0x9f8   : > { %v8960_v60 = vadd.f32 %v17331_v44, %v8932_v55 }
 0x9fa   : > { %v8984_v9 = vadd.f32 %v8960_v60, %v7126_v36  ;;  %v8768_v35 = vpop.f32.mrf.mxu0  ;;  %v8842_v36 = vpop.f32.mrf.mxu1  ;;  %v7130_v60 = vadd.f32 %v17326_v57, %v19047_v63 }
 0x9fb   : > { %v8476_v62 = vpop.f32.mrf.mxu3  ;;  %v8838_v16 = vadd.f32 %v8837_v2, %v8768_v35 }
 0x9fc   : > { %9008 = vst [vmem:[%s17344_s28 + $0x90] sm:$0xff] %v8984_v9  ;;  %v8477_v23 = vadd.f32 %v8476_v62, %v8408_v58  ;;  %v19048_v58 = vld [vmem:[#allocation82_spill] sm:$0xff] }
 0x9fd   : > { %v8907_v54 = vadd.f32 %v8906_v6, %v8838_v16  ;;  %v8418_v62 = vadd.f32 %v19048_v58, %v8349_v43 }
 0x9fe   : > { %v8933_v31 = vadd.f32 %v8902_v14, %v8477_v23  ;;  %v8911_v14 = vpop.f32.mrf.mxu2 }
 0xa00   : > { %v8961_v3 = vadd.f32 %v17331_v44, %v8933_v31 }
 0xa02   : > { %v8985_v50 = vadd.f32 %v8961_v3, %v7127_v27  ;;  %v8771_v15 = vpop.f32.mrf.mxu0 }
 0xa03   : > { %v8479_v39 = vpop.f32.mrf.mxu3  ;;  %v8841_v10 = vadd.f32 %v8840_v20, %v8771_v15 }
 0xa04   : > { %9009 = vst [vmem:[%s17344_s28 + $0x98] sm:$0xff] %v8985_v50  ;;  %v8480_v40 = vadd.f32 %v8479_v39, %v8411_v21 }
 0xa05   : > { %v8910_v18 = vadd.f32 %v8909_v7, %v8841_v10 }
 0xa06   : > { %v8934_v47 = vadd.f32 %v8905_v59, %v8480_v40 }
 0xa08   : > { %v8962_v0 = vadd.f32 %v17331_v44, %v8934_v47 }
 0xa0a   : > { %v8986_v38 = vadd.f32 %v8962_v0, %v7128_v46  ;;  %v8773_v33 = vpop.f32.mrf.mxu0 }
 0xa0b   : > { %v8481_v53 = vpop.f32.mrf.mxu3  ;;  %v8843_v8 = vadd.f32 %v8842_v36, %v8773_v33 }
 0xa0c   : > { %9010 = vst [vmem:[%s17344_s28 + $0xa0] sm:$0xff] %v8986_v38  ;;  %v8482_v49 = vadd.f32 %v8481_v53, %v8413_v52 }
 0xa0d   : > { %v8912_v1 = vadd.f32 %v8911_v14, %v8843_v8 }
 0xa0e   : > { %v8935_v12 = vadd.f32 %v8907_v54, %v8482_v49 }
 0xa10   : > { %v8963_v25 = vadd.f32 %v17331_v44, %v8935_v12 }
 0xa12   : > { %v8987_v5 = vadd.f32 %v8963_v25, %v7129_v24 }
 0xa13   : > { %v8484_v4 = vpop.f32.mrf.mxu3 }
 0xa14   : > { %9011 = vst [vmem:[%s17344_s28 + $0xa8] sm:$0xff] %v8987_v5  ;;  %v8485_v55 = vadd.f32 %v8484_v4, %v8416_v51 }
 0xa16   : > { %v8936_v32 = vadd.f32 %v8910_v18, %v8485_v55 }
 0xa18   : > { %v8964_v9 = vadd.f32 %v17331_v44, %v8936_v32 }
 0xa1a   : > { %v8988_v19 = vadd.f32 %v8964_v9, %v7130_v60 }
 0xa1b   : > { %v8486_v23 = vpop.f32.mrf.mxu3 }
 0xa1c   : > { %9012 = vst [vmem:[%s17344_s28 + $0xb0] sm:$0xff] %v8988_v19  ;;  %v8487_v31 = vadd.f32 %v8486_v23, %v8418_v62 }
 0xa1e   : > { %v8937_v42 = vadd.f32 %v8912_v1, %v8487_v31 }
 0xa20   : > { %v8965_v61 = vadd.f32 %v17331_v44, %v8937_v42 }
 0xa22   : > { %v8989_v27 = vadd.f32 %v8965_v61, %v7131_v34 }
 0xa24   : > { %9013 = vst [vmem:[%s17344_s28 + $0xb8] sm:$0xff] %v8989_v27 }
 0xa25 PF: > { %s19_s13 = sadd.s32 1, %s11262_s13   ;;  %s19050_s30 = smov %s11254_s11 }
 0xa26   : > { %p16_p7 = scmp.ge.s32.totalorder %s19_s13, 6   ;;  %s19051_s10 = smov %s11258_s12 }
 0xa27   : > { %s19052_s11 = smov %s19055_s14  ;;  %s19053_s12 = smov %s19059_s15 }
 0xa28   :  { %18 = sbr.rel (!%p16_p7) target bundleno = 3 (0x3), region = 95 }

</bundles_post_ra>
